<compile_context>
chip_gen: v6e
topology: v6e:2x2x1
jax: 0.10.0
libtpu: 0.0.40
codegen_flags: <defaults>
</compile_context>

<pallas_src>
import functools

import jax
import jax.numpy as jnp
from jax.experimental import pallas as pl
from jax.experimental.pallas import tpu as pltpu

# ----------------------------- config ---------------------------------------
BS = 2
IMG_C, IMG_H, IMG_W = 3, 16, 16
PATCH = 8
VISION_WIDTH = 32          # vit width
TEXT_WIDTH = 32            # bert hidden size
EMBED_DIM = 16             # contrastive embed dim
N_HEADS = 2
N_LAYERS = 1
INTER = 64                 # FFN intermediate
VOCAB = 64
MAX_POS = 32
CAP_LEN = 8                # caption max length (30 in the original)
KNOW_LEN = 8               # knowledge max length (200 in the original)
QUEUE_SIZE = 8             # 57600 in the original; must be divisible by BS
MOMENTUM = 0.995
PAD_ID, BOS_ID, ENC_ID = 0, 1, 2

_NEG = -1e9


# --------------------- pallas_call plumbing (whole-array blocks) -------------
def _fullspec(shape):
    nd = len(shape)
    return pl.BlockSpec(shape, lambda i, _nd=nd: (0,) * _nd)


def _pcall(kernel, args, out_shape):
    args = tuple(args)
    single = isinstance(out_shape, jax.ShapeDtypeStruct)
    outs = (out_shape,) if single else tuple(out_shape)
    out_specs = tuple(_fullspec(o.shape) for o in outs)
    fn = pl.pallas_call(
        kernel,
        grid=(1,),
        in_specs=[_fullspec(a.shape) for a in args],
        out_specs=out_specs[0] if single else out_specs,
        out_shape=outs[0] if single else outs,
        compiler_params=pltpu.CompilerParams(dimension_semantics=("arbitrary",)),
    )
    return fn(*args)


# --------------------------- in-kernel helpers --------------------------------
def _mm_bf16(a, b):
    # MXU matmul: bf16 operands, f32 accumulation.
    return jax.lax.dot_general(a.astype(jnp.bfloat16), b.astype(jnp.bfloat16),
                               (((1,), (0,)), ((), ())),
                               preferred_element_type=jnp.float32)


def _mm_f32(a, b):
    return jax.lax.dot_general(a, b, (((1,), (0,)), ((), ())),
                               preferred_element_type=jnp.float32)


def _ln(x, g, b, eps):
    mu = jnp.mean(x, axis=-1, keepdims=True)
    var = jnp.mean((x - mu) ** 2, axis=-1, keepdims=True)
    return (x - mu) * jax.lax.rsqrt(var + eps) * g + b


def _softmax(x):
    m = jnp.max(x, axis=-1, keepdims=True)
    e = jnp.exp(x - m)
    return e / jnp.sum(e, axis=-1, keepdims=True)


def _log_softmax(x):
    m = jnp.max(x, axis=-1, keepdims=True)
    s = x - m
    return s - jnp.log(jnp.sum(jnp.exp(s), axis=-1, keepdims=True))


def _attention_block(q2, k2, v2, add_mask, n_heads, dh):
    # q2: (Sq, H*dh), k2/v2: (Sk, H*dh), add_mask: (Sq, Sk) additive (-1e9 mask).
    scale = 1.0 / float(dh) ** 0.5
    ctx_heads = []
    for h in range(n_heads):
        q = q2[:, h * dh:(h + 1) * dh]
        k = k2[:, h * dh:(h + 1) * dh]
        v = v2[:, h * dh:(h + 1) * dh]
        s = jax.lax.dot_general(q.astype(jnp.bfloat16), k.astype(jnp.bfloat16),
                                (((1,), (1,)), ((), ())),
                                preferred_element_type=jnp.float32) * scale
        s = s + add_mask
        s = s - jnp.max(s, axis=-1, keepdims=True)
        p = jnp.exp(s)
        p = p * pl.reciprocal(jnp.sum(p, axis=-1, keepdims=True), approx=True)
        ctx_heads.append(
            jax.lax.dot_general(p.astype(jnp.bfloat16), v.astype(jnp.bfloat16),
                                (((1,), (0,)), ((), ())),
                                preferred_element_type=jnp.float32))
    return jnp.concatenate(ctx_heads, axis=-1)


# ----------------------------- fused kernels ----------------------------------
def _linear_kernel(x_ref, w_ref, b_ref, o_ref):
    o_ref[...] = _mm_bf16(x_ref[...], w_ref[...]) + b_ref[...]


def _proj_norm_kernel(x_ref, w_ref, b_ref, o_ref):
    # linear projection + L2 normalize, fused (f32 for accuracy -- tiny).
    y = _mm_f32(x_ref[...], w_ref[...]) + b_ref[...]
    n = jnp.sum(y * y, axis=-1, keepdims=True)
    o_ref[...] = y * jax.lax.rsqrt(jnp.maximum(n, 1e-24))


def _bert_layer_kernel(n_heads, has_cross, has_emb_ln, *refs):
    # One full post-LN BERT layer (embedding LN fused into the first layer):
    # self-attn (+optional cross-attn) + FFN, all residuals and LayerNorms
    # fused, activations live in VMEM only.
    it = iter(refs)
    x_ref = next(it)
    smask_ref = next(it)
    if has_cross:
        enc_ref = next(it)
        cmask_ref = next(it)
    if has_emb_ln:
        ge_ref = next(it)
        be_ref = next(it)
    wqkv_ref = next(it); bqkv_ref = next(it)
    wo_ref = next(it); bo_ref = next(it)
    g1_ref = next(it); b1_ref = next(it)
    if has_cross:
        wqc_ref = next(it); bqc_ref = next(it)
        wkvc_ref = next(it); bkvc_ref = next(it)
        woc_ref = next(it); boc_ref = next(it)
        gc_ref = next(it); bc_ref = next(it)
    w1_ref = next(it); bf1_ref = next(it)
    w2_ref = next(it); bf2_ref = next(it)
    g2_ref = next(it); b2_ref = next(it)
    o_ref = next(it)

    x = x_ref[...]                       # (S, D), batch folded into S
    D = x.shape[1]
    dh = D // n_heads

    # --- embedding LayerNorm (first layer of a tower only) ---
    if has_emb_ln:
        x = _ln(x, ge_ref[...], be_ref[...], 1e-12)

    # --- self attention (fused QKV) ---
    qkv = _mm_bf16(x, wqkv_ref[...]) + bqkv_ref[...]
    ctx = _attention_block(qkv[:, :D], qkv[:, D:2 * D], qkv[:, 2 * D:],
                           smask_ref[...], n_heads, dh)
    x = _ln(x + _mm_bf16(ctx, wo_ref[...]) + bo_ref[...],
            g1_ref[...], b1_ref[...], 1e-12)

    # --- cross attention ---
    if has_cross:
        enc = enc_ref[...]
        qc = _mm_bf16(x, wqc_ref[...]) + bqc_ref[...]
        kvc = _mm_bf16(enc, wkvc_ref[...]) + bkvc_ref[...]
        ctx = _attention_block(qc, kvc[:, :D], kvc[:, D:],
                               cmask_ref[...], n_heads, dh)
        x = _ln(x + _mm_bf16(ctx, woc_ref[...]) + boc_ref[...],
                gc_ref[...], bc_ref[...], 1e-12)

    # --- FFN ---  TODO(synk): tanh-approx GELU vs HF's exact erf GELU.
    h = jax.nn.gelu(_mm_bf16(x, w1_ref[...]) + bf1_ref[...], approximate=True)
    x = _ln(x + _mm_bf16(h, w2_ref[...]) + bf2_ref[...],
            g2_ref[...], b2_ref[...], 1e-12)
    o_ref[...] = x


def _vit_block_kernel(n_heads, has_final_ln, *refs):
    # One pre-LN ViT block (LN -> MHA -> +res ; LN -> FFN -> +res), fused.
    # The encoder's trailing LayerNorm is fused into the last block.
    it = iter(refs)
    x_ref = next(it); mask_ref = next(it)
    g1_ref = next(it); b1_ref = next(it)
    wqkv_ref = next(it); bqkv_ref = next(it)
    wo_ref = next(it); bo_ref = next(it)
    g2_ref = next(it); b2_ref = next(it)
    w1_ref = next(it); bf1_ref = next(it)
    w2_ref = next(it); bf2_ref = next(it)
    if has_final_ln:
        gf_ref = next(it); bfin_ref = next(it)
    o_ref = next(it)

    x = x_ref[...]
    D = x.shape[1]
    dh = D // n_heads

    xn = _ln(x, g1_ref[...], b1_ref[...], 1e-6)
    qkv = _mm_bf16(xn, wqkv_ref[...]) + bqkv_ref[...]
    ctx = _attention_block(qkv[:, :D], qkv[:, D:2 * D], qkv[:, 2 * D:],
                           mask_ref[...], n_heads, dh)
    x = x + _mm_bf16(ctx, wo_ref[...]) + bo_ref[...]

    xn = _ln(x, g2_ref[...], b2_ref[...], 1e-6)
    h = jax.nn.gelu(_mm_bf16(xn, w1_ref[...]) + bf1_ref[...], approximate=True)
    x = x + _mm_bf16(h, w2_ref[...]) + bf2_ref[...]

    if has_final_ln:
        x = _ln(x, gf_ref[...], bfin_ref[...], 1e-6)
    o_ref[...] = x


def _ita_kernel(img_ref, txt_ref, imgm_ref, txtm_ref, iq_ref, tq_ref,
                temp_ref, alpha_ref, loss_ref, wt2i_ref, wi2t_ref):
    # Fused contrastive loss: similarities vs (momentum feats + queue), soft
    # targets, log-softmax cross-entropy, and the ITM hard-negative weights.
    img, txt = img_ref[...], txt_ref[...]
    imgm, txtm = imgm_ref[...], txtm_ref[...]
    iq, tq = iq_ref[...], tq_ref[...]
    inv_t = 1.0 / temp_ref[...]          # (1,1) broadcast
    alpha = alpha_ref[...]               # (1,1) broadcast
    B = img.shape[0]

    def sims(a, feats_m, queue):
        s0 = jax.lax.dot_general(a, feats_m, (((1,), (1,)), ((), ())),
                                 preferred_element_type=jnp.float32)   # (B,B)
        s1 = _mm_f32(a, queue)                                         # (B,Q)
        return jnp.concatenate([s0, s1], axis=1) * inv_t

    sim_i2t_m = sims(imgm, txtm, tq)
    sim_t2i_m = sims(txtm, imgm, iq)
    sim_i2t = sims(img, txtm, tq)
    sim_t2i = sims(txt, imgm, iq)

    N = sim_i2t.shape[1]
    r = jax.lax.broadcasted_iota(jnp.int32, (B, N), 0)
    c = jax.lax.broadcasted_iota(jnp.int32, (B, N), 1)
    targets = jnp.where(r == c, 1.0, 0.0)

    i2t_t = alpha * _softmax(sim_i2t_m) + (1.0 - alpha) * targets
    t2i_t = alpha * _softmax(sim_t2i_m) + (1.0 - alpha) * targets
    l_i2t = -jnp.sum(jnp.sum(_log_softmax(sim_i2t) * i2t_t, axis=1, keepdims=True),
                     axis=0, keepdims=True) / B
    l_t2i = -jnp.sum(jnp.sum(_log_softmax(sim_t2i) * t2i_t, axis=1, keepdims=True),
                     axis=0, keepdims=True) / B
    loss_ref[...] = 0.5 * (l_i2t + l_t2i)

    rb = jax.lax.broadcasted_iota(jnp.int32, (B, B), 0)
    cb = jax.lax.broadcasted_iota(jnp.int32, (B, B), 1)
    off_diag = rb != cb
    wt2i_ref[...] = jnp.where(off_diag, _softmax(sim_t2i[:, :B]) + 1e-4, 0.0)
    wi2t_ref[...] = jnp.where(off_diag, _softmax(sim_i2t[:, :B]) + 1e-4, 0.0)


def _itm_kernel(bs, x_ref, w_ref, b_ref, loss_ref):
    # Fused ITM head: linear -> log-softmax -> NLL (labels 1 for first bs rows).
    logits = _mm_f32(x_ref[...], w_ref[...]) + b_ref[...]      # (3B, 2)
    logp = _log_softmax(logits)
    row = jax.lax.broadcasted_iota(jnp.int32, (logits.shape[0], 1), 0)
    pick = jnp.where(row < bs, logp[:, 1:2], logp[:, 0:1])     # (3B, 1)
    loss_ref[...] = -jnp.sum(pick, axis=0, keepdims=True) / logits.shape[0]


def _lm_kernel(h_ref, lab_ref, w_ref, b_ref, loss_ref):
    # Fused LM head: linear -> log-softmax -> masked NLL (ignore_index = -100).
    h = h_ref[...]                                     # (N, D)
    labels = lab_ref[...]                              # (N, 1) int32
    logits = _mm_f32(h, w_ref[...]) + b_ref[...]       # (N, V)
    logp = _log_softmax(logits)
    iota_v = jax.lax.broadcasted_iota(jnp.int32, logits.shape, 1)
    onehot = (iota_v == labels).astype(jnp.float32)    # -100 matches nothing
    nll = -jnp.sum(logp * onehot, axis=1, keepdims=True)       # (N, 1)
    valid = (labels != -100).astype(jnp.float32)               # (N, 1)
    num = jnp.sum(nll * valid, axis=0, keepdims=True)
    den = jnp.maximum(jnp.sum(valid, axis=0, keepdims=True), 1.0)
    loss_ref[...] = num / den


# ------------------------------ kernel wrappers -------------------------------
def pallas_linear2d(x, w, b):
    return _pcall(_linear_kernel, (x, w, b),
                  jax.ShapeDtypeStruct((x.shape[0], w.shape[1]), jnp.float32))


def pallas_proj_norm(x, p):
    return _pcall(_proj_norm_kernel, (x, p['w'], p['b']),
                  jax.ShapeDtypeStruct((x.shape[0], p['w'].shape[1]), jnp.float32))


def pallas_bert_layer(layer, x2, self_mask, enc2=None, cross_mask=None,
                      emb_ln=None):
    has_cross = enc2 is not None
    has_emb = emb_ln is not None
    args = [x2, self_mask]
    if has_cross:
        args += [enc2, cross_mask]
    if has_emb:
        args += [emb_ln['g'], emb_ln['b']]
    s, f = layer['self'], layer['ffn']
    args += [s['wqkv'], s['bqkv'], s['wo'], s['bo'],
             layer['ln_self']['g'], layer['ln_self']['b']]
    if has_cross:
        c = layer['cross']
        args += [c['wq'], c['bq'], c['wkv'], c['bkv'], c['wo'], c['bo'],
                 layer['ln_cross']['g'], layer['ln_cross']['b']]
    args += [f['w1'], f['b1'], f['w2'], f['b2'],
             layer['ln_out']['g'], layer['ln_out']['b']]
    return _pcall(functools.partial(_bert_layer_kernel, N_HEADS, has_cross, has_emb),
                  args, jax.ShapeDtypeStruct(x2.shape, jnp.float32))


def pallas_vit_block(blk, x2, mask, final_ln=None):
    has_final = final_ln is not None
    a, m = blk['attn'], blk['mlp']
    args = [x2, mask,
            blk['ln1']['g'], blk['ln1']['b'],
            a['wqkv'], a['bqkv'], a['wo'], a['bo'],
            blk['ln2']['g'], blk['ln2']['b'],
            m['w1'], m['b1'], m['w2'], m['b2']]
    if has_final:
        args += [final_ln['g'], final_ln['b']]
    return _pcall(functools.partial(_vit_block_kernel, N_HEADS, has_final),
                  args, jax.ShapeDtypeStruct(x2.shape, jnp.float32))


def pallas_ita_loss(image_feat, text_feat, image_feat_m, text_feat_m,
                    image_queue, text_queue, temp, alpha):
    bs = image_feat.shape[0]
    outs = (jax.ShapeDtypeStruct((1, 1), jnp.float32),
            jax.ShapeDtypeStruct((bs, bs), jnp.float32),
            jax.ShapeDtypeStruct((bs, bs), jnp.float32))
    return _pcall(_ita_kernel,
                  (image_feat, text_feat, image_feat_m, text_feat_m,
                   image_queue, text_queue, temp, alpha), outs)


def pallas_itm_loss(vl_emb, head, bs):
    return _pcall(functools.partial(_itm_kernel, bs),
                  (vl_emb, head['w'], head['b']),
                  jax.ShapeDtypeStruct((1, 1), jnp.float32))


def pallas_lm_loss(hidden, labels, head):
    B, Tm1, D = hidden.shape
    h2 = hidden.reshape(B * Tm1, D)
    lab2 = labels.reshape(B * Tm1, 1).astype(jnp.int32)
    return _pcall(_lm_kernel, (h2, lab2, head['w'], head['b']),
                  jax.ShapeDtypeStruct((1, 1), jnp.float32))


# ------------------------------ mask glue (XLA) --------------------------------
def make_self_mask(mask_f, causal=False):
    # Additive (-1e9) mask for batch folded into sequence: block-diagonal over
    # batches, key-padding, optional causal.  Shape (B*T, B*T).
    B, T = mask_f.shape
    same_b = jnp.eye(B, dtype=jnp.float32)[:, None, :, None]      # (B,1,B,1)
    key_ok = mask_f[None, None, :, :]                              # (1,1,B,T)
    allowed = jnp.broadcast_to(same_b * key_ok, (B, T, B, T))
    if causal:
        tri = jnp.tril(jnp.ones((T, T), jnp.float32))
        allowed = allowed * tri[None, :, None, :]
    return (1.0 - allowed).reshape(B * T, B * T) * _NEG


def make_cross_mask(enc_mask_f, Tq):
    B, Tk = enc_mask_f.shape
    same_b = jnp.eye(B, dtype=jnp.float32)[:, None, :, None]
    key_ok = enc_mask_f[None, None, :, :]
    allowed = jnp.broadcast_to(same_b * key_ok, (B, Tq, B, Tk))
    return (1.0 - allowed).reshape(B * Tq, B * Tk) * _NEG


# ------------------------------ model towers -----------------------------------
def bert_forward(p, input_ids=None, inputs_embeds=None, attention_mask=None,
                 encoder_hidden_states=None, encoder_attention_mask=None,
                 causal=False):
    if inputs_embeds is None:
        x = p['word_emb'][input_ids]                      # XLA gather glue
    else:
        x = inputs_embeds
    B, T, D = x.shape
    x = x + p['pos_emb'][None, :T, :]                     # XLA add glue
    x2 = x.reshape(B * T, D)
    if attention_mask is None:
        attention_mask = jnp.ones((B, T), jnp.float32)
    mask_f = attention_mask.astype(jnp.float32)
    self_mask = make_self_mask(mask_f, causal=causal)

    enc2 = cross_mask = None
    if encoder_hidden_states is not None:
        Be, Tk, De = encoder_hidden_states.shape
        enc2 = encoder_hidden_states.reshape(Be * Tk, De)
        emask_f = (jnp.ones((Be, Tk), jnp.float32)
                   if encoder_attention_mask is None
                   else encoder_attention_mask.astype(jnp.float32))
        cross_mask = make_cross_mask(emask_f, T)

    for li, layer in enumerate(p['layers']):
        # embedding LayerNorm fused into the first layer's kernel
        x2 = pallas_bert_layer(layer, x2, self_mask, enc2, cross_mask,
                               emb_ln=p['emb_ln'] if li == 0 else None)
    return x2.reshape(B, T, D)


def vit_forward(p, image):
    # image: NCHW; conv(patch, stride=patch) == reshape + matmul
    B, C, H, W = image.shape
    nh, nw = H // PATCH, W // PATCH
    patches = image.reshape(B, C, nh, PATCH, nw, PATCH)
    patches = patches.transpose(0, 2, 4, 1, 3, 5).reshape(B * nh * nw,
                                                          C * PATCH * PATCH)
    x = pallas_linear2d(patches, p['patch']['w'], p['patch']['b'])
    x = x.reshape(B, nh * nw, VISION_WIDTH)
    cls = jnp.broadcast_to(p['cls'], (B, 1, VISION_WIDTH))
    x = jnp.concatenate([cls, x], axis=1) + p['pos']
    B, T, D = x.shape
    x2 = x.reshape(B * T, D)
    block_mask = make_self_mask(jnp.ones((B, T), jnp.float32))
    n_blocks = len(p['blocks'])
    for bi, blk in enumerate(p['blocks']):
        # final encoder LayerNorm fused into the last block's kernel
        x2 = pallas_vit_block(blk, x2, block_mask,
                              final_ln=p['ln'] if bi == n_blocks - 1 else None)
    return x2.reshape(B, T, D)


# ----------------------------- parameter init -----------------------------------
class KeyGen:
    def __init__(self, seed):
        self._key = jax.random.PRNGKey(seed)

    def __call__(self):
        self._key, sub = jax.random.split(self._key)
        return sub


def _w(kg, shape):
    return 0.02 * jax.random.normal(kg(), shape, jnp.float32)


def init_linear(kg, din, dout):
    return {'w': _w(kg, (din, dout)), 'b': jnp.zeros((1, dout), jnp.float32)}


def init_ln(d):
    return {'g': jnp.ones((1, d), jnp.float32), 'b': jnp.zeros((1, d), jnp.float32)}


def init_bert(kg, hidden=TEXT_WIDTH, enc_width=VISION_WIDTH):
    layers = []
    for _ in range(N_LAYERS):
        layers.append({
            'self': {'wqkv': _w(kg, (hidden, 3 * hidden)),
                     'bqkv': jnp.zeros((1, 3 * hidden), jnp.float32),
                     'wo': _w(kg, (hidden, hidden)),
                     'bo': jnp.zeros((1, hidden), jnp.float32)},
            'ln_self': init_ln(hidden),
            'cross': {'wq': _w(kg, (hidden, hidden)),
                      'bq': jnp.zeros((1, hidden), jnp.float32),
                      'wkv': _w(kg, (enc_width, 2 * hidden)),
                      'bkv': jnp.zeros((1, 2 * hidden), jnp.float32),
                      'wo': _w(kg, (hidden, hidden)),
                      'bo': jnp.zeros((1, hidden), jnp.float32)},
            'ln_cross': init_ln(hidden),
            'ffn': {'w1': _w(kg, (hidden, INTER)),
                    'b1': jnp.zeros((1, INTER), jnp.float32),
                    'w2': _w(kg, (INTER, hidden)),
                    'b2': jnp.zeros((1, hidden), jnp.float32)},
            'ln_out': init_ln(hidden),
        })
    return {'word_emb': _w(kg, (VOCAB, hidden)),
            'pos_emb': _w(kg, (MAX_POS, hidden)),
            'emb_ln': init_ln(hidden),
            'layers': layers}


def init_vit(kg):
    blocks = []
    for _ in range(N_LAYERS):
        blocks.append({
            'ln1': init_ln(VISION_WIDTH),
            'attn': {'wqkv': _w(kg, (VISION_WIDTH, 3 * VISION_WIDTH)),
                     'bqkv': jnp.zeros((1, 3 * VISION_WIDTH), jnp.float32),
                     'wo': _w(kg, (VISION_WIDTH, VISION_WIDTH)),
                     'bo': jnp.zeros((1, VISION_WIDTH), jnp.float32)},
            'ln2': init_ln(VISION_WIDTH),
            'mlp': {'w1': _w(kg, (VISION_WIDTH, INTER)),
                    'b1': jnp.zeros((1, INTER), jnp.float32),
                    'w2': _w(kg, (INTER, VISION_WIDTH)),
                    'b2': jnp.zeros((1, VISION_WIDTH), jnp.float32)},
        })
    n_tok = (IMG_H // PATCH) * (IMG_W // PATCH) + 1
    return {'patch': init_linear(kg, IMG_C * PATCH * PATCH, VISION_WIDTH),
            'cls': _w(kg, (1, 1, VISION_WIDTH)),
            'pos': _w(kg, (1, n_tok, VISION_WIDTH)),
            'blocks': blocks,
            'ln': init_ln(VISION_WIDTH)}


def init_all(kg):
    visual_encoder = init_vit(kg)
    text_encoder = init_bert(kg)
    params = {
        'visual_encoder': visual_encoder,
        'text_encoder': text_encoder,
        'vision_proj': init_linear(kg, TEXT_WIDTH, EMBED_DIM),
        'text_proj': init_linear(kg, TEXT_WIDTH, EMBED_DIM),
        'itm_head': init_linear(kg, TEXT_WIDTH, 2),
        'lm_head': init_linear(kg, TEXT_WIDTH, VOCAB),
        'temp': jnp.float32(0.07),
        # TODO(synk): partial weight tying (skip '/attention') not reproduced;
        # decoder body shares ALL encoder weights, LM head is separate.
        'text_decoder': text_encoder,
    }
    return params


def init_state(kg, params):
    iq = jax.random.normal(kg(), (EMBED_DIM, QUEUE_SIZE), jnp.float32)
    tq = jax.random.normal(kg(), (EMBED_DIM, QUEUE_SIZE), jnp.float32)
    iq = iq / jnp.maximum(jnp.linalg.norm(iq, axis=0, keepdims=True), 1e-12)
    tq = tq / jnp.maximum(jnp.linalg.norm(tq, axis=0, keepdims=True), 1e-12)
    copy = lambda t: jax.tree_util.tree_map(lambda x: x, t)
    # copy_params(): momentum towers start as exact copies and live in state so
    # the EMA update is carried across steps.
    return {'image_queue': iq, 'text_queue': tq, 'queue_ptr': jnp.int32(0),
            'visual_encoder_m': copy(params['visual_encoder']),
            'vision_proj_m': copy(params['vision_proj']),
            'text_encoder_m': copy(params['text_encoder']),
            'text_proj_m': copy(params['text_proj'])}


# --------------------------------- forward --------------------------------------
@jax.jit
def blip_forward(params, state, image, cap_ids, cap_mask, know_ids, know_mask,
                 alpha, rng):
    temp = jnp.clip(params['temp'], 0.001, 0.5).reshape(1, 1)
    alpha2 = jnp.reshape(alpha.astype(jnp.float32), (1, 1))
    bs = image.shape[0]
    cap_mask_f = cap_mask.astype(jnp.float32)
    know_mask_f = know_mask.astype(jnp.float32)

    # knowledge text encoding (mode='text')
    know_hidden = bert_forward(params['text_encoder'], input_ids=know_ids,
                               attention_mask=know_mask_f)

    # visual encoder + knowledge fusion through the text encoder (cross-attn);
    # the reference passes no encoder_attention_mask here (-> all ones).
    vit_embeds = vit_forward(params['visual_encoder'], image)
    vit_mask_f = jnp.ones(vit_embeds.shape[:2], jnp.float32)
    image_embeds = bert_forward(params['text_encoder'], inputs_embeds=vit_embeds,
                                attention_mask=vit_mask_f,
                                encoder_hidden_states=know_hidden,
                                encoder_attention_mask=None)
    image_atts_f = jnp.ones(image_embeds.shape[:2], jnp.float32)
    image_feat = pallas_proj_norm(image_embeds[:, 0, :], params['vision_proj'])

    # caption text encoding
    text_hidden = bert_forward(params['text_encoder'], input_ids=cap_ids,
                               attention_mask=cap_mask_f)
    text_feat = pallas_proj_norm(text_hidden[:, 0, :], params['text_proj'])

    # momentum branch (EMA written back into new_state -> persists across steps)
    ema = lambda pm, pc: jax.tree_util.tree_map(
        lambda a, b: a * MOMENTUM + b * (1.0 - MOMENTUM), pm, pc)
    ve_m = ema(state['visual_encoder_m'], params['visual_encoder'])
    vp_m = ema(state['vision_proj_m'], params['vision_proj'])
    te_m = ema(state['text_encoder_m'], params['text_encoder'])
    tp_m = ema(state['text_proj_m'], params['text_proj'])

    image_embeds_m = vit_forward(ve_m, image)
    image_feat_m = pallas_proj_norm(image_embeds_m[:, 0, :], vp_m)
    text_hidden_m = bert_forward(te_m, input_ids=cap_ids,
                                 attention_mask=cap_mask_f)
    text_feat_m = pallas_proj_norm(text_hidden_m[:, 0, :], tp_m)

    # ---- fused contrastive (ITA) loss + hard-negative sampling weights ----
    loss_ita_arr, weights_t2i, weights_i2t = pallas_ita_loss(
        image_feat, text_feat, image_feat_m, text_feat_m,
        state['image_queue'], state['text_queue'], temp, alpha2)

    # dequeue & enqueue (all_gather == identity at world size 1).
    # dynamic_update_slice clamps instead of wrapping; safe because
    # QUEUE_SIZE % BS == 0 (matches the reference's assert).
    ptr = state['queue_ptr']
    new_image_queue = jax.lax.dynamic_update_slice(
        state['image_queue'], image_feat_m.T, (jnp.int32(0), ptr))
    new_text_queue = jax.lax.dynamic_update_slice(
        state['text_queue'], text_feat_m.T, (jnp.int32(0), ptr))

    # ---- ITM ----
    enc_ids = cap_ids.at[:, 0].set(ENC_ID)
    out_pos = bert_forward(params['text_encoder'], input_ids=enc_ids,
                           attention_mask=cap_mask_f,
                           encoder_hidden_states=image_embeds,
                           encoder_attention_mask=image_atts_f)
    k1, k2 = jax.random.split(rng)
    # log(0) -> -inf on the zeroed diagonal is intended; categorical treats it
    # as probability 0 (mirrors torch.multinomial on zeroed weights).
    neg_idx_img = jax.random.categorical(k1, jnp.log(weights_t2i), axis=1)
    neg_idx_txt = jax.random.categorical(k2, jnp.log(weights_i2t), axis=1)
    image_embeds_neg = image_embeds[neg_idx_img]
    text_ids_neg = enc_ids[neg_idx_txt]
    text_atts_neg = cap_mask_f[neg_idx_txt]
    text_ids_all = jnp.concatenate([enc_ids, text_ids_neg], axis=0)
    text_atts_all = jnp.concatenate([cap_mask_f, text_atts_neg], axis=0)
    image_embeds_all = jnp.concatenate([image_embeds_neg, image_embeds], axis=0)
    image_atts_all = jnp.concatenate([image_atts_f, image_atts_f], axis=0)
    out_neg = bert_forward(params['text_encoder'], input_ids=text_ids_all,
                           attention_mask=text_atts_all,
                           encoder_hidden_states=image_embeds_all,
                           encoder_attention_mask=image_atts_all)
    vl_emb = jnp.concatenate([out_pos[:, 0, :], out_neg[:, 0, :]], axis=0)
    loss_itm_arr = pallas_itm_loss(vl_emb, params['itm_head'], bs)

    # ---- LM (causal decoder with cross-attention to image) ----
    dec_ids = cap_ids.at[:, 0].set(BOS_ID)
    dec_targets = jnp.where(dec_ids == PAD_ID, -100, dec_ids)
    dec_hidden = bert_forward(params['text_decoder'], input_ids=dec_ids,
                              attention_mask=cap_mask_f,
                              encoder_hidden_states=image_embeds,
                              encoder_attention_mask=image_atts_f,
                              causal=True)
    loss_lm_arr = pallas_lm_loss(dec_hidden[:, :-1, :], dec_targets[:, 1:],
                                 params['lm_head'])

    new_state = {'image_queue': new_image_queue, 'text_queue': new_text_queue,
                 'queue_ptr': (ptr + bs) % QUEUE_SIZE,
                 'visual_encoder_m': ve_m, 'vision_proj_m': vp_m,
                 'text_encoder_m': te_m, 'text_proj_m': tp_m}
    return (loss_ita_arr[0, 0], loss_itm_arr[0, 0], loss_lm_arr[0, 0]), new_state


# ---------------------------------- main -----------------------------------------
if __name__ == "__main__":
    kg = KeyGen(0)
    params = init_all(kg)
    state = init_state(kg, params)

    key = jax.random.PRNGKey(0)
    k_img, k_cap, k_know, k_samp = jax.random.split(key, 4)
    image = jax.random.normal(k_img, (BS, IMG_C, IMG_H, IMG_W), jnp.float32)

    cap_ids = jax.random.randint(k_cap, (BS, CAP_LEN), 3, VOCAB, dtype=jnp.int32)
    cap_mask = (jnp.arange(CAP_LEN)[None, :]
                < jnp.array([6, 5], jnp.int32)[:, None]).astype(jnp.int32)
    cap_ids = jnp.where(cap_mask == 1, cap_ids, PAD_ID)

    know_ids = jax.random.randint(k_know, (BS, KNOW_LEN), 3, VOCAB, dtype=jnp.int32)
    know_mask = (jnp.arange(KNOW_LEN)[None, :]
                 < jnp.array([8, 7], jnp.int32)[:, None]).astype(jnp.int32)
    know_ids = jnp.where(know_mask == 1, know_ids, PAD_ID)

    alpha = jnp.float32(0.4)

    (loss_ita, loss_itm, loss_lm), new_state = blip_forward(
        params, state, image, cap_ids, cap_mask, know_ids, know_mask, alpha, k_samp)
    jax.block_until_ready((loss_ita, loss_itm, loss_lm, new_state))
    assert bool(jnp.isfinite(loss_ita)) and bool(jnp.isfinite(loss_itm)) \
        and bool(jnp.isfinite(loss_lm))
    print("KERNEL_OK")
</pallas_src>

<mosaic_0001>
module attributes {stable_mosaic.version = 11 : i64} {
  func.func @_linear_kernel(%arg0: i32, %arg1: memref<8x192xf32, #tpu.memory_space<vmem>>, %arg2: memref<192x32xf32, #tpu.memory_space<vmem>>, %arg3: memref<1x32xf32, #tpu.memory_space<vmem>>, %arg4: memref<8x32xf32, #tpu.memory_space<vmem>>) attributes {dimension_semantics = [#tpu.dimension_semantics<arbitrary>], iteration_bounds = array<i64: 1>, scalar_prefetch = 0 : i64, scratch_operands = 0 : i64, tpu.core_type = #tpu.core_type<tc>, window_params = [{pipeline_mode = #tpu.pipeline_mode<synchronous>, transform_indices = @transform_0, window_bounds = array<i64: 8, 192>}, {pipeline_mode = #tpu.pipeline_mode<synchronous>, transform_indices = @transform_1, window_bounds = array<i64: 192, 32>}, {pipeline_mode = #tpu.pipeline_mode<synchronous>, transform_indices = @transform_2, window_bounds = array<i64: 1, 32>}, {pipeline_mode = #tpu.pipeline_mode<synchronous>, transform_indices = @transform_3, window_bounds = array<i64: 8, 32>}]} {
    %c0 = arith.constant 0 : index
    %c0_0 = arith.constant 0 : index
    %0 = vector.load %arg1[%c0, %c0_0] : memref<8x192xf32, #tpu.memory_space<vmem>>, vector<8x192xf32>
    %c0_1 = arith.constant 0 : index
    %c0_2 = arith.constant 0 : index
    %1 = vector.load %arg2[%c0_1, %c0_2] : memref<192x32xf32, #tpu.memory_space<vmem>>, vector<192x32xf32>
    %2 = arith.truncf %0 : vector<8x192xf32> to vector<8x192xbf16>
    %3 = arith.truncf %1 : vector<192x32xf32> to vector<192x32xbf16>
    %cst = arith.constant dense<0.000000e+00> : vector<8x32xf32>
    %4 = tpu.matmul %2, %3, %cst {dimension_numbers = #tpu.dot_dimension_numbers<[1], [0], [0], [1], [0, 0, 1, 1], [], []>} : vector<8x192xbf16>, vector<192x32xbf16>, vector<8x32xf32> -> vector<8x32xf32>
    %c0_3 = arith.constant 0 : index
    %c0_4 = arith.constant 0 : index
    %5 = vector.load %arg3[%c0_3, %c0_4] : memref<1x32xf32, #tpu.memory_space<vmem>>, vector<1x32xf32>
    %6 = vector.broadcast %5 : vector<1x32xf32> to vector<8x32xf32>
    %7 = arith.addf %4, %6 : vector<8x32xf32>
    %c0_5 = arith.constant 0 : index
    %c0_6 = arith.constant 0 : index
    %8 = vector.load %arg4[%c0_5, %c0_6] : memref<8x32xf32, #tpu.memory_space<vmem>>, vector<8x32xf32>
    tpu.vector_store %arg4[%c0_5, %c0_6], %7 {strides = array<i32>} : memref<8x32xf32, #tpu.memory_space<vmem>>, vector<8x32xf32>,
    return
  }
  func.func @transform_0(%arg0: i32) -> (i32, i32) {
    %c0_i32 = arith.constant 0 : i32
    %c0_i32_0 = arith.constant 0 : i32
    %c0_i32_1 = arith.constant 0 : i32
    return %c0_i32, %c0_i32_0 : i32, i32
  }
  func.func @transform_1(%arg0: i32) -> (i32, i32) {
    %c0_i32 = arith.constant 0 : i32
    %c0_i32_0 = arith.constant 0 : i32
    %c0_i32_1 = arith.constant 0 : i32
    return %c0_i32, %c0_i32_0 : i32, i32
  }
  func.func @transform_2(%arg0: i32) -> (i32, i32) {
    %c0_i32 = arith.constant 0 : i32
    %c0_i32_0 = arith.constant 0 : i32
    %c0_i32_1 = arith.constant 0 : i32
    return %c0_i32, %c0_i32_0 : i32, i32
  }
  func.func @transform_3(%arg0: i32) -> (i32, i32) {
    %c0_i32 = arith.constant 0 : i32
    %c0_i32_0 = arith.constant 0 : i32
    %c0_i32_1 = arith.constant 0 : i32
    return %c0_i32, %c0_i32_0 : i32, i32
  }
}

module attributes {stable_mosaic.version = 11 : i64} {
  func.func @_vit_block_kernel(%arg0: i32, %arg1: memref<10x32xf32, #tpu.memory_space<vmem>>, %arg2: memref<10x10xf32, #tpu.memory_space<vmem>>, %arg3: memref<1x32xf32, #tpu.memory_space<vmem>>, %arg4: memref<1x32xf32, #tpu.memory_space<vmem>>, %arg5: memref<32x96xf32, #tpu.memory_space<vmem>>, %arg6: memref<1x96xf32, #tpu.memory_space<vmem>>, %arg7: memref<32x32xf32, #tpu.memory_space<vmem>>, %arg8: memref<1x32xf32, #tpu.memory_space<vmem>>, %arg9: memref<1x32xf32, #tpu.memory_space<vmem>>, %arg10: memref<1x32xf32, #tpu.memory_space<vmem>>, %arg11: memref<32x64xf32, #tpu.memory_space<vmem>>, %arg12: memref<1x64xf32, #tpu.memory_space<vmem>>, %arg13: memref<64x32xf32, #tpu.memory_space<vmem>>, %arg14: memref<1x32xf32, #tpu.memory_space<vmem>>, %arg15: memref<1x32xf32, #tpu.memory_space<vmem>>, %arg16: memref<1x32xf32, #tpu.memory_space<vmem>>, %arg17: memref<10x32xf32, #tpu.memory_space<vmem>>) attributes {dimension_semantics = [#tpu.dimension_semantics<arbitrary>], iteration_bounds = array<i64: 1>, scalar_prefetch = 0 : i64, scratch_operands = 0 : i64, tpu.core_type = #tpu.core_type<tc>, window_params = [{pipeline_mode = #tpu.pipeline_mode<synchronous>, transform_indices = @transform_0, window_bounds = array<i64: 10, 32>}, {pipeline_mode = #tpu.pipeline_mode<synchronous>, transform_indices = @transform_1, window_bounds = array<i64: 10, 10>}, {pipeline_mode = #tpu.pipeline_mode<synchronous>, transform_indices = @transform_2, window_bounds = array<i64: 1, 32>}, {pipeline_mode = #tpu.pipeline_mode<synchronous>, transform_indices = @transform_3, window_bounds = array<i64: 1, 32>}, {pipeline_mode = #tpu.pipeline_mode<synchronous>, transform_indices = @transform_4, window_bounds = array<i64: 32, 96>}, {pipeline_mode = #tpu.pipeline_mode<synchronous>, transform_indices = @transform_5, window_bounds = array<i64: 1, 96>}, {pipeline_mode = #tpu.pipeline_mode<synchronous>, transform_indices = @transform_6, window_bounds = array<i64: 32, 32>}, {pipeline_mode = #tpu.pipeline_mode<synchronous>, transform_indices = @transform_7, window_bounds = array<i64: 1, 32>}, {pipeline_mode = #tpu.pipeline_mode<synchronous>, transform_indices = @transform_8, window_bounds = array<i64: 1, 32>}, {pipeline_mode = #tpu.pipeline_mode<synchronous>, transform_indices = @transform_9, window_bounds = array<i64: 1, 32>}, {pipeline_mode = #tpu.pipeline_mode<synchronous>, transform_indices = @transform_10, window_bounds = array<i64: 32, 64>}, {pipeline_mode = #tpu.pipeline_mode<synchronous>, transform_indices = @transform_11, window_bounds = array<i64: 1, 64>}, {pipeline_mode = #tpu.pipeline_mode<synchronous>, transform_indices = @transform_12, window_bounds = array<i64: 64, 32>}, {pipeline_mode = #tpu.pipeline_mode<synchronous>, transform_indices = @transform_13, window_bounds = array<i64: 1, 32>}, {pipeline_mode = #tpu.pipeline_mode<synchronous>, transform_indices = @transform_14, window_bounds = array<i64: 1, 32>}, {pipeline_mode = #tpu.pipeline_mode<synchronous>, transform_indices = @transform_15, window_bounds = array<i64: 1, 32>}, {pipeline_mode = #tpu.pipeline_mode<synchronous>, transform_indices = @transform_16, window_bounds = array<i64: 10, 32>}]} {
    %c0 = arith.constant 0 : index
    %c0_0 = arith.constant 0 : index
    %0 = vector.load %arg1[%c0, %c0_0] : memref<10x32xf32, #tpu.memory_space<vmem>>, vector<10x32xf32>
    %c0_1 = arith.constant 0 : index
    %c0_2 = arith.constant 0 : index
    %1 = vector.load %arg3[%c0_1, %c0_2] : memref<1x32xf32, #tpu.memory_space<vmem>>, vector<1x32xf32>
    %c0_3 = arith.constant 0 : index
    %c0_4 = arith.constant 0 : index
    %2 = vector.load %arg4[%c0_3, %c0_4] : memref<1x32xf32, #tpu.memory_space<vmem>>, vector<1x32xf32>
    %cst = arith.constant dense<0.000000e+00> : vector<10xf32>
    %3 = vector.multi_reduction <add>, %0, %cst [1] : vector<10x32xf32> to vector<10xf32>
    %4 = vector.shape_cast %3 : vector<10xf32> to vector<10x1xf32>
    %cst_5 = arith.constant 3.200000e+01 : f32
    %5 = vector.broadcast %cst_5 : f32 to vector<10x1xf32>
    %6 = arith.divf %4, %5 : vector<10x1xf32>
    %7 = vector.broadcast %6 : vector<10x1xf32> to vector<10x32xf32>
    %8 = arith.subf %0, %7 : vector<10x32xf32>
    %9 = arith.mulf %8, %8 : vector<10x32xf32>
    %cst_6 = arith.constant dense<0.000000e+00> : vector<10xf32>
    %10 = vector.multi_reduction <add>, %9, %cst_6 [1] : vector<10x32xf32> to vector<10xf32>
    %11 = vector.shape_cast %10 : vector<10xf32> to vector<10x1xf32>
    %cst_7 = arith.constant 3.200000e+01 : f32
    %12 = vector.broadcast %cst_7 : f32 to vector<10x1xf32>
    %13 = arith.divf %11, %12 : vector<10x1xf32>
    %14 = vector.broadcast %6 : vector<10x1xf32> to vector<10x32xf32>
    %15 = arith.subf %0, %14 : vector<10x32xf32>
    %cst_8 = arith.constant 9.99999997E-7 : f32
    %16 = vector.broadcast %cst_8 : f32 to vector<10x1xf32>
    %17 = arith.addf %13, %16 : vector<10x1xf32>
    %18 = math.rsqrt %17 : vector<10x1xf32>
    %19 = vector.broadcast %18 : vector<10x1xf32> to vector<10x32xf32>
    %20 = arith.mulf %15, %19 : vector<10x32xf32>
    %21 = vector.broadcast %1 : vector<1x32xf32> to vector<10x32xf32>
    %22 = arith.mulf %20, %21 : vector<10x32xf32>
    %23 = vector.broadcast %2 : vector<1x32xf32> to vector<10x32xf32>
    %24 = arith.addf %22, %23 : vector<10x32xf32>
    %c0_9 = arith.constant 0 : index
    %c0_10 = arith.constant 0 : index
    %25 = vector.load %arg5[%c0_9, %c0_10] : memref<32x96xf32, #tpu.memory_space<vmem>>, vector<32x96xf32>
    %26 = arith.truncf %24 : vector<10x32xf32> to vector<10x32xbf16>
    %27 = arith.truncf %25 : vector<32x96xf32> to vector<32x96xbf16>
    %cst_11 = arith.constant dense<0.000000e+00> : vector<10x96xf32>
    %28 = tpu.matmul %26, %27, %cst_11 {dimension_numbers = #tpu.dot_dimension_numbers<[1], [0], [0], [1], [0, 0, 1, 1], [], []>} : vector<10x32xbf16>, vector<32x96xbf16>, vector<10x96xf32> -> vector<10x96xf32>
    %c0_12 = arith.constant 0 : index
    %c0_13 = arith.constant 0 : index
    %29 = vector.load %arg6[%c0_12, %c0_13] : memref<1x96xf32, #tpu.memory_space<vmem>>, vector<1x96xf32>
    %30 = vector.broadcast %29 : vector<1x96xf32> to vector<10x96xf32>
    %31 = arith.addf %28, %30 : vector<10x96xf32>
    %32 = vector.extract_strided_slice %31 {offsets = [0, 0], sizes = [10, 32], strides = [1, 1]} : vector<10x96xf32> to vector<10x32xf32>
    %33 = vector.extract_strided_slice %31 {offsets = [0, 32], sizes = [10, 32], strides = [1, 1]} : vector<10x96xf32> to vector<10x32xf32>
    %34 = vector.extract_strided_slice %31 {offsets = [0, 64], sizes = [10, 32], strides = [1, 1]} : vector<10x96xf32> to vector<10x32xf32>
    %c0_14 = arith.constant 0 : index
    %c0_15 = arith.constant 0 : index
    %35 = vector.load %arg2[%c0_14, %c0_15] : memref<10x10xf32, #tpu.memory_space<vmem>>, vector<10x10xf32>
    %36 = vector.extract_strided_slice %32 {offsets = [0, 0], sizes = [10, 16], strides = [1, 1]} : vector<10x32xf32> to vector<10x16xf32>
    %37 = vector.extract_strided_slice %33 {offsets = [0, 0], sizes = [10, 16], strides = [1, 1]} : vector<10x32xf32> to vector<10x16xf32>
    %38 = vector.extract_strided_slice %34 {offsets = [0, 0], sizes = [10, 16], strides = [1, 1]} : vector<10x32xf32> to vector<10x16xf32>
    %39 = arith.truncf %36 : vector<10x16xf32> to vector<10x16xbf16>
    %40 = arith.truncf %37 : vector<10x16xf32> to vector<10x16xbf16>
    %cst_16 = arith.constant dense<0.000000e+00> : vector<10x10xf32>
    %41 = tpu.matmul %39, %40, %cst_16 {dimension_numbers = #tpu.dot_dimension_numbers<[1], [1], [0], [0], [0, 0, 1, 0], [], []>} : vector<10x16xbf16>, vector<10x16xbf16>, vector<10x10xf32> -> vector<10x10xf32>
    %cst_17 = arith.constant 2.500000e-01 : f32
    %42 = vector.broadcast %cst_17 : f32 to vector<10x10xf32>
    %43 = arith.mulf %41, %42 : vector<10x10xf32>
    %44 = arith.addf %43, %35 : vector<10x10xf32>
    %cst_18 = arith.constant dense<0xFF800000> : vector<10xf32>
    %45 = vector.multi_reduction <maximumf>, %44, %cst_18 [1] : vector<10x10xf32> to vector<10xf32>
    %46 = vector.shape_cast %45 : vector<10xf32> to vector<10x1xf32>
    %47 = vector.broadcast %46 : vector<10x1xf32> to vector<10x10xf32>
    %48 = arith.subf %44, %47 : vector<10x10xf32>
    %49 = math.exp %48 : vector<10x10xf32>
    %cst_19 = arith.constant dense<0.000000e+00> : vector<10xf32>
    %50 = vector.multi_reduction <add>, %49, %cst_19 [1] : vector<10x10xf32> to vector<10xf32>
    %51 = vector.shape_cast %50 : vector<10xf32> to vector<10x1xf32>
    %52 = tpu.reciprocal %51 {approx = true} : vector<10x1xf32> -> vector<10x1xf32>
    %53 = vector.broadcast %52 : vector<10x1xf32> to vector<10x10xf32>
    %54 = arith.mulf %49, %53 : vector<10x10xf32>
    %55 = arith.truncf %54 : vector<10x10xf32> to vector<10x10xbf16>
    %56 = arith.truncf %38 : vector<10x16xf32> to vector<10x16xbf16>
    %cst_20 = arith.constant dense<0.000000e+00> : vector<10x16xf32>
    %57 = tpu.matmul %55, %56, %cst_20 {dimension_numbers = #tpu.dot_dimension_numbers<[1], [0], [0], [1], [0, 0, 1, 1], [], []>} : vector<10x10xbf16>, vector<10x16xbf16>, vector<10x16xf32> -> vector<10x16xf32>
    %58 = vector.extract_strided_slice %32 {offsets = [0, 16], sizes = [10, 16], strides = [1, 1]} : vector<10x32xf32> to vector<10x16xf32>
    %59 = vector.extract_strided_slice %33 {offsets = [0, 16], sizes = [10, 16], strides = [1, 1]} : vector<10x32xf32> to vector<10x16xf32>
    %60 = vector.extract_strided_slice %34 {offsets = [0, 16], sizes = [10, 16], strides = [1, 1]} : vector<10x32xf32> to vector<10x16xf32>
    %61 = arith.truncf %58 : vector<10x16xf32> to vector<10x16xbf16>
    %62 = arith.truncf %59 : vector<10x16xf32> to vector<10x16xbf16>
    %cst_21 = arith.constant dense<0.000000e+00> : vector<10x10xf32>
    %63 = tpu.matmul %61, %62, %cst_21 {dimension_numbers = #tpu.dot_dimension_numbers<[1], [1], [0], [0], [0, 0, 1, 0], [], []>} : vector<10x16xbf16>, vector<10x16xbf16>, vector<10x10xf32> -> vector<10x10xf32>
    %cst_22 = arith.constant 2.500000e-01 : f32
    %64 = vector.broadcast %cst_22 : f32 to vector<10x10xf32>
    %65 = arith.mulf %63, %64 : vector<10x10xf32>
    %66 = arith.addf %65, %35 : vector<10x10xf32>
    %cst_23 = arith.constant dense<0xFF800000> : vector<10xf32>
    %67 = vector.multi_reduction <maximumf>, %66, %cst_23 [1] : vector<10x10xf32> to vector<10xf32>
    %68 = vector.shape_cast %67 : vector<10xf32> to vector<10x1xf32>
    %69 = vector.broadcast %68 : vector<10x1xf32> to vector<10x10xf32>
    %70 = arith.subf %66, %69 : vector<10x10xf32>
    %71 = math.exp %70 : vector<10x10xf32>
    %cst_24 = arith.constant dense<0.000000e+00> : vector<10xf32>
    %72 = vector.multi_reduction <add>, %71, %cst_24 [1] : vector<10x10xf32> to vector<10xf32>
    %73 = vector.shape_cast %72 : vector<10xf32> to vector<10x1xf32>
    %74 = tpu.reciprocal %73 {approx = true} : vector<10x1xf32> -> vector<10x1xf32>
    %75 = vector.broadcast %74 : vector<10x1xf32> to vector<10x10xf32>
    %76 = arith.mulf %71, %75 : vector<10x10xf32>
    %77 = arith.truncf %76 : vector<10x10xf32> to vector<10x10xbf16>
    %78 = arith.truncf %60 : vector<10x16xf32> to vector<10x16xbf16>
    %cst_25 = arith.constant dense<0.000000e+00> : vector<10x16xf32>
    %79 = tpu.matmul %77, %78, %cst_25 {dimension_numbers = #tpu.dot_dimension_numbers<[1], [0], [0], [1], [0, 0, 1, 1], [], []>} : vector<10x10xbf16>, vector<10x16xbf16>, vector<10x16xf32> -> vector<10x16xf32>
    %80 = tpu.concatenate %57, %79 in 1 : vector<10x16xf32>, vector<10x16xf32> -> vector<10x32xf32>
    %c0_26 = arith.constant 0 : index
    %c0_27 = arith.constant 0 : index
    %81 = vector.load %arg7[%c0_26, %c0_27] : memref<32x32xf32, #tpu.memory_space<vmem>>, vector<32x32xf32>
    %82 = arith.truncf %80 : vector<10x32xf32> to vector<10x32xbf16>
    %83 = arith.truncf %81 : vector<32x32xf32> to vector<32x32xbf16>
    %cst_28 = arith.constant dense<0.000000e+00> : vector<10x32xf32>
    %84 = tpu.matmul %82, %83, %cst_28 {dimension_numbers = #tpu.dot_dimension_numbers<[1], [0], [0], [1], [0, 0, 1, 1], [], []>} : vector<10x32xbf16>, vector<32x32xbf16>, vector<10x32xf32> -> vector<10x32xf32>
    %85 = arith.addf %0, %84 : vector<10x32xf32>
    %c0_29 = arith.constant 0 : index
    %c0_30 = arith.constant 0 : index
    %86 = vector.load %arg8[%c0_29, %c0_30] : memref<1x32xf32, #tpu.memory_space<vmem>>, vector<1x32xf32>
    %87 = vector.broadcast %86 : vector<1x32xf32> to vector<10x32xf32>
    %88 = arith.addf %85, %87 : vector<10x32xf32>
    %c0_31 = arith.constant 0 : index
    %c0_32 = arith.constant 0 : index
    %89 = vector.load %arg9[%c0_31, %c0_32] : memref<1x32xf32, #tpu.memory_space<vmem>>, vector<1x32xf32>
    %c0_33 = arith.constant 0 : index
    %c0_34 = arith.constant 0 : index
    %90 = vector.load %arg10[%c0_33, %c0_34] : memref<1x32xf32, #tpu.memory_space<vmem>>, vector<1x32xf32>
    %cst_35 = arith.constant dense<0.000000e+00> : vector<10xf32>
    %91 = vector.multi_reduction <add>, %88, %cst_35 [1] : vector<10x32xf32> to vector<10xf32>
    %92 = vector.shape_cast %91 : vector<10xf32> to vector<10x1xf32>
    %cst_36 = arith.constant 3.200000e+01 : f32
    %93 = vector.broadcast %cst_36 : f32 to vector<10x1xf32>
    %94 = arith.divf %92, %93 : vector<10x1xf32>
    %95 = vector.broadcast %94 : vector<10x1xf32> to vector<10x32xf32>
    %96 = arith.subf %88, %95 : vector<10x32xf32>
    %97 = arith.mulf %96, %96 : vector<10x32xf32>
    %cst_37 = arith.constant dense<0.000000e+00> : vector<10xf32>
    %98 = vector.multi_reduction <add>, %97, %cst_37 [1] : vector<10x32xf32> to vector<10xf32>
    %99 = vector.shape_cast %98 : vector<10xf32> to vector<10x1xf32>
    %cst_38 = arith.constant 3.200000e+01 : f32
    %100 = vector.broadcast %cst_38 : f32 to vector<10x1xf32>
    %101 = arith.divf %99, %100 : vector<10x1xf32>
    %102 = vector.broadcast %94 : vector<10x1xf32> to vector<10x32xf32>
    %103 = arith.subf %88, %102 : vector<10x32xf32>
    %cst_39 = arith.constant 9.99999997E-7 : f32
    %104 = vector.broadcast %cst_39 : f32 to vector<10x1xf32>
    %105 = arith.addf %101, %104 : vector<10x1xf32>
    %106 = math.rsqrt %105 : vector<10x1xf32>
    %107 = vector.broadcast %106 : vector<10x1xf32> to vector<10x32xf32>
    %108 = arith.mulf %103, %107 : vector<10x32xf32>
    %109 = vector.broadcast %89 : vector<1x32xf32> to vector<10x32xf32>
    %110 = arith.mulf %108, %109 : vector<10x32xf32>
    %111 = vector.broadcast %90 : vector<1x32xf32> to vector<10x32xf32>
    %112 = arith.addf %110, %111 : vector<10x32xf32>
    %c0_40 = arith.constant 0 : index
    %c0_41 = arith.constant 0 : index
    %113 = vector.load %arg11[%c0_40, %c0_41] : memref<32x64xf32, #tpu.memory_space<vmem>>, vector<32x64xf32>
    %114 = arith.truncf %112 : vector<10x32xf32> to vector<10x32xbf16>
    %115 = arith.truncf %113 : vector<32x64xf32> to vector<32x64xbf16>
    %cst_42 = arith.constant dense<0.000000e+00> : vector<10x64xf32>
    %116 = tpu.matmul %114, %115, %cst_42 {dimension_numbers = #tpu.dot_dimension_numbers<[1], [0], [0], [1], [0, 0, 1, 1], [], []>} : vector<10x32xbf16>, vector<32x64xbf16>, vector<10x64xf32> -> vector<10x64xf32>
    %c0_43 = arith.constant 0 : index
    %c0_44 = arith.constant 0 : index
    %117 = vector.load %arg12[%c0_43, %c0_44] : memref<1x64xf32, #tpu.memory_space<vmem>>, vector<1x64xf32>
    %118 = vector.broadcast %117 : vector<1x64xf32> to vector<10x64xf32>
    %119 = arith.addf %116, %118 : vector<10x64xf32>
    %120 = arith.mulf %119, %119 : vector<10x64xf32>
    %121 = arith.mulf %119, %120 : vector<10x64xf32>
    %cst_45 = arith.constant 4.471500e-02 : f32
    %122 = vector.broadcast %cst_45 : f32 to vector<10x64xf32>
    %123 = arith.mulf %122, %121 : vector<10x64xf32>
    %124 = arith.addf %119, %123 : vector<10x64xf32>
    %cst_46 = arith.constant 0.797884583 : f32
    %125 = vector.broadcast %cst_46 : f32 to vector<10x64xf32>
    %126 = arith.mulf %125, %124 : vector<10x64xf32>
    %127 = math.tanh %126 : vector<10x64xf32>
    %cst_47 = arith.constant 1.000000e+00 : f32
    %128 = vector.broadcast %cst_47 : f32 to vector<10x64xf32>
    %129 = arith.addf %128, %127 : vector<10x64xf32>
    %cst_48 = arith.constant 5.000000e-01 : f32
    %130 = vector.broadcast %cst_48 : f32 to vector<10x64xf32>
    %131 = arith.mulf %130, %129 : vector<10x64xf32>
    %132 = arith.mulf %119, %131 : vector<10x64xf32>
    %c0_49 = arith.constant 0 : index
    %c0_50 = arith.constant 0 : index
    %133 = vector.load %arg13[%c0_49, %c0_50] : memref<64x32xf32, #tpu.memory_space<vmem>>, vector<64x32xf32>
    %134 = arith.truncf %132 : vector<10x64xf32> to vector<10x64xbf16>
    %135 = arith.truncf %133 : vector<64x32xf32> to vector<64x32xbf16>
    %cst_51 = arith.constant dense<0.000000e+00> : vector<10x32xf32>
    %136 = tpu.matmul %134, %135, %cst_51 {dimension_numbers = #tpu.dot_dimension_numbers<[1], [0], [0], [1], [0, 0, 1, 1], [], []>} : vector<10x64xbf16>, vector<64x32xbf16>, vector<10x32xf32> -> vector<10x32xf32>
    %137 = arith.addf %88, %136 : vector<10x32xf32>
    %c0_52 = arith.constant 0 : index
    %c0_53 = arith.constant 0 : index
    %138 = vector.load %arg14[%c0_52, %c0_53] : memref<1x32xf32, #tpu.memory_space<vmem>>, vector<1x32xf32>
    %139 = vector.broadcast %138 : vector<1x32xf32> to vector<10x32xf32>
    %140 = arith.addf %137, %139 : vector<10x32xf32>
    %c0_54 = arith.constant 0 : index
    %c0_55 = arith.constant 0 : index
    %141 = vector.load %arg15[%c0_54, %c0_55] : memref<1x32xf32, #tpu.memory_space<vmem>>, vector<1x32xf32>
    %c0_56 = arith.constant 0 : index
    %c0_57 = arith.constant 0 : index
    %142 = vector.load %arg16[%c0_56, %c0_57] : memref<1x32xf32, #tpu.memory_space<vmem>>, vector<1x32xf32>
    %cst_58 = arith.constant dense<0.000000e+00> : vector<10xf32>
    %143 = vector.multi_reduction <add>, %140, %cst_58 [1] : vector<10x32xf32> to vector<10xf32>
    %144 = vector.shape_cast %143 : vector<10xf32> to vector<10x1xf32>
    %cst_59 = arith.constant 3.200000e+01 : f32
    %145 = vector.broadcast %cst_59 : f32 to vector<10x1xf32>
    %146 = arith.divf %144, %145 : vector<10x1xf32>
    %147 = vector.broadcast %146 : vector<10x1xf32> to vector<10x32xf32>
    %148 = arith.subf %140, %147 : vector<10x32xf32>
    %149 = arith.mulf %148, %148 : vector<10x32xf32>
    %cst_60 = arith.constant dense<0.000000e+00> : vector<10xf32>
    %150 = vector.multi_reduction <add>, %149, %cst_60 [1] : vector<10x32xf32> to vector<10xf32>
    %151 = vector.shape_cast %150 : vector<10xf32> to vector<10x1xf32>
    %cst_61 = arith.constant 3.200000e+01 : f32
    %152 = vector.broadcast %cst_61 : f32 to vector<10x1xf32>
    %153 = arith.divf %151, %152 : vector<10x1xf32>
    %154 = vector.broadcast %146 : vector<10x1xf32> to vector<10x32xf32>
    %155 = arith.subf %140, %154 : vector<10x32xf32>
    %cst_62 = arith.constant 9.99999997E-7 : f32
    %156 = vector.broadcast %cst_62 : f32 to vector<10x1xf32>
    %157 = arith.addf %153, %156 : vector<10x1xf32>
    %158 = math.rsqrt %157 : vector<10x1xf32>
    %159 = vector.broadcast %158 : vector<10x1xf32> to vector<10x32xf32>
    %160 = arith.mulf %155, %159 : vector<10x32xf32>
    %161 = vector.broadcast %141 : vector<1x32xf32> to vector<10x32xf32>
    %162 = arith.mulf %160, %161 : vector<10x32xf32>
    %163 = vector.broadcast %142 : vector<1x32xf32> to vector<10x32xf32>
    %164 = arith.addf %162, %163 : vector<10x32xf32>
    %c0_63 = arith.constant 0 : index
    %c0_64 = arith.constant 0 : index
    %165 = vector.load %arg17[%c0_63, %c0_64] : memref<10x32xf32, #tpu.memory_space<vmem>>, vector<10x32xf32>
    tpu.vector_store %arg17[%c0_63, %c0_64], %164 {strides = array<i32>} : memref<10x32xf32, #tpu.memory_space<vmem>>, vector<10x32xf32>,
    return
  }
  func.func @transform_0(%arg0: i32) -> (i32, i32) {
    %c0_i32 = arith.constant 0 : i32
    %c0_i32_0 = arith.constant 0 : i32
    %c0_i32_1 = arith.constant 0 : i32
    return %c0_i32, %c0_i32_0 : i32, i32
  }
  func.func @transform_1(%arg0: i32) -> (i32, i32) {
    %c0_i32 = arith.constant 0 : i32
    %c0_i32_0 = arith.constant 0 : i32
    %c0_i32_1 = arith.constant 0 : i32
    return %c0_i32, %c0_i32_0 : i32, i32
  }
  func.func @transform_2(%arg0: i32) -> (i32, i32) {
    %c0_i32 = arith.constant 0 : i32
    %c0_i32_0 = arith.constant 0 : i32
    %c0_i32_1 = arith.constant 0 : i32
    return %c0_i32, %c0_i32_0 : i32, i32
  }
  func.func @transform_3(%arg0: i32) -> (i32, i32) {
    %c0_i32 = arith.constant 0 : i32
    %c0_i32_0 = arith.constant 0 : i32
    %c0_i32_1 = arith.constant 0 : i32
    return %c0_i32, %c0_i32_0 : i32, i32
  }
  func.func @transform_4(%arg0: i32) -> (i32, i32) {
    %c0_i32 = arith.constant 0 : i32
    %c0_i32_0 = arith.constant 0 : i32
    %c0_i32_1 = arith.constant 0 : i32
    return %c0_i32, %c0_i32_0 : i32, i32
  }
  func.func @transform_5(%arg0: i32) -> (i32, i32) {
    %c0_i32 = arith.constant 0 : i32
    %c0_i32_0 = arith.constant 0 : i32
    %c0_i32_1 = arith.constant 0 : i32
    return %c0_i32, %c0_i32_0 : i32, i32
  }
  func.func @transform_6(%arg0: i32) -> (i32, i32) {
    %c0_i32 = arith.constant 0 : i32
    %c0_i32_0 = arith.constant 0 : i32
    %c0_i32_1 = arith.constant 0 : i32
    return %c0_i32, %c0_i32_0 : i32, i32
  }
  func.func @transform_7(%arg0: i32) -> (i32, i32) {
    %c0_i32 = arith.constant 0 : i32
    %c0_i32_0 = arith.constant 0 : i32
    %c0_i32_1 = arith.constant 0 : i32
    return %c0_i32, %c0_i32_0 : i32, i32
  }
  func.func @transform_8(%arg0: i32) -> (i32, i32) {
    %c0_i32 = arith.constant 0 : i32
    %c0_i32_0 = arith.constant 0 : i32
    %c0_i32_1 = arith.constant 0 : i32
    return %c0_i32, %c0_i32_0 : i32, i32
  }
  func.func @transform_9(%arg0: i32) -> (i32, i32) {
    %c0_i32 = arith.constant 0 : i32
    %c0_i32_0 = arith.constant 0 : i32
    %c0_i32_1 = arith.constant 0 : i32
    return %c0_i32, %c0_i32_0 : i32, i32
  }
  func.func @transform_10(%arg0: i32) -> (i32, i32) {
    %c0_i32 = arith.constant 0 : i32
    %c0_i32_0 = arith.constant 0 : i32
    %c0_i32_1 = arith.constant 0 : i32
    return %c0_i32, %c0_i32_0 : i32, i32
  }
  func.func @transform_11(%arg0: i32) -> (i32, i32) {
    %c0_i32 = arith.constant 0 : i32
    %c0_i32_0 = arith.constant 0 : i32
    %c0_i32_1 = arith.constant 0 : i32
    return %c0_i32, %c0_i32_0 : i32, i32
  }
  func.func @transform_12(%arg0: i32) -> (i32, i32) {
    %c0_i32 = arith.constant 0 : i32
    %c0_i32_0 = arith.constant 0 : i32
    %c0_i32_1 = arith.constant 0 : i32
    return %c0_i32, %c0_i32_0 : i32, i32
  }
  func.func @transform_13(%arg0: i32) -> (i32, i32) {
    %c0_i32 = arith.constant 0 : i32
    %c0_i32_0 = arith.constant 0 : i32
    %c0_i32_1 = arith.constant 0 : i32
    return %c0_i32, %c0_i32_0 : i32, i32
  }
  func.func @transform_14(%arg0: i32) -> (i32, i32) {
    %c0_i32 = arith.constant 0 : i32
    %c0_i32_0 = arith.constant 0 : i32
    %c0_i32_1 = arith.constant 0 : i32
    return %c0_i32, %c0_i32_0 : i32, i32
  }
  func.func @transform_15(%arg0: i32) -> (i32, i32) {
    %c0_i32 = arith.constant 0 : i32
    %c0_i32_0 = arith.constant 0 : i32
    %c0_i32_1 = arith.constant 0 : i32
    return %c0_i32, %c0_i32_0 : i32, i32
  }
  func.func @transform_16(%arg0: i32) -> (i32, i32) {
    %c0_i32 = arith.constant 0 : i32
    %c0_i32_0 = arith.constant 0 : i32
    %c0_i32_1 = arith.constant 0 : i32
    return %c0_i32, %c0_i32_0 : i32, i32
  }
}

module attributes {stable_mosaic.version = 11 : i64} {
  func.func @_bert_layer_kernel(%arg0: i32, %arg1: memref<16x32xf32, #tpu.memory_space<vmem>>, %arg2: memref<16x16xf32, #tpu.memory_space<vmem>>, %arg3: memref<1x32xf32, #tpu.memory_space<vmem>>, %arg4: memref<1x32xf32, #tpu.memory_space<vmem>>, %arg5: memref<32x96xf32, #tpu.memory_space<vmem>>, %arg6: memref<1x96xf32, #tpu.memory_space<vmem>>, %arg7: memref<32x32xf32, #tpu.memory_space<vmem>>, %arg8: memref<1x32xf32, #tpu.memory_space<vmem>>, %arg9: memref<1x32xf32, #tpu.memory_space<vmem>>, %arg10: memref<1x32xf32, #tpu.memory_space<vmem>>, %arg11: memref<32x64xf32, #tpu.memory_space<vmem>>, %arg12: memref<1x64xf32, #tpu.memory_space<vmem>>, %arg13: memref<64x32xf32, #tpu.memory_space<vmem>>, %arg14: memref<1x32xf32, #tpu.memory_space<vmem>>, %arg15: memref<1x32xf32, #tpu.memory_space<vmem>>, %arg16: memref<1x32xf32, #tpu.memory_space<vmem>>, %arg17: memref<16x32xf32, #tpu.memory_space<vmem>>) attributes {dimension_semantics = [#tpu.dimension_semantics<arbitrary>], iteration_bounds = array<i64: 1>, scalar_prefetch = 0 : i64, scratch_operands = 0 : i64, tpu.core_type = #tpu.core_type<tc>, window_params = [{pipeline_mode = #tpu.pipeline_mode<synchronous>, transform_indices = @transform_0, window_bounds = array<i64: 16, 32>}, {pipeline_mode = #tpu.pipeline_mode<synchronous>, transform_indices = @transform_1, window_bounds = array<i64: 16, 16>}, {pipeline_mode = #tpu.pipeline_mode<synchronous>, transform_indices = @transform_2, window_bounds = array<i64: 1, 32>}, {pipeline_mode = #tpu.pipeline_mode<synchronous>, transform_indices = @transform_3, window_bounds = array<i64: 1, 32>}, {pipeline_mode = #tpu.pipeline_mode<synchronous>, transform_indices = @transform_4, window_bounds = array<i64: 32, 96>}, {pipeline_mode = #tpu.pipeline_mode<synchronous>, transform_indices = @transform_5, window_bounds = array<i64: 1, 96>}, {pipeline_mode = #tpu.pipeline_mode<synchronous>, transform_indices = @transform_6, window_bounds = array<i64: 32, 32>}, {pipeline_mode = #tpu.pipeline_mode<synchronous>, transform_indices = @transform_7, window_bounds = array<i64: 1, 32>}, {pipeline_mode = #tpu.pipeline_mode<synchronous>, transform_indices = @transform_8, window_bounds = array<i64: 1, 32>}, {pipeline_mode = #tpu.pipeline_mode<synchronous>, transform_indices = @transform_9, window_bounds = array<i64: 1, 32>}, {pipeline_mode = #tpu.pipeline_mode<synchronous>, transform_indices = @transform_10, window_bounds = array<i64: 32, 64>}, {pipeline_mode = #tpu.pipeline_mode<synchronous>, transform_indices = @transform_11, window_bounds = array<i64: 1, 64>}, {pipeline_mode = #tpu.pipeline_mode<synchronous>, transform_indices = @transform_12, window_bounds = array<i64: 64, 32>}, {pipeline_mode = #tpu.pipeline_mode<synchronous>, transform_indices = @transform_13, window_bounds = array<i64: 1, 32>}, {pipeline_mode = #tpu.pipeline_mode<synchronous>, transform_indices = @transform_14, window_bounds = array<i64: 1, 32>}, {pipeline_mode = #tpu.pipeline_mode<synchronous>, transform_indices = @transform_15, window_bounds = array<i64: 1, 32>}, {pipeline_mode = #tpu.pipeline_mode<synchronous>, transform_indices = @transform_16, window_bounds = array<i64: 16, 32>}]} {
    %c0 = arith.constant 0 : index
    %c0_0 = arith.constant 0 : index
    %0 = vector.load %arg1[%c0, %c0_0] : memref<16x32xf32, #tpu.memory_space<vmem>>, vector<16x32xf32>
    %c0_1 = arith.constant 0 : index
    %c0_2 = arith.constant 0 : index
    %1 = vector.load %arg3[%c0_1, %c0_2] : memref<1x32xf32, #tpu.memory_space<vmem>>, vector<1x32xf32>
    %c0_3 = arith.constant 0 : index
    %c0_4 = arith.constant 0 : index
    %2 = vector.load %arg4[%c0_3, %c0_4] : memref<1x32xf32, #tpu.memory_space<vmem>>, vector<1x32xf32>
    %cst = arith.constant dense<0.000000e+00> : vector<16xf32>
    %3 = vector.multi_reduction <add>, %0, %cst [1] : vector<16x32xf32> to vector<16xf32>
    %4 = vector.shape_cast %3 : vector<16xf32> to vector<16x1xf32>
    %cst_5 = arith.constant 3.200000e+01 : f32
    %5 = vector.broadcast %cst_5 : f32 to vector<16x1xf32>
    %6 = arith.divf %4, %5 : vector<16x1xf32>
    %7 = vector.broadcast %6 : vector<16x1xf32> to vector<16x32xf32>
    %8 = arith.subf %0, %7 : vector<16x32xf32>
    %9 = arith.mulf %8, %8 : vector<16x32xf32>
    %cst_6 = arith.constant dense<0.000000e+00> : vector<16xf32>
    %10 = vector.multi_reduction <add>, %9, %cst_6 [1] : vector<16x32xf32> to vector<16xf32>
    %11 = vector.shape_cast %10 : vector<16xf32> to vector<16x1xf32>
    %cst_7 = arith.constant 3.200000e+01 : f32
    %12 = vector.broadcast %cst_7 : f32 to vector<16x1xf32>
    %13 = arith.divf %11, %12 : vector<16x1xf32>
    %14 = vector.broadcast %6 : vector<16x1xf32> to vector<16x32xf32>
    %15 = arith.subf %0, %14 : vector<16x32xf32>
    %cst_8 = arith.constant 9.99999996E-13 : f32
    %16 = vector.broadcast %cst_8 : f32 to vector<16x1xf32>
    %17 = arith.addf %13, %16 : vector<16x1xf32>
    %18 = math.rsqrt %17 : vector<16x1xf32>
    %19 = vector.broadcast %18 : vector<16x1xf32> to vector<16x32xf32>
    %20 = arith.mulf %15, %19 : vector<16x32xf32>
    %21 = vector.broadcast %1 : vector<1x32xf32> to vector<16x32xf32>
    %22 = arith.mulf %20, %21 : vector<16x32xf32>
    %23 = vector.broadcast %2 : vector<1x32xf32> to vector<16x32xf32>
    %24 = arith.addf %22, %23 : vector<16x32xf32>
    %c0_9 = arith.constant 0 : index
    %c0_10 = arith.constant 0 : index
    %25 = vector.load %arg5[%c0_9, %c0_10] : memref<32x96xf32, #tpu.memory_space<vmem>>, vector<32x96xf32>
    %26 = arith.truncf %24 : vector<16x32xf32> to vector<16x32xbf16>
    %27 = arith.truncf %25 : vector<32x96xf32> to vector<32x96xbf16>
    %cst_11 = arith.constant dense<0.000000e+00> : vector<16x96xf32>
    %28 = tpu.matmul %26, %27, %cst_11 {dimension_numbers = #tpu.dot_dimension_numbers<[1], [0], [0], [1], [0, 0, 1, 1], [], []>} : vector<16x32xbf16>, vector<32x96xbf16>, vector<16x96xf32> -> vector<16x96xf32>
    %c0_12 = arith.constant 0 : index
    %c0_13 = arith.constant 0 : index
    %29 = vector.load %arg6[%c0_12, %c0_13] : memref<1x96xf32, #tpu.memory_space<vmem>>, vector<1x96xf32>
    %30 = vector.broadcast %29 : vector<1x96xf32> to vector<16x96xf32>
    %31 = arith.addf %28, %30 : vector<16x96xf32>
    %32 = vector.extract_strided_slice %31 {offsets = [0, 0], sizes = [16, 32], strides = [1, 1]} : vector<16x96xf32> to vector<16x32xf32>
    %33 = vector.extract_strided_slice %31 {offsets = [0, 32], sizes = [16, 32], strides = [1, 1]} : vector<16x96xf32> to vector<16x32xf32>
    %34 = vector.extract_strided_slice %31 {offsets = [0, 64], sizes = [16, 32], strides = [1, 1]} : vector<16x96xf32> to vector<16x32xf32>
    %c0_14 = arith.constant 0 : index
    %c0_15 = arith.constant 0 : index
    %35 = vector.load %arg2[%c0_14, %c0_15] : memref<16x16xf32, #tpu.memory_space<vmem>>, vector<16x16xf32>
    %36 = vector.extract_strided_slice %32 {offsets = [0, 0], sizes = [16, 16], strides = [1, 1]} : vector<16x32xf32> to vector<16x16xf32>
    %37 = vector.extract_strided_slice %33 {offsets = [0, 0], sizes = [16, 16], strides = [1, 1]} : vector<16x32xf32> to vector<16x16xf32>
    %38 = vector.extract_strided_slice %34 {offsets = [0, 0], sizes = [16, 16], strides = [1, 1]} : vector<16x32xf32> to vector<16x16xf32>
    %39 = arith.truncf %36 : vector<16x16xf32> to vector<16x16xbf16>
    %40 = arith.truncf %37 : vector<16x16xf32> to vector<16x16xbf16>
    %cst_16 = arith.constant dense<0.000000e+00> : vector<16x16xf32>
    %41 = tpu.matmul %39, %40, %cst_16 {dimension_numbers = #tpu.dot_dimension_numbers<[1], [1], [0], [0], [0, 0, 1, 0], [], []>} : vector<16x16xbf16>, vector<16x16xbf16>, vector<16x16xf32> -> vector<16x16xf32>
    %cst_17 = arith.constant 2.500000e-01 : f32
    %42 = vector.broadcast %cst_17 : f32 to vector<16x16xf32>
    %43 = arith.mulf %41, %42 : vector<16x16xf32>
    %44 = arith.addf %43, %35 : vector<16x16xf32>
    %cst_18 = arith.constant dense<0xFF800000> : vector<16xf32>
    %45 = vector.multi_reduction <maximumf>, %44, %cst_18 [1] : vector<16x16xf32> to vector<16xf32>
    %46 = vector.shape_cast %45 : vector<16xf32> to vector<16x1xf32>
    %47 = vector.broadcast %46 : vector<16x1xf32> to vector<16x16xf32>
    %48 = arith.subf %44, %47 : vector<16x16xf32>
    %49 = math.exp %48 : vector<16x16xf32>
    %cst_19 = arith.constant dense<0.000000e+00> : vector<16xf32>
    %50 = vector.multi_reduction <add>, %49, %cst_19 [1] : vector<16x16xf32> to vector<16xf32>
    %51 = vector.shape_cast %50 : vector<16xf32> to vector<16x1xf32>
    %52 = tpu.reciprocal %51 {approx = true} : vector<16x1xf32> -> vector<16x1xf32>
    %53 = vector.broadcast %52 : vector<16x1xf32> to vector<16x16xf32>
    %54 = arith.mulf %49, %53 : vector<16x16xf32>
    %55 = arith.truncf %54 : vector<16x16xf32> to vector<16x16xbf16>
    %56 = arith.truncf %38 : vector<16x16xf32> to vector<16x16xbf16>
    %cst_20 = arith.constant dense<0.000000e+00> : vector<16x16xf32>
    %57 = tpu.matmul %55, %56, %cst_20 {dimension_numbers = #tpu.dot_dimension_numbers<[1], [0], [0], [1], [0, 0, 1, 1], [], []>} : vector<16x16xbf16>, vector<16x16xbf16>, vector<16x16xf32> -> vector<16x16xf32>
    %58 = vector.extract_strided_slice %32 {offsets = [0, 16], sizes = [16, 16], strides = [1, 1]} : vector<16x32xf32> to vector<16x16xf32>
    %59 = vector.extract_strided_slice %33 {offsets = [0, 16], sizes = [16, 16], strides = [1, 1]} : vector<16x32xf32> to vector<16x16xf32>
    %60 = vector.extract_strided_slice %34 {offsets = [0, 16], sizes = [16, 16], strides = [1, 1]} : vector<16x32xf32> to vector<16x16xf32>
    %61 = arith.truncf %58 : vector<16x16xf32> to vector<16x16xbf16>
    %62 = arith.truncf %59 : vector<16x16xf32> to vector<16x16xbf16>
    %cst_21 = arith.constant dense<0.000000e+00> : vector<16x16xf32>
    %63 = tpu.matmul %61, %62, %cst_21 {dimension_numbers = #tpu.dot_dimension_numbers<[1], [1], [0], [0], [0, 0, 1, 0], [], []>} : vector<16x16xbf16>, vector<16x16xbf16>, vector<16x16xf32> -> vector<16x16xf32>
    %cst_22 = arith.constant 2.500000e-01 : f32
    %64 = vector.broadcast %cst_22 : f32 to vector<16x16xf32>
    %65 = arith.mulf %63, %64 : vector<16x16xf32>
    %66 = arith.addf %65, %35 : vector<16x16xf32>
    %cst_23 = arith.constant dense<0xFF800000> : vector<16xf32>
    %67 = vector.multi_reduction <maximumf>, %66, %cst_23 [1] : vector<16x16xf32> to vector<16xf32>
    %68 = vector.shape_cast %67 : vector<16xf32> to vector<16x1xf32>
    %69 = vector.broadcast %68 : vector<16x1xf32> to vector<16x16xf32>
    %70 = arith.subf %66, %69 : vector<16x16xf32>
    %71 = math.exp %70 : vector<16x16xf32>
    %cst_24 = arith.constant dense<0.000000e+00> : vector<16xf32>
    %72 = vector.multi_reduction <add>, %71, %cst_24 [1] : vector<16x16xf32> to vector<16xf32>
    %73 = vector.shape_cast %72 : vector<16xf32> to vector<16x1xf32>
    %74 = tpu.reciprocal %73 {approx = true} : vector<16x1xf32> -> vector<16x1xf32>
    %75 = vector.broadcast %74 : vector<16x1xf32> to vector<16x16xf32>
    %76 = arith.mulf %71, %75 : vector<16x16xf32>
    %77 = arith.truncf %76 : vector<16x16xf32> to vector<16x16xbf16>
    %78 = arith.truncf %60 : vector<16x16xf32> to vector<16x16xbf16>
    %cst_25 = arith.constant dense<0.000000e+00> : vector<16x16xf32>
    %79 = tpu.matmul %77, %78, %cst_25 {dimension_numbers = #tpu.dot_dimension_numbers<[1], [0], [0], [1], [0, 0, 1, 1], [], []>} : vector<16x16xbf16>, vector<16x16xbf16>, vector<16x16xf32> -> vector<16x16xf32>
    %80 = tpu.concatenate %57, %79 in 1 : vector<16x16xf32>, vector<16x16xf32> -> vector<16x32xf32>
    %c0_26 = arith.constant 0 : index
    %c0_27 = arith.constant 0 : index
    %81 = vector.load %arg7[%c0_26, %c0_27] : memref<32x32xf32, #tpu.memory_space<vmem>>, vector<32x32xf32>
    %82 = arith.truncf %80 : vector<16x32xf32> to vector<16x32xbf16>
    %83 = arith.truncf %81 : vector<32x32xf32> to vector<32x32xbf16>
    %cst_28 = arith.constant dense<0.000000e+00> : vector<16x32xf32>
    %84 = tpu.matmul %82, %83, %cst_28 {dimension_numbers = #tpu.dot_dimension_numbers<[1], [0], [0], [1], [0, 0, 1, 1], [], []>} : vector<16x32xbf16>, vector<32x32xbf16>, vector<16x32xf32> -> vector<16x32xf32>
    %85 = arith.addf %24, %84 : vector<16x32xf32>
    %c0_29 = arith.constant 0 : index
    %c0_30 = arith.constant 0 : index
    %86 = vector.load %arg8[%c0_29, %c0_30] : memref<1x32xf32, #tpu.memory_space<vmem>>, vector<1x32xf32>
    %87 = vector.broadcast %86 : vector<1x32xf32> to vector<16x32xf32>
    %88 = arith.addf %85, %87 : vector<16x32xf32>
    %c0_31 = arith.constant 0 : index
    %c0_32 = arith.constant 0 : index
    %89 = vector.load %arg9[%c0_31, %c0_32] : memref<1x32xf32, #tpu.memory_space<vmem>>, vector<1x32xf32>
    %c0_33 = arith.constant 0 : index
    %c0_34 = arith.constant 0 : index
    %90 = vector.load %arg10[%c0_33, %c0_34] : memref<1x32xf32, #tpu.memory_space<vmem>>, vector<1x32xf32>
    %cst_35 = arith.constant dense<0.000000e+00> : vector<16xf32>
    %91 = vector.multi_reduction <add>, %88, %cst_35 [1] : vector<16x32xf32> to vector<16xf32>
    %92 = vector.shape_cast %91 : vector<16xf32> to vector<16x1xf32>
    %cst_36 = arith.constant 3.200000e+01 : f32
    %93 = vector.broadcast %cst_36 : f32 to vector<16x1xf32>
    %94 = arith.divf %92, %93 : vector<16x1xf32>
    %95 = vector.broadcast %94 : vector<16x1xf32> to vector<16x32xf32>
    %96 = arith.subf %88, %95 : vector<16x32xf32>
    %97 = arith.mulf %96, %96 : vector<16x32xf32>
    %cst_37 = arith.constant dense<0.000000e+00> : vector<16xf32>
    %98 = vector.multi_reduction <add>, %97, %cst_37 [1] : vector<16x32xf32> to vector<16xf32>
    %99 = vector.shape_cast %98 : vector<16xf32> to vector<16x1xf32>
    %cst_38 = arith.constant 3.200000e+01 : f32
    %100 = vector.broadcast %cst_38 : f32 to vector<16x1xf32>
    %101 = arith.divf %99, %100 : vector<16x1xf32>
    %102 = vector.broadcast %94 : vector<16x1xf32> to vector<16x32xf32>
    %103 = arith.subf %88, %102 : vector<16x32xf32>
    %cst_39 = arith.constant 9.99999996E-13 : f32
    %104 = vector.broadcast %cst_39 : f32 to vector<16x1xf32>
    %105 = arith.addf %101, %104 : vector<16x1xf32>
    %106 = math.rsqrt %105 : vector<16x1xf32>
    %107 = vector.broadcast %106 : vector<16x1xf32> to vector<16x32xf32>
    %108 = arith.mulf %103, %107 : vector<16x32xf32>
    %109 = vector.broadcast %89 : vector<1x32xf32> to vector<16x32xf32>
    %110 = arith.mulf %108, %109 : vector<16x32xf32>
    %111 = vector.broadcast %90 : vector<1x32xf32> to vector<16x32xf32>
    %112 = arith.addf %110, %111 : vector<16x32xf32>
    %c0_40 = arith.constant 0 : index
    %c0_41 = arith.constant 0 : index
    %113 = vector.load %arg11[%c0_40, %c0_41] : memref<32x64xf32, #tpu.memory_space<vmem>>, vector<32x64xf32>
    %114 = arith.truncf %112 : vector<16x32xf32> to vector<16x32xbf16>
    %115 = arith.truncf %113 : vector<32x64xf32> to vector<32x64xbf16>
    %cst_42 = arith.constant dense<0.000000e+00> : vector<16x64xf32>
    %116 = tpu.matmul %114, %115, %cst_42 {dimension_numbers = #tpu.dot_dimension_numbers<[1], [0], [0], [1], [0, 0, 1, 1], [], []>} : vector<16x32xbf16>, vector<32x64xbf16>, vector<16x64xf32> -> vector<16x64xf32>
    %c0_43 = arith.constant 0 : index
    %c0_44 = arith.constant 0 : index
    %117 = vector.load %arg12[%c0_43, %c0_44] : memref<1x64xf32, #tpu.memory_space<vmem>>, vector<1x64xf32>
    %118 = vector.broadcast %117 : vector<1x64xf32> to vector<16x64xf32>
    %119 = arith.addf %116, %118 : vector<16x64xf32>
    %120 = arith.mulf %119, %119 : vector<16x64xf32>
    %121 = arith.mulf %119, %120 : vector<16x64xf32>
    %cst_45 = arith.constant 4.471500e-02 : f32
    %122 = vector.broadcast %cst_45 : f32 to vector<16x64xf32>
    %123 = arith.mulf %122, %121 : vector<16x64xf32>
    %124 = arith.addf %119, %123 : vector<16x64xf32>
    %cst_46 = arith.constant 0.797884583 : f32
    %125 = vector.broadcast %cst_46 : f32 to vector<16x64xf32>
    %126 = arith.mulf %125, %124 : vector<16x64xf32>
    %127 = math.tanh %126 : vector<16x64xf32>
    %cst_47 = arith.constant 1.000000e+00 : f32
    %128 = vector.broadcast %cst_47 : f32 to vector<16x64xf32>
    %129 = arith.addf %128, %127 : vector<16x64xf32>
    %cst_48 = arith.constant 5.000000e-01 : f32
    %130 = vector.broadcast %cst_48 : f32 to vector<16x64xf32>
    %131 = arith.mulf %130, %129 : vector<16x64xf32>
    %132 = arith.mulf %119, %131 : vector<16x64xf32>
    %c0_49 = arith.constant 0 : index
    %c0_50 = arith.constant 0 : index
    %133 = vector.load %arg13[%c0_49, %c0_50] : memref<64x32xf32, #tpu.memory_space<vmem>>, vector<64x32xf32>
    %134 = arith.truncf %132 : vector<16x64xf32> to vector<16x64xbf16>
    %135 = arith.truncf %133 : vector<64x32xf32> to vector<64x32xbf16>
    %cst_51 = arith.constant dense<0.000000e+00> : vector<16x32xf32>
    %136 = tpu.matmul %134, %135, %cst_51 {dimension_numbers = #tpu.dot_dimension_numbers<[1], [0], [0], [1], [0, 0, 1, 1], [], []>} : vector<16x64xbf16>, vector<64x32xbf16>, vector<16x32xf32> -> vector<16x32xf32>
    %137 = arith.addf %112, %136 : vector<16x32xf32>
    %c0_52 = arith.constant 0 : index
    %c0_53 = arith.constant 0 : index
    %138 = vector.load %arg14[%c0_52, %c0_53] : memref<1x32xf32, #tpu.memory_space<vmem>>, vector<1x32xf32>
    %139 = vector.broadcast %138 : vector<1x32xf32> to vector<16x32xf32>
    %140 = arith.addf %137, %139 : vector<16x32xf32>
    %c0_54 = arith.constant 0 : index
    %c0_55 = arith.constant 0 : index
    %141 = vector.load %arg15[%c0_54, %c0_55] : memref<1x32xf32, #tpu.memory_space<vmem>>, vector<1x32xf32>
    %c0_56 = arith.constant 0 : index
    %c0_57 = arith.constant 0 : index
    %142 = vector.load %arg16[%c0_56, %c0_57] : memref<1x32xf32, #tpu.memory_space<vmem>>, vector<1x32xf32>
    %cst_58 = arith.constant dense<0.000000e+00> : vector<16xf32>
    %143 = vector.multi_reduction <add>, %140, %cst_58 [1] : vector<16x32xf32> to vector<16xf32>
    %144 = vector.shape_cast %143 : vector<16xf32> to vector<16x1xf32>
    %cst_59 = arith.constant 3.200000e+01 : f32
    %145 = vector.broadcast %cst_59 : f32 to vector<16x1xf32>
    %146 = arith.divf %144, %145 : vector<16x1xf32>
    %147 = vector.broadcast %146 : vector<16x1xf32> to vector<16x32xf32>
    %148 = arith.subf %140, %147 : vector<16x32xf32>
    %149 = arith.mulf %148, %148 : vector<16x32xf32>
    %cst_60 = arith.constant dense<0.000000e+00> : vector<16xf32>
    %150 = vector.multi_reduction <add>, %149, %cst_60 [1] : vector<16x32xf32> to vector<16xf32>
    %151 = vector.shape_cast %150 : vector<16xf32> to vector<16x1xf32>
    %cst_61 = arith.constant 3.200000e+01 : f32
    %152 = vector.broadcast %cst_61 : f32 to vector<16x1xf32>
    %153 = arith.divf %151, %152 : vector<16x1xf32>
    %154 = vector.broadcast %146 : vector<16x1xf32> to vector<16x32xf32>
    %155 = arith.subf %140, %154 : vector<16x32xf32>
    %cst_62 = arith.constant 9.99999996E-13 : f32
    %156 = vector.broadcast %cst_62 : f32 to vector<16x1xf32>
    %157 = arith.addf %153, %156 : vector<16x1xf32>
    %158 = math.rsqrt %157 : vector<16x1xf32>
    %159 = vector.broadcast %158 : vector<16x1xf32> to vector<16x32xf32>
    %160 = arith.mulf %155, %159 : vector<16x32xf32>
    %161 = vector.broadcast %141 : vector<1x32xf32> to vector<16x32xf32>
    %162 = arith.mulf %160, %161 : vector<16x32xf32>
    %163 = vector.broadcast %142 : vector<1x32xf32> to vector<16x32xf32>
    %164 = arith.addf %162, %163 : vector<16x32xf32>
    %c0_63 = arith.constant 0 : index
    %c0_64 = arith.constant 0 : index
    %165 = vector.load %arg17[%c0_63, %c0_64] : memref<16x32xf32, #tpu.memory_space<vmem>>, vector<16x32xf32>
    tpu.vector_store %arg17[%c0_63, %c0_64], %164 {strides = array<i32>} : memref<16x32xf32, #tpu.memory_space<vmem>>, vector<16x32xf32>,
    return
  }
  func.func @transform_0(%arg0: i32) -> (i32, i32) {
    %c0_i32 = arith.constant 0 : i32
    %c0_i32_0 = arith.constant 0 : i32
    %c0_i32_1 = arith.constant 0 : i32
    return %c0_i32, %c0_i32_0 : i32, i32
  }
  func.func @transform_1(%arg0: i32) -> (i32, i32) {
    %c0_i32 = arith.constant 0 : i32
    %c0_i32_0 = arith.constant 0 : i32
    %c0_i32_1 = arith.constant 0 : i32
    return %c0_i32, %c0_i32_0 : i32, i32
  }
  func.func @transform_2(%arg0: i32) -> (i32, i32) {
    %c0_i32 = arith.constant 0 : i32
    %c0_i32_0 = arith.constant 0 : i32
    %c0_i32_1 = arith.constant 0 : i32
    return %c0_i32, %c0_i32_0 : i32, i32
  }
  func.func @transform_3(%arg0: i32) -> (i32, i32) {
    %c0_i32 = arith.constant 0 : i32
    %c0_i32_0 = arith.constant 0 : i32
    %c0_i32_1 = arith.constant 0 : i32
    return %c0_i32, %c0_i32_0 : i32, i32
  }
  func.func @transform_4(%arg0: i32) -> (i32, i32) {
    %c0_i32 = arith.constant 0 : i32
    %c0_i32_0 = arith.constant 0 : i32
    %c0_i32_1 = arith.constant 0 : i32
    return %c0_i32, %c0_i32_0 : i32, i32
  }
  func.func @transform_5(%arg0: i32) -> (i32, i32) {
    %c0_i32 = arith.constant 0 : i32
    %c0_i32_0 = arith.constant 0 : i32
    %c0_i32_1 = arith.constant 0 : i32
    return %c0_i32, %c0_i32_0 : i32, i32
  }
  func.func @transform_6(%arg0: i32) -> (i32, i32) {
    %c0_i32 = arith.constant 0 : i32
    %c0_i32_0 = arith.constant 0 : i32
    %c0_i32_1 = arith.constant 0 : i32
    return %c0_i32, %c0_i32_0 : i32, i32
  }
  func.func @transform_7(%arg0: i32) -> (i32, i32) {
    %c0_i32 = arith.constant 0 : i32
    %c0_i32_0 = arith.constant 0 : i32
    %c0_i32_1 = arith.constant 0 : i32
    return %c0_i32, %c0_i32_0 : i32, i32
  }
  func.func @transform_8(%arg0: i32) -> (i32, i32) {
    %c0_i32 = arith.constant 0 : i32
    %c0_i32_0 = arith.constant 0 : i32
    %c0_i32_1 = arith.constant 0 : i32
    return %c0_i32, %c0_i32_0 : i32, i32
  }
  func.func @transform_9(%arg0: i32) -> (i32, i32) {
    %c0_i32 = arith.constant 0 : i32
    %c0_i32_0 = arith.constant 0 : i32
    %c0_i32_1 = arith.constant 0 : i32
    return %c0_i32, %c0_i32_0 : i32, i32
  }
  func.func @transform_10(%arg0: i32) -> (i32, i32) {
    %c0_i32 = arith.constant 0 : i32
    %c0_i32_0 = arith.constant 0 : i32
    %c0_i32_1 = arith.constant 0 : i32
    return %c0_i32, %c0_i32_0 : i32, i32
  }
  func.func @transform_11(%arg0: i32) -> (i32, i32) {
    %c0_i32 = arith.constant 0 : i32
    %c0_i32_0 = arith.constant 0 : i32
    %c0_i32_1 = arith.constant 0 : i32
    return %c0_i32, %c0_i32_0 : i32, i32
  }
  func.func @transform_12(%arg0: i32) -> (i32, i32) {
    %c0_i32 = arith.constant 0 : i32
    %c0_i32_0 = arith.constant 0 : i32
    %c0_i32_1 = arith.constant 0 : i32
    return %c0_i32, %c0_i32_0 : i32, i32
  }
  func.func @transform_13(%arg0: i32) -> (i32, i32) {
    %c0_i32 = arith.constant 0 : i32
    %c0_i32_0 = arith.constant 0 : i32
    %c0_i32_1 = arith.constant 0 : i32
    return %c0_i32, %c0_i32_0 : i32, i32
  }
  func.func @transform_14(%arg0: i32) -> (i32, i32) {
    %c0_i32 = arith.constant 0 : i32
    %c0_i32_0 = arith.constant 0 : i32
    %c0_i32_1 = arith.constant 0 : i32
    return %c0_i32, %c0_i32_0 : i32, i32
  }
  func.func @transform_15(%arg0: i32) -> (i32, i32) {
    %c0_i32 = arith.constant 0 : i32
    %c0_i32_0 = arith.constant 0 : i32
    %c0_i32_1 = arith.constant 0 : i32
    return %c0_i32, %c0_i32_0 : i32, i32
  }
  func.func @transform_16(%arg0: i32) -> (i32, i32) {
    %c0_i32 = arith.constant 0 : i32
    %c0_i32_0 = arith.constant 0 : i32
    %c0_i32_1 = arith.constant 0 : i32
    return %c0_i32, %c0_i32_0 : i32, i32
  }
}

module attributes {stable_mosaic.version = 11 : i64} {
  func.func @_bert_layer_kernel(%arg0: i32, %arg1: memref<10x32xf32, #tpu.memory_space<vmem>>, %arg2: memref<10x10xf32, #tpu.memory_space<vmem>>, %arg3: memref<16x32xf32, #tpu.memory_space<vmem>>, %arg4: memref<10x16xf32, #tpu.memory_space<vmem>>, %arg5: memref<1x32xf32, #tpu.memory_space<vmem>>, %arg6: memref<1x32xf32, #tpu.memory_space<vmem>>, %arg7: memref<32x96xf32, #tpu.memory_space<vmem>>, %arg8: memref<1x96xf32, #tpu.memory_space<vmem>>, %arg9: memref<32x32xf32, #tpu.memory_space<vmem>>, %arg10: memref<1x32xf32, #tpu.memory_space<vmem>>, %arg11: memref<1x32xf32, #tpu.memory_space<vmem>>, %arg12: memref<1x32xf32, #tpu.memory_space<vmem>>, %arg13: memref<32x32xf32, #tpu.memory_space<vmem>>, %arg14: memref<1x32xf32, #tpu.memory_space<vmem>>, %arg15: memref<32x64xf32, #tpu.memory_space<vmem>>, %arg16: memref<1x64xf32, #tpu.memory_space<vmem>>, %arg17: memref<32x32xf32, #tpu.memory_space<vmem>>, %arg18: memref<1x32xf32, #tpu.memory_space<vmem>>, %arg19: memref<1x32xf32, #tpu.memory_space<vmem>>, %arg20: memref<1x32xf32, #tpu.memory_space<vmem>>, %arg21: memref<32x64xf32, #tpu.memory_space<vmem>>, %arg22: memref<1x64xf32, #tpu.memory_space<vmem>>, %arg23: memref<64x32xf32, #tpu.memory_space<vmem>>, %arg24: memref<1x32xf32, #tpu.memory_space<vmem>>, %arg25: memref<1x32xf32, #tpu.memory_space<vmem>>, %arg26: memref<1x32xf32, #tpu.memory_space<vmem>>, %arg27: memref<10x32xf32, #tpu.memory_space<vmem>>) attributes {dimension_semantics = [#tpu.dimension_semantics<arbitrary>], iteration_bounds = array<i64: 1>, scalar_prefetch = 0 : i64, scratch_operands = 0 : i64, tpu.core_type = #tpu.core_type<tc>, window_params = [{pipeline_mode = #tpu.pipeline_mode<synchronous>, transform_indices = @transform_0, window_bounds = array<i64: 10, 32>}, {pipeline_mode = #tpu.pipeline_mode<synchronous>, transform_indices = @transform_1, window_bounds = array<i64: 10, 10>}, {pipeline_mode = #tpu.pipeline_mode<synchronous>, transform_indices = @transform_2, window_bounds = array<i64: 16, 32>}, {pipeline_mode = #tpu.pipeline_mode<synchronous>, transform_indices = @transform_3, window_bounds = array<i64: 10, 16>}, {pipeline_mode = #tpu.pipeline_mode<synchronous>, transform_indices = @transform_4, window_bounds = array<i64: 1, 32>}, {pipeline_mode = #tpu.pipeline_mode<synchronous>, transform_indices = @transform_5, window_bounds = array<i64: 1, 32>}, {pipeline_mode = #tpu.pipeline_mode<synchronous>, transform_indices = @transform_6, window_bounds = array<i64: 32, 96>}, {pipeline_mode = #tpu.pipeline_mode<synchronous>, transform_indices = @transform_7, window_bounds = array<i64: 1, 96>}, {pipeline_mode = #tpu.pipeline_mode<synchronous>, transform_indices = @transform_8, window_bounds = array<i64: 32, 32>}, {pipeline_mode = #tpu.pipeline_mode<synchronous>, transform_indices = @transform_9, window_bounds = array<i64: 1, 32>}, {pipeline_mode = #tpu.pipeline_mode<synchronous>, transform_indices = @transform_10, window_bounds = array<i64: 1, 32>}, {pipeline_mode = #tpu.pipeline_mode<synchronous>, transform_indices = @transform_11, window_bounds = array<i64: 1, 32>}, {pipeline_mode = #tpu.pipeline_mode<synchronous>, transform_indices = @transform_12, window_bounds = array<i64: 32, 32>}, {pipeline_mode = #tpu.pipeline_mode<synchronous>, transform_indices = @transform_13, window_bounds = array<i64: 1, 32>}, {pipeline_mode = #tpu.pipeline_mode<synchronous>, transform_indices = @transform_14, window_bounds = array<i64: 32, 64>}, {pipeline_mode = #tpu.pipeline_mode<synchronous>, transform_indices = @transform_15, window_bounds = array<i64: 1, 64>}, {pipeline_mode = #tpu.pipeline_mode<synchronous>, transform_indices = @transform_16, window_bounds = array<i64: 32, 32>}, {pipeline_mode = #tpu.pipeline_mode<synchronous>, transform_indices = @transform_17, window_bounds = array<i64: 1, 32>}, {pipeline_mode = #tpu.pipeline_mode<synchronous>, transform_indices = @transform_18, window_bounds = array<i64: 1, 32>}, {pipeline_mode = #tpu.pipeline_mode<synchronous>, transform_indices = @transform_19, window_bounds = array<i64: 1, 32>}, {pipeline_mode = #tpu.pipeline_mode<synchronous>, transform_indices = @transform_20, window_bounds = array<i64: 32, 64>}, {pipeline_mode = #tpu.pipeline_mode<synchronous>, transform_indices = @transform_21, window_bounds = array<i64: 1, 64>}, {pipeline_mode = #tpu.pipeline_mode<synchronous>, transform_indices = @transform_22, window_bounds = array<i64: 64, 32>}, {pipeline_mode = #tpu.pipeline_mode<synchronous>, transform_indices = @transform_23, window_bounds = array<i64: 1, 32>}, {pipeline_mode = #tpu.pipeline_mode<synchronous>, transform_indices = @transform_24, window_bounds = array<i64: 1, 32>}, {pipeline_mode = #tpu.pipeline_mode<synchronous>, transform_indices = @transform_25, window_bounds = array<i64: 1, 32>}, {pipeline_mode = #tpu.pipeline_mode<synchronous>, transform_indices = @transform_26, window_bounds = array<i64: 10, 32>}]} {
    %c0 = arith.constant 0 : index
    %c0_0 = arith.constant 0 : index
    %0 = vector.load %arg1[%c0, %c0_0] : memref<10x32xf32, #tpu.memory_space<vmem>>, vector<10x32xf32>
    %c0_1 = arith.constant 0 : index
    %c0_2 = arith.constant 0 : index
    %1 = vector.load %arg5[%c0_1, %c0_2] : memref<1x32xf32, #tpu.memory_space<vmem>>, vector<1x32xf32>
    %c0_3 = arith.constant 0 : index
    %c0_4 = arith.constant 0 : index
    %2 = vector.load %arg6[%c0_3, %c0_4] : memref<1x32xf32, #tpu.memory_space<vmem>>, vector<1x32xf32>
    %cst = arith.constant dense<0.000000e+00> : vector<10xf32>
    %3 = vector.multi_reduction <add>, %0, %cst [1] : vector<10x32xf32> to vector<10xf32>
    %4 = vector.shape_cast %3 : vector<10xf32> to vector<10x1xf32>
    %cst_5 = arith.constant 3.200000e+01 : f32
    %5 = vector.broadcast %cst_5 : f32 to vector<10x1xf32>
    %6 = arith.divf %4, %5 : vector<10x1xf32>
    %7 = vector.broadcast %6 : vector<10x1xf32> to vector<10x32xf32>
    %8 = arith.subf %0, %7 : vector<10x32xf32>
    %9 = arith.mulf %8, %8 : vector<10x32xf32>
    %cst_6 = arith.constant dense<0.000000e+00> : vector<10xf32>
    %10 = vector.multi_reduction <add>, %9, %cst_6 [1] : vector<10x32xf32> to vector<10xf32>
    %11 = vector.shape_cast %10 : vector<10xf32> to vector<10x1xf32>
    %cst_7 = arith.constant 3.200000e+01 : f32
    %12 = vector.broadcast %cst_7 : f32 to vector<10x1xf32>
    %13 = arith.divf %11, %12 : vector<10x1xf32>
    %14 = vector.broadcast %6 : vector<10x1xf32> to vector<10x32xf32>
    %15 = arith.subf %0, %14 : vector<10x32xf32>
    %cst_8 = arith.constant 9.99999996E-13 : f32
    %16 = vector.broadcast %cst_8 : f32 to vector<10x1xf32>
    %17 = arith.addf %13, %16 : vector<10x1xf32>
    %18 = math.rsqrt %17 : vector<10x1xf32>
    %19 = vector.broadcast %18 : vector<10x1xf32> to vector<10x32xf32>
    %20 = arith.mulf %15, %19 : vector<10x32xf32>
    %21 = vector.broadcast %1 : vector<1x32xf32> to vector<10x32xf32>
    %22 = arith.mulf %20, %21 : vector<10x32xf32>
    %23 = vector.broadcast %2 : vector<1x32xf32> to vector<10x32xf32>
    %24 = arith.addf %22, %23 : vector<10x32xf32>
    %c0_9 = arith.constant 0 : index
    %c0_10 = arith.constant 0 : index
    %25 = vector.load %arg7[%c0_9, %c0_10] : memref<32x96xf32, #tpu.memory_space<vmem>>, vector<32x96xf32>
    %26 = arith.truncf %24 : vector<10x32xf32> to vector<10x32xbf16>
    %27 = arith.truncf %25 : vector<32x96xf32> to vector<32x96xbf16>
    %cst_11 = arith.constant dense<0.000000e+00> : vector<10x96xf32>
    %28 = tpu.matmul %26, %27, %cst_11 {dimension_numbers = #tpu.dot_dimension_numbers<[1], [0], [0], [1], [0, 0, 1, 1], [], []>} : vector<10x32xbf16>, vector<32x96xbf16>, vector<10x96xf32> -> vector<10x96xf32>
    %c0_12 = arith.constant 0 : index
    %c0_13 = arith.constant 0 : index
    %29 = vector.load %arg8[%c0_12, %c0_13] : memref<1x96xf32, #tpu.memory_space<vmem>>, vector<1x96xf32>
    %30 = vector.broadcast %29 : vector<1x96xf32> to vector<10x96xf32>
    %31 = arith.addf %28, %30 : vector<10x96xf32>
    %32 = vector.extract_strided_slice %31 {offsets = [0, 0], sizes = [10, 32], strides = [1, 1]} : vector<10x96xf32> to vector<10x32xf32>
    %33 = vector.extract_strided_slice %31 {offsets = [0, 32], sizes = [10, 32], strides = [1, 1]} : vector<10x96xf32> to vector<10x32xf32>
    %34 = vector.extract_strided_slice %31 {offsets = [0, 64], sizes = [10, 32], strides = [1, 1]} : vector<10x96xf32> to vector<10x32xf32>
    %c0_14 = arith.constant 0 : index
    %c0_15 = arith.constant 0 : index
    %35 = vector.load %arg2[%c0_14, %c0_15] : memref<10x10xf32, #tpu.memory_space<vmem>>, vector<10x10xf32>
    %36 = vector.extract_strided_slice %32 {offsets = [0, 0], sizes = [10, 16], strides = [1, 1]} : vector<10x32xf32> to vector<10x16xf32>
    %37 = vector.extract_strided_slice %33 {offsets = [0, 0], sizes = [10, 16], strides = [1, 1]} : vector<10x32xf32> to vector<10x16xf32>
    %38 = vector.extract_strided_slice %34 {offsets = [0, 0], sizes = [10, 16], strides = [1, 1]} : vector<10x32xf32> to vector<10x16xf32>
    %39 = arith.truncf %36 : vector<10x16xf32> to vector<10x16xbf16>
    %40 = arith.truncf %37 : vector<10x16xf32> to vector<10x16xbf16>
    %cst_16 = arith.constant dense<0.000000e+00> : vector<10x10xf32>
    %41 = tpu.matmul %39, %40, %cst_16 {dimension_numbers = #tpu.dot_dimension_numbers<[1], [1], [0], [0], [0, 0, 1, 0], [], []>} : vector<10x16xbf16>, vector<10x16xbf16>, vector<10x10xf32> -> vector<10x10xf32>
    %cst_17 = arith.constant 2.500000e-01 : f32
    %42 = vector.broadcast %cst_17 : f32 to vector<10x10xf32>
    %43 = arith.mulf %41, %42 : vector<10x10xf32>
    %44 = arith.addf %43, %35 : vector<10x10xf32>
    %cst_18 = arith.constant dense<0xFF800000> : vector<10xf32>
    %45 = vector.multi_reduction <maximumf>, %44, %cst_18 [1] : vector<10x10xf32> to vector<10xf32>
    %46 = vector.shape_cast %45 : vector<10xf32> to vector<10x1xf32>
    %47 = vector.broadcast %46 : vector<10x1xf32> to vector<10x10xf32>
    %48 = arith.subf %44, %47 : vector<10x10xf32>
    %49 = math.exp %48 : vector<10x10xf32>
    %cst_19 = arith.constant dense<0.000000e+00> : vector<10xf32>
    %50 = vector.multi_reduction <add>, %49, %cst_19 [1] : vector<10x10xf32> to vector<10xf32>
    %51 = vector.shape_cast %50 : vector<10xf32> to vector<10x1xf32>
    %52 = tpu.reciprocal %51 {approx = true} : vector<10x1xf32> -> vector<10x1xf32>
    %53 = vector.broadcast %52 : vector<10x1xf32> to vector<10x10xf32>
    %54 = arith.mulf %49, %53 : vector<10x10xf32>
    %55 = arith.truncf %54 : vector<10x10xf32> to vector<10x10xbf16>
    %56 = arith.truncf %38 : vector<10x16xf32> to vector<10x16xbf16>
    %cst_20 = arith.constant dense<0.000000e+00> : vector<10x16xf32>
    %57 = tpu.matmul %55, %56, %cst_20 {dimension_numbers = #tpu.dot_dimension_numbers<[1], [0], [0], [1], [0, 0, 1, 1], [], []>} : vector<10x10xbf16>, vector<10x16xbf16>, vector<10x16xf32> -> vector<10x16xf32>
    %58 = vector.extract_strided_slice %32 {offsets = [0, 16], sizes = [10, 16], strides = [1, 1]} : vector<10x32xf32> to vector<10x16xf32>
    %59 = vector.extract_strided_slice %33 {offsets = [0, 16], sizes = [10, 16], strides = [1, 1]} : vector<10x32xf32> to vector<10x16xf32>
    %60 = vector.extract_strided_slice %34 {offsets = [0, 16], sizes = [10, 16], strides = [1, 1]} : vector<10x32xf32> to vector<10x16xf32>
    %61 = arith.truncf %58 : vector<10x16xf32> to vector<10x16xbf16>
    %62 = arith.truncf %59 : vector<10x16xf32> to vector<10x16xbf16>
    %cst_21 = arith.constant dense<0.000000e+00> : vector<10x10xf32>
    %63 = tpu.matmul %61, %62, %cst_21 {dimension_numbers = #tpu.dot_dimension_numbers<[1], [1], [0], [0], [0, 0, 1, 0], [], []>} : vector<10x16xbf16>, vector<10x16xbf16>, vector<10x10xf32> -> vector<10x10xf32>
    %cst_22 = arith.constant 2.500000e-01 : f32
    %64 = vector.broadcast %cst_22 : f32 to vector<10x10xf32>
    %65 = arith.mulf %63, %64 : vector<10x10xf32>
    %66 = arith.addf %65, %35 : vector<10x10xf32>
    %cst_23 = arith.constant dense<0xFF800000> : vector<10xf32>
    %67 = vector.multi_reduction <maximumf>, %66, %cst_23 [1] : vector<10x10xf32> to vector<10xf32>
    %68 = vector.shape_cast %67 : vector<10xf32> to vector<10x1xf32>
    %69 = vector.broadcast %68 : vector<10x1xf32> to vector<10x10xf32>
    %70 = arith.subf %66, %69 : vector<10x10xf32>
    %71 = math.exp %70 : vector<10x10xf32>
    %cst_24 = arith.constant dense<0.000000e+00> : vector<10xf32>
    %72 = vector.multi_reduction <add>, %71, %cst_24 [1] : vector<10x10xf32> to vector<10xf32>
    %73 = vector.shape_cast %72 : vector<10xf32> to vector<10x1xf32>
    %74 = tpu.reciprocal %73 {approx = true} : vector<10x1xf32> -> vector<10x1xf32>
    %75 = vector.broadcast %74 : vector<10x1xf32> to vector<10x10xf32>
    %76 = arith.mulf %71, %75 : vector<10x10xf32>
    %77 = arith.truncf %76 : vector<10x10xf32> to vector<10x10xbf16>
    %78 = arith.truncf %60 : vector<10x16xf32> to vector<10x16xbf16>
    %cst_25 = arith.constant dense<0.000000e+00> : vector<10x16xf32>
    %79 = tpu.matmul %77, %78, %cst_25 {dimension_numbers = #tpu.dot_dimension_numbers<[1], [0], [0], [1], [0, 0, 1, 1], [], []>} : vector<10x10xbf16>, vector<10x16xbf16>, vector<10x16xf32> -> vector<10x16xf32>
    %80 = tpu.concatenate %57, %79 in 1 : vector<10x16xf32>, vector<10x16xf32> -> vector<10x32xf32>
    %c0_26 = arith.constant 0 : index
    %c0_27 = arith.constant 0 : index
    %81 = vector.load %arg9[%c0_26, %c0_27] : memref<32x32xf32, #tpu.memory_space<vmem>>, vector<32x32xf32>
    %82 = arith.truncf %80 : vector<10x32xf32> to vector<10x32xbf16>
    %83 = arith.truncf %81 : vector<32x32xf32> to vector<32x32xbf16>
    %cst_28 = arith.constant dense<0.000000e+00> : vector<10x32xf32>
    %84 = tpu.matmul %82, %83, %cst_28 {dimension_numbers = #tpu.dot_dimension_numbers<[1], [0], [0], [1], [0, 0, 1, 1], [], []>} : vector<10x32xbf16>, vector<32x32xbf16>, vector<10x32xf32> -> vector<10x32xf32>
    %85 = arith.addf %24, %84 : vector<10x32xf32>
    %c0_29 = arith.constant 0 : index
    %c0_30 = arith.constant 0 : index
    %86 = vector.load %arg10[%c0_29, %c0_30] : memref<1x32xf32, #tpu.memory_space<vmem>>, vector<1x32xf32>
    %87 = vector.broadcast %86 : vector<1x32xf32> to vector<10x32xf32>
    %88 = arith.addf %85, %87 : vector<10x32xf32>
    %c0_31 = arith.constant 0 : index
    %c0_32 = arith.constant 0 : index
    %89 = vector.load %arg11[%c0_31, %c0_32] : memref<1x32xf32, #tpu.memory_space<vmem>>, vector<1x32xf32>
    %c0_33 = arith.constant 0 : index
    %c0_34 = arith.constant 0 : index
    %90 = vector.load %arg12[%c0_33, %c0_34] : memref<1x32xf32, #tpu.memory_space<vmem>>, vector<1x32xf32>
    %cst_35 = arith.constant dense<0.000000e+00> : vector<10xf32>
    %91 = vector.multi_reduction <add>, %88, %cst_35 [1] : vector<10x32xf32> to vector<10xf32>
    %92 = vector.shape_cast %91 : vector<10xf32> to vector<10x1xf32>
    %cst_36 = arith.constant 3.200000e+01 : f32
    %93 = vector.broadcast %cst_36 : f32 to vector<10x1xf32>
    %94 = arith.divf %92, %93 : vector<10x1xf32>
    %95 = vector.broadcast %94 : vector<10x1xf32> to vector<10x32xf32>
    %96 = arith.subf %88, %95 : vector<10x32xf32>
    %97 = arith.mulf %96, %96 : vector<10x32xf32>
    %cst_37 = arith.constant dense<0.000000e+00> : vector<10xf32>
    %98 = vector.multi_reduction <add>, %97, %cst_37 [1] : vector<10x32xf32> to vector<10xf32>
    %99 = vector.shape_cast %98 : vector<10xf32> to vector<10x1xf32>
    %cst_38 = arith.constant 3.200000e+01 : f32
    %100 = vector.broadcast %cst_38 : f32 to vector<10x1xf32>
    %101 = arith.divf %99, %100 : vector<10x1xf32>
    %102 = vector.broadcast %94 : vector<10x1xf32> to vector<10x32xf32>
    %103 = arith.subf %88, %102 : vector<10x32xf32>
    %cst_39 = arith.constant 9.99999996E-13 : f32
    %104 = vector.broadcast %cst_39 : f32 to vector<10x1xf32>
    %105 = arith.addf %101, %104 : vector<10x1xf32>
    %106 = math.rsqrt %105 : vector<10x1xf32>
    %107 = vector.broadcast %106 : vector<10x1xf32> to vector<10x32xf32>
    %108 = arith.mulf %103, %107 : vector<10x32xf32>
    %109 = vector.broadcast %89 : vector<1x32xf32> to vector<10x32xf32>
    %110 = arith.mulf %108, %109 : vector<10x32xf32>
    %111 = vector.broadcast %90 : vector<1x32xf32> to vector<10x32xf32>
    %112 = arith.addf %110, %111 : vector<10x32xf32>
    %c0_40 = arith.constant 0 : index
    %c0_41 = arith.constant 0 : index
    %113 = vector.load %arg3[%c0_40, %c0_41] : memref<16x32xf32, #tpu.memory_space<vmem>>, vector<16x32xf32>
    %c0_42 = arith.constant 0 : index
    %c0_43 = arith.constant 0 : index
    %114 = vector.load %arg13[%c0_42, %c0_43] : memref<32x32xf32, #tpu.memory_space<vmem>>, vector<32x32xf32>
    %115 = arith.truncf %112 : vector<10x32xf32> to vector<10x32xbf16>
    %116 = arith.truncf %114 : vector<32x32xf32> to vector<32x32xbf16>
    %cst_44 = arith.constant dense<0.000000e+00> : vector<10x32xf32>
    %117 = tpu.matmul %115, %116, %cst_44 {dimension_numbers = #tpu.dot_dimension_numbers<[1], [0], [0], [1], [0, 0, 1, 1], [], []>} : vector<10x32xbf16>, vector<32x32xbf16>, vector<10x32xf32> -> vector<10x32xf32>
    %c0_45 = arith.constant 0 : index
    %c0_46 = arith.constant 0 : index
    %118 = vector.load %arg14[%c0_45, %c0_46] : memref<1x32xf32, #tpu.memory_space<vmem>>, vector<1x32xf32>
    %119 = vector.broadcast %118 : vector<1x32xf32> to vector<10x32xf32>
    %120 = arith.addf %117, %119 : vector<10x32xf32>
    %c0_47 = arith.constant 0 : index
    %c0_48 = arith.constant 0 : index
    %121 = vector.load %arg15[%c0_47, %c0_48] : memref<32x64xf32, #tpu.memory_space<vmem>>, vector<32x64xf32>
    %122 = arith.truncf %113 : vector<16x32xf32> to vector<16x32xbf16>
    %123 = arith.truncf %121 : vector<32x64xf32> to vector<32x64xbf16>
    %cst_49 = arith.constant dense<0.000000e+00> : vector<16x64xf32>
    %124 = tpu.matmul %122, %123, %cst_49 {dimension_numbers = #tpu.dot_dimension_numbers<[1], [0], [0], [1], [0, 0, 1, 1], [], []>} : vector<16x32xbf16>, vector<32x64xbf16>, vector<16x64xf32> -> vector<16x64xf32>
    %c0_50 = arith.constant 0 : index
    %c0_51 = arith.constant 0 : index
    %125 = vector.load %arg16[%c0_50, %c0_51] : memref<1x64xf32, #tpu.memory_space<vmem>>, vector<1x64xf32>
    %126 = vector.broadcast %125 : vector<1x64xf32> to vector<16x64xf32>
    %127 = arith.addf %124, %126 : vector<16x64xf32>
    %128 = vector.extract_strided_slice %127 {offsets = [0, 0], sizes = [16, 32], strides = [1, 1]} : vector<16x64xf32> to vector<16x32xf32>
    %129 = vector.extract_strided_slice %127 {offsets = [0, 32], sizes = [16, 32], strides = [1, 1]} : vector<16x64xf32> to vector<16x32xf32>
    %c0_52 = arith.constant 0 : index
    %c0_53 = arith.constant 0 : index
    %130 = vector.load %arg4[%c0_52, %c0_53] : memref<10x16xf32, #tpu.memory_space<vmem>>, vector<10x16xf32>
    %131 = vector.extract_strided_slice %120 {offsets = [0, 0], sizes = [10, 16], strides = [1, 1]} : vector<10x32xf32> to vector<10x16xf32>
    %132 = vector.extract_strided_slice %128 {offsets = [0, 0], sizes = [16, 16], strides = [1, 1]} : vector<16x32xf32> to vector<16x16xf32>
    %133 = vector.extract_strided_slice %129 {offsets = [0, 0], sizes = [16, 16], strides = [1, 1]} : vector<16x32xf32> to vector<16x16xf32>
    %134 = arith.truncf %131 : vector<10x16xf32> to vector<10x16xbf16>
    %135 = arith.truncf %132 : vector<16x16xf32> to vector<16x16xbf16>
    %cst_54 = arith.constant dense<0.000000e+00> : vector<10x16xf32>
    %136 = tpu.matmul %134, %135, %cst_54 {dimension_numbers = #tpu.dot_dimension_numbers<[1], [1], [0], [0], [0, 0, 1, 0], [], []>} : vector<10x16xbf16>, vector<16x16xbf16>, vector<10x16xf32> -> vector<10x16xf32>
    %cst_55 = arith.constant 2.500000e-01 : f32
    %137 = vector.broadcast %cst_55 : f32 to vector<10x16xf32>
    %138 = arith.mulf %136, %137 : vector<10x16xf32>
    %139 = arith.addf %138, %130 : vector<10x16xf32>
    %cst_56 = arith.constant dense<0xFF800000> : vector<10xf32>
    %140 = vector.multi_reduction <maximumf>, %139, %cst_56 [1] : vector<10x16xf32> to vector<10xf32>
    %141 = vector.shape_cast %140 : vector<10xf32> to vector<10x1xf32>
    %142 = vector.broadcast %141 : vector<10x1xf32> to vector<10x16xf32>
    %143 = arith.subf %139, %142 : vector<10x16xf32>
    %144 = math.exp %143 : vector<10x16xf32>
    %cst_57 = arith.constant dense<0.000000e+00> : vector<10xf32>
    %145 = vector.multi_reduction <add>, %144, %cst_57 [1] : vector<10x16xf32> to vector<10xf32>
    %146 = vector.shape_cast %145 : vector<10xf32> to vector<10x1xf32>
    %147 = tpu.reciprocal %146 {approx = true} : vector<10x1xf32> -> vector<10x1xf32>
    %148 = vector.broadcast %147 : vector<10x1xf32> to vector<10x16xf32>
    %149 = arith.mulf %144, %148 : vector<10x16xf32>
    %150 = arith.truncf %149 : vector<10x16xf32> to vector<10x16xbf16>
    %151 = arith.truncf %133 : vector<16x16xf32> to vector<16x16xbf16>
    %cst_58 = arith.constant dense<0.000000e+00> : vector<10x16xf32>
    %152 = tpu.matmul %150, %151, %cst_58 {dimension_numbers = #tpu.dot_dimension_numbers<[1], [0], [0], [1], [0, 0, 1, 1], [], []>} : vector<10x16xbf16>, vector<16x16xbf16>, vector<10x16xf32> -> vector<10x16xf32>
    %153 = vector.extract_strided_slice %120 {offsets = [0, 16], sizes = [10, 16], strides = [1, 1]} : vector<10x32xf32> to vector<10x16xf32>
    %154 = vector.extract_strided_slice %128 {offsets = [0, 16], sizes = [16, 16], strides = [1, 1]} : vector<16x32xf32> to vector<16x16xf32>
    %155 = vector.extract_strided_slice %129 {offsets = [0, 16], sizes = [16, 16], strides = [1, 1]} : vector<16x32xf32> to vector<16x16xf32>
    %156 = arith.truncf %153 : vector<10x16xf32> to vector<10x16xbf16>
    %157 = arith.truncf %154 : vector<16x16xf32> to vector<16x16xbf16>
    %cst_59 = arith.constant dense<0.000000e+00> : vector<10x16xf32>
    %158 = tpu.matmul %156, %157, %cst_59 {dimension_numbers = #tpu.dot_dimension_numbers<[1], [1], [0], [0], [0, 0, 1, 0], [], []>} : vector<10x16xbf16>, vector<16x16xbf16>, vector<10x16xf32> -> vector<10x16xf32>
    %cst_60 = arith.constant 2.500000e-01 : f32
    %159 = vector.broadcast %cst_60 : f32 to vector<10x16xf32>
    %160 = arith.mulf %158, %159 : vector<10x16xf32>
    %161 = arith.addf %160, %130 : vector<10x16xf32>
    %cst_61 = arith.constant dense<0xFF800000> : vector<10xf32>
    %162 = vector.multi_reduction <maximumf>, %161, %cst_61 [1] : vector<10x16xf32> to vector<10xf32>
    %163 = vector.shape_cast %162 : vector<10xf32> to vector<10x1xf32>
    %164 = vector.broadcast %163 : vector<10x1xf32> to vector<10x16xf32>
    %165 = arith.subf %161, %164 : vector<10x16xf32>
    %166 = math.exp %165 : vector<10x16xf32>
    %cst_62 = arith.constant dense<0.000000e+00> : vector<10xf32>
    %167 = vector.multi_reduction <add>, %166, %cst_62 [1] : vector<10x16xf32> to vector<10xf32>
    %168 = vector.shape_cast %167 : vector<10xf32> to vector<10x1xf32>
    %169 = tpu.reciprocal %168 {approx = true} : vector<10x1xf32> -> vector<10x1xf32>
    %170 = vector.broadcast %169 : vector<10x1xf32> to vector<10x16xf32>
    %171 = arith.mulf %166, %170 : vector<10x16xf32>
    %172 = arith.truncf %171 : vector<10x16xf32> to vector<10x16xbf16>
    %173 = arith.truncf %155 : vector<16x16xf32> to vector<16x16xbf16>
    %cst_63 = arith.constant dense<0.000000e+00> : vector<10x16xf32>
    %174 = tpu.matmul %172, %173, %cst_63 {dimension_numbers = #tpu.dot_dimension_numbers<[1], [0], [0], [1], [0, 0, 1, 1], [], []>} : vector<10x16xbf16>, vector<16x16xbf16>, vector<10x16xf32> -> vector<10x16xf32>
    %175 = tpu.concatenate %152, %174 in 1 : vector<10x16xf32>, vector<10x16xf32> -> vector<10x32xf32>
    %c0_64 = arith.constant 0 : index
    %c0_65 = arith.constant 0 : index
    %176 = vector.load %arg17[%c0_64, %c0_65] : memref<32x32xf32, #tpu.memory_space<vmem>>, vector<32x32xf32>
    %177 = arith.truncf %175 : vector<10x32xf32> to vector<10x32xbf16>
    %178 = arith.truncf %176 : vector<32x32xf32> to vector<32x32xbf16>
    %cst_66 = arith.constant dense<0.000000e+00> : vector<10x32xf32>
    %179 = tpu.matmul %177, %178, %cst_66 {dimension_numbers = #tpu.dot_dimension_numbers<[1], [0], [0], [1], [0, 0, 1, 1], [], []>} : vector<10x32xbf16>, vector<32x32xbf16>, vector<10x32xf32> -> vector<10x32xf32>
    %180 = arith.addf %112, %179 : vector<10x32xf32>
    %c0_67 = arith.constant 0 : index
    %c0_68 = arith.constant 0 : index
    %181 = vector.load %arg18[%c0_67, %c0_68] : memref<1x32xf32, #tpu.memory_space<vmem>>, vector<1x32xf32>
    %182 = vector.broadcast %181 : vector<1x32xf32> to vector<10x32xf32>
    %183 = arith.addf %180, %182 : vector<10x32xf32>
    %c0_69 = arith.constant 0 : index
    %c0_70 = arith.constant 0 : index
    %184 = vector.load %arg19[%c0_69, %c0_70] : memref<1x32xf32, #tpu.memory_space<vmem>>, vector<1x32xf32>
    %c0_71 = arith.constant 0 : index
    %c0_72 = arith.constant 0 : index
    %185 = vector.load %arg20[%c0_71, %c0_72] : memref<1x32xf32, #tpu.memory_space<vmem>>, vector<1x32xf32>
    %cst_73 = arith.constant dense<0.000000e+00> : vector<10xf32>
    %186 = vector.multi_reduction <add>, %183, %cst_73 [1] : vector<10x32xf32> to vector<10xf32>
    %187 = vector.shape_cast %186 : vector<10xf32> to vector<10x1xf32>
    %cst_74 = arith.constant 3.200000e+01 : f32
    %188 = vector.broadcast %cst_74 : f32 to vector<10x1xf32>
    %189 = arith.divf %187, %188 : vector<10x1xf32>
    %190 = vector.broadcast %189 : vector<10x1xf32> to vector<10x32xf32>
    %191 = arith.subf %183, %190 : vector<10x32xf32>
    %192 = arith.mulf %191, %191 : vector<10x32xf32>
    %cst_75 = arith.constant dense<0.000000e+00> : vector<10xf32>
    %193 = vector.multi_reduction <add>, %192, %cst_75 [1] : vector<10x32xf32> to vector<10xf32>
    %194 = vector.shape_cast %193 : vector<10xf32> to vector<10x1xf32>
    %cst_76 = arith.constant 3.200000e+01 : f32
    %195 = vector.broadcast %cst_76 : f32 to vector<10x1xf32>
    %196 = arith.divf %194, %195 : vector<10x1xf32>
    %197 = vector.broadcast %189 : vector<10x1xf32> to vector<10x32xf32>
    %198 = arith.subf %183, %197 : vector<10x32xf32>
    %cst_77 = arith.constant 9.99999996E-13 : f32
    %199 = vector.broadcast %cst_77 : f32 to vector<10x1xf32>
    %200 = arith.addf %196, %199 : vector<10x1xf32>
    %201 = math.rsqrt %200 : vector<10x1xf32>
    %202 = vector.broadcast %201 : vector<10x1xf32> to vector<10x32xf32>
    %203 = arith.mulf %198, %202 : vector<10x32xf32>
    %204 = vector.broadcast %184 : vector<1x32xf32> to vector<10x32xf32>
    %205 = arith.mulf %203, %204 : vector<10x32xf32>
    %206 = vector.broadcast %185 : vector<1x32xf32> to vector<10x32xf32>
    %207 = arith.addf %205, %206 : vector<10x32xf32>
    %c0_78 = arith.constant 0 : index
    %c0_79 = arith.constant 0 : index
    %208 = vector.load %arg21[%c0_78, %c0_79] : memref<32x64xf32, #tpu.memory_space<vmem>>, vector<32x64xf32>
    %209 = arith.truncf %207 : vector<10x32xf32> to vector<10x32xbf16>
    %210 = arith.truncf %208 : vector<32x64xf32> to vector<32x64xbf16>
    %cst_80 = arith.constant dense<0.000000e+00> : vector<10x64xf32>
    %211 = tpu.matmul %209, %210, %cst_80 {dimension_numbers = #tpu.dot_dimension_numbers<[1], [0], [0], [1], [0, 0, 1, 1], [], []>} : vector<10x32xbf16>, vector<32x64xbf16>, vector<10x64xf32> -> vector<10x64xf32>
    %c0_81 = arith.constant 0 : index
    %c0_82 = arith.constant 0 : index
    %212 = vector.load %arg22[%c0_81, %c0_82] : memref<1x64xf32, #tpu.memory_space<vmem>>, vector<1x64xf32>
    %213 = vector.broadcast %212 : vector<1x64xf32> to vector<10x64xf32>
    %214 = arith.addf %211, %213 : vector<10x64xf32>
    %215 = arith.mulf %214, %214 : vector<10x64xf32>
    %216 = arith.mulf %214, %215 : vector<10x64xf32>
    %cst_83 = arith.constant 4.471500e-02 : f32
    %217 = vector.broadcast %cst_83 : f32 to vector<10x64xf32>
    %218 = arith.mulf %217, %216 : vector<10x64xf32>
    %219 = arith.addf %214, %218 : vector<10x64xf32>
    %cst_84 = arith.constant 0.797884583 : f32
    %220 = vector.broadcast %cst_84 : f32 to vector<10x64xf32>
    %221 = arith.mulf %220, %219 : vector<10x64xf32>
    %222 = math.tanh %221 : vector<10x64xf32>
    %cst_85 = arith.constant 1.000000e+00 : f32
    %223 = vector.broadcast %cst_85 : f32 to vector<10x64xf32>
    %224 = arith.addf %223, %222 : vector<10x64xf32>
    %cst_86 = arith.constant 5.000000e-01 : f32
    %225 = vector.broadcast %cst_86 : f32 to vector<10x64xf32>
    %226 = arith.mulf %225, %224 : vector<10x64xf32>
    %227 = arith.mulf %214, %226 : vector<10x64xf32>
    %c0_87 = arith.constant 0 : index
    %c0_88 = arith.constant 0 : index
    %228 = vector.load %arg23[%c0_87, %c0_88] : memref<64x32xf32, #tpu.memory_space<vmem>>, vector<64x32xf32>
    %229 = arith.truncf %227 : vector<10x64xf32> to vector<10x64xbf16>
    %230 = arith.truncf %228 : vector<64x32xf32> to vector<64x32xbf16>
    %cst_89 = arith.constant dense<0.000000e+00> : vector<10x32xf32>
    %231 = tpu.matmul %229, %230, %cst_89 {dimension_numbers = #tpu.dot_dimension_numbers<[1], [0], [0], [1], [0, 0, 1, 1], [], []>} : vector<10x64xbf16>, vector<64x32xbf16>, vector<10x32xf32> -> vector<10x32xf32>
    %232 = arith.addf %207, %231 : vector<10x32xf32>
    %c0_90 = arith.constant 0 : index
    %c0_91 = arith.constant 0 : index
    %233 = vector.load %arg24[%c0_90, %c0_91] : memref<1x32xf32, #tpu.memory_space<vmem>>, vector<1x32xf32>
    %234 = vector.broadcast %233 : vector<1x32xf32> to vector<10x32xf32>
    %235 = arith.addf %232, %234 : vector<10x32xf32>
    %c0_92 = arith.constant 0 : index
    %c0_93 = arith.constant 0 : index
    %236 = vector.load %arg25[%c0_92, %c0_93] : memref<1x32xf32, #tpu.memory_space<vmem>>, vector<1x32xf32>
    %c0_94 = arith.constant 0 : index
    %c0_95 = arith.constant 0 : index
    %237 = vector.load %arg26[%c0_94, %c0_95] : memref<1x32xf32, #tpu.memory_space<vmem>>, vector<1x32xf32>
    %cst_96 = arith.constant dense<0.000000e+00> : vector<10xf32>
    %238 = vector.multi_reduction <add>, %235, %cst_96 [1] : vector<10x32xf32> to vector<10xf32>
    %239 = vector.shape_cast %238 : vector<10xf32> to vector<10x1xf32>
    %cst_97 = arith.constant 3.200000e+01 : f32
    %240 = vector.broadcast %cst_97 : f32 to vector<10x1xf32>
    %241 = arith.divf %239, %240 : vector<10x1xf32>
    %242 = vector.broadcast %241 : vector<10x1xf32> to vector<10x32xf32>
    %243 = arith.subf %235, %242 : vector<10x32xf32>
    %244 = arith.mulf %243, %243 : vector<10x32xf32>
    %cst_98 = arith.constant dense<0.000000e+00> : vector<10xf32>
    %245 = vector.multi_reduction <add>, %244, %cst_98 [1] : vector<10x32xf32> to vector<10xf32>
    %246 = vector.shape_cast %245 : vector<10xf32> to vector<10x1xf32>
    %cst_99 = arith.constant 3.200000e+01 : f32
    %247 = vector.broadcast %cst_99 : f32 to vector<10x1xf32>
    %248 = arith.divf %246, %247 : vector<10x1xf32>
    %249 = vector.broadcast %241 : vector<10x1xf32> to vector<10x32xf32>
    %250 = arith.subf %235, %249 : vector<10x32xf32>
    %cst_100 = arith.constant 9.99999996E-13 : f32
    %251 = vector.broadcast %cst_100 : f32 to vector<10x1xf32>
    %252 = arith.addf %248, %251 : vector<10x1xf32>
    %253 = math.rsqrt %252 : vector<10x1xf32>
    %254 = vector.broadcast %253 : vector<10x1xf32> to vector<10x32xf32>
    %255 = arith.mulf %250, %254 : vector<10x32xf32>
    %256 = vector.broadcast %236 : vector<1x32xf32> to vector<10x32xf32>
    %257 = arith.mulf %255, %256 : vector<10x32xf32>
    %258 = vector.broadcast %237 : vector<1x32xf32> to vector<10x32xf32>
    %259 = arith.addf %257, %258 : vector<10x32xf32>
    %c0_101 = arith.constant 0 : index
    %c0_102 = arith.constant 0 : index
    %260 = vector.load %arg27[%c0_101, %c0_102] : memref<10x32xf32, #tpu.memory_space<vmem>>, vector<10x32xf32>
    tpu.vector_store %arg27[%c0_101, %c0_102], %259 {strides = array<i32>} : memref<10x32xf32, #tpu.memory_space<vmem>>, vector<10x32xf32>,
    return
  }
  func.func @transform_0(%arg0: i32) -> (i32, i32) {
    %c0_i32 = arith.constant 0 : i32
    %c0_i32_0 = arith.constant 0 : i32
    %c0_i32_1 = arith.constant 0 : i32
    return %c0_i32, %c0_i32_0 : i32, i32
  }
  func.func @transform_1(%arg0: i32) -> (i32, i32) {
    %c0_i32 = arith.constant 0 : i32
    %c0_i32_0 = arith.constant 0 : i32
    %c0_i32_1 = arith.constant 0 : i32
    return %c0_i32, %c0_i32_0 : i32, i32
  }
  func.func @transform_2(%arg0: i32) -> (i32, i32) {
    %c0_i32 = arith.constant 0 : i32
    %c0_i32_0 = arith.constant 0 : i32
    %c0_i32_1 = arith.constant 0 : i32
    return %c0_i32, %c0_i32_0 : i32, i32
  }
  func.func @transform_3(%arg0: i32) -> (i32, i32) {
    %c0_i32 = arith.constant 0 : i32
    %c0_i32_0 = arith.constant 0 : i32
    %c0_i32_1 = arith.constant 0 : i32
    return %c0_i32, %c0_i32_0 : i32, i32
  }
  func.func @transform_4(%arg0: i32) -> (i32, i32) {
    %c0_i32 = arith.constant 0 : i32
    %c0_i32_0 = arith.constant 0 : i32
    %c0_i32_1 = arith.constant 0 : i32
    return %c0_i32, %c0_i32_0 : i32, i32
  }
  func.func @transform_5(%arg0: i32) -> (i32, i32) {
    %c0_i32 = arith.constant 0 : i32
    %c0_i32_0 = arith.constant 0 : i32
    %c0_i32_1 = arith.constant 0 : i32
    return %c0_i32, %c0_i32_0 : i32, i32
  }
  func.func @transform_6(%arg0: i32) -> (i32, i32) {
    %c0_i32 = arith.constant 0 : i32
    %c0_i32_0 = arith.constant 0 : i32
    %c0_i32_1 = arith.constant 0 : i32
    return %c0_i32, %c0_i32_0 : i32, i32
  }
  func.func @transform_7(%arg0: i32) -> (i32, i32) {
    %c0_i32 = arith.constant 0 : i32
    %c0_i32_0 = arith.constant 0 : i32
    %c0_i32_1 = arith.constant 0 : i32
    return %c0_i32, %c0_i32_0 : i32, i32
  }
  func.func @transform_8(%arg0: i32) -> (i32, i32) {
    %c0_i32 = arith.constant 0 : i32
    %c0_i32_0 = arith.constant 0 : i32
    %c0_i32_1 = arith.constant 0 : i32
    return %c0_i32, %c0_i32_0 : i32, i32
  }
  func.func @transform_9(%arg0: i32) -> (i32, i32) {
    %c0_i32 = arith.constant 0 : i32
    %c0_i32_0 = arith.constant 0 : i32
    %c0_i32_1 = arith.constant 0 : i32
    return %c0_i32, %c0_i32_0 : i32, i32
  }
  func.func @transform_10(%arg0: i32) -> (i32, i32) {
    %c0_i32 = arith.constant 0 : i32
    %c0_i32_0 = arith.constant 0 : i32
    %c0_i32_1 = arith.constant 0 : i32
    return %c0_i32, %c0_i32_0 : i32, i32
  }
  func.func @transform_11(%arg0: i32) -> (i32, i32) {
    %c0_i32 = arith.constant 0 : i32
    %c0_i32_0 = arith.constant 0 : i32
    %c0_i32_1 = arith.constant 0 : i32
    return %c0_i32, %c0_i32_0 : i32, i32
  }
  func.func @transform_12(%arg0: i32) -> (i32, i32) {
    %c0_i32 = arith.constant 0 : i32
    %c0_i32_0 = arith.constant 0 : i32
    %c0_i32_1 = arith.constant 0 : i32
    return %c0_i32, %c0_i32_0 : i32, i32
  }
  func.func @transform_13(%arg0: i32) -> (i32, i32) {
    %c0_i32 = arith.constant 0 : i32
    %c0_i32_0 = arith.constant 0 : i32
    %c0_i32_1 = arith.constant 0 : i32
    return %c0_i32, %c0_i32_0 : i32, i32
  }
  func.func @transform_14(%arg0: i32) -> (i32, i32) {
    %c0_i32 = arith.constant 0 : i32
    %c0_i32_0 = arith.constant 0 : i32
    %c0_i32_1 = arith.constant 0 : i32
    return %c0_i32, %c0_i32_0 : i32, i32
  }
  func.func @transform_15(%arg0: i32) -> (i32, i32) {
    %c0_i32 = arith.constant 0 : i32
    %c0_i32_0 = arith.constant 0 : i32
    %c0_i32_1 = arith.constant 0 : i32
    return %c0_i32, %c0_i32_0 : i32, i32
  }
  func.func @transform_16(%arg0: i32) -> (i32, i32) {
    %c0_i32 = arith.constant 0 : i32
    %c0_i32_0 = arith.constant 0 : i32
    %c0_i32_1 = arith.constant 0 : i32
    return %c0_i32, %c0_i32_0 : i32, i32
  }
  func.func @transform_17(%arg0: i32) -> (i32, i32) {
    %c0_i32 = arith.constant 0 : i32
    %c0_i32_0 = arith.constant 0 : i32
    %c0_i32_1 = arith.constant 0 : i32
    return %c0_i32, %c0_i32_0 : i32, i32
  }
  func.func @transform_18(%arg0: i32) -> (i32, i32) {
    %c0_i32 = arith.constant 0 : i32
    %c0_i32_0 = arith.constant 0 : i32
    %c0_i32_1 = arith.constant 0 : i32
    return %c0_i32, %c0_i32_0 : i32, i32
  }
  func.func @transform_19(%arg0: i32) -> (i32, i32) {
    %c0_i32 = arith.constant 0 : i32
    %c0_i32_0 = arith.constant 0 : i32
    %c0_i32_1 = arith.constant 0 : i32
    return %c0_i32, %c0_i32_0 : i32, i32
  }
  func.func @transform_20(%arg0: i32) -> (i32, i32) {
    %c0_i32 = arith.constant 0 : i32
    %c0_i32_0 = arith.constant 0 : i32
    %c0_i32_1 = arith.constant 0 : i32
    return %c0_i32, %c0_i32_0 : i32, i32
  }
  func.func @transform_21(%arg0: i32) -> (i32, i32) {
    %c0_i32 = arith.constant 0 : i32
    %c0_i32_0 = arith.constant 0 : i32
    %c0_i32_1 = arith.constant 0 : i32
    return %c0_i32, %c0_i32_0 : i32, i32
  }
  func.func @transform_22(%arg0: i32) -> (i32, i32) {
    %c0_i32 = arith.constant 0 : i32
    %c0_i32_0 = arith.constant 0 : i32
    %c0_i32_1 = arith.constant 0 : i32
    return %c0_i32, %c0_i32_0 : i32, i32
  }
  func.func @transform_23(%arg0: i32) -> (i32, i32) {
    %c0_i32 = arith.constant 0 : i32
    %c0_i32_0 = arith.constant 0 : i32
    %c0_i32_1 = arith.constant 0 : i32
    return %c0_i32, %c0_i32_0 : i32, i32
  }
  func.func @transform_24(%arg0: i32) -> (i32, i32) {
    %c0_i32 = arith.constant 0 : i32
    %c0_i32_0 = arith.constant 0 : i32
    %c0_i32_1 = arith.constant 0 : i32
    return %c0_i32, %c0_i32_0 : i32, i32
  }
  func.func @transform_25(%arg0: i32) -> (i32, i32) {
    %c0_i32 = arith.constant 0 : i32
    %c0_i32_0 = arith.constant 0 : i32
    %c0_i32_1 = arith.constant 0 : i32
    return %c0_i32, %c0_i32_0 : i32, i32
  }
  func.func @transform_26(%arg0: i32) -> (i32, i32) {
    %c0_i32 = arith.constant 0 : i32
    %c0_i32_0 = arith.constant 0 : i32
    %c0_i32_1 = arith.constant 0 : i32
    return %c0_i32, %c0_i32_0 : i32, i32
  }
}

module attributes {stable_mosaic.version = 11 : i64} {
  func.func @_proj_norm_kernel(%arg0: i32, %arg1: memref<2x32xf32, #tpu.memory_space<vmem>>, %arg2: memref<32x16xf32, #tpu.memory_space<vmem>>, %arg3: memref<1x16xf32, #tpu.memory_space<vmem>>, %arg4: memref<2x16xf32, #tpu.memory_space<vmem>>) attributes {dimension_semantics = [#tpu.dimension_semantics<arbitrary>], iteration_bounds = array<i64: 1>, scalar_prefetch = 0 : i64, scratch_operands = 0 : i64, tpu.core_type = #tpu.core_type<tc>, window_params = [{pipeline_mode = #tpu.pipeline_mode<synchronous>, transform_indices = @transform_0, window_bounds = array<i64: 2, 32>}, {pipeline_mode = #tpu.pipeline_mode<synchronous>, transform_indices = @transform_1, window_bounds = array<i64: 32, 16>}, {pipeline_mode = #tpu.pipeline_mode<synchronous>, transform_indices = @transform_2, window_bounds = array<i64: 1, 16>}, {pipeline_mode = #tpu.pipeline_mode<synchronous>, transform_indices = @transform_3, window_bounds = array<i64: 2, 16>}]} {
    %c0 = arith.constant 0 : index
    %c0_0 = arith.constant 0 : index
    %0 = vector.load %arg1[%c0, %c0_0] : memref<2x32xf32, #tpu.memory_space<vmem>>, vector<2x32xf32>
    %c0_1 = arith.constant 0 : index
    %c0_2 = arith.constant 0 : index
    %1 = vector.load %arg2[%c0_1, %c0_2] : memref<32x16xf32, #tpu.memory_space<vmem>>, vector<32x16xf32>
    %cst = arith.constant dense<0.000000e+00> : vector<2x16xf32>
    %2 = tpu.matmul %0, %1, %cst {dimension_numbers = #tpu.dot_dimension_numbers<[1], [0], [0], [1], [0, 0, 1, 1], [], []>} : vector<2x32xf32>, vector<32x16xf32>, vector<2x16xf32> -> vector<2x16xf32>
    %c0_3 = arith.constant 0 : index
    %c0_4 = arith.constant 0 : index
    %3 = vector.load %arg3[%c0_3, %c0_4] : memref<1x16xf32, #tpu.memory_space<vmem>>, vector<1x16xf32>
    %4 = vector.broadcast %3 : vector<1x16xf32> to vector<2x16xf32>
    %5 = arith.addf %2, %4 : vector<2x16xf32>
    %6 = arith.mulf %5, %5 : vector<2x16xf32>
    %cst_5 = arith.constant dense<0.000000e+00> : vector<2xf32>
    %7 = vector.multi_reduction <add>, %6, %cst_5 [1] : vector<2x16xf32> to vector<2xf32>
    %8 = vector.shape_cast %7 : vector<2xf32> to vector<2x1xf32>
    %cst_6 = arith.constant 1.000000e-24 : f32
    %9 = vector.broadcast %cst_6 : f32 to vector<2x1xf32>
    %10 = arith.maximumf %8, %9 : vector<2x1xf32>
    %11 = math.rsqrt %10 : vector<2x1xf32>
    %12 = vector.broadcast %11 : vector<2x1xf32> to vector<2x16xf32>
    %13 = arith.mulf %5, %12 : vector<2x16xf32>
    %c0_7 = arith.constant 0 : index
    %c0_8 = arith.constant 0 : index
    %14 = vector.load %arg4[%c0_7, %c0_8] : memref<2x16xf32, #tpu.memory_space<vmem>>, vector<2x16xf32>
    tpu.vector_store %arg4[%c0_7, %c0_8], %13 {strides = array<i32>} : memref<2x16xf32, #tpu.memory_space<vmem>>, vector<2x16xf32>,
    return
  }
  func.func @transform_0(%arg0: i32) -> (i32, i32) {
    %c0_i32 = arith.constant 0 : i32
    %c0_i32_0 = arith.constant 0 : i32
    %c0_i32_1 = arith.constant 0 : i32
    return %c0_i32, %c0_i32_0 : i32, i32
  }
  func.func @transform_1(%arg0: i32) -> (i32, i32) {
    %c0_i32 = arith.constant 0 : i32
    %c0_i32_0 = arith.constant 0 : i32
    %c0_i32_1 = arith.constant 0 : i32
    return %c0_i32, %c0_i32_0 : i32, i32
  }
  func.func @transform_2(%arg0: i32) -> (i32, i32) {
    %c0_i32 = arith.constant 0 : i32
    %c0_i32_0 = arith.constant 0 : i32
    %c0_i32_1 = arith.constant 0 : i32
    return %c0_i32, %c0_i32_0 : i32, i32
  }
  func.func @transform_3(%arg0: i32) -> (i32, i32) {
    %c0_i32 = arith.constant 0 : i32
    %c0_i32_0 = arith.constant 0 : i32
    %c0_i32_1 = arith.constant 0 : i32
    return %c0_i32, %c0_i32_0 : i32, i32
  }
}

module attributes {stable_mosaic.version = 11 : i64} {
  func.func @_ita_kernel(%arg0: i32, %arg1: memref<2x16xf32, #tpu.memory_space<vmem>>, %arg2: memref<2x16xf32, #tpu.memory_space<vmem>>, %arg3: memref<2x16xf32, #tpu.memory_space<vmem>>, %arg4: memref<2x16xf32, #tpu.memory_space<vmem>>, %arg5: memref<16x8xf32, #tpu.memory_space<vmem>>, %arg6: memref<16x8xf32, #tpu.memory_space<vmem>>, %arg7: memref<1x1xf32, #tpu.memory_space<vmem>>, %arg8: memref<1x1xf32, #tpu.memory_space<vmem>>, %arg9: memref<1x1xf32, #tpu.memory_space<vmem>>, %arg10: memref<2x2xf32, #tpu.memory_space<vmem>>, %arg11: memref<2x2xf32, #tpu.memory_space<vmem>>) attributes {dimension_semantics = [#tpu.dimension_semantics<arbitrary>], iteration_bounds = array<i64: 1>, scalar_prefetch = 0 : i64, scratch_operands = 0 : i64, tpu.core_type = #tpu.core_type<tc>, window_params = [{pipeline_mode = #tpu.pipeline_mode<synchronous>, transform_indices = @transform_0, window_bounds = array<i64: 2, 16>}, {pipeline_mode = #tpu.pipeline_mode<synchronous>, transform_indices = @transform_1, window_bounds = array<i64: 2, 16>}, {pipeline_mode = #tpu.pipeline_mode<synchronous>, transform_indices = @transform_2, window_bounds = array<i64: 2, 16>}, {pipeline_mode = #tpu.pipeline_mode<synchronous>, transform_indices = @transform_3, window_bounds = array<i64: 2, 16>}, {pipeline_mode = #tpu.pipeline_mode<synchronous>, transform_indices = @transform_4, window_bounds = array<i64: 16, 8>}, {pipeline_mode = #tpu.pipeline_mode<synchronous>, transform_indices = @transform_5, window_bounds = array<i64: 16, 8>}, {pipeline_mode = #tpu.pipeline_mode<synchronous>, transform_indices = @transform_6, window_bounds = array<i64: 1, 1>}, {pipeline_mode = #tpu.pipeline_mode<synchronous>, transform_indices = @transform_7, window_bounds = array<i64: 1, 1>}, {pipeline_mode = #tpu.pipeline_mode<synchronous>, transform_indices = @transform_8, window_bounds = array<i64: 1, 1>}, {pipeline_mode = #tpu.pipeline_mode<synchronous>, transform_indices = @transform_9, window_bounds = array<i64: 2, 2>}, {pipeline_mode = #tpu.pipeline_mode<synchronous>, transform_indices = @transform_10, window_bounds = array<i64: 2, 2>}]} {
    %c0 = arith.constant 0 : index
    %c0_0 = arith.constant 0 : index
    %0 = vector.load %arg1[%c0, %c0_0] : memref<2x16xf32, #tpu.memory_space<vmem>>, vector<2x16xf32>
    %c0_1 = arith.constant 0 : index
    %c0_2 = arith.constant 0 : index
    %1 = vector.load %arg2[%c0_1, %c0_2] : memref<2x16xf32, #tpu.memory_space<vmem>>, vector<2x16xf32>
    %c0_3 = arith.constant 0 : index
    %c0_4 = arith.constant 0 : index
    %2 = vector.load %arg3[%c0_3, %c0_4] : memref<2x16xf32, #tpu.memory_space<vmem>>, vector<2x16xf32>
    %c0_5 = arith.constant 0 : index
    %c0_6 = arith.constant 0 : index
    %3 = vector.load %arg4[%c0_5, %c0_6] : memref<2x16xf32, #tpu.memory_space<vmem>>, vector<2x16xf32>
    %c0_7 = arith.constant 0 : index
    %c0_8 = arith.constant 0 : index
    %4 = vector.load %arg5[%c0_7, %c0_8] : memref<16x8xf32, #tpu.memory_space<vmem>>, vector<16x8xf32>
    %c0_9 = arith.constant 0 : index
    %c0_10 = arith.constant 0 : index
    %5 = vector.load %arg6[%c0_9, %c0_10] : memref<16x8xf32, #tpu.memory_space<vmem>>, vector<16x8xf32>
    %c0_11 = arith.constant 0 : index
    %c0_12 = arith.constant 0 : index
    %6 = vector.load %arg7[%c0_11, %c0_12] : memref<1x1xf32, #tpu.memory_space<vmem>>, vector<1x1xf32>
    %cst = arith.constant 1.000000e+00 : f32
    %7 = vector.broadcast %cst : f32 to vector<1x1xf32>
    %8 = arith.divf %7, %6 : vector<1x1xf32>
    %c0_13 = arith.constant 0 : index
    %c0_14 = arith.constant 0 : index
    %9 = vector.load %arg8[%c0_13, %c0_14] : memref<1x1xf32, #tpu.memory_space<vmem>>, vector<1x1xf32>
    %cst_15 = arith.constant dense<0.000000e+00> : vector<2x2xf32>
    %10 = tpu.matmul %2, %3, %cst_15 {dimension_numbers = #tpu.dot_dimension_numbers<[1], [1], [0], [0], [0, 0, 1, 0], [], []>} : vector<2x16xf32>, vector<2x16xf32>, vector<2x2xf32> -> vector<2x2xf32>
    %cst_16 = arith.constant dense<0.000000e+00> : vector<2x8xf32>
    %11 = tpu.matmul %2, %5, %cst_16 {dimension_numbers = #tpu.dot_dimension_numbers<[1], [0], [0], [1], [0, 0, 1, 1], [], []>} : vector<2x16xf32>, vector<16x8xf32>, vector<2x8xf32> -> vector<2x8xf32>
    %12 = tpu.concatenate %10, %11 in 1 : vector<2x2xf32>, vector<2x8xf32> -> vector<2x10xf32>
    %13 = vector.broadcast %8 : vector<1x1xf32> to vector<2x10xf32>
    %14 = arith.mulf %12, %13 : vector<2x10xf32>
    %cst_17 = arith.constant dense<0.000000e+00> : vector<2x2xf32>
    %15 = tpu.matmul %3, %2, %cst_17 {dimension_numbers = #tpu.dot_dimension_numbers<[1], [1], [0], [0], [0, 0, 1, 0], [], []>} : vector<2x16xf32>, vector<2x16xf32>, vector<2x2xf32> -> vector<2x2xf32>
    %cst_18 = arith.constant dense<0.000000e+00> : vector<2x8xf32>
    %16 = tpu.matmul %3, %4, %cst_18 {dimension_numbers = #tpu.dot_dimension_numbers<[1], [0], [0], [1], [0, 0, 1, 1], [], []>} : vector<2x16xf32>, vector<16x8xf32>, vector<2x8xf32> -> vector<2x8xf32>
    %17 = tpu.concatenate %15, %16 in 1 : vector<2x2xf32>, vector<2x8xf32> -> vector<2x10xf32>
    %18 = vector.broadcast %8 : vector<1x1xf32> to vector<2x10xf32>
    %19 = arith.mulf %17, %18 : vector<2x10xf32>
    %cst_19 = arith.constant dense<0.000000e+00> : vector<2x2xf32>
    %20 = tpu.matmul %0, %3, %cst_19 {dimension_numbers = #tpu.dot_dimension_numbers<[1], [1], [0], [0], [0, 0, 1, 0], [], []>} : vector<2x16xf32>, vector<2x16xf32>, vector<2x2xf32> -> vector<2x2xf32>
    %cst_20 = arith.constant dense<0.000000e+00> : vector<2x8xf32>
    %21 = tpu.matmul %0, %5, %cst_20 {dimension_numbers = #tpu.dot_dimension_numbers<[1], [0], [0], [1], [0, 0, 1, 1], [], []>} : vector<2x16xf32>, vector<16x8xf32>, vector<2x8xf32> -> vector<2x8xf32>
    %22 = tpu.concatenate %20, %21 in 1 : vector<2x2xf32>, vector<2x8xf32> -> vector<2x10xf32>
    %23 = vector.broadcast %8 : vector<1x1xf32> to vector<2x10xf32>
    %24 = arith.mulf %22, %23 : vector<2x10xf32>
    %cst_21 = arith.constant dense<0.000000e+00> : vector<2x2xf32>
    %25 = tpu.matmul %1, %2, %cst_21 {dimension_numbers = #tpu.dot_dimension_numbers<[1], [1], [0], [0], [0, 0, 1, 0], [], []>} : vector<2x16xf32>, vector<2x16xf32>, vector<2x2xf32> -> vector<2x2xf32>
    %cst_22 = arith.constant dense<0.000000e+00> : vector<2x8xf32>
    %26 = tpu.matmul %1, %4, %cst_22 {dimension_numbers = #tpu.dot_dimension_numbers<[1], [0], [0], [1], [0, 0, 1, 1], [], []>} : vector<2x16xf32>, vector<16x8xf32>, vector<2x8xf32> -> vector<2x8xf32>
    %27 = tpu.concatenate %25, %26 in 1 : vector<2x2xf32>, vector<2x8xf32> -> vector<2x10xf32>
    %28 = vector.broadcast %8 : vector<1x1xf32> to vector<2x10xf32>
    %29 = arith.mulf %27, %28 : vector<2x10xf32>
    %30 = tpu.iota {dimensions = array<i32: 0>} : vector<2x10xi32>
    %31 = tpu.iota {dimensions = array<i32: 1>} : vector<2x10xi32>
    %32 = arith.cmpi eq, %30, %31 : vector<2x10xi32>
    %cst_23 = arith.constant 1.000000e+00 : f32
    %cst_24 = arith.constant 0.000000e+00 : f32
    %33 = vector.broadcast %cst_23 : f32 to vector<2x10xf32>
    %34 = vector.broadcast %cst_24 : f32 to vector<2x10xf32>
    %35 = arith.select %32, %33, %34 : vector<2x10xi1>, vector<2x10xf32>
    %cst_25 = arith.constant dense<0xFF800000> : vector<2xf32>
    %36 = vector.multi_reduction <maximumf>, %14, %cst_25 [1] : vector<2x10xf32> to vector<2xf32>
    %37 = vector.shape_cast %36 : vector<2xf32> to vector<2x1xf32>
    %38 = vector.broadcast %37 : vector<2x1xf32> to vector<2x10xf32>
    %39 = arith.subf %14, %38 : vector<2x10xf32>
    %40 = math.exp %39 : vector<2x10xf32>
    %cst_26 = arith.constant dense<0.000000e+00> : vector<2xf32>
    %41 = vector.multi_reduction <add>, %40, %cst_26 [1] : vector<2x10xf32> to vector<2xf32>
    %42 = vector.shape_cast %41 : vector<2xf32> to vector<2x1xf32>
    %43 = vector.broadcast %42 : vector<2x1xf32> to vector<2x10xf32>
    %44 = arith.divf %40, %43 : vector<2x10xf32>
    %45 = vector.broadcast %9 : vector<1x1xf32> to vector<2x10xf32>
    %46 = arith.mulf %45, %44 : vector<2x10xf32>
    %cst_27 = arith.constant 1.000000e+00 : f32
    %47 = vector.broadcast %cst_27 : f32 to vector<1x1xf32>
    %48 = arith.subf %47, %9 : vector<1x1xf32>
    %49 = vector.broadcast %48 : vector<1x1xf32> to vector<2x10xf32>
    %50 = arith.mulf %49, %35 : vector<2x10xf32>
    %51 = arith.addf %46, %50 : vector<2x10xf32>
    %cst_28 = arith.constant dense<0xFF800000> : vector<2xf32>
    %52 = vector.multi_reduction <maximumf>, %19, %cst_28 [1] : vector<2x10xf32> to vector<2xf32>
    %53 = vector.shape_cast %52 : vector<2xf32> to vector<2x1xf32>
    %54 = vector.broadcast %53 : vector<2x1xf32> to vector<2x10xf32>
    %55 = arith.subf %19, %54 : vector<2x10xf32>
    %56 = math.exp %55 : vector<2x10xf32>
    %cst_29 = arith.constant dense<0.000000e+00> : vector<2xf32>
    %57 = vector.multi_reduction <add>, %56, %cst_29 [1] : vector<2x10xf32> to vector<2xf32>
    %58 = vector.shape_cast %57 : vector<2xf32> to vector<2x1xf32>
    %59 = vector.broadcast %58 : vector<2x1xf32> to vector<2x10xf32>
    %60 = arith.divf %56, %59 : vector<2x10xf32>
    %61 = vector.broadcast %9 : vector<1x1xf32> to vector<2x10xf32>
    %62 = arith.mulf %61, %60 : vector<2x10xf32>
    %cst_30 = arith.constant 1.000000e+00 : f32
    %63 = vector.broadcast %cst_30 : f32 to vector<1x1xf32>
    %64 = arith.subf %63, %9 : vector<1x1xf32>
    %65 = vector.broadcast %64 : vector<1x1xf32> to vector<2x10xf32>
    %66 = arith.mulf %65, %35 : vector<2x10xf32>
    %67 = arith.addf %62, %66 : vector<2x10xf32>
    %cst_31 = arith.constant dense<0xFF800000> : vector<2xf32>
    %68 = vector.multi_reduction <maximumf>, %24, %cst_31 [1] : vector<2x10xf32> to vector<2xf32>
    %69 = vector.shape_cast %68 : vector<2xf32> to vector<2x1xf32>
    %70 = vector.broadcast %69 : vector<2x1xf32> to vector<2x10xf32>
    %71 = arith.subf %24, %70 : vector<2x10xf32>
    %72 = math.exp %71 : vector<2x10xf32>
    %cst_32 = arith.constant dense<0.000000e+00> : vector<2xf32>
    %73 = vector.multi_reduction <add>, %72, %cst_32 [1] : vector<2x10xf32> to vector<2xf32>
    %74 = vector.shape_cast %73 : vector<2xf32> to vector<2x1xf32>
    %75 = math.log %74 : vector<2x1xf32>
    %76 = vector.broadcast %75 : vector<2x1xf32> to vector<2x10xf32>
    %77 = arith.subf %71, %76 : vector<2x10xf32>
    %78 = arith.mulf %77, %51 : vector<2x10xf32>
    %cst_33 = arith.constant dense<0.000000e+00> : vector<2xf32>
    %79 = vector.multi_reduction <add>, %78, %cst_33 [1] : vector<2x10xf32> to vector<2xf32>
    %80 = vector.shape_cast %79 : vector<2xf32> to vector<2x1xf32>
    %cst_34 = arith.constant dense<0.000000e+00> : vector<1xf32>
    %81 = vector.multi_reduction <add>, %80, %cst_34 [0] : vector<2x1xf32> to vector<1xf32>
    %82 = vector.shape_cast %81 : vector<1xf32> to vector<1x1xf32>
    %cst_35 = arith.constant 0.000000e+00 : f32
    %83 = vector.broadcast %cst_35 : f32 to vector<1x1xf32>
    %84 = arith.subf %83, %82 : vector<1x1xf32>
    %cst_36 = arith.constant 2.000000e+00 : f32
    %85 = vector.broadcast %cst_36 : f32 to vector<1x1xf32>
    %86 = arith.divf %84, %85 : vector<1x1xf32>
    %cst_37 = arith.constant dense<0xFF800000> : vector<2xf32>
    %87 = vector.multi_reduction <maximumf>, %29, %cst_37 [1] : vector<2x10xf32> to vector<2xf32>
    %88 = vector.shape_cast %87 : vector<2xf32> to vector<2x1xf32>
    %89 = vector.broadcast %88 : vector<2x1xf32> to vector<2x10xf32>
    %90 = arith.subf %29, %89 : vector<2x10xf32>
    %91 = math.exp %90 : vector<2x10xf32>
    %cst_38 = arith.constant dense<0.000000e+00> : vector<2xf32>
    %92 = vector.multi_reduction <add>, %91, %cst_38 [1] : vector<2x10xf32> to vector<2xf32>
    %93 = vector.shape_cast %92 : vector<2xf32> to vector<2x1xf32>
    %94 = math.log %93 : vector<2x1xf32>
    %95 = vector.broadcast %94 : vector<2x1xf32> to vector<2x10xf32>
    %96 = arith.subf %90, %95 : vector<2x10xf32>
    %97 = arith.mulf %96, %67 : vector<2x10xf32>
    %cst_39 = arith.constant dense<0.000000e+00> : vector<2xf32>
    %98 = vector.multi_reduction <add>, %97, %cst_39 [1] : vector<2x10xf32> to vector<2xf32>
    %99 = vector.shape_cast %98 : vector<2xf32> to vector<2x1xf32>
    %cst_40 = arith.constant dense<0.000000e+00> : vector<1xf32>
    %100 = vector.multi_reduction <add>, %99, %cst_40 [0] : vector<2x1xf32> to vector<1xf32>
    %101 = vector.shape_cast %100 : vector<1xf32> to vector<1x1xf32>
    %cst_41 = arith.constant 0.000000e+00 : f32
    %102 = vector.broadcast %cst_41 : f32 to vector<1x1xf32>
    %103 = arith.subf %102, %101 : vector<1x1xf32>
    %cst_42 = arith.constant 2.000000e+00 : f32
    %104 = vector.broadcast %cst_42 : f32 to vector<1x1xf32>
    %105 = arith.divf %103, %104 : vector<1x1xf32>
    %106 = arith.addf %86, %105 : vector<1x1xf32>
    %cst_43 = arith.constant 5.000000e-01 : f32
    %107 = vector.broadcast %cst_43 : f32 to vector<1x1xf32>
    %108 = arith.mulf %107, %106 : vector<1x1xf32>
    %c0_44 = arith.constant 0 : index
    %c0_45 = arith.constant 0 : index
    %109 = vector.load %arg9[%c0_44, %c0_45] : memref<1x1xf32, #tpu.memory_space<vmem>>, vector<1x1xf32>
    tpu.vector_store %arg9[%c0_44, %c0_45], %108 {strides = array<i32>} : memref<1x1xf32, #tpu.memory_space<vmem>>, vector<1x1xf32>,
    %110 = tpu.iota {dimensions = array<i32: 0>} : vector<2x2xi32>
    %111 = tpu.iota {dimensions = array<i32: 1>} : vector<2x2xi32>
    %112 = arith.cmpi ne, %110, %111 : vector<2x2xi32>
    %113 = vector.extract_strided_slice %29 {offsets = [0, 0], sizes = [2, 2], strides = [1, 1]} : vector<2x10xf32> to vector<2x2xf32>
    %cst_46 = arith.constant dense<0xFF800000> : vector<2xf32>
    %114 = vector.multi_reduction <maximumf>, %113, %cst_46 [1] : vector<2x2xf32> to vector<2xf32>
    %115 = vector.shape_cast %114 : vector<2xf32> to vector<2x1xf32>
    %116 = vector.broadcast %115 : vector<2x1xf32> to vector<2x2xf32>
    %117 = arith.subf %113, %116 : vector<2x2xf32>
    %118 = math.exp %117 : vector<2x2xf32>
    %cst_47 = arith.constant dense<0.000000e+00> : vector<2xf32>
    %119 = vector.multi_reduction <add>, %118, %cst_47 [1] : vector<2x2xf32> to vector<2xf32>
    %120 = vector.shape_cast %119 : vector<2xf32> to vector<2x1xf32>
    %121 = vector.broadcast %120 : vector<2x1xf32> to vector<2x2xf32>
    %122 = arith.divf %118, %121 : vector<2x2xf32>
    %cst_48 = arith.constant 9.99999974E-5 : f32
    %123 = vector.broadcast %cst_48 : f32 to vector<2x2xf32>
    %124 = arith.addf %122, %123 : vector<2x2xf32>
    %cst_49 = arith.constant 0.000000e+00 : f32
    %125 = vector.broadcast %cst_49 : f32 to vector<2x2xf32>
    %126 = arith.select %112, %124, %125 : vector<2x2xi1>, vector<2x2xf32>
    %c0_50 = arith.constant 0 : index
    %c0_51 = arith.constant 0 : index
    %127 = vector.load %arg10[%c0_50, %c0_51] : memref<2x2xf32, #tpu.memory_space<vmem>>, vector<2x2xf32>
    tpu.vector_store %arg10[%c0_50, %c0_51], %126 {strides = array<i32>} : memref<2x2xf32, #tpu.memory_space<vmem>>, vector<2x2xf32>,
    %128 = vector.extract_strided_slice %24 {offsets = [0, 0], sizes = [2, 2], strides = [1, 1]} : vector<2x10xf32> to vector<2x2xf32>
    %cst_52 = arith.constant dense<0xFF800000> : vector<2xf32>
    %129 = vector.multi_reduction <maximumf>, %128, %cst_52 [1] : vector<2x2xf32> to vector<2xf32>
    %130 = vector.shape_cast %129 : vector<2xf32> to vector<2x1xf32>
    %131 = vector.broadcast %130 : vector<2x1xf32> to vector<2x2xf32>
    %132 = arith.subf %128, %131 : vector<2x2xf32>
    %133 = math.exp %132 : vector<2x2xf32>
    %cst_53 = arith.constant dense<0.000000e+00> : vector<2xf32>
    %134 = vector.multi_reduction <add>, %133, %cst_53 [1] : vector<2x2xf32> to vector<2xf32>
    %135 = vector.shape_cast %134 : vector<2xf32> to vector<2x1xf32>
    %136 = vector.broadcast %135 : vector<2x1xf32> to vector<2x2xf32>
    %137 = arith.divf %133, %136 : vector<2x2xf32>
    %cst_54 = arith.constant 9.99999974E-5 : f32
    %138 = vector.broadcast %cst_54 : f32 to vector<2x2xf32>
    %139 = arith.addf %137, %138 : vector<2x2xf32>
    %cst_55 = arith.constant 0.000000e+00 : f32
    %140 = vector.broadcast %cst_55 : f32 to vector<2x2xf32>
    %141 = arith.select %112, %139, %140 : vector<2x2xi1>, vector<2x2xf32>
    %c0_56 = arith.constant 0 : index
    %c0_57 = arith.constant 0 : index
    %142 = vector.load %arg11[%c0_56, %c0_57] : memref<2x2xf32, #tpu.memory_space<vmem>>, vector<2x2xf32>
    tpu.vector_store %arg11[%c0_56, %c0_57], %141 {strides = array<i32>} : memref<2x2xf32, #tpu.memory_space<vmem>>, vector<2x2xf32>,
    return
  }
  func.func @transform_0(%arg0: i32) -> (i32, i32) {
    %c0_i32 = arith.constant 0 : i32
    %c0_i32_0 = arith.constant 0 : i32
    %c0_i32_1 = arith.constant 0 : i32
    return %c0_i32, %c0_i32_0 : i32, i32
  }
  func.func @transform_1(%arg0: i32) -> (i32, i32) {
    %c0_i32 = arith.constant 0 : i32
    %c0_i32_0 = arith.constant 0 : i32
    %c0_i32_1 = arith.constant 0 : i32
    return %c0_i32, %c0_i32_0 : i32, i32
  }
  func.func @transform_2(%arg0: i32) -> (i32, i32) {
    %c0_i32 = arith.constant 0 : i32
    %c0_i32_0 = arith.constant 0 : i32
    %c0_i32_1 = arith.constant 0 : i32
    return %c0_i32, %c0_i32_0 : i32, i32
  }
  func.func @transform_3(%arg0: i32) -> (i32, i32) {
    %c0_i32 = arith.constant 0 : i32
    %c0_i32_0 = arith.constant 0 : i32
    %c0_i32_1 = arith.constant 0 : i32
    return %c0_i32, %c0_i32_0 : i32, i32
  }
  func.func @transform_4(%arg0: i32) -> (i32, i32) {
    %c0_i32 = arith.constant 0 : i32
    %c0_i32_0 = arith.constant 0 : i32
    %c0_i32_1 = arith.constant 0 : i32
    return %c0_i32, %c0_i32_0 : i32, i32
  }
  func.func @transform_5(%arg0: i32) -> (i32, i32) {
    %c0_i32 = arith.constant 0 : i32
    %c0_i32_0 = arith.constant 0 : i32
    %c0_i32_1 = arith.constant 0 : i32
    return %c0_i32, %c0_i32_0 : i32, i32
  }
  func.func @transform_6(%arg0: i32) -> (i32, i32) {
    %c0_i32 = arith.constant 0 : i32
    %c0_i32_0 = arith.constant 0 : i32
    %c0_i32_1 = arith.constant 0 : i32
    return %c0_i32, %c0_i32_0 : i32, i32
  }
  func.func @transform_7(%arg0: i32) -> (i32, i32) {
    %c0_i32 = arith.constant 0 : i32
    %c0_i32_0 = arith.constant 0 : i32
    %c0_i32_1 = arith.constant 0 : i32
    return %c0_i32, %c0_i32_0 : i32, i32
  }
  func.func @transform_8(%arg0: i32) -> (i32, i32) {
    %c0_i32 = arith.constant 0 : i32
    %c0_i32_0 = arith.constant 0 : i32
    %c0_i32_1 = arith.constant 0 : i32
    return %c0_i32, %c0_i32_0 : i32, i32
  }
  func.func @transform_9(%arg0: i32) -> (i32, i32) {
    %c0_i32 = arith.constant 0 : i32
    %c0_i32_0 = arith.constant 0 : i32
    %c0_i32_1 = arith.constant 0 : i32
    return %c0_i32, %c0_i32_0 : i32, i32
  }
  func.func @transform_10(%arg0: i32) -> (i32, i32) {
    %c0_i32 = arith.constant 0 : i32
    %c0_i32_0 = arith.constant 0 : i32
    %c0_i32_1 = arith.constant 0 : i32
    return %c0_i32, %c0_i32_0 : i32, i32
  }
}

module attributes {stable_mosaic.version = 11 : i64} {
  func.func @_bert_layer_kernel(%arg0: i32, %arg1: memref<32x32xf32, #tpu.memory_space<vmem>>, %arg2: memref<32x32xf32, #tpu.memory_space<vmem>>, %arg3: memref<20x32xf32, #tpu.memory_space<vmem>>, %arg4: memref<32x20xf32, #tpu.memory_space<vmem>>, %arg5: memref<1x32xf32, #tpu.memory_space<vmem>>, %arg6: memref<1x32xf32, #tpu.memory_space<vmem>>, %arg7: memref<32x96xf32, #tpu.memory_space<vmem>>, %arg8: memref<1x96xf32, #tpu.memory_space<vmem>>, %arg9: memref<32x32xf32, #tpu.memory_space<vmem>>, %arg10: memref<1x32xf32, #tpu.memory_space<vmem>>, %arg11: memref<1x32xf32, #tpu.memory_space<vmem>>, %arg12: memref<1x32xf32, #tpu.memory_space<vmem>>, %arg13: memref<32x32xf32, #tpu.memory_space<vmem>>, %arg14: memref<1x32xf32, #tpu.memory_space<vmem>>, %arg15: memref<32x64xf32, #tpu.memory_space<vmem>>, %arg16: memref<1x64xf32, #tpu.memory_space<vmem>>, %arg17: memref<32x32xf32, #tpu.memory_space<vmem>>, %arg18: memref<1x32xf32, #tpu.memory_space<vmem>>, %arg19: memref<1x32xf32, #tpu.memory_space<vmem>>, %arg20: memref<1x32xf32, #tpu.memory_space<vmem>>, %arg21: memref<32x64xf32, #tpu.memory_space<vmem>>, %arg22: memref<1x64xf32, #tpu.memory_space<vmem>>, %arg23: memref<64x32xf32, #tpu.memory_space<vmem>>, %arg24: memref<1x32xf32, #tpu.memory_space<vmem>>, %arg25: memref<1x32xf32, #tpu.memory_space<vmem>>, %arg26: memref<1x32xf32, #tpu.memory_space<vmem>>, %arg27: memref<32x32xf32, #tpu.memory_space<vmem>>) attributes {dimension_semantics = [#tpu.dimension_semantics<arbitrary>], iteration_bounds = array<i64: 1>, scalar_prefetch = 0 : i64, scratch_operands = 0 : i64, tpu.core_type = #tpu.core_type<tc>, window_params = [{pipeline_mode = #tpu.pipeline_mode<synchronous>, transform_indices = @transform_0, window_bounds = array<i64: 32, 32>}, {pipeline_mode = #tpu.pipeline_mode<synchronous>, transform_indices = @transform_1, window_bounds = array<i64: 32, 32>}, {pipeline_mode = #tpu.pipeline_mode<synchronous>, transform_indices = @transform_2, window_bounds = array<i64: 20, 32>}, {pipeline_mode = #tpu.pipeline_mode<synchronous>, transform_indices = @transform_3, window_bounds = array<i64: 32, 20>}, {pipeline_mode = #tpu.pipeline_mode<synchronous>, transform_indices = @transform_4, window_bounds = array<i64: 1, 32>}, {pipeline_mode = #tpu.pipeline_mode<synchronous>, transform_indices = @transform_5, window_bounds = array<i64: 1, 32>}, {pipeline_mode = #tpu.pipeline_mode<synchronous>, transform_indices = @transform_6, window_bounds = array<i64: 32, 96>}, {pipeline_mode = #tpu.pipeline_mode<synchronous>, transform_indices = @transform_7, window_bounds = array<i64: 1, 96>}, {pipeline_mode = #tpu.pipeline_mode<synchronous>, transform_indices = @transform_8, window_bounds = array<i64: 32, 32>}, {pipeline_mode = #tpu.pipeline_mode<synchronous>, transform_indices = @transform_9, window_bounds = array<i64: 1, 32>}, {pipeline_mode = #tpu.pipeline_mode<synchronous>, transform_indices = @transform_10, window_bounds = array<i64: 1, 32>}, {pipeline_mode = #tpu.pipeline_mode<synchronous>, transform_indices = @transform_11, window_bounds = array<i64: 1, 32>}, {pipeline_mode = #tpu.pipeline_mode<synchronous>, transform_indices = @transform_12, window_bounds = array<i64: 32, 32>}, {pipeline_mode = #tpu.pipeline_mode<synchronous>, transform_indices = @transform_13, window_bounds = array<i64: 1, 32>}, {pipeline_mode = #tpu.pipeline_mode<synchronous>, transform_indices = @transform_14, window_bounds = array<i64: 32, 64>}, {pipeline_mode = #tpu.pipeline_mode<synchronous>, transform_indices = @transform_15, window_bounds = array<i64: 1, 64>}, {pipeline_mode = #tpu.pipeline_mode<synchronous>, transform_indices = @transform_16, window_bounds = array<i64: 32, 32>}, {pipeline_mode = #tpu.pipeline_mode<synchronous>, transform_indices = @transform_17, window_bounds = array<i64: 1, 32>}, {pipeline_mode = #tpu.pipeline_mode<synchronous>, transform_indices = @transform_18, window_bounds = array<i64: 1, 32>}, {pipeline_mode = #tpu.pipeline_mode<synchronous>, transform_indices = @transform_19, window_bounds = array<i64: 1, 32>}, {pipeline_mode = #tpu.pipeline_mode<synchronous>, transform_indices = @transform_20, window_bounds = array<i64: 32, 64>}, {pipeline_mode = #tpu.pipeline_mode<synchronous>, transform_indices = @transform_21, window_bounds = array<i64: 1, 64>}, {pipeline_mode = #tpu.pipeline_mode<synchronous>, transform_indices = @transform_22, window_bounds = array<i64: 64, 32>}, {pipeline_mode = #tpu.pipeline_mode<synchronous>, transform_indices = @transform_23, window_bounds = array<i64: 1, 32>}, {pipeline_mode = #tpu.pipeline_mode<synchronous>, transform_indices = @transform_24, window_bounds = array<i64: 1, 32>}, {pipeline_mode = #tpu.pipeline_mode<synchronous>, transform_indices = @transform_25, window_bounds = array<i64: 1, 32>}, {pipeline_mode = #tpu.pipeline_mode<synchronous>, transform_indices = @transform_26, window_bounds = array<i64: 32, 32>}]} {
    %c0 = arith.constant 0 : index
    %c0_0 = arith.constant 0 : index
    %0 = vector.load %arg1[%c0, %c0_0] : memref<32x32xf32, #tpu.memory_space<vmem>>, vector<32x32xf32>
    %c0_1 = arith.constant 0 : index
    %c0_2 = arith.constant 0 : index
    %1 = vector.load %arg5[%c0_1, %c0_2] : memref<1x32xf32, #tpu.memory_space<vmem>>, vector<1x32xf32>
    %c0_3 = arith.constant 0 : index
    %c0_4 = arith.constant 0 : index
    %2 = vector.load %arg6[%c0_3, %c0_4] : memref<1x32xf32, #tpu.memory_space<vmem>>, vector<1x32xf32>
    %cst = arith.constant dense<0.000000e+00> : vector<32xf32>
    %3 = vector.multi_reduction <add>, %0, %cst [1] : vector<32x32xf32> to vector<32xf32>
    %4 = vector.shape_cast %3 : vector<32xf32> to vector<32x1xf32>
    %cst_5 = arith.constant 3.200000e+01 : f32
    %5 = vector.broadcast %cst_5 : f32 to vector<32x1xf32>
    %6 = arith.divf %4, %5 : vector<32x1xf32>
    %7 = vector.broadcast %6 : vector<32x1xf32> to vector<32x32xf32>
    %8 = arith.subf %0, %7 : vector<32x32xf32>
    %9 = arith.mulf %8, %8 : vector<32x32xf32>
    %cst_6 = arith.constant dense<0.000000e+00> : vector<32xf32>
    %10 = vector.multi_reduction <add>, %9, %cst_6 [1] : vector<32x32xf32> to vector<32xf32>
    %11 = vector.shape_cast %10 : vector<32xf32> to vector<32x1xf32>
    %cst_7 = arith.constant 3.200000e+01 : f32
    %12 = vector.broadcast %cst_7 : f32 to vector<32x1xf32>
    %13 = arith.divf %11, %12 : vector<32x1xf32>
    %14 = vector.broadcast %6 : vector<32x1xf32> to vector<32x32xf32>
    %15 = arith.subf %0, %14 : vector<32x32xf32>
    %cst_8 = arith.constant 9.99999996E-13 : f32
    %16 = vector.broadcast %cst_8 : f32 to vector<32x1xf32>
    %17 = arith.addf %13, %16 : vector<32x1xf32>
    %18 = math.rsqrt %17 : vector<32x1xf32>
    %19 = vector.broadcast %18 : vector<32x1xf32> to vector<32x32xf32>
    %20 = arith.mulf %15, %19 : vector<32x32xf32>
    %21 = vector.broadcast %1 : vector<1x32xf32> to vector<32x32xf32>
    %22 = arith.mulf %20, %21 : vector<32x32xf32>
    %23 = vector.broadcast %2 : vector<1x32xf32> to vector<32x32xf32>
    %24 = arith.addf %22, %23 : vector<32x32xf32>
    %c0_9 = arith.constant 0 : index
    %c0_10 = arith.constant 0 : index
    %25 = vector.load %arg7[%c0_9, %c0_10] : memref<32x96xf32, #tpu.memory_space<vmem>>, vector<32x96xf32>
    %26 = arith.truncf %24 : vector<32x32xf32> to vector<32x32xbf16>
    %27 = arith.truncf %25 : vector<32x96xf32> to vector<32x96xbf16>
    %cst_11 = arith.constant dense<0.000000e+00> : vector<32x96xf32>
    %28 = tpu.matmul %26, %27, %cst_11 {dimension_numbers = #tpu.dot_dimension_numbers<[1], [0], [0], [1], [0, 0, 1, 1], [], []>} : vector<32x32xbf16>, vector<32x96xbf16>, vector<32x96xf32> -> vector<32x96xf32>
    %c0_12 = arith.constant 0 : index
    %c0_13 = arith.constant 0 : index
    %29 = vector.load %arg8[%c0_12, %c0_13] : memref<1x96xf32, #tpu.memory_space<vmem>>, vector<1x96xf32>
    %30 = vector.broadcast %29 : vector<1x96xf32> to vector<32x96xf32>
    %31 = arith.addf %28, %30 : vector<32x96xf32>
    %32 = vector.extract_strided_slice %31 {offsets = [0, 0], sizes = [32, 32], strides = [1, 1]} : vector<32x96xf32> to vector<32x32xf32>
    %33 = vector.extract_strided_slice %31 {offsets = [0, 32], sizes = [32, 32], strides = [1, 1]} : vector<32x96xf32> to vector<32x32xf32>
    %34 = vector.extract_strided_slice %31 {offsets = [0, 64], sizes = [32, 32], strides = [1, 1]} : vector<32x96xf32> to vector<32x32xf32>
    %c0_14 = arith.constant 0 : index
    %c0_15 = arith.constant 0 : index
    %35 = vector.load %arg2[%c0_14, %c0_15] : memref<32x32xf32, #tpu.memory_space<vmem>>, vector<32x32xf32>
    %36 = vector.extract_strided_slice %32 {offsets = [0, 0], sizes = [32, 16], strides = [1, 1]} : vector<32x32xf32> to vector<32x16xf32>
    %37 = vector.extract_strided_slice %33 {offsets = [0, 0], sizes = [32, 16], strides = [1, 1]} : vector<32x32xf32> to vector<32x16xf32>
    %38 = vector.extract_strided_slice %34 {offsets = [0, 0], sizes = [32, 16], strides = [1, 1]} : vector<32x32xf32> to vector<32x16xf32>
    %39 = arith.truncf %36 : vector<32x16xf32> to vector<32x16xbf16>
    %40 = arith.truncf %37 : vector<32x16xf32> to vector<32x16xbf16>
    %cst_16 = arith.constant dense<0.000000e+00> : vector<32x32xf32>
    %41 = tpu.matmul %39, %40, %cst_16 {dimension_numbers = #tpu.dot_dimension_numbers<[1], [1], [0], [0], [0, 0, 1, 0], [], []>} : vector<32x16xbf16>, vector<32x16xbf16>, vector<32x32xf32> -> vector<32x32xf32>
    %cst_17 = arith.constant 2.500000e-01 : f32
    %42 = vector.broadcast %cst_17 : f32 to vector<32x32xf32>
    %43 = arith.mulf %41, %42 : vector<32x32xf32>
    %44 = arith.addf %43, %35 : vector<32x32xf32>
    %cst_18 = arith.constant dense<0xFF800000> : vector<32xf32>
    %45 = vector.multi_reduction <maximumf>, %44, %cst_18 [1] : vector<32x32xf32> to vector<32xf32>
    %46 = vector.shape_cast %45 : vector<32xf32> to vector<32x1xf32>
    %47 = vector.broadcast %46 : vector<32x1xf32> to vector<32x32xf32>
    %48 = arith.subf %44, %47 : vector<32x32xf32>
    %49 = math.exp %48 : vector<32x32xf32>
    %cst_19 = arith.constant dense<0.000000e+00> : vector<32xf32>
    %50 = vector.multi_reduction <add>, %49, %cst_19 [1] : vector<32x32xf32> to vector<32xf32>
    %51 = vector.shape_cast %50 : vector<32xf32> to vector<32x1xf32>
    %52 = tpu.reciprocal %51 {approx = true} : vector<32x1xf32> -> vector<32x1xf32>
    %53 = vector.broadcast %52 : vector<32x1xf32> to vector<32x32xf32>
    %54 = arith.mulf %49, %53 : vector<32x32xf32>
    %55 = arith.truncf %54 : vector<32x32xf32> to vector<32x32xbf16>
    %56 = arith.truncf %38 : vector<32x16xf32> to vector<32x16xbf16>
    %cst_20 = arith.constant dense<0.000000e+00> : vector<32x16xf32>
    %57 = tpu.matmul %55, %56, %cst_20 {dimension_numbers = #tpu.dot_dimension_numbers<[1], [0], [0], [1], [0, 0, 1, 1], [], []>} : vector<32x32xbf16>, vector<32x16xbf16>, vector<32x16xf32> -> vector<32x16xf32>
    %58 = vector.extract_strided_slice %32 {offsets = [0, 16], sizes = [32, 16], strides = [1, 1]} : vector<32x32xf32> to vector<32x16xf32>
    %59 = vector.extract_strided_slice %33 {offsets = [0, 16], sizes = [32, 16], strides = [1, 1]} : vector<32x32xf32> to vector<32x16xf32>
    %60 = vector.extract_strided_slice %34 {offsets = [0, 16], sizes = [32, 16], strides = [1, 1]} : vector<32x32xf32> to vector<32x16xf32>
    %61 = arith.truncf %58 : vector<32x16xf32> to vector<32x16xbf16>
    %62 = arith.truncf %59 : vector<32x16xf32> to vector<32x16xbf16>
    %cst_21 = arith.constant dense<0.000000e+00> : vector<32x32xf32>
    %63 = tpu.matmul %61, %62, %cst_21 {dimension_numbers = #tpu.dot_dimension_numbers<[1], [1], [0], [0], [0, 0, 1, 0], [], []>} : vector<32x16xbf16>, vector<32x16xbf16>, vector<32x32xf32> -> vector<32x32xf32>
    %cst_22 = arith.constant 2.500000e-01 : f32
    %64 = vector.broadcast %cst_22 : f32 to vector<32x32xf32>
    %65 = arith.mulf %63, %64 : vector<32x32xf32>
    %66 = arith.addf %65, %35 : vector<32x32xf32>
    %cst_23 = arith.constant dense<0xFF800000> : vector<32xf32>
    %67 = vector.multi_reduction <maximumf>, %66, %cst_23 [1] : vector<32x32xf32> to vector<32xf32>
    %68 = vector.shape_cast %67 : vector<32xf32> to vector<32x1xf32>
    %69 = vector.broadcast %68 : vector<32x1xf32> to vector<32x32xf32>
    %70 = arith.subf %66, %69 : vector<32x32xf32>
    %71 = math.exp %70 : vector<32x32xf32>
    %cst_24 = arith.constant dense<0.000000e+00> : vector<32xf32>
    %72 = vector.multi_reduction <add>, %71, %cst_24 [1] : vector<32x32xf32> to vector<32xf32>
    %73 = vector.shape_cast %72 : vector<32xf32> to vector<32x1xf32>
    %74 = tpu.reciprocal %73 {approx = true} : vector<32x1xf32> -> vector<32x1xf32>
    %75 = vector.broadcast %74 : vector<32x1xf32> to vector<32x32xf32>
    %76 = arith.mulf %71, %75 : vector<32x32xf32>
    %77 = arith.truncf %76 : vector<32x32xf32> to vector<32x32xbf16>
    %78 = arith.truncf %60 : vector<32x16xf32> to vector<32x16xbf16>
    %cst_25 = arith.constant dense<0.000000e+00> : vector<32x16xf32>
    %79 = tpu.matmul %77, %78, %cst_25 {dimension_numbers = #tpu.dot_dimension_numbers<[1], [0], [0], [1], [0, 0, 1, 1], [], []>} : vector<32x32xbf16>, vector<32x16xbf16>, vector<32x16xf32> -> vector<32x16xf32>
    %80 = tpu.concatenate %57, %79 in 1 : vector<32x16xf32>, vector<32x16xf32> -> vector<32x32xf32>
    %c0_26 = arith.constant 0 : index
    %c0_27 = arith.constant 0 : index
    %81 = vector.load %arg9[%c0_26, %c0_27] : memref<32x32xf32, #tpu.memory_space<vmem>>, vector<32x32xf32>
    %82 = arith.truncf %80 : vector<32x32xf32> to vector<32x32xbf16>
    %83 = arith.truncf %81 : vector<32x32xf32> to vector<32x32xbf16>
    %cst_28 = arith.constant dense<0.000000e+00> : vector<32x32xf32>
    %84 = tpu.matmul %82, %83, %cst_28 {dimension_numbers = #tpu.dot_dimension_numbers<[1], [0], [0], [1], [0, 0, 1, 1], [], []>} : vector<32x32xbf16>, vector<32x32xbf16>, vector<32x32xf32> -> vector<32x32xf32>
    %85 = arith.addf %24, %84 : vector<32x32xf32>
    %c0_29 = arith.constant 0 : index
    %c0_30 = arith.constant 0 : index
    %86 = vector.load %arg10[%c0_29, %c0_30] : memref<1x32xf32, #tpu.memory_space<vmem>>, vector<1x32xf32>
    %87 = vector.broadcast %86 : vector<1x32xf32> to vector<32x32xf32>
    %88 = arith.addf %85, %87 : vector<32x32xf32>
    %c0_31 = arith.constant 0 : index
    %c0_32 = arith.constant 0 : index
    %89 = vector.load %arg11[%c0_31, %c0_32] : memref<1x32xf32, #tpu.memory_space<vmem>>, vector<1x32xf32>
    %c0_33 = arith.constant 0 : index
    %c0_34 = arith.constant 0 : index
    %90 = vector.load %arg12[%c0_33, %c0_34] : memref<1x32xf32, #tpu.memory_space<vmem>>, vector<1x32xf32>
    %cst_35 = arith.constant dense<0.000000e+00> : vector<32xf32>
    %91 = vector.multi_reduction <add>, %88, %cst_35 [1] : vector<32x32xf32> to vector<32xf32>
    %92 = vector.shape_cast %91 : vector<32xf32> to vector<32x1xf32>
    %cst_36 = arith.constant 3.200000e+01 : f32
    %93 = vector.broadcast %cst_36 : f32 to vector<32x1xf32>
    %94 = arith.divf %92, %93 : vector<32x1xf32>
    %95 = vector.broadcast %94 : vector<32x1xf32> to vector<32x32xf32>
    %96 = arith.subf %88, %95 : vector<32x32xf32>
    %97 = arith.mulf %96, %96 : vector<32x32xf32>
    %cst_37 = arith.constant dense<0.000000e+00> : vector<32xf32>
    %98 = vector.multi_reduction <add>, %97, %cst_37 [1] : vector<32x32xf32> to vector<32xf32>
    %99 = vector.shape_cast %98 : vector<32xf32> to vector<32x1xf32>
    %cst_38 = arith.constant 3.200000e+01 : f32
    %100 = vector.broadcast %cst_38 : f32 to vector<32x1xf32>
    %101 = arith.divf %99, %100 : vector<32x1xf32>
    %102 = vector.broadcast %94 : vector<32x1xf32> to vector<32x32xf32>
    %103 = arith.subf %88, %102 : vector<32x32xf32>
    %cst_39 = arith.constant 9.99999996E-13 : f32
    %104 = vector.broadcast %cst_39 : f32 to vector<32x1xf32>
    %105 = arith.addf %101, %104 : vector<32x1xf32>
    %106 = math.rsqrt %105 : vector<32x1xf32>
    %107 = vector.broadcast %106 : vector<32x1xf32> to vector<32x32xf32>
    %108 = arith.mulf %103, %107 : vector<32x32xf32>
    %109 = vector.broadcast %89 : vector<1x32xf32> to vector<32x32xf32>
    %110 = arith.mulf %108, %109 : vector<32x32xf32>
    %111 = vector.broadcast %90 : vector<1x32xf32> to vector<32x32xf32>
    %112 = arith.addf %110, %111 : vector<32x32xf32>
    %c0_40 = arith.constant 0 : index
    %c0_41 = arith.constant 0 : index
    %113 = vector.load %arg3[%c0_40, %c0_41] : memref<20x32xf32, #tpu.memory_space<vmem>>, vector<20x32xf32>
    %c0_42 = arith.constant 0 : index
    %c0_43 = arith.constant 0 : index
    %114 = vector.load %arg13[%c0_42, %c0_43] : memref<32x32xf32, #tpu.memory_space<vmem>>, vector<32x32xf32>
    %115 = arith.truncf %112 : vector<32x32xf32> to vector<32x32xbf16>
    %116 = arith.truncf %114 : vector<32x32xf32> to vector<32x32xbf16>
    %cst_44 = arith.constant dense<0.000000e+00> : vector<32x32xf32>
    %117 = tpu.matmul %115, %116, %cst_44 {dimension_numbers = #tpu.dot_dimension_numbers<[1], [0], [0], [1], [0, 0, 1, 1], [], []>} : vector<32x32xbf16>, vector<32x32xbf16>, vector<32x32xf32> -> vector<32x32xf32>
    %c0_45 = arith.constant 0 : index
    %c0_46 = arith.constant 0 : index
    %118 = vector.load %arg14[%c0_45, %c0_46] : memref<1x32xf32, #tpu.memory_space<vmem>>, vector<1x32xf32>
    %119 = vector.broadcast %118 : vector<1x32xf32> to vector<32x32xf32>
    %120 = arith.addf %117, %119 : vector<32x32xf32>
    %c0_47 = arith.constant 0 : index
    %c0_48 = arith.constant 0 : index
    %121 = vector.load %arg15[%c0_47, %c0_48] : memref<32x64xf32, #tpu.memory_space<vmem>>, vector<32x64xf32>
    %122 = arith.truncf %113 : vector<20x32xf32> to vector<20x32xbf16>
    %123 = arith.truncf %121 : vector<32x64xf32> to vector<32x64xbf16>
    %cst_49 = arith.constant dense<0.000000e+00> : vector<20x64xf32>
    %124 = tpu.matmul %122, %123, %cst_49 {dimension_numbers = #tpu.dot_dimension_numbers<[1], [0], [0], [1], [0, 0, 1, 1], [], []>} : vector<20x32xbf16>, vector<32x64xbf16>, vector<20x64xf32> -> vector<20x64xf32>
    %c0_50 = arith.constant 0 : index
    %c0_51 = arith.constant 0 : index
    %125 = vector.load %arg16[%c0_50, %c0_51] : memref<1x64xf32, #tpu.memory_space<vmem>>, vector<1x64xf32>
    %126 = vector.broadcast %125 : vector<1x64xf32> to vector<20x64xf32>
    %127 = arith.addf %124, %126 : vector<20x64xf32>
    %128 = vector.extract_strided_slice %127 {offsets = [0, 0], sizes = [20, 32], strides = [1, 1]} : vector<20x64xf32> to vector<20x32xf32>
    %129 = vector.extract_strided_slice %127 {offsets = [0, 32], sizes = [20, 32], strides = [1, 1]} : vector<20x64xf32> to vector<20x32xf32>
    %c0_52 = arith.constant 0 : index
    %c0_53 = arith.constant 0 : index
    %130 = vector.load %arg4[%c0_52, %c0_53] : memref<32x20xf32, #tpu.memory_space<vmem>>, vector<32x20xf32>
    %131 = vector.extract_strided_slice %120 {offsets = [0, 0], sizes = [32, 16], strides = [1, 1]} : vector<32x32xf32> to vector<32x16xf32>
    %132 = vector.extract_strided_slice %128 {offsets = [0, 0], sizes = [20, 16], strides = [1, 1]} : vector<20x32xf32> to vector<20x16xf32>
    %133 = vector.extract_strided_slice %129 {offsets = [0, 0], sizes = [20, 16], strides = [1, 1]} : vector<20x32xf32> to vector<20x16xf32>
    %134 = arith.truncf %131 : vector<32x16xf32> to vector<32x16xbf16>
    %135 = arith.truncf %132 : vector<20x16xf32> to vector<20x16xbf16>
    %cst_54 = arith.constant dense<0.000000e+00> : vector<32x20xf32>
    %136 = tpu.matmul %134, %135, %cst_54 {dimension_numbers = #tpu.dot_dimension_numbers<[1], [1], [0], [0], [0, 0, 1, 0], [], []>} : vector<32x16xbf16>, vector<20x16xbf16>, vector<32x20xf32> -> vector<32x20xf32>
    %cst_55 = arith.constant 2.500000e-01 : f32
    %137 = vector.broadcast %cst_55 : f32 to vector<32x20xf32>
    %138 = arith.mulf %136, %137 : vector<32x20xf32>
    %139 = arith.addf %138, %130 : vector<32x20xf32>
    %cst_56 = arith.constant dense<0xFF800000> : vector<32xf32>
    %140 = vector.multi_reduction <maximumf>, %139, %cst_56 [1] : vector<32x20xf32> to vector<32xf32>
    %141 = vector.shape_cast %140 : vector<32xf32> to vector<32x1xf32>
    %142 = vector.broadcast %141 : vector<32x1xf32> to vector<32x20xf32>
    %143 = arith.subf %139, %142 : vector<32x20xf32>
    %144 = math.exp %143 : vector<32x20xf32>
    %cst_57 = arith.constant dense<0.000000e+00> : vector<32xf32>
    %145 = vector.multi_reduction <add>, %144, %cst_57 [1] : vector<32x20xf32> to vector<32xf32>
    %146 = vector.shape_cast %145 : vector<32xf32> to vector<32x1xf32>
    %147 = tpu.reciprocal %146 {approx = true} : vector<32x1xf32> -> vector<32x1xf32>
    %148 = vector.broadcast %147 : vector<32x1xf32> to vector<32x20xf32>
    %149 = arith.mulf %144, %148 : vector<32x20xf32>
    %150 = arith.truncf %149 : vector<32x20xf32> to vector<32x20xbf16>
    %151 = arith.truncf %133 : vector<20x16xf32> to vector<20x16xbf16>
    %cst_58 = arith.constant dense<0.000000e+00> : vector<32x16xf32>
    %152 = tpu.matmul %150, %151, %cst_58 {dimension_numbers = #tpu.dot_dimension_numbers<[1], [0], [0], [1], [0, 0, 1, 1], [], []>} : vector<32x20xbf16>, vector<20x16xbf16>, vector<32x16xf32> -> vector<32x16xf32>
    %153 = vector.extract_strided_slice %120 {offsets = [0, 16], sizes = [32, 16], strides = [1, 1]} : vector<32x32xf32> to vector<32x16xf32>
    %154 = vector.extract_strided_slice %128 {offsets = [0, 16], sizes = [20, 16], strides = [1, 1]} : vector<20x32xf32> to vector<20x16xf32>
    %155 = vector.extract_strided_slice %129 {offsets = [0, 16], sizes = [20, 16], strides = [1, 1]} : vector<20x32xf32> to vector<20x16xf32>
    %156 = arith.truncf %153 : vector<32x16xf32> to vector<32x16xbf16>
    %157 = arith.truncf %154 : vector<20x16xf32> to vector<20x16xbf16>
    %cst_59 = arith.constant dense<0.000000e+00> : vector<32x20xf32>
    %158 = tpu.matmul %156, %157, %cst_59 {dimension_numbers = #tpu.dot_dimension_numbers<[1], [1], [0], [0], [0, 0, 1, 0], [], []>} : vector<32x16xbf16>, vector<20x16xbf16>, vector<32x20xf32> -> vector<32x20xf32>
    %cst_60 = arith.constant 2.500000e-01 : f32
    %159 = vector.broadcast %cst_60 : f32 to vector<32x20xf32>
    %160 = arith.mulf %158, %159 : vector<32x20xf32>
    %161 = arith.addf %160, %130 : vector<32x20xf32>
    %cst_61 = arith.constant dense<0xFF800000> : vector<32xf32>
    %162 = vector.multi_reduction <maximumf>, %161, %cst_61 [1] : vector<32x20xf32> to vector<32xf32>
    %163 = vector.shape_cast %162 : vector<32xf32> to vector<32x1xf32>
    %164 = vector.broadcast %163 : vector<32x1xf32> to vector<32x20xf32>
    %165 = arith.subf %161, %164 : vector<32x20xf32>
    %166 = math.exp %165 : vector<32x20xf32>
    %cst_62 = arith.constant dense<0.000000e+00> : vector<32xf32>
    %167 = vector.multi_reduction <add>, %166, %cst_62 [1] : vector<32x20xf32> to vector<32xf32>
    %168 = vector.shape_cast %167 : vector<32xf32> to vector<32x1xf32>
    %169 = tpu.reciprocal %168 {approx = true} : vector<32x1xf32> -> vector<32x1xf32>
    %170 = vector.broadcast %169 : vector<32x1xf32> to vector<32x20xf32>
    %171 = arith.mulf %166, %170 : vector<32x20xf32>
    %172 = arith.truncf %171 : vector<32x20xf32> to vector<32x20xbf16>
    %173 = arith.truncf %155 : vector<20x16xf32> to vector<20x16xbf16>
    %cst_63 = arith.constant dense<0.000000e+00> : vector<32x16xf32>
    %174 = tpu.matmul %172, %173, %cst_63 {dimension_numbers = #tpu.dot_dimension_numbers<[1], [0], [0], [1], [0, 0, 1, 1], [], []>} : vector<32x20xbf16>, vector<20x16xbf16>, vector<32x16xf32> -> vector<32x16xf32>
    %175 = tpu.concatenate %152, %174 in 1 : vector<32x16xf32>, vector<32x16xf32> -> vector<32x32xf32>
    %c0_64 = arith.constant 0 : index
    %c0_65 = arith.constant 0 : index
    %176 = vector.load %arg17[%c0_64, %c0_65] : memref<32x32xf32, #tpu.memory_space<vmem>>, vector<32x32xf32>
    %177 = arith.truncf %175 : vector<32x32xf32> to vector<32x32xbf16>
    %178 = arith.truncf %176 : vector<32x32xf32> to vector<32x32xbf16>
    %cst_66 = arith.constant dense<0.000000e+00> : vector<32x32xf32>
    %179 = tpu.matmul %177, %178, %cst_66 {dimension_numbers = #tpu.dot_dimension_numbers<[1], [0], [0], [1], [0, 0, 1, 1], [], []>} : vector<32x32xbf16>, vector<32x32xbf16>, vector<32x32xf32> -> vector<32x32xf32>
    %180 = arith.addf %112, %179 : vector<32x32xf32>
    %c0_67 = arith.constant 0 : index
    %c0_68 = arith.constant 0 : index
    %181 = vector.load %arg18[%c0_67, %c0_68] : memref<1x32xf32, #tpu.memory_space<vmem>>, vector<1x32xf32>
    %182 = vector.broadcast %181 : vector<1x32xf32> to vector<32x32xf32>
    %183 = arith.addf %180, %182 : vector<32x32xf32>
    %c0_69 = arith.constant 0 : index
    %c0_70 = arith.constant 0 : index
    %184 = vector.load %arg19[%c0_69, %c0_70] : memref<1x32xf32, #tpu.memory_space<vmem>>, vector<1x32xf32>
    %c0_71 = arith.constant 0 : index
    %c0_72 = arith.constant 0 : index
    %185 = vector.load %arg20[%c0_71, %c0_72] : memref<1x32xf32, #tpu.memory_space<vmem>>, vector<1x32xf32>
    %cst_73 = arith.constant dense<0.000000e+00> : vector<32xf32>
    %186 = vector.multi_reduction <add>, %183, %cst_73 [1] : vector<32x32xf32> to vector<32xf32>
    %187 = vector.shape_cast %186 : vector<32xf32> to vector<32x1xf32>
    %cst_74 = arith.constant 3.200000e+01 : f32
    %188 = vector.broadcast %cst_74 : f32 to vector<32x1xf32>
    %189 = arith.divf %187, %188 : vector<32x1xf32>
    %190 = vector.broadcast %189 : vector<32x1xf32> to vector<32x32xf32>
    %191 = arith.subf %183, %190 : vector<32x32xf32>
    %192 = arith.mulf %191, %191 : vector<32x32xf32>
    %cst_75 = arith.constant dense<0.000000e+00> : vector<32xf32>
    %193 = vector.multi_reduction <add>, %192, %cst_75 [1] : vector<32x32xf32> to vector<32xf32>
    %194 = vector.shape_cast %193 : vector<32xf32> to vector<32x1xf32>
    %cst_76 = arith.constant 3.200000e+01 : f32
    %195 = vector.broadcast %cst_76 : f32 to vector<32x1xf32>
    %196 = arith.divf %194, %195 : vector<32x1xf32>
    %197 = vector.broadcast %189 : vector<32x1xf32> to vector<32x32xf32>
    %198 = arith.subf %183, %197 : vector<32x32xf32>
    %cst_77 = arith.constant 9.99999996E-13 : f32
    %199 = vector.broadcast %cst_77 : f32 to vector<32x1xf32>
    %200 = arith.addf %196, %199 : vector<32x1xf32>
    %201 = math.rsqrt %200 : vector<32x1xf32>
    %202 = vector.broadcast %201 : vector<32x1xf32> to vector<32x32xf32>
    %203 = arith.mulf %198, %202 : vector<32x32xf32>
    %204 = vector.broadcast %184 : vector<1x32xf32> to vector<32x32xf32>
    %205 = arith.mulf %203, %204 : vector<32x32xf32>
    %206 = vector.broadcast %185 : vector<1x32xf32> to vector<32x32xf32>
    %207 = arith.addf %205, %206 : vector<32x32xf32>
    %c0_78 = arith.constant 0 : index
    %c0_79 = arith.constant 0 : index
    %208 = vector.load %arg21[%c0_78, %c0_79] : memref<32x64xf32, #tpu.memory_space<vmem>>, vector<32x64xf32>
    %209 = arith.truncf %207 : vector<32x32xf32> to vector<32x32xbf16>
    %210 = arith.truncf %208 : vector<32x64xf32> to vector<32x64xbf16>
    %cst_80 = arith.constant dense<0.000000e+00> : vector<32x64xf32>
    %211 = tpu.matmul %209, %210, %cst_80 {dimension_numbers = #tpu.dot_dimension_numbers<[1], [0], [0], [1], [0, 0, 1, 1], [], []>} : vector<32x32xbf16>, vector<32x64xbf16>, vector<32x64xf32> -> vector<32x64xf32>
    %c0_81 = arith.constant 0 : index
    %c0_82 = arith.constant 0 : index
    %212 = vector.load %arg22[%c0_81, %c0_82] : memref<1x64xf32, #tpu.memory_space<vmem>>, vector<1x64xf32>
    %213 = vector.broadcast %212 : vector<1x64xf32> to vector<32x64xf32>
    %214 = arith.addf %211, %213 : vector<32x64xf32>
    %215 = arith.mulf %214, %214 : vector<32x64xf32>
    %216 = arith.mulf %214, %215 : vector<32x64xf32>
    %cst_83 = arith.constant 4.471500e-02 : f32
    %217 = vector.broadcast %cst_83 : f32 to vector<32x64xf32>
    %218 = arith.mulf %217, %216 : vector<32x64xf32>
    %219 = arith.addf %214, %218 : vector<32x64xf32>
    %cst_84 = arith.constant 0.797884583 : f32
    %220 = vector.broadcast %cst_84 : f32 to vector<32x64xf32>
    %221 = arith.mulf %220, %219 : vector<32x64xf32>
    %222 = math.tanh %221 : vector<32x64xf32>
    %cst_85 = arith.constant 1.000000e+00 : f32
    %223 = vector.broadcast %cst_85 : f32 to vector<32x64xf32>
    %224 = arith.addf %223, %222 : vector<32x64xf32>
    %cst_86 = arith.constant 5.000000e-01 : f32
    %225 = vector.broadcast %cst_86 : f32 to vector<32x64xf32>
    %226 = arith.mulf %225, %224 : vector<32x64xf32>
    %227 = arith.mulf %214, %226 : vector<32x64xf32>
    %c0_87 = arith.constant 0 : index
    %c0_88 = arith.constant 0 : index
    %228 = vector.load %arg23[%c0_87, %c0_88] : memref<64x32xf32, #tpu.memory_space<vmem>>, vector<64x32xf32>
    %229 = arith.truncf %227 : vector<32x64xf32> to vector<32x64xbf16>
    %230 = arith.truncf %228 : vector<64x32xf32> to vector<64x32xbf16>
    %cst_89 = arith.constant dense<0.000000e+00> : vector<32x32xf32>
    %231 = tpu.matmul %229, %230, %cst_89 {dimension_numbers = #tpu.dot_dimension_numbers<[1], [0], [0], [1], [0, 0, 1, 1], [], []>} : vector<32x64xbf16>, vector<64x32xbf16>, vector<32x32xf32> -> vector<32x32xf32>
    %232 = arith.addf %207, %231 : vector<32x32xf32>
    %c0_90 = arith.constant 0 : index
    %c0_91 = arith.constant 0 : index
    %233 = vector.load %arg24[%c0_90, %c0_91] : memref<1x32xf32, #tpu.memory_space<vmem>>, vector<1x32xf32>
    %234 = vector.broadcast %233 : vector<1x32xf32> to vector<32x32xf32>
    %235 = arith.addf %232, %234 : vector<32x32xf32>
    %c0_92 = arith.constant 0 : index
    %c0_93 = arith.constant 0 : index
    %236 = vector.load %arg25[%c0_92, %c0_93] : memref<1x32xf32, #tpu.memory_space<vmem>>, vector<1x32xf32>
    %c0_94 = arith.constant 0 : index
    %c0_95 = arith.constant 0 : index
    %237 = vector.load %arg26[%c0_94, %c0_95] : memref<1x32xf32, #tpu.memory_space<vmem>>, vector<1x32xf32>
    %cst_96 = arith.constant dense<0.000000e+00> : vector<32xf32>
    %238 = vector.multi_reduction <add>, %235, %cst_96 [1] : vector<32x32xf32> to vector<32xf32>
    %239 = vector.shape_cast %238 : vector<32xf32> to vector<32x1xf32>
    %cst_97 = arith.constant 3.200000e+01 : f32
    %240 = vector.broadcast %cst_97 : f32 to vector<32x1xf32>
    %241 = arith.divf %239, %240 : vector<32x1xf32>
    %242 = vector.broadcast %241 : vector<32x1xf32> to vector<32x32xf32>
    %243 = arith.subf %235, %242 : vector<32x32xf32>
    %244 = arith.mulf %243, %243 : vector<32x32xf32>
    %cst_98 = arith.constant dense<0.000000e+00> : vector<32xf32>
    %245 = vector.multi_reduction <add>, %244, %cst_98 [1] : vector<32x32xf32> to vector<32xf32>
    %246 = vector.shape_cast %245 : vector<32xf32> to vector<32x1xf32>
    %cst_99 = arith.constant 3.200000e+01 : f32
    %247 = vector.broadcast %cst_99 : f32 to vector<32x1xf32>
    %248 = arith.divf %246, %247 : vector<32x1xf32>
    %249 = vector.broadcast %241 : vector<32x1xf32> to vector<32x32xf32>
    %250 = arith.subf %235, %249 : vector<32x32xf32>
    %cst_100 = arith.constant 9.99999996E-13 : f32
    %251 = vector.broadcast %cst_100 : f32 to vector<32x1xf32>
    %252 = arith.addf %248, %251 : vector<32x1xf32>
    %253 = math.rsqrt %252 : vector<32x1xf32>
    %254 = vector.broadcast %253 : vector<32x1xf32> to vector<32x32xf32>
    %255 = arith.mulf %250, %254 : vector<32x32xf32>
    %256 = vector.broadcast %236 : vector<1x32xf32> to vector<32x32xf32>
    %257 = arith.mulf %255, %256 : vector<32x32xf32>
    %258 = vector.broadcast %237 : vector<1x32xf32> to vector<32x32xf32>
    %259 = arith.addf %257, %258 : vector<32x32xf32>
    %c0_101 = arith.constant 0 : index
    %c0_102 = arith.constant 0 : index
    %260 = vector.load %arg27[%c0_101, %c0_102] : memref<32x32xf32, #tpu.memory_space<vmem>>, vector<32x32xf32>
    tpu.vector_store %arg27[%c0_101, %c0_102], %259 {strides = array<i32>} : memref<32x32xf32, #tpu.memory_space<vmem>>, vector<32x32xf32>,
    return
  }
  func.func @transform_0(%arg0: i32) -> (i32, i32) {
    %c0_i32 = arith.constant 0 : i32
    %c0_i32_0 = arith.constant 0 : i32
    %c0_i32_1 = arith.constant 0 : i32
    return %c0_i32, %c0_i32_0 : i32, i32
  }
  func.func @transform_1(%arg0: i32) -> (i32, i32) {
    %c0_i32 = arith.constant 0 : i32
    %c0_i32_0 = arith.constant 0 : i32
    %c0_i32_1 = arith.constant 0 : i32
    return %c0_i32, %c0_i32_0 : i32, i32
  }
  func.func @transform_2(%arg0: i32) -> (i32, i32) {
    %c0_i32 = arith.constant 0 : i32
    %c0_i32_0 = arith.constant 0 : i32
    %c0_i32_1 = arith.constant 0 : i32
    return %c0_i32, %c0_i32_0 : i32, i32
  }
  func.func @transform_3(%arg0: i32) -> (i32, i32) {
    %c0_i32 = arith.constant 0 : i32
    %c0_i32_0 = arith.constant 0 : i32
    %c0_i32_1 = arith.constant 0 : i32
    return %c0_i32, %c0_i32_0 : i32, i32
  }
  func.func @transform_4(%arg0: i32) -> (i32, i32) {
    %c0_i32 = arith.constant 0 : i32
    %c0_i32_0 = arith.constant 0 : i32
    %c0_i32_1 = arith.constant 0 : i32
    return %c0_i32, %c0_i32_0 : i32, i32
  }
  func.func @transform_5(%arg0: i32) -> (i32, i32) {
    %c0_i32 = arith.constant 0 : i32
    %c0_i32_0 = arith.constant 0 : i32
    %c0_i32_1 = arith.constant 0 : i32
    return %c0_i32, %c0_i32_0 : i32, i32
  }
  func.func @transform_6(%arg0: i32) -> (i32, i32) {
    %c0_i32 = arith.constant 0 : i32
    %c0_i32_0 = arith.constant 0 : i32
    %c0_i32_1 = arith.constant 0 : i32
    return %c0_i32, %c0_i32_0 : i32, i32
  }
  func.func @transform_7(%arg0: i32) -> (i32, i32) {
    %c0_i32 = arith.constant 0 : i32
    %c0_i32_0 = arith.constant 0 : i32
    %c0_i32_1 = arith.constant 0 : i32
    return %c0_i32, %c0_i32_0 : i32, i32
  }
  func.func @transform_8(%arg0: i32) -> (i32, i32) {
    %c0_i32 = arith.constant 0 : i32
    %c0_i32_0 = arith.constant 0 : i32
    %c0_i32_1 = arith.constant 0 : i32
    return %c0_i32, %c0_i32_0 : i32, i32
  }
  func.func @transform_9(%arg0: i32) -> (i32, i32) {
    %c0_i32 = arith.constant 0 : i32
    %c0_i32_0 = arith.constant 0 : i32
    %c0_i32_1 = arith.constant 0 : i32
    return %c0_i32, %c0_i32_0 : i32, i32
  }
  func.func @transform_10(%arg0: i32) -> (i32, i32) {
    %c0_i32 = arith.constant 0 : i32
    %c0_i32_0 = arith.constant 0 : i32
    %c0_i32_1 = arith.constant 0 : i32
    return %c0_i32, %c0_i32_0 : i32, i32
  }
  func.func @transform_11(%arg0: i32) -> (i32, i32) {
    %c0_i32 = arith.constant 0 : i32
    %c0_i32_0 = arith.constant 0 : i32
    %c0_i32_1 = arith.constant 0 : i32
    return %c0_i32, %c0_i32_0 : i32, i32
  }
  func.func @transform_12(%arg0: i32) -> (i32, i32) {
    %c0_i32 = arith.constant 0 : i32
    %c0_i32_0 = arith.constant 0 : i32
    %c0_i32_1 = arith.constant 0 : i32
    return %c0_i32, %c0_i32_0 : i32, i32
  }
  func.func @transform_13(%arg0: i32) -> (i32, i32) {
    %c0_i32 = arith.constant 0 : i32
    %c0_i32_0 = arith.constant 0 : i32
    %c0_i32_1 = arith.constant 0 : i32
    return %c0_i32, %c0_i32_0 : i32, i32
  }
  func.func @transform_14(%arg0: i32) -> (i32, i32) {
    %c0_i32 = arith.constant 0 : i32
    %c0_i32_0 = arith.constant 0 : i32
    %c0_i32_1 = arith.constant 0 : i32
    return %c0_i32, %c0_i32_0 : i32, i32
  }
  func.func @transform_15(%arg0: i32) -> (i32, i32) {
    %c0_i32 = arith.constant 0 : i32
    %c0_i32_0 = arith.constant 0 : i32
    %c0_i32_1 = arith.constant 0 : i32
    return %c0_i32, %c0_i32_0 : i32, i32
  }
  func.func @transform_16(%arg0: i32) -> (i32, i32) {
    %c0_i32 = arith.constant 0 : i32
    %c0_i32_0 = arith.constant 0 : i32
    %c0_i32_1 = arith.constant 0 : i32
    return %c0_i32, %c0_i32_0 : i32, i32
  }
  func.func @transform_17(%arg0: i32) -> (i32, i32) {
    %c0_i32 = arith.constant 0 : i32
    %c0_i32_0 = arith.constant 0 : i32
    %c0_i32_1 = arith.constant 0 : i32
    return %c0_i32, %c0_i32_0 : i32, i32
  }
  func.func @transform_18(%arg0: i32) -> (i32, i32) {
    %c0_i32 = arith.constant 0 : i32
    %c0_i32_0 = arith.constant 0 : i32
    %c0_i32_1 = arith.constant 0 : i32
    return %c0_i32, %c0_i32_0 : i32, i32
  }
  func.func @transform_19(%arg0: i32) -> (i32, i32) {
    %c0_i32 = arith.constant 0 : i32
    %c0_i32_0 = arith.constant 0 : i32
    %c0_i32_1 = arith.constant 0 : i32
    return %c0_i32, %c0_i32_0 : i32, i32
  }
  func.func @transform_20(%arg0: i32) -> (i32, i32) {
    %c0_i32 = arith.constant 0 : i32
    %c0_i32_0 = arith.constant 0 : i32
    %c0_i32_1 = arith.constant 0 : i32
    return %c0_i32, %c0_i32_0 : i32, i32
  }
  func.func @transform_21(%arg0: i32) -> (i32, i32) {
    %c0_i32 = arith.constant 0 : i32
    %c0_i32_0 = arith.constant 0 : i32
    %c0_i32_1 = arith.constant 0 : i32
    return %c0_i32, %c0_i32_0 : i32, i32
  }
  func.func @transform_22(%arg0: i32) -> (i32, i32) {
    %c0_i32 = arith.constant 0 : i32
    %c0_i32_0 = arith.constant 0 : i32
    %c0_i32_1 = arith.constant 0 : i32
    return %c0_i32, %c0_i32_0 : i32, i32
  }
  func.func @transform_23(%arg0: i32) -> (i32, i32) {
    %c0_i32 = arith.constant 0 : i32
    %c0_i32_0 = arith.constant 0 : i32
    %c0_i32_1 = arith.constant 0 : i32
    return %c0_i32, %c0_i32_0 : i32, i32
  }
  func.func @transform_24(%arg0: i32) -> (i32, i32) {
    %c0_i32 = arith.constant 0 : i32
    %c0_i32_0 = arith.constant 0 : i32
    %c0_i32_1 = arith.constant 0 : i32
    return %c0_i32, %c0_i32_0 : i32, i32
  }
  func.func @transform_25(%arg0: i32) -> (i32, i32) {
    %c0_i32 = arith.constant 0 : i32
    %c0_i32_0 = arith.constant 0 : i32
    %c0_i32_1 = arith.constant 0 : i32
    return %c0_i32, %c0_i32_0 : i32, i32
  }
  func.func @transform_26(%arg0: i32) -> (i32, i32) {
    %c0_i32 = arith.constant 0 : i32
    %c0_i32_0 = arith.constant 0 : i32
    %c0_i32_1 = arith.constant 0 : i32
    return %c0_i32, %c0_i32_0 : i32, i32
  }
}

module attributes {stable_mosaic.version = 11 : i64} {
  func.func @_itm_kernel(%arg0: i32, %arg1: memref<6x32xf32, #tpu.memory_space<vmem>>, %arg2: memref<32x2xf32, #tpu.memory_space<vmem>>, %arg3: memref<1x2xf32, #tpu.memory_space<vmem>>, %arg4: memref<1x1xf32, #tpu.memory_space<vmem>>) attributes {dimension_semantics = [#tpu.dimension_semantics<arbitrary>], iteration_bounds = array<i64: 1>, scalar_prefetch = 0 : i64, scratch_operands = 0 : i64, tpu.core_type = #tpu.core_type<tc>, window_params = [{pipeline_mode = #tpu.pipeline_mode<synchronous>, transform_indices = @transform_0, window_bounds = array<i64: 6, 32>}, {pipeline_mode = #tpu.pipeline_mode<synchronous>, transform_indices = @transform_1, window_bounds = array<i64: 32, 2>}, {pipeline_mode = #tpu.pipeline_mode<synchronous>, transform_indices = @transform_2, window_bounds = array<i64: 1, 2>}, {pipeline_mode = #tpu.pipeline_mode<synchronous>, transform_indices = @transform_3, window_bounds = array<i64: 1, 1>}]} {
    %c0 = arith.constant 0 : index
    %c0_0 = arith.constant 0 : index
    %0 = vector.load %arg1[%c0, %c0_0] : memref<6x32xf32, #tpu.memory_space<vmem>>, vector<6x32xf32>
    %c0_1 = arith.constant 0 : index
    %c0_2 = arith.constant 0 : index
    %1 = vector.load %arg2[%c0_1, %c0_2] : memref<32x2xf32, #tpu.memory_space<vmem>>, vector<32x2xf32>
    %cst = arith.constant dense<0.000000e+00> : vector<6x2xf32>
    %2 = tpu.matmul %0, %1, %cst {dimension_numbers = #tpu.dot_dimension_numbers<[1], [0], [0], [1], [0, 0, 1, 1], [], []>} : vector<6x32xf32>, vector<32x2xf32>, vector<6x2xf32> -> vector<6x2xf32>
    %c0_3 = arith.constant 0 : index
    %c0_4 = arith.constant 0 : index
    %3 = vector.load %arg3[%c0_3, %c0_4] : memref<1x2xf32, #tpu.memory_space<vmem>>, vector<1x2xf32>
    %4 = vector.broadcast %3 : vector<1x2xf32> to vector<6x2xf32>
    %5 = arith.addf %2, %4 : vector<6x2xf32>
    %cst_5 = arith.constant dense<0xFF800000> : vector<6xf32>
    %6 = vector.multi_reduction <maximumf>, %5, %cst_5 [1] : vector<6x2xf32> to vector<6xf32>
    %7 = vector.shape_cast %6 : vector<6xf32> to vector<6x1xf32>
    %8 = vector.broadcast %7 : vector<6x1xf32> to vector<6x2xf32>
    %9 = arith.subf %5, %8 : vector<6x2xf32>
    %10 = math.exp %9 : vector<6x2xf32>
    %cst_6 = arith.constant dense<0.000000e+00> : vector<6xf32>
    %11 = vector.multi_reduction <add>, %10, %cst_6 [1] : vector<6x2xf32> to vector<6xf32>
    %12 = vector.shape_cast %11 : vector<6xf32> to vector<6x1xf32>
    %13 = math.log %12 : vector<6x1xf32>
    %14 = vector.broadcast %13 : vector<6x1xf32> to vector<6x2xf32>
    %15 = arith.subf %9, %14 : vector<6x2xf32>
    %16 = tpu.iota {dimensions = array<i32: 0>} : vector<6x1xi32>
    %c2_i32 = arith.constant 2 : i32
    %17 = vector.broadcast %c2_i32 : i32 to vector<6x1xi32>
    %18 = arith.cmpi slt, %16, %17 : vector<6x1xi32>
    %19 = vector.extract_strided_slice %15 {offsets = [0, 1], sizes = [6, 1], strides = [1, 1]} : vector<6x2xf32> to vector<6x1xf32>
    %20 = vector.extract_strided_slice %15 {offsets = [0, 0], sizes = [6, 1], strides = [1, 1]} : vector<6x2xf32> to vector<6x1xf32>
    %21 = arith.select %18, %19, %20 : vector<6x1xi1>, vector<6x1xf32>
    %cst_7 = arith.constant dense<0.000000e+00> : vector<1xf32>
    %22 = vector.multi_reduction <add>, %21, %cst_7 [0] : vector<6x1xf32> to vector<1xf32>
    %23 = vector.shape_cast %22 : vector<1xf32> to vector<1x1xf32>
    %cst_8 = arith.constant 0.000000e+00 : f32
    %24 = vector.broadcast %cst_8 : f32 to vector<1x1xf32>
    %25 = arith.subf %24, %23 : vector<1x1xf32>
    %cst_9 = arith.constant 6.000000e+00 : f32
    %26 = vector.broadcast %cst_9 : f32 to vector<1x1xf32>
    %27 = arith.divf %25, %26 : vector<1x1xf32>
    %c0_10 = arith.constant 0 : index
    %c0_11 = arith.constant 0 : index
    %28 = vector.load %arg4[%c0_10, %c0_11] : memref<1x1xf32, #tpu.memory_space<vmem>>, vector<1x1xf32>
    tpu.vector_store %arg4[%c0_10, %c0_11], %27 {strides = array<i32>} : memref<1x1xf32, #tpu.memory_space<vmem>>, vector<1x1xf32>,
    return
  }
  func.func @transform_0(%arg0: i32) -> (i32, i32) {
    %c0_i32 = arith.constant 0 : i32
    %c0_i32_0 = arith.constant 0 : i32
    %c0_i32_1 = arith.constant 0 : i32
    return %c0_i32, %c0_i32_0 : i32, i32
  }
  func.func @transform_1(%arg0: i32) -> (i32, i32) {
    %c0_i32 = arith.constant 0 : i32
    %c0_i32_0 = arith.constant 0 : i32
    %c0_i32_1 = arith.constant 0 : i32
    return %c0_i32, %c0_i32_0 : i32, i32
  }
  func.func @transform_2(%arg0: i32) -> (i32, i32) {
    %c0_i32 = arith.constant 0 : i32
    %c0_i32_0 = arith.constant 0 : i32
    %c0_i32_1 = arith.constant 0 : i32
    return %c0_i32, %c0_i32_0 : i32, i32
  }
  func.func @transform_3(%arg0: i32) -> (i32, i32) {
    %c0_i32 = arith.constant 0 : i32
    %c0_i32_0 = arith.constant 0 : i32
    %c0_i32_1 = arith.constant 0 : i32
    return %c0_i32, %c0_i32_0 : i32, i32
  }
}

module attributes {stable_mosaic.version = 11 : i64} {
  func.func @_bert_layer_kernel(%arg0: i32, %arg1: memref<16x32xf32, #tpu.memory_space<vmem>>, %arg2: memref<16x16xf32, #tpu.memory_space<vmem>>, %arg3: memref<10x32xf32, #tpu.memory_space<vmem>>, %arg4: memref<16x10xf32, #tpu.memory_space<vmem>>, %arg5: memref<1x32xf32, #tpu.memory_space<vmem>>, %arg6: memref<1x32xf32, #tpu.memory_space<vmem>>, %arg7: memref<32x96xf32, #tpu.memory_space<vmem>>, %arg8: memref<1x96xf32, #tpu.memory_space<vmem>>, %arg9: memref<32x32xf32, #tpu.memory_space<vmem>>, %arg10: memref<1x32xf32, #tpu.memory_space<vmem>>, %arg11: memref<1x32xf32, #tpu.memory_space<vmem>>, %arg12: memref<1x32xf32, #tpu.memory_space<vmem>>, %arg13: memref<32x32xf32, #tpu.memory_space<vmem>>, %arg14: memref<1x32xf32, #tpu.memory_space<vmem>>, %arg15: memref<32x64xf32, #tpu.memory_space<vmem>>, %arg16: memref<1x64xf32, #tpu.memory_space<vmem>>, %arg17: memref<32x32xf32, #tpu.memory_space<vmem>>, %arg18: memref<1x32xf32, #tpu.memory_space<vmem>>, %arg19: memref<1x32xf32, #tpu.memory_space<vmem>>, %arg20: memref<1x32xf32, #tpu.memory_space<vmem>>, %arg21: memref<32x64xf32, #tpu.memory_space<vmem>>, %arg22: memref<1x64xf32, #tpu.memory_space<vmem>>, %arg23: memref<64x32xf32, #tpu.memory_space<vmem>>, %arg24: memref<1x32xf32, #tpu.memory_space<vmem>>, %arg25: memref<1x32xf32, #tpu.memory_space<vmem>>, %arg26: memref<1x32xf32, #tpu.memory_space<vmem>>, %arg27: memref<16x32xf32, #tpu.memory_space<vmem>>) attributes {dimension_semantics = [#tpu.dimension_semantics<arbitrary>], iteration_bounds = array<i64: 1>, scalar_prefetch = 0 : i64, scratch_operands = 0 : i64, tpu.core_type = #tpu.core_type<tc>, window_params = [{pipeline_mode = #tpu.pipeline_mode<synchronous>, transform_indices = @transform_0, window_bounds = array<i64: 16, 32>}, {pipeline_mode = #tpu.pipeline_mode<synchronous>, transform_indices = @transform_1, window_bounds = array<i64: 16, 16>}, {pipeline_mode = #tpu.pipeline_mode<synchronous>, transform_indices = @transform_2, window_bounds = array<i64: 10, 32>}, {pipeline_mode = #tpu.pipeline_mode<synchronous>, transform_indices = @transform_3, window_bounds = array<i64: 16, 10>}, {pipeline_mode = #tpu.pipeline_mode<synchronous>, transform_indices = @transform_4, window_bounds = array<i64: 1, 32>}, {pipeline_mode = #tpu.pipeline_mode<synchronous>, transform_indices = @transform_5, window_bounds = array<i64: 1, 32>}, {pipeline_mode = #tpu.pipeline_mode<synchronous>, transform_indices = @transform_6, window_bounds = array<i64: 32, 96>}, {pipeline_mode = #tpu.pipeline_mode<synchronous>, transform_indices = @transform_7, window_bounds = array<i64: 1, 96>}, {pipeline_mode = #tpu.pipeline_mode<synchronous>, transform_indices = @transform_8, window_bounds = array<i64: 32, 32>}, {pipeline_mode = #tpu.pipeline_mode<synchronous>, transform_indices = @transform_9, window_bounds = array<i64: 1, 32>}, {pipeline_mode = #tpu.pipeline_mode<synchronous>, transform_indices = @transform_10, window_bounds = array<i64: 1, 32>}, {pipeline_mode = #tpu.pipeline_mode<synchronous>, transform_indices = @transform_11, window_bounds = array<i64: 1, 32>}, {pipeline_mode = #tpu.pipeline_mode<synchronous>, transform_indices = @transform_12, window_bounds = array<i64: 32, 32>}, {pipeline_mode = #tpu.pipeline_mode<synchronous>, transform_indices = @transform_13, window_bounds = array<i64: 1, 32>}, {pipeline_mode = #tpu.pipeline_mode<synchronous>, transform_indices = @transform_14, window_bounds = array<i64: 32, 64>}, {pipeline_mode = #tpu.pipeline_mode<synchronous>, transform_indices = @transform_15, window_bounds = array<i64: 1, 64>}, {pipeline_mode = #tpu.pipeline_mode<synchronous>, transform_indices = @transform_16, window_bounds = array<i64: 32, 32>}, {pipeline_mode = #tpu.pipeline_mode<synchronous>, transform_indices = @transform_17, window_bounds = array<i64: 1, 32>}, {pipeline_mode = #tpu.pipeline_mode<synchronous>, transform_indices = @transform_18, window_bounds = array<i64: 1, 32>}, {pipeline_mode = #tpu.pipeline_mode<synchronous>, transform_indices = @transform_19, window_bounds = array<i64: 1, 32>}, {pipeline_mode = #tpu.pipeline_mode<synchronous>, transform_indices = @transform_20, window_bounds = array<i64: 32, 64>}, {pipeline_mode = #tpu.pipeline_mode<synchronous>, transform_indices = @transform_21, window_bounds = array<i64: 1, 64>}, {pipeline_mode = #tpu.pipeline_mode<synchronous>, transform_indices = @transform_22, window_bounds = array<i64: 64, 32>}, {pipeline_mode = #tpu.pipeline_mode<synchronous>, transform_indices = @transform_23, window_bounds = array<i64: 1, 32>}, {pipeline_mode = #tpu.pipeline_mode<synchronous>, transform_indices = @transform_24, window_bounds = array<i64: 1, 32>}, {pipeline_mode = #tpu.pipeline_mode<synchronous>, transform_indices = @transform_25, window_bounds = array<i64: 1, 32>}, {pipeline_mode = #tpu.pipeline_mode<synchronous>, transform_indices = @transform_26, window_bounds = array<i64: 16, 32>}]} {
    %c0 = arith.constant 0 : index
    %c0_0 = arith.constant 0 : index
    %0 = vector.load %arg1[%c0, %c0_0] : memref<16x32xf32, #tpu.memory_space<vmem>>, vector<16x32xf32>
    %c0_1 = arith.constant 0 : index
    %c0_2 = arith.constant 0 : index
    %1 = vector.load %arg5[%c0_1, %c0_2] : memref<1x32xf32, #tpu.memory_space<vmem>>, vector<1x32xf32>
    %c0_3 = arith.constant 0 : index
    %c0_4 = arith.constant 0 : index
    %2 = vector.load %arg6[%c0_3, %c0_4] : memref<1x32xf32, #tpu.memory_space<vmem>>, vector<1x32xf32>
    %cst = arith.constant dense<0.000000e+00> : vector<16xf32>
    %3 = vector.multi_reduction <add>, %0, %cst [1] : vector<16x32xf32> to vector<16xf32>
    %4 = vector.shape_cast %3 : vector<16xf32> to vector<16x1xf32>
    %cst_5 = arith.constant 3.200000e+01 : f32
    %5 = vector.broadcast %cst_5 : f32 to vector<16x1xf32>
    %6 = arith.divf %4, %5 : vector<16x1xf32>
    %7 = vector.broadcast %6 : vector<16x1xf32> to vector<16x32xf32>
    %8 = arith.subf %0, %7 : vector<16x32xf32>
    %9 = arith.mulf %8, %8 : vector<16x32xf32>
    %cst_6 = arith.constant dense<0.000000e+00> : vector<16xf32>
    %10 = vector.multi_reduction <add>, %9, %cst_6 [1] : vector<16x32xf32> to vector<16xf32>
    %11 = vector.shape_cast %10 : vector<16xf32> to vector<16x1xf32>
    %cst_7 = arith.constant 3.200000e+01 : f32
    %12 = vector.broadcast %cst_7 : f32 to vector<16x1xf32>
    %13 = arith.divf %11, %12 : vector<16x1xf32>
    %14 = vector.broadcast %6 : vector<16x1xf32> to vector<16x32xf32>
    %15 = arith.subf %0, %14 : vector<16x32xf32>
    %cst_8 = arith.constant 9.99999996E-13 : f32
    %16 = vector.broadcast %cst_8 : f32 to vector<16x1xf32>
    %17 = arith.addf %13, %16 : vector<16x1xf32>
    %18 = math.rsqrt %17 : vector<16x1xf32>
    %19 = vector.broadcast %18 : vector<16x1xf32> to vector<16x32xf32>
    %20 = arith.mulf %15, %19 : vector<16x32xf32>
    %21 = vector.broadcast %1 : vector<1x32xf32> to vector<16x32xf32>
    %22 = arith.mulf %20, %21 : vector<16x32xf32>
    %23 = vector.broadcast %2 : vector<1x32xf32> to vector<16x32xf32>
    %24 = arith.addf %22, %23 : vector<16x32xf32>
    %c0_9 = arith.constant 0 : index
    %c0_10 = arith.constant 0 : index
    %25 = vector.load %arg7[%c0_9, %c0_10] : memref<32x96xf32, #tpu.memory_space<vmem>>, vector<32x96xf32>
    %26 = arith.truncf %24 : vector<16x32xf32> to vector<16x32xbf16>
    %27 = arith.truncf %25 : vector<32x96xf32> to vector<32x96xbf16>
    %cst_11 = arith.constant dense<0.000000e+00> : vector<16x96xf32>
    %28 = tpu.matmul %26, %27, %cst_11 {dimension_numbers = #tpu.dot_dimension_numbers<[1], [0], [0], [1], [0, 0, 1, 1], [], []>} : vector<16x32xbf16>, vector<32x96xbf16>, vector<16x96xf32> -> vector<16x96xf32>
    %c0_12 = arith.constant 0 : index
    %c0_13 = arith.constant 0 : index
    %29 = vector.load %arg8[%c0_12, %c0_13] : memref<1x96xf32, #tpu.memory_space<vmem>>, vector<1x96xf32>
    %30 = vector.broadcast %29 : vector<1x96xf32> to vector<16x96xf32>
    %31 = arith.addf %28, %30 : vector<16x96xf32>
    %32 = vector.extract_strided_slice %31 {offsets = [0, 0], sizes = [16, 32], strides = [1, 1]} : vector<16x96xf32> to vector<16x32xf32>
    %33 = vector.extract_strided_slice %31 {offsets = [0, 32], sizes = [16, 32], strides = [1, 1]} : vector<16x96xf32> to vector<16x32xf32>
    %34 = vector.extract_strided_slice %31 {offsets = [0, 64], sizes = [16, 32], strides = [1, 1]} : vector<16x96xf32> to vector<16x32xf32>
    %c0_14 = arith.constant 0 : index
    %c0_15 = arith.constant 0 : index
    %35 = vector.load %arg2[%c0_14, %c0_15] : memref<16x16xf32, #tpu.memory_space<vmem>>, vector<16x16xf32>
    %36 = vector.extract_strided_slice %32 {offsets = [0, 0], sizes = [16, 16], strides = [1, 1]} : vector<16x32xf32> to vector<16x16xf32>
    %37 = vector.extract_strided_slice %33 {offsets = [0, 0], sizes = [16, 16], strides = [1, 1]} : vector<16x32xf32> to vector<16x16xf32>
    %38 = vector.extract_strided_slice %34 {offsets = [0, 0], sizes = [16, 16], strides = [1, 1]} : vector<16x32xf32> to vector<16x16xf32>
    %39 = arith.truncf %36 : vector<16x16xf32> to vector<16x16xbf16>
    %40 = arith.truncf %37 : vector<16x16xf32> to vector<16x16xbf16>
    %cst_16 = arith.constant dense<0.000000e+00> : vector<16x16xf32>
    %41 = tpu.matmul %39, %40, %cst_16 {dimension_numbers = #tpu.dot_dimension_numbers<[1], [1], [0], [0], [0, 0, 1, 0], [], []>} : vector<16x16xbf16>, vector<16x16xbf16>, vector<16x16xf32> -> vector<16x16xf32>
    %cst_17 = arith.constant 2.500000e-01 : f32
    %42 = vector.broadcast %cst_17 : f32 to vector<16x16xf32>
    %43 = arith.mulf %41, %42 : vector<16x16xf32>
    %44 = arith.addf %43, %35 : vector<16x16xf32>
    %cst_18 = arith.constant dense<0xFF800000> : vector<16xf32>
    %45 = vector.multi_reduction <maximumf>, %44, %cst_18 [1] : vector<16x16xf32> to vector<16xf32>
    %46 = vector.shape_cast %45 : vector<16xf32> to vector<16x1xf32>
    %47 = vector.broadcast %46 : vector<16x1xf32> to vector<16x16xf32>
    %48 = arith.subf %44, %47 : vector<16x16xf32>
    %49 = math.exp %48 : vector<16x16xf32>
    %cst_19 = arith.constant dense<0.000000e+00> : vector<16xf32>
    %50 = vector.multi_reduction <add>, %49, %cst_19 [1] : vector<16x16xf32> to vector<16xf32>
    %51 = vector.shape_cast %50 : vector<16xf32> to vector<16x1xf32>
    %52 = tpu.reciprocal %51 {approx = true} : vector<16x1xf32> -> vector<16x1xf32>
    %53 = vector.broadcast %52 : vector<16x1xf32> to vector<16x16xf32>
    %54 = arith.mulf %49, %53 : vector<16x16xf32>
    %55 = arith.truncf %54 : vector<16x16xf32> to vector<16x16xbf16>
    %56 = arith.truncf %38 : vector<16x16xf32> to vector<16x16xbf16>
    %cst_20 = arith.constant dense<0.000000e+00> : vector<16x16xf32>
    %57 = tpu.matmul %55, %56, %cst_20 {dimension_numbers = #tpu.dot_dimension_numbers<[1], [0], [0], [1], [0, 0, 1, 1], [], []>} : vector<16x16xbf16>, vector<16x16xbf16>, vector<16x16xf32> -> vector<16x16xf32>
    %58 = vector.extract_strided_slice %32 {offsets = [0, 16], sizes = [16, 16], strides = [1, 1]} : vector<16x32xf32> to vector<16x16xf32>
    %59 = vector.extract_strided_slice %33 {offsets = [0, 16], sizes = [16, 16], strides = [1, 1]} : vector<16x32xf32> to vector<16x16xf32>
    %60 = vector.extract_strided_slice %34 {offsets = [0, 16], sizes = [16, 16], strides = [1, 1]} : vector<16x32xf32> to vector<16x16xf32>
    %61 = arith.truncf %58 : vector<16x16xf32> to vector<16x16xbf16>
    %62 = arith.truncf %59 : vector<16x16xf32> to vector<16x16xbf16>
    %cst_21 = arith.constant dense<0.000000e+00> : vector<16x16xf32>
    %63 = tpu.matmul %61, %62, %cst_21 {dimension_numbers = #tpu.dot_dimension_numbers<[1], [1], [0], [0], [0, 0, 1, 0], [], []>} : vector<16x16xbf16>, vector<16x16xbf16>, vector<16x16xf32> -> vector<16x16xf32>
    %cst_22 = arith.constant 2.500000e-01 : f32
    %64 = vector.broadcast %cst_22 : f32 to vector<16x16xf32>
    %65 = arith.mulf %63, %64 : vector<16x16xf32>
    %66 = arith.addf %65, %35 : vector<16x16xf32>
    %cst_23 = arith.constant dense<0xFF800000> : vector<16xf32>
    %67 = vector.multi_reduction <maximumf>, %66, %cst_23 [1] : vector<16x16xf32> to vector<16xf32>
    %68 = vector.shape_cast %67 : vector<16xf32> to vector<16x1xf32>
    %69 = vector.broadcast %68 : vector<16x1xf32> to vector<16x16xf32>
    %70 = arith.subf %66, %69 : vector<16x16xf32>
    %71 = math.exp %70 : vector<16x16xf32>
    %cst_24 = arith.constant dense<0.000000e+00> : vector<16xf32>
    %72 = vector.multi_reduction <add>, %71, %cst_24 [1] : vector<16x16xf32> to vector<16xf32>
    %73 = vector.shape_cast %72 : vector<16xf32> to vector<16x1xf32>
    %74 = tpu.reciprocal %73 {approx = true} : vector<16x1xf32> -> vector<16x1xf32>
    %75 = vector.broadcast %74 : vector<16x1xf32> to vector<16x16xf32>
    %76 = arith.mulf %71, %75 : vector<16x16xf32>
    %77 = arith.truncf %76 : vector<16x16xf32> to vector<16x16xbf16>
    %78 = arith.truncf %60 : vector<16x16xf32> to vector<16x16xbf16>
    %cst_25 = arith.constant dense<0.000000e+00> : vector<16x16xf32>
    %79 = tpu.matmul %77, %78, %cst_25 {dimension_numbers = #tpu.dot_dimension_numbers<[1], [0], [0], [1], [0, 0, 1, 1], [], []>} : vector<16x16xbf16>, vector<16x16xbf16>, vector<16x16xf32> -> vector<16x16xf32>
    %80 = tpu.concatenate %57, %79 in 1 : vector<16x16xf32>, vector<16x16xf32> -> vector<16x32xf32>
    %c0_26 = arith.constant 0 : index
    %c0_27 = arith.constant 0 : index
    %81 = vector.load %arg9[%c0_26, %c0_27] : memref<32x32xf32, #tpu.memory_space<vmem>>, vector<32x32xf32>
    %82 = arith.truncf %80 : vector<16x32xf32> to vector<16x32xbf16>
    %83 = arith.truncf %81 : vector<32x32xf32> to vector<32x32xbf16>
    %cst_28 = arith.constant dense<0.000000e+00> : vector<16x32xf32>
    %84 = tpu.matmul %82, %83, %cst_28 {dimension_numbers = #tpu.dot_dimension_numbers<[1], [0], [0], [1], [0, 0, 1, 1], [], []>} : vector<16x32xbf16>, vector<32x32xbf16>, vector<16x32xf32> -> vector<16x32xf32>
    %85 = arith.addf %24, %84 : vector<16x32xf32>
    %c0_29 = arith.constant 0 : index
    %c0_30 = arith.constant 0 : index
    %86 = vector.load %arg10[%c0_29, %c0_30] : memref<1x32xf32, #tpu.memory_space<vmem>>, vector<1x32xf32>
    %87 = vector.broadcast %86 : vector<1x32xf32> to vector<16x32xf32>
    %88 = arith.addf %85, %87 : vector<16x32xf32>
    %c0_31 = arith.constant 0 : index
    %c0_32 = arith.constant 0 : index
    %89 = vector.load %arg11[%c0_31, %c0_32] : memref<1x32xf32, #tpu.memory_space<vmem>>, vector<1x32xf32>
    %c0_33 = arith.constant 0 : index
    %c0_34 = arith.constant 0 : index
    %90 = vector.load %arg12[%c0_33, %c0_34] : memref<1x32xf32, #tpu.memory_space<vmem>>, vector<1x32xf32>
    %cst_35 = arith.constant dense<0.000000e+00> : vector<16xf32>
    %91 = vector.multi_reduction <add>, %88, %cst_35 [1] : vector<16x32xf32> to vector<16xf32>
    %92 = vector.shape_cast %91 : vector<16xf32> to vector<16x1xf32>
    %cst_36 = arith.constant 3.200000e+01 : f32
    %93 = vector.broadcast %cst_36 : f32 to vector<16x1xf32>
    %94 = arith.divf %92, %93 : vector<16x1xf32>
    %95 = vector.broadcast %94 : vector<16x1xf32> to vector<16x32xf32>
    %96 = arith.subf %88, %95 : vector<16x32xf32>
    %97 = arith.mulf %96, %96 : vector<16x32xf32>
    %cst_37 = arith.constant dense<0.000000e+00> : vector<16xf32>
    %98 = vector.multi_reduction <add>, %97, %cst_37 [1] : vector<16x32xf32> to vector<16xf32>
    %99 = vector.shape_cast %98 : vector<16xf32> to vector<16x1xf32>
    %cst_38 = arith.constant 3.200000e+01 : f32
    %100 = vector.broadcast %cst_38 : f32 to vector<16x1xf32>
    %101 = arith.divf %99, %100 : vector<16x1xf32>
    %102 = vector.broadcast %94 : vector<16x1xf32> to vector<16x32xf32>
    %103 = arith.subf %88, %102 : vector<16x32xf32>
    %cst_39 = arith.constant 9.99999996E-13 : f32
    %104 = vector.broadcast %cst_39 : f32 to vector<16x1xf32>
    %105 = arith.addf %101, %104 : vector<16x1xf32>
    %106 = math.rsqrt %105 : vector<16x1xf32>
    %107 = vector.broadcast %106 : vector<16x1xf32> to vector<16x32xf32>
    %108 = arith.mulf %103, %107 : vector<16x32xf32>
    %109 = vector.broadcast %89 : vector<1x32xf32> to vector<16x32xf32>
    %110 = arith.mulf %108, %109 : vector<16x32xf32>
    %111 = vector.broadcast %90 : vector<1x32xf32> to vector<16x32xf32>
    %112 = arith.addf %110, %111 : vector<16x32xf32>
    %c0_40 = arith.constant 0 : index
    %c0_41 = arith.constant 0 : index
    %113 = vector.load %arg3[%c0_40, %c0_41] : memref<10x32xf32, #tpu.memory_space<vmem>>, vector<10x32xf32>
    %c0_42 = arith.constant 0 : index
    %c0_43 = arith.constant 0 : index
    %114 = vector.load %arg13[%c0_42, %c0_43] : memref<32x32xf32, #tpu.memory_space<vmem>>, vector<32x32xf32>
    %115 = arith.truncf %112 : vector<16x32xf32> to vector<16x32xbf16>
    %116 = arith.truncf %114 : vector<32x32xf32> to vector<32x32xbf16>
    %cst_44 = arith.constant dense<0.000000e+00> : vector<16x32xf32>
    %117 = tpu.matmul %115, %116, %cst_44 {dimension_numbers = #tpu.dot_dimension_numbers<[1], [0], [0], [1], [0, 0, 1, 1], [], []>} : vector<16x32xbf16>, vector<32x32xbf16>, vector<16x32xf32> -> vector<16x32xf32>
    %c0_45 = arith.constant 0 : index
    %c0_46 = arith.constant 0 : index
    %118 = vector.load %arg14[%c0_45, %c0_46] : memref<1x32xf32, #tpu.memory_space<vmem>>, vector<1x32xf32>
    %119 = vector.broadcast %118 : vector<1x32xf32> to vector<16x32xf32>
    %120 = arith.addf %117, %119 : vector<16x32xf32>
    %c0_47 = arith.constant 0 : index
    %c0_48 = arith.constant 0 : index
    %121 = vector.load %arg15[%c0_47, %c0_48] : memref<32x64xf32, #tpu.memory_space<vmem>>, vector<32x64xf32>
    %122 = arith.truncf %113 : vector<10x32xf32> to vector<10x32xbf16>
    %123 = arith.truncf %121 : vector<32x64xf32> to vector<32x64xbf16>
    %cst_49 = arith.constant dense<0.000000e+00> : vector<10x64xf32>
    %124 = tpu.matmul %122, %123, %cst_49 {dimension_numbers = #tpu.dot_dimension_numbers<[1], [0], [0], [1], [0, 0, 1, 1], [], []>} : vector<10x32xbf16>, vector<32x64xbf16>, vector<10x64xf32> -> vector<10x64xf32>
    %c0_50 = arith.constant 0 : index
    %c0_51 = arith.constant 0 : index
    %125 = vector.load %arg16[%c0_50, %c0_51] : memref<1x64xf32, #tpu.memory_space<vmem>>, vector<1x64xf32>
    %126 = vector.broadcast %125 : vector<1x64xf32> to vector<10x64xf32>
    %127 = arith.addf %124, %126 : vector<10x64xf32>
    %128 = vector.extract_strided_slice %127 {offsets = [0, 0], sizes = [10, 32], strides = [1, 1]} : vector<10x64xf32> to vector<10x32xf32>
    %129 = vector.extract_strided_slice %127 {offsets = [0, 32], sizes = [10, 32], strides = [1, 1]} : vector<10x64xf32> to vector<10x32xf32>
    %c0_52 = arith.constant 0 : index
    %c0_53 = arith.constant 0 : index
    %130 = vector.load %arg4[%c0_52, %c0_53] : memref<16x10xf32, #tpu.memory_space<vmem>>, vector<16x10xf32>
    %131 = vector.extract_strided_slice %120 {offsets = [0, 0], sizes = [16, 16], strides = [1, 1]} : vector<16x32xf32> to vector<16x16xf32>
    %132 = vector.extract_strided_slice %128 {offsets = [0, 0], sizes = [10, 16], strides = [1, 1]} : vector<10x32xf32> to vector<10x16xf32>
    %133 = vector.extract_strided_slice %129 {offsets = [0, 0], sizes = [10, 16], strides = [1, 1]} : vector<10x32xf32> to vector<10x16xf32>
    %134 = arith.truncf %131 : vector<16x16xf32> to vector<16x16xbf16>
    %135 = arith.truncf %132 : vector<10x16xf32> to vector<10x16xbf16>
    %cst_54 = arith.constant dense<0.000000e+00> : vector<16x10xf32>
    %136 = tpu.matmul %134, %135, %cst_54 {dimension_numbers = #tpu.dot_dimension_numbers<[1], [1], [0], [0], [0, 0, 1, 0], [], []>} : vector<16x16xbf16>, vector<10x16xbf16>, vector<16x10xf32> -> vector<16x10xf32>
    %cst_55 = arith.constant 2.500000e-01 : f32
    %137 = vector.broadcast %cst_55 : f32 to vector<16x10xf32>
    %138 = arith.mulf %136, %137 : vector<16x10xf32>
    %139 = arith.addf %138, %130 : vector<16x10xf32>
    %cst_56 = arith.constant dense<0xFF800000> : vector<16xf32>
    %140 = vector.multi_reduction <maximumf>, %139, %cst_56 [1] : vector<16x10xf32> to vector<16xf32>
    %141 = vector.shape_cast %140 : vector<16xf32> to vector<16x1xf32>
    %142 = vector.broadcast %141 : vector<16x1xf32> to vector<16x10xf32>
    %143 = arith.subf %139, %142 : vector<16x10xf32>
    %144 = math.exp %143 : vector<16x10xf32>
    %cst_57 = arith.constant dense<0.000000e+00> : vector<16xf32>
    %145 = vector.multi_reduction <add>, %144, %cst_57 [1] : vector<16x10xf32> to vector<16xf32>
    %146 = vector.shape_cast %145 : vector<16xf32> to vector<16x1xf32>
    %147 = tpu.reciprocal %146 {approx = true} : vector<16x1xf32> -> vector<16x1xf32>
    %148 = vector.broadcast %147 : vector<16x1xf32> to vector<16x10xf32>
    %149 = arith.mulf %144, %148 : vector<16x10xf32>
    %150 = arith.truncf %149 : vector<16x10xf32> to vector<16x10xbf16>
    %151 = arith.truncf %133 : vector<10x16xf32> to vector<10x16xbf16>
    %cst_58 = arith.constant dense<0.000000e+00> : vector<16x16xf32>
    %152 = tpu.matmul %150, %151, %cst_58 {dimension_numbers = #tpu.dot_dimension_numbers<[1], [0], [0], [1], [0, 0, 1, 1], [], []>} : vector<16x10xbf16>, vector<10x16xbf16>, vector<16x16xf32> -> vector<16x16xf32>
    %153 = vector.extract_strided_slice %120 {offsets = [0, 16], sizes = [16, 16], strides = [1, 1]} : vector<16x32xf32> to vector<16x16xf32>
    %154 = vector.extract_strided_slice %128 {offsets = [0, 16], sizes = [10, 16], strides = [1, 1]} : vector<10x32xf32> to vector<10x16xf32>
    %155 = vector.extract_strided_slice %129 {offsets = [0, 16], sizes = [10, 16], strides = [1, 1]} : vector<10x32xf32> to vector<10x16xf32>
    %156 = arith.truncf %153 : vector<16x16xf32> to vector<16x16xbf16>
    %157 = arith.truncf %154 : vector<10x16xf32> to vector<10x16xbf16>
    %cst_59 = arith.constant dense<0.000000e+00> : vector<16x10xf32>
    %158 = tpu.matmul %156, %157, %cst_59 {dimension_numbers = #tpu.dot_dimension_numbers<[1], [1], [0], [0], [0, 0, 1, 0], [], []>} : vector<16x16xbf16>, vector<10x16xbf16>, vector<16x10xf32> -> vector<16x10xf32>
    %cst_60 = arith.constant 2.500000e-01 : f32
    %159 = vector.broadcast %cst_60 : f32 to vector<16x10xf32>
    %160 = arith.mulf %158, %159 : vector<16x10xf32>
    %161 = arith.addf %160, %130 : vector<16x10xf32>
    %cst_61 = arith.constant dense<0xFF800000> : vector<16xf32>
    %162 = vector.multi_reduction <maximumf>, %161, %cst_61 [1] : vector<16x10xf32> to vector<16xf32>
    %163 = vector.shape_cast %162 : vector<16xf32> to vector<16x1xf32>
    %164 = vector.broadcast %163 : vector<16x1xf32> to vector<16x10xf32>
    %165 = arith.subf %161, %164 : vector<16x10xf32>
    %166 = math.exp %165 : vector<16x10xf32>
    %cst_62 = arith.constant dense<0.000000e+00> : vector<16xf32>
    %167 = vector.multi_reduction <add>, %166, %cst_62 [1] : vector<16x10xf32> to vector<16xf32>
    %168 = vector.shape_cast %167 : vector<16xf32> to vector<16x1xf32>
    %169 = tpu.reciprocal %168 {approx = true} : vector<16x1xf32> -> vector<16x1xf32>
    %170 = vector.broadcast %169 : vector<16x1xf32> to vector<16x10xf32>
    %171 = arith.mulf %166, %170 : vector<16x10xf32>
    %172 = arith.truncf %171 : vector<16x10xf32> to vector<16x10xbf16>
    %173 = arith.truncf %155 : vector<10x16xf32> to vector<10x16xbf16>
    %cst_63 = arith.constant dense<0.000000e+00> : vector<16x16xf32>
    %174 = tpu.matmul %172, %173, %cst_63 {dimension_numbers = #tpu.dot_dimension_numbers<[1], [0], [0], [1], [0, 0, 1, 1], [], []>} : vector<16x10xbf16>, vector<10x16xbf16>, vector<16x16xf32> -> vector<16x16xf32>
    %175 = tpu.concatenate %152, %174 in 1 : vector<16x16xf32>, vector<16x16xf32> -> vector<16x32xf32>
    %c0_64 = arith.constant 0 : index
    %c0_65 = arith.constant 0 : index
    %176 = vector.load %arg17[%c0_64, %c0_65] : memref<32x32xf32, #tpu.memory_space<vmem>>, vector<32x32xf32>
    %177 = arith.truncf %175 : vector<16x32xf32> to vector<16x32xbf16>
    %178 = arith.truncf %176 : vector<32x32xf32> to vector<32x32xbf16>
    %cst_66 = arith.constant dense<0.000000e+00> : vector<16x32xf32>
    %179 = tpu.matmul %177, %178, %cst_66 {dimension_numbers = #tpu.dot_dimension_numbers<[1], [0], [0], [1], [0, 0, 1, 1], [], []>} : vector<16x32xbf16>, vector<32x32xbf16>, vector<16x32xf32> -> vector<16x32xf32>
    %180 = arith.addf %112, %179 : vector<16x32xf32>
    %c0_67 = arith.constant 0 : index
    %c0_68 = arith.constant 0 : index
    %181 = vector.load %arg18[%c0_67, %c0_68] : memref<1x32xf32, #tpu.memory_space<vmem>>, vector<1x32xf32>
    %182 = vector.broadcast %181 : vector<1x32xf32> to vector<16x32xf32>
    %183 = arith.addf %180, %182 : vector<16x32xf32>
    %c0_69 = arith.constant 0 : index
    %c0_70 = arith.constant 0 : index
    %184 = vector.load %arg19[%c0_69, %c0_70] : memref<1x32xf32, #tpu.memory_space<vmem>>, vector<1x32xf32>
    %c0_71 = arith.constant 0 : index
    %c0_72 = arith.constant 0 : index
    %185 = vector.load %arg20[%c0_71, %c0_72] : memref<1x32xf32, #tpu.memory_space<vmem>>, vector<1x32xf32>
    %cst_73 = arith.constant dense<0.000000e+00> : vector<16xf32>
    %186 = vector.multi_reduction <add>, %183, %cst_73 [1] : vector<16x32xf32> to vector<16xf32>
    %187 = vector.shape_cast %186 : vector<16xf32> to vector<16x1xf32>
    %cst_74 = arith.constant 3.200000e+01 : f32
    %188 = vector.broadcast %cst_74 : f32 to vector<16x1xf32>
    %189 = arith.divf %187, %188 : vector<16x1xf32>
    %190 = vector.broadcast %189 : vector<16x1xf32> to vector<16x32xf32>
    %191 = arith.subf %183, %190 : vector<16x32xf32>
    %192 = arith.mulf %191, %191 : vector<16x32xf32>
    %cst_75 = arith.constant dense<0.000000e+00> : vector<16xf32>
    %193 = vector.multi_reduction <add>, %192, %cst_75 [1] : vector<16x32xf32> to vector<16xf32>
    %194 = vector.shape_cast %193 : vector<16xf32> to vector<16x1xf32>
    %cst_76 = arith.constant 3.200000e+01 : f32
    %195 = vector.broadcast %cst_76 : f32 to vector<16x1xf32>
    %196 = arith.divf %194, %195 : vector<16x1xf32>
    %197 = vector.broadcast %189 : vector<16x1xf32> to vector<16x32xf32>
    %198 = arith.subf %183, %197 : vector<16x32xf32>
    %cst_77 = arith.constant 9.99999996E-13 : f32
    %199 = vector.broadcast %cst_77 : f32 to vector<16x1xf32>
    %200 = arith.addf %196, %199 : vector<16x1xf32>
    %201 = math.rsqrt %200 : vector<16x1xf32>
    %202 = vector.broadcast %201 : vector<16x1xf32> to vector<16x32xf32>
    %203 = arith.mulf %198, %202 : vector<16x32xf32>
    %204 = vector.broadcast %184 : vector<1x32xf32> to vector<16x32xf32>
    %205 = arith.mulf %203, %204 : vector<16x32xf32>
    %206 = vector.broadcast %185 : vector<1x32xf32> to vector<16x32xf32>
    %207 = arith.addf %205, %206 : vector<16x32xf32>
    %c0_78 = arith.constant 0 : index
    %c0_79 = arith.constant 0 : index
    %208 = vector.load %arg21[%c0_78, %c0_79] : memref<32x64xf32, #tpu.memory_space<vmem>>, vector<32x64xf32>
    %209 = arith.truncf %207 : vector<16x32xf32> to vector<16x32xbf16>
    %210 = arith.truncf %208 : vector<32x64xf32> to vector<32x64xbf16>
    %cst_80 = arith.constant dense<0.000000e+00> : vector<16x64xf32>
    %211 = tpu.matmul %209, %210, %cst_80 {dimension_numbers = #tpu.dot_dimension_numbers<[1], [0], [0], [1], [0, 0, 1, 1], [], []>} : vector<16x32xbf16>, vector<32x64xbf16>, vector<16x64xf32> -> vector<16x64xf32>
    %c0_81 = arith.constant 0 : index
    %c0_82 = arith.constant 0 : index
    %212 = vector.load %arg22[%c0_81, %c0_82] : memref<1x64xf32, #tpu.memory_space<vmem>>, vector<1x64xf32>
    %213 = vector.broadcast %212 : vector<1x64xf32> to vector<16x64xf32>
    %214 = arith.addf %211, %213 : vector<16x64xf32>
    %215 = arith.mulf %214, %214 : vector<16x64xf32>
    %216 = arith.mulf %214, %215 : vector<16x64xf32>
    %cst_83 = arith.constant 4.471500e-02 : f32
    %217 = vector.broadcast %cst_83 : f32 to vector<16x64xf32>
    %218 = arith.mulf %217, %216 : vector<16x64xf32>
    %219 = arith.addf %214, %218 : vector<16x64xf32>
    %cst_84 = arith.constant 0.797884583 : f32
    %220 = vector.broadcast %cst_84 : f32 to vector<16x64xf32>
    %221 = arith.mulf %220, %219 : vector<16x64xf32>
    %222 = math.tanh %221 : vector<16x64xf32>
    %cst_85 = arith.constant 1.000000e+00 : f32
    %223 = vector.broadcast %cst_85 : f32 to vector<16x64xf32>
    %224 = arith.addf %223, %222 : vector<16x64xf32>
    %cst_86 = arith.constant 5.000000e-01 : f32
    %225 = vector.broadcast %cst_86 : f32 to vector<16x64xf32>
    %226 = arith.mulf %225, %224 : vector<16x64xf32>
    %227 = arith.mulf %214, %226 : vector<16x64xf32>
    %c0_87 = arith.constant 0 : index
    %c0_88 = arith.constant 0 : index
    %228 = vector.load %arg23[%c0_87, %c0_88] : memref<64x32xf32, #tpu.memory_space<vmem>>, vector<64x32xf32>
    %229 = arith.truncf %227 : vector<16x64xf32> to vector<16x64xbf16>
    %230 = arith.truncf %228 : vector<64x32xf32> to vector<64x32xbf16>
    %cst_89 = arith.constant dense<0.000000e+00> : vector<16x32xf32>
    %231 = tpu.matmul %229, %230, %cst_89 {dimension_numbers = #tpu.dot_dimension_numbers<[1], [0], [0], [1], [0, 0, 1, 1], [], []>} : vector<16x64xbf16>, vector<64x32xbf16>, vector<16x32xf32> -> vector<16x32xf32>
    %232 = arith.addf %207, %231 : vector<16x32xf32>
    %c0_90 = arith.constant 0 : index
    %c0_91 = arith.constant 0 : index
    %233 = vector.load %arg24[%c0_90, %c0_91] : memref<1x32xf32, #tpu.memory_space<vmem>>, vector<1x32xf32>
    %234 = vector.broadcast %233 : vector<1x32xf32> to vector<16x32xf32>
    %235 = arith.addf %232, %234 : vector<16x32xf32>
    %c0_92 = arith.constant 0 : index
    %c0_93 = arith.constant 0 : index
    %236 = vector.load %arg25[%c0_92, %c0_93] : memref<1x32xf32, #tpu.memory_space<vmem>>, vector<1x32xf32>
    %c0_94 = arith.constant 0 : index
    %c0_95 = arith.constant 0 : index
    %237 = vector.load %arg26[%c0_94, %c0_95] : memref<1x32xf32, #tpu.memory_space<vmem>>, vector<1x32xf32>
    %cst_96 = arith.constant dense<0.000000e+00> : vector<16xf32>
    %238 = vector.multi_reduction <add>, %235, %cst_96 [1] : vector<16x32xf32> to vector<16xf32>
    %239 = vector.shape_cast %238 : vector<16xf32> to vector<16x1xf32>
    %cst_97 = arith.constant 3.200000e+01 : f32
    %240 = vector.broadcast %cst_97 : f32 to vector<16x1xf32>
    %241 = arith.divf %239, %240 : vector<16x1xf32>
    %242 = vector.broadcast %241 : vector<16x1xf32> to vector<16x32xf32>
    %243 = arith.subf %235, %242 : vector<16x32xf32>
    %244 = arith.mulf %243, %243 : vector<16x32xf32>
    %cst_98 = arith.constant dense<0.000000e+00> : vector<16xf32>
    %245 = vector.multi_reduction <add>, %244, %cst_98 [1] : vector<16x32xf32> to vector<16xf32>
    %246 = vector.shape_cast %245 : vector<16xf32> to vector<16x1xf32>
    %cst_99 = arith.constant 3.200000e+01 : f32
    %247 = vector.broadcast %cst_99 : f32 to vector<16x1xf32>
    %248 = arith.divf %246, %247 : vector<16x1xf32>
    %249 = vector.broadcast %241 : vector<16x1xf32> to vector<16x32xf32>
    %250 = arith.subf %235, %249 : vector<16x32xf32>
    %cst_100 = arith.constant 9.99999996E-13 : f32
    %251 = vector.broadcast %cst_100 : f32 to vector<16x1xf32>
    %252 = arith.addf %248, %251 : vector<16x1xf32>
    %253 = math.rsqrt %252 : vector<16x1xf32>
    %254 = vector.broadcast %253 : vector<16x1xf32> to vector<16x32xf32>
    %255 = arith.mulf %250, %254 : vector<16x32xf32>
    %256 = vector.broadcast %236 : vector<1x32xf32> to vector<16x32xf32>
    %257 = arith.mulf %255, %256 : vector<16x32xf32>
    %258 = vector.broadcast %237 : vector<1x32xf32> to vector<16x32xf32>
    %259 = arith.addf %257, %258 : vector<16x32xf32>
    %c0_101 = arith.constant 0 : index
    %c0_102 = arith.constant 0 : index
    %260 = vector.load %arg27[%c0_101, %c0_102] : memref<16x32xf32, #tpu.memory_space<vmem>>, vector<16x32xf32>
    tpu.vector_store %arg27[%c0_101, %c0_102], %259 {strides = array<i32>} : memref<16x32xf32, #tpu.memory_space<vmem>>, vector<16x32xf32>,
    return
  }
  func.func @transform_0(%arg0: i32) -> (i32, i32) {
    %c0_i32 = arith.constant 0 : i32
    %c0_i32_0 = arith.constant 0 : i32
    %c0_i32_1 = arith.constant 0 : i32
    return %c0_i32, %c0_i32_0 : i32, i32
  }
  func.func @transform_1(%arg0: i32) -> (i32, i32) {
    %c0_i32 = arith.constant 0 : i32
    %c0_i32_0 = arith.constant 0 : i32
    %c0_i32_1 = arith.constant 0 : i32
    return %c0_i32, %c0_i32_0 : i32, i32
  }
  func.func @transform_2(%arg0: i32) -> (i32, i32) {
    %c0_i32 = arith.constant 0 : i32
    %c0_i32_0 = arith.constant 0 : i32
    %c0_i32_1 = arith.constant 0 : i32
    return %c0_i32, %c0_i32_0 : i32, i32
  }
  func.func @transform_3(%arg0: i32) -> (i32, i32) {
    %c0_i32 = arith.constant 0 : i32
    %c0_i32_0 = arith.constant 0 : i32
    %c0_i32_1 = arith.constant 0 : i32
    return %c0_i32, %c0_i32_0 : i32, i32
  }
  func.func @transform_4(%arg0: i32) -> (i32, i32) {
    %c0_i32 = arith.constant 0 : i32
    %c0_i32_0 = arith.constant 0 : i32
    %c0_i32_1 = arith.constant 0 : i32
    return %c0_i32, %c0_i32_0 : i32, i32
  }
  func.func @transform_5(%arg0: i32) -> (i32, i32) {
    %c0_i32 = arith.constant 0 : i32
    %c0_i32_0 = arith.constant 0 : i32
    %c0_i32_1 = arith.constant 0 : i32
    return %c0_i32, %c0_i32_0 : i32, i32
  }
  func.func @transform_6(%arg0: i32) -> (i32, i32) {
    %c0_i32 = arith.constant 0 : i32
    %c0_i32_0 = arith.constant 0 : i32
    %c0_i32_1 = arith.constant 0 : i32
    return %c0_i32, %c0_i32_0 : i32, i32
  }
  func.func @transform_7(%arg0: i32) -> (i32, i32) {
    %c0_i32 = arith.constant 0 : i32
    %c0_i32_0 = arith.constant 0 : i32
    %c0_i32_1 = arith.constant 0 : i32
    return %c0_i32, %c0_i32_0 : i32, i32
  }
  func.func @transform_8(%arg0: i32) -> (i32, i32) {
    %c0_i32 = arith.constant 0 : i32
    %c0_i32_0 = arith.constant 0 : i32
    %c0_i32_1 = arith.constant 0 : i32
    return %c0_i32, %c0_i32_0 : i32, i32
  }
  func.func @transform_9(%arg0: i32) -> (i32, i32) {
    %c0_i32 = arith.constant 0 : i32
    %c0_i32_0 = arith.constant 0 : i32
    %c0_i32_1 = arith.constant 0 : i32
    return %c0_i32, %c0_i32_0 : i32, i32
  }
  func.func @transform_10(%arg0: i32) -> (i32, i32) {
    %c0_i32 = arith.constant 0 : i32
    %c0_i32_0 = arith.constant 0 : i32
    %c0_i32_1 = arith.constant 0 : i32
    return %c0_i32, %c0_i32_0 : i32, i32
  }
  func.func @transform_11(%arg0: i32) -> (i32, i32) {
    %c0_i32 = arith.constant 0 : i32
    %c0_i32_0 = arith.constant 0 : i32
    %c0_i32_1 = arith.constant 0 : i32
    return %c0_i32, %c0_i32_0 : i32, i32
  }
  func.func @transform_12(%arg0: i32) -> (i32, i32) {
    %c0_i32 = arith.constant 0 : i32
    %c0_i32_0 = arith.constant 0 : i32
    %c0_i32_1 = arith.constant 0 : i32
    return %c0_i32, %c0_i32_0 : i32, i32
  }
  func.func @transform_13(%arg0: i32) -> (i32, i32) {
    %c0_i32 = arith.constant 0 : i32
    %c0_i32_0 = arith.constant 0 : i32
    %c0_i32_1 = arith.constant 0 : i32
    return %c0_i32, %c0_i32_0 : i32, i32
  }
  func.func @transform_14(%arg0: i32) -> (i32, i32) {
    %c0_i32 = arith.constant 0 : i32
    %c0_i32_0 = arith.constant 0 : i32
    %c0_i32_1 = arith.constant 0 : i32
    return %c0_i32, %c0_i32_0 : i32, i32
  }
  func.func @transform_15(%arg0: i32) -> (i32, i32) {
    %c0_i32 = arith.constant 0 : i32
    %c0_i32_0 = arith.constant 0 : i32
    %c0_i32_1 = arith.constant 0 : i32
    return %c0_i32, %c0_i32_0 : i32, i32
  }
  func.func @transform_16(%arg0: i32) -> (i32, i32) {
    %c0_i32 = arith.constant 0 : i32
    %c0_i32_0 = arith.constant 0 : i32
    %c0_i32_1 = arith.constant 0 : i32
    return %c0_i32, %c0_i32_0 : i32, i32
  }
  func.func @transform_17(%arg0: i32) -> (i32, i32) {
    %c0_i32 = arith.constant 0 : i32
    %c0_i32_0 = arith.constant 0 : i32
    %c0_i32_1 = arith.constant 0 : i32
    return %c0_i32, %c0_i32_0 : i32, i32
  }
  func.func @transform_18(%arg0: i32) -> (i32, i32) {
    %c0_i32 = arith.constant 0 : i32
    %c0_i32_0 = arith.constant 0 : i32
    %c0_i32_1 = arith.constant 0 : i32
    return %c0_i32, %c0_i32_0 : i32, i32
  }
  func.func @transform_19(%arg0: i32) -> (i32, i32) {
    %c0_i32 = arith.constant 0 : i32
    %c0_i32_0 = arith.constant 0 : i32
    %c0_i32_1 = arith.constant 0 : i32
    return %c0_i32, %c0_i32_0 : i32, i32
  }
  func.func @transform_20(%arg0: i32) -> (i32, i32) {
    %c0_i32 = arith.constant 0 : i32
    %c0_i32_0 = arith.constant 0 : i32
    %c0_i32_1 = arith.constant 0 : i32
    return %c0_i32, %c0_i32_0 : i32, i32
  }
  func.func @transform_21(%arg0: i32) -> (i32, i32) {
    %c0_i32 = arith.constant 0 : i32
    %c0_i32_0 = arith.constant 0 : i32
    %c0_i32_1 = arith.constant 0 : i32
    return %c0_i32, %c0_i32_0 : i32, i32
  }
  func.func @transform_22(%arg0: i32) -> (i32, i32) {
    %c0_i32 = arith.constant 0 : i32
    %c0_i32_0 = arith.constant 0 : i32
    %c0_i32_1 = arith.constant 0 : i32
    return %c0_i32, %c0_i32_0 : i32, i32
  }
  func.func @transform_23(%arg0: i32) -> (i32, i32) {
    %c0_i32 = arith.constant 0 : i32
    %c0_i32_0 = arith.constant 0 : i32
    %c0_i32_1 = arith.constant 0 : i32
    return %c0_i32, %c0_i32_0 : i32, i32
  }
  func.func @transform_24(%arg0: i32) -> (i32, i32) {
    %c0_i32 = arith.constant 0 : i32
    %c0_i32_0 = arith.constant 0 : i32
    %c0_i32_1 = arith.constant 0 : i32
    return %c0_i32, %c0_i32_0 : i32, i32
  }
  func.func @transform_25(%arg0: i32) -> (i32, i32) {
    %c0_i32 = arith.constant 0 : i32
    %c0_i32_0 = arith.constant 0 : i32
    %c0_i32_1 = arith.constant 0 : i32
    return %c0_i32, %c0_i32_0 : i32, i32
  }
  func.func @transform_26(%arg0: i32) -> (i32, i32) {
    %c0_i32 = arith.constant 0 : i32
    %c0_i32_0 = arith.constant 0 : i32
    %c0_i32_1 = arith.constant 0 : i32
    return %c0_i32, %c0_i32_0 : i32, i32
  }
}

module attributes {stable_mosaic.version = 11 : i64} {
  func.func @_lm_kernel(%arg0: i32, %arg1: memref<14x32xf32, #tpu.memory_space<vmem>>, %arg2: memref<14x1xi32, #tpu.memory_space<vmem>>, %arg3: memref<32x64xf32, #tpu.memory_space<vmem>>, %arg4: memref<1x64xf32, #tpu.memory_space<vmem>>, %arg5: memref<1x1xf32, #tpu.memory_space<vmem>>) attributes {dimension_semantics = [#tpu.dimension_semantics<arbitrary>], iteration_bounds = array<i64: 1>, scalar_prefetch = 0 : i64, scratch_operands = 0 : i64, tpu.core_type = #tpu.core_type<tc>, window_params = [{pipeline_mode = #tpu.pipeline_mode<synchronous>, transform_indices = @transform_0, window_bounds = array<i64: 14, 32>}, {pipeline_mode = #tpu.pipeline_mode<synchronous>, transform_indices = @transform_1, window_bounds = array<i64: 14, 1>}, {pipeline_mode = #tpu.pipeline_mode<synchronous>, transform_indices = @transform_2, window_bounds = array<i64: 32, 64>}, {pipeline_mode = #tpu.pipeline_mode<synchronous>, transform_indices = @transform_3, window_bounds = array<i64: 1, 64>}, {pipeline_mode = #tpu.pipeline_mode<synchronous>, transform_indices = @transform_4, window_bounds = array<i64: 1, 1>}]} {
    %c0 = arith.constant 0 : index
    %c0_0 = arith.constant 0 : index
    %0 = vector.load %arg1[%c0, %c0_0] : memref<14x32xf32, #tpu.memory_space<vmem>>, vector<14x32xf32>
    %c0_1 = arith.constant 0 : index
    %c0_2 = arith.constant 0 : index
    %1 = vector.load %arg2[%c0_1, %c0_2] : memref<14x1xi32, #tpu.memory_space<vmem>>, vector<14x1xi32>
    %c0_3 = arith.constant 0 : index
    %c0_4 = arith.constant 0 : index
    %2 = vector.load %arg3[%c0_3, %c0_4] : memref<32x64xf32, #tpu.memory_space<vmem>>, vector<32x64xf32>
    %cst = arith.constant dense<0.000000e+00> : vector<14x64xf32>
    %3 = tpu.matmul %0, %2, %cst {dimension_numbers = #tpu.dot_dimension_numbers<[1], [0], [0], [1], [0, 0, 1, 1], [], []>} : vector<14x32xf32>, vector<32x64xf32>, vector<14x64xf32> -> vector<14x64xf32>
    %c0_5 = arith.constant 0 : index
    %c0_6 = arith.constant 0 : index
    %4 = vector.load %arg4[%c0_5, %c0_6] : memref<1x64xf32, #tpu.memory_space<vmem>>, vector<1x64xf32>
    %5 = vector.broadcast %4 : vector<1x64xf32> to vector<14x64xf32>
    %6 = arith.addf %3, %5 : vector<14x64xf32>
    %cst_7 = arith.constant dense<0xFF800000> : vector<14xf32>
    %7 = vector.multi_reduction <maximumf>, %6, %cst_7 [1] : vector<14x64xf32> to vector<14xf32>
    %8 = vector.shape_cast %7 : vector<14xf32> to vector<14x1xf32>
    %9 = vector.broadcast %8 : vector<14x1xf32> to vector<14x64xf32>
    %10 = arith.subf %6, %9 : vector<14x64xf32>
    %11 = math.exp %10 : vector<14x64xf32>
    %cst_8 = arith.constant dense<0.000000e+00> : vector<14xf32>
    %12 = vector.multi_reduction <add>, %11, %cst_8 [1] : vector<14x64xf32> to vector<14xf32>
    %13 = vector.shape_cast %12 : vector<14xf32> to vector<14x1xf32>
    %14 = math.log %13 : vector<14x1xf32>
    %15 = vector.broadcast %14 : vector<14x1xf32> to vector<14x64xf32>
    %16 = arith.subf %10, %15 : vector<14x64xf32>
    %17 = tpu.iota {dimensions = array<i32: 1>} : vector<14x64xi32>
    %18 = vector.broadcast %1 : vector<14x1xi32> to vector<14x64xi32>
    %19 = arith.cmpi eq, %17, %18 : vector<14x64xi32>
    %20 = arith.extui %19 : vector<14x64xi1> to vector<14x64xi32>
    %21 = arith.sitofp %20 : vector<14x64xi32> to vector<14x64xf32>
    %22 = arith.mulf %16, %21 : vector<14x64xf32>
    %cst_9 = arith.constant dense<0.000000e+00> : vector<14xf32>
    %23 = vector.multi_reduction <add>, %22, %cst_9 [1] : vector<14x64xf32> to vector<14xf32>
    %24 = vector.shape_cast %23 : vector<14xf32> to vector<14x1xf32>
    %cst_10 = arith.constant 0.000000e+00 : f32
    %25 = vector.broadcast %cst_10 : f32 to vector<14x1xf32>
    %26 = arith.subf %25, %24 : vector<14x1xf32>
    %c-100_i32 = arith.constant -100 : i32
    %27 = vector.broadcast %c-100_i32 : i32 to vector<14x1xi32>
    %28 = arith.cmpi ne, %1, %27 : vector<14x1xi32>
    %29 = arith.extui %28 : vector<14x1xi1> to vector<14x1xi32>
    %30 = arith.sitofp %29 : vector<14x1xi32> to vector<14x1xf32>
    %31 = arith.mulf %26, %30 : vector<14x1xf32>
    %cst_11 = arith.constant dense<0.000000e+00> : vector<1xf32>
    %32 = vector.multi_reduction <add>, %31, %cst_11 [0] : vector<14x1xf32> to vector<1xf32>
    %33 = vector.shape_cast %32 : vector<1xf32> to vector<1x1xf32>
    %cst_12 = arith.constant dense<0.000000e+00> : vector<1xf32>
    %34 = vector.multi_reduction <add>, %30, %cst_12 [0] : vector<14x1xf32> to vector<1xf32>
    %35 = vector.shape_cast %34 : vector<1xf32> to vector<1x1xf32>
    %cst_13 = arith.constant 1.000000e+00 : f32
    %36 = vector.broadcast %cst_13 : f32 to vector<1x1xf32>
    %37 = arith.maximumf %35, %36 : vector<1x1xf32>
    %38 = arith.divf %33, %37 : vector<1x1xf32>
    %c0_14 = arith.constant 0 : index
    %c0_15 = arith.constant 0 : index
    %39 = vector.load %arg5[%c0_14, %c0_15] : memref<1x1xf32, #tpu.memory_space<vmem>>, vector<1x1xf32>
    tpu.vector_store %arg5[%c0_14, %c0_15], %38 {strides = array<i32>} : memref<1x1xf32, #tpu.memory_space<vmem>>, vector<1x1xf32>,
    return
  }
  func.func @transform_0(%arg0: i32) -> (i32, i32) {
    %c0_i32 = arith.constant 0 : i32
    %c0_i32_0 = arith.constant 0 : i32
    %c0_i32_1 = arith.constant 0 : i32
    return %c0_i32, %c0_i32_0 : i32, i32
  }
  func.func @transform_1(%arg0: i32) -> (i32, i32) {
    %c0_i32 = arith.constant 0 : i32
    %c0_i32_0 = arith.constant 0 : i32
    %c0_i32_1 = arith.constant 0 : i32
    return %c0_i32, %c0_i32_0 : i32, i32
  }
  func.func @transform_2(%arg0: i32) -> (i32, i32) {
    %c0_i32 = arith.constant 0 : i32
    %c0_i32_0 = arith.constant 0 : i32
    %c0_i32_1 = arith.constant 0 : i32
    return %c0_i32, %c0_i32_0 : i32, i32
  }
  func.func @transform_3(%arg0: i32) -> (i32, i32) {
    %c0_i32 = arith.constant 0 : i32
    %c0_i32_0 = arith.constant 0 : i32
    %c0_i32_1 = arith.constant 0 : i32
    return %c0_i32, %c0_i32_0 : i32, i32
  }
  func.func @transform_4(%arg0: i32) -> (i32, i32) {
    %c0_i32 = arith.constant 0 : i32
    %c0_i32_0 = arith.constant 0 : i32
    %c0_i32_1 = arith.constant 0 : i32
    return %c0_i32, %c0_i32_0 : i32, i32
  }
}

</mosaic_0001>

<bundles_post_ra>
// kernel: blip_forward.18
= control target key start
LH: loop header
LB: loop body
LE: loop exit
PB: predicated region body
PF: predicated region fallthrough
CT: control target
= control target key end

     0   :  { %v115_v0 = vmov 0   ;;  %vm62_vm0 = vcmask 523264   ;;  %vm106_vm1 = vcmask 261120   ;;  %s232_s1 = inlined_call_operand.vmem [shape: f32[192,32], index: 1, kind: input, shape index: {}]   ;;  %s233_s0 = inlined_call_operand.vmem [shape: f32[8,192], index: 0, kind: input, shape index: {}]   ;;  %s234_s2 = inlined_call_operand.vmem [shape: f32[1,32], index: 2, kind: input, shape index: {}]   ;;  %s235_s3 = inlined_call_operand.vmem [shape: f32[8,32], index: 3, kind: output, shape index: {}]  }
   0x1   :  { %66 = vmatprep.subr.bf16.mxu0 %v115_v0  ;;  %v31_v1 = vld [vmem:[%s232_s1 + $0x70] sm:$0xff]  ;;  %v32_v2 = vld [vmem:[%s232_s1 + $0x78] sm:$0xff]  ;;  %v29_v3 = vld [vmem:[%s232_s1 + $0x60] sm:$0xff] }
   0x2   :  { %v50_v4 = vpack.c.bf16 %v32_v2, %v31_v1  ;;  %v30_v5 = vld [vmem:[%s232_s1 + $0x68] sm:$0xff]  ;;  %v27_v7 = vld [vmem:[%s232_s1 + $0x50] sm:$0xff]  ;;  %v28_v8 = vld [vmem:[%s232_s1 + $0x58] sm:$0xff] }
   0x3   :  { %v49_v6 = vpack.c.bf16 %v30_v5, %v29_v3  ;;  %v48_v9 = vpack.c.bf16 %v28_v8, %v27_v7  ;;  %v25_v10 = vld [vmem:[%s232_s1 + $0x40] sm:$0xff]  ;;  %v26_v11 = vld [vmem:[%s232_s1 + $0x48] sm:$0xff]  ;;  %v23_v15 = vld [vmem:[%s232_s1 + $0x30] sm:$0xff] }
   0x4   :  { %67 = vmatpush1.bf16.msra.mxu0 %v50_v4  ;;  %v16_v12 = vld [vmem:[%s233_s0 + $0x8] sm:$0xff]  ;;  %v47_v14 = vpack.c.bf16 %v26_v11, %v25_v10  ;;  %v24_v16 = vld [vmem:[%s232_s1 + $0x38] sm:$0xff]  ;;  %v21_v18 = vld [vmem:[%s232_s1 + $0x20] sm:$0xff] }
   0x5   :  { %68 = vmatprep.subr.bf16.mxu0 %v115_v0  ;;  %v42_v13 = vpack.c.bf16 %v16_v12, %v16_v12  ;;  %v46_v17 = vpack.c.bf16 %v24_v16, %v23_v15  ;;  %v22_v19 = vld [vmem:[%s232_s1 + $0x28] sm:$0xff]  ;;  %v19_v21 = vld [vmem:[%s232_s1 + $0x10] sm:$0xff]  ;;  %v20_v22 = vld [vmem:[%s232_s1 + $0x18] sm:$0xff] }
   0x6   :  { %v45_v20 = vpack.c.bf16 %v22_v19, %v21_v18  ;;  %v44_v23 = vpack.c.bf16 %v20_v22, %v19_v21  ;;  %v17_v24 = vld [vmem:[%s232_s1] sm:$0xff]  ;;  %v18_v25 = vld [vmem:[%s232_s1 + $0x8] sm:$0xff]  ;;  %v39_v27 = vld [vmem:[%s232_s1 + $0xb0] sm:$0xff] }
   0x7   :  { %113 = vmatprep.mubr.msk.bf16.mxu0 %vm62_vm0, %v42_v13  ;;  %v43_v26 = vpack.c.bf16 %v18_v25, %v17_v24  ;;  %v40_v28 = vld [vmem:[%s232_s1 + $0xb8] sm:$0xff]  ;;  %v37_v30 = vld [vmem:[%s232_s1 + $0xa0] sm:$0xff]  ;;  %v38_v31 = vld [vmem:[%s232_s1 + $0xa8] sm:$0xff] }
   0x8   :  { %69 = vmatpush1.bf16.msra.mxu0 %v49_v6  ;;  %v54_v29 = vpack.c.bf16 %v40_v28, %v39_v27  ;;  %v53_v32 = vpack.c.bf16 %v38_v31, %v37_v30  ;;  %v35_v33 = vld [vmem:[%s232_s1 + $0x90] sm:$0xff]  ;;  %v36_v34 = vld [vmem:[%s232_s1 + $0x98] sm:$0xff]  ;;  %v33_v36 = vld [vmem:[%s232_s1 + $0x80] sm:$0xff] }
   0x9   :  { %70 = vmatprep.subr.bf16.mxu0 %v115_v0  ;;  %v52_v35 = vpack.c.bf16 %v36_v34, %v35_v33  ;;  %v34_v37 = vld [vmem:[%s232_s1 + $0x88] sm:$0xff]  ;;  %v15_v39 = vld [vmem:[%s233_s0] sm:$0xff] }
   0xa   :  { %v51_v38 = vpack.c.bf16 %v34_v37, %v33_v36  ;;  %v41_v40 = vpack.c.bf16 %v15_v39, %v15_v39  ;;  %v112_v41 = vld [vmem:[%s234_s2] ss:$0 sm:$0xff] }
   0xc   :  { %71 = vmatpush1.bf16.msra.mxu0 %v48_v9 }
   0xd   :  { %72 = vmatprep.subr.bf16.mxu0 %v115_v0 }
  0x10   :  { %73 = vmatpush1.bf16.msra.mxu0 %v47_v14 }
  0x11   :  { %74 = vmatprep.subr.bf16.mxu0 %v115_v0 }
  0x14   :  { %75 = vmatpush1.bf16.msra.mxu0 %v46_v17 }
  0x15   :  { %76 = vmatprep.subr.bf16.mxu0 %v115_v0 }
  0x18   :  { %77 = vmatpush1.bf16.msra.mxu0 %v45_v20 }
  0x19   :  { %78 = vmatprep.subr.bf16.mxu0 %v115_v0 }
  0x1c   :  { %79 = vmatpush1.bf16.msra.mxu0 %v44_v23 }
  0x1d   :  { %80 = vmatprep.subr.bf16.mxu0 %v115_v0 }
  0x20   :  { %81 = vmatpush1.bf16.msra.mxu0 %v43_v26 }
  0x21   :  { %90 = vmatprep.subr.bf16.mxu0 %v115_v0 }
  0x24   :  { %91 = vmatpush2.bf16.msra.mxu0 %v54_v29 }
  0x25   :  { %92 = vmatprep.subr.bf16.mxu0 %v115_v0 }
  0x28   :  { %93 = vmatpush2.bf16.msra.mxu0 %v53_v32 }
  0x29   :  { %94 = vmatprep.subr.bf16.mxu0 %v115_v0 }
  0x2c   :  { %95 = vmatpush2.bf16.msra.mxu0 %v52_v35 }
  0x2d   :  { %96 = vmatprep.subr.bf16.mxu0 %v115_v0 }
  0x30   :  { %97 = vmatpush2.bf16.msra.mxu0 %v51_v38 }
  0x33   :  { %99 = vmatmul.mubr.bf16.vlgmr.msra.gmra.mxu0 %v41_v40 }
  0xf3   :  { %v100_v42 = vpop.f32.mrf.mxu0 }
  0xf4   :  { %v101_v43 = vadd.f32 %v112_v41, %v100_v42 }
  0xf5   :  { %v102_v44 = vpop.f32.mrf.mxu0 }
  0xf6   :  { %107 = vst.msk [vmem:[%s235_s3] sm:$0xff] %vm106_vm1, %v101_v43 }
  0xf7   :  { %v103_v45 = vpop.f32.mrf.mxu0 }
  0xf9   :  { %v104_v46 = vpop.f32.mrf.mxu0 }

// kernel: blip_forward.19
= control target key start
LH: loop header
LB: loop body
LE: loop exit
PB: predicated region body
PF: predicated region fallthrough
CT: control target
= control target key end

     0   :  { %vm58_vm0 = vcmask 261120   ;;  %vm62_vm1 = vcmask 254976   ;;  %v877_v14 = vmov 0.0   ;;  %vm878_vm2 = vmmov 0   ;;  %s881_s24 = smov 112   ;;  %s883_s28 = smov 48   ;;  %s1169_s0 = inlined_call_operand.vmem [shape: f32[10,32], index: 0, kind: input, shape index: {}]   ;;  %s1170_s4 = inlined_call_operand.vmem [shape: f32[32,96], index: 4, kind: input, shape index: {}]   ;;  %s1171_s2 = inlined_call_operand.vmem [shape: f32[1,32], index: 2, kind: input, shape index: {}]   ;;  %s1172_s3 = inlined_call_operand.vmem [shape: f32[1,32], index: 3, kind: input, shape index: {}]   ;;  %s1173_s5 = inlined_call_operand.vmem [shape: f32[1,96], index: 5, kind: input, shape index: {}]   ;;  %s1174_s1 = inlined_call_operand.vmem [shape: f32[10,10], index: 1, kind: input, shape index: {}]   ;;  %s1175_s6 = inlined_call_operand.vmem [shape: f32[32,32], index: 6, kind: input, shape index: {}]   ;;  %s1176_s7 = inlined_call_operand.vmem [shape: f32[1,32], index: 7, kind: input, shape index: {}]   ;;  %s1177_s10 = inlined_call_operand.vmem [shape: f32[32,64], index: 10, kind: input, shape index: {}]   ;;  %s1178_s8 = inlined_call_operand.vmem [shape: f32[1,32], index: 8, kind: input, shape index: {}]   ;;  %s1179_s9 = inlined_call_operand.vmem [shape: f32[1,32], index: 9, kind: input, shape index: {}]   ;;  %s1180_s12 = inlined_call_operand.vmem [shape: f32[64,32], index: 12, kind: input, shape index: {}]   ;;  %s1181_s11 = inlined_call_operand.vmem [shape: f32[1,64], index: 11, kind: input, shape index: {}]   ;;  %s1182_s13 = inlined_call_operand.vmem [shape: f32[1,32], index: 13, kind: input, shape index: {}]   ;;  %s1183_s14 = inlined_call_operand.vmem [shape: f32[1,32], index: 14, kind: input, shape index: {}]   ;;  %s1184_s15 = inlined_call_operand.vmem [shape: f32[1,32], index: 15, kind: input, shape index: {}]   ;;  %s1185_s16 = inlined_call_operand.vmem [shape: f32[10,32], index: 16, kind: output, shape index: {}]  }
   0x1   :  { %1187 = sst [smem:[#allocation2_spill]] %s1169_s0  ;;  %772 = vmatprep.subr.bf16.mxu0 %v877_v14  ;;  %v105_v15 = vld [vmem:[%s1170_s4 + $0x10] sm:$0xff]  ;;  %v106_v16 = vld [vmem:[%s1170_s4 + $0x18] sm:$0xff]  ;;  %v103_v17 = vld [vmem:[%s1170_s4] sm:$0xff]  ;;  %776 = vmatprep.mubr.msk.bf16.mxu0 %vm878_vm2, %v877_v14  ;;  %vm167_vm3 = vcmask 130048   ;;  %vm219_vm4 = vcmask 80896  }
   0x2   :  { %s1188_s23 = sld [smem:[#allocation2_spill]]  ;;  %v109_v18 = vpack.c.bf16 %v106_v16, %v105_v15  ;;  %v104_v19 = vld [vmem:[%s1170_s4 + $0x8] sm:$0xff]  ;;  %780 = vmatprep.subr.bf16.mxu1 %v877_v14  ;;  %782 = vmatprep.mubr.msk.bf16.mxu1 %vm878_vm2, %v877_v14  ;;  %v732_v29 = vld [vmem:[%s1171_s2] ss:$0 sm:$0xff]  ;;  %s879_s2 = smov 80   ;;  %vm223_vm5 = vcmask 74752  }
   0x3   :  { %v108_v20 = vpack.c.bf16 %v104_v19, %v103_v17  ;;  %v733_v33 = vld [vmem:[%s1172_s3] ss:$0 sm:$0xff]  ;;  %s880_s3 = smov 96   ;;  %v162_v57 = vld [vmem:[%s1174_s1 + $0x8] sm:$0x3]  ;;  %vm249_vm6 = vcmask 1044480  }
   0x4   :  { %773 = vmatpush3.bf16.msra.mxu0 %v109_v18  ;;  %v734_v39 = vld [vmem:[%s1173_s5] ss:$0 sm:$0xff]  ;;  %s884_s21 = smov 16   ;;  %vm626_vm7 = vcmask 523264  }
   0x5   :  { %774 = vmatprep.subr.bf16.mxu0 %v877_v14  ;;  %v161_v52 = vld [vmem:[%s1174_s1] sm:$0xff]  ;;  %s882_s1 = smov 64  }
   0x8   :  { %v973_v0 = vld [vmem:[%s1188_s23] sm:$0xff]  ;;  %v978_v1 = vld [vmem:[%s1188_s23 + $0x8] sm:$0x3]  ;;  %775 = vmatpush3.bf16.msra.mxu0 %v108_v20 }
   0x9   :  { %v59_v2 = vsel %vm58_vm0, %v973_v0, 0.0  ;;  %v63_v3 = vsel %vm62_vm1, %v978_v1, 0.0  ;;  %786 = vmatprep.subr.bf16.mxu0 %v877_v14 }
   0xa   :  { %60 = vadd.xlane.f32.xlu0 %v59_v2 }
   0xe   :  { %64 = vadd.xlane.f32.xlu0 %v63_v3 }
  0x93   :  { %v61_v4 = vpop.xlane.xlu0 %60 }
  0x94   :  { %v67_v5 = vmul.f32 0.03125, %v61_v4 }
  0x96   :  { %v69_v6 = vsub.f32 %v973_v0, %v67_v5 }
  0x97   :  { %v65_v7 = vpop.xlane.xlu0 %64 }
  0x98   :  { %v68_v8 = vmul.f32 0.03125, %v65_v7  ;;  %v71_v9 = vmul.f32 %v69_v6, %v69_v6 }
  0x9a   :  { %v70_v10 = vsub.f32 %v978_v1, %v68_v8  ;;  %v73_v11 = vsel %vm58_vm0, %v71_v9, 0.0 }
  0x9b   :  { %74 = vadd.xlane.f32.xlu1 %v73_v11 }
  0x9c   :  { %v72_v12 = vmul.f32 %v70_v10, %v70_v10 }
  0x9e   :  { %v76_v13 = vsel %vm62_vm1, %v72_v12, 0.0 }
  0x9f   :  { %77 = vadd.xlane.f32.xlu1 %v76_v13 }
 0x124   :  { %v75_v21 = vpop.xlane.xlu1 %74 }
 0x125   :  { %v79_v22 = vmul.f32 0.03125, %v75_v21 }
 0x127   :  { %v81_v23 = vadd.f32 1e-06, %v79_v22 }
 0x128   :  { %v78_v24 = vpop.xlane.xlu1 %77 }
 0x129   :  { %845 = vrsqrt.f32 %v81_v23  ;;  %v80_v25 = vmul.f32 0.03125, %v78_v24 }
 0x12b   :  { %v82_v26 = vadd.f32 1e-06, %v80_v25 }
 0x12d   :  { %847 = vrsqrt.f32 %v82_v26 }
 0x136   :  { %v846_v27 = vpop.eup %845 }
 0x137   :  { %v85_v28 = vmul.f32 %v846_v27, %v69_v6 }
 0x139   :  { %v93_v32 = vmul.f32 %v732_v29, %v85_v28 }
 0x13a   :  { %v848_v30 = vpop.eup %847 }
 0x13b   :  { %v86_v31 = vmul.f32 %v848_v30, %v70_v10  ;;  %v101_v35 = vadd.f32 %v733_v33, %v93_v32 }
 0x13d   :  { %v94_v34 = vmul.f32 %v732_v29, %v86_v31 }
 0x13f   :  { %v102_v36 = vadd.f32 %v733_v33, %v94_v34 }
 0x141   :  { %v107_v37 = vpack.c.bf16 %v102_v36, %v101_v35 }
 0x143   :  { %777 = vmatmul.mubr.msk.bf16.vlgmr.msra.gmra.mxu0 %vm58_vm0, %v107_v37 }
 0x144   :  { %788 = vmatprep.mubr.msk.bf16.mxu0 %vm878_vm2, %v877_v14 }
 0x203   :  { %v154_v38 = vpop.f32.mrf.mxu0 }
 0x204   :  { %v155_v42 = vadd.f32 %v734_v39, %v154_v38 }
 0x205   :  { %v778_v40 = vpop.f32.mrf.mxu0 }
 0x207   :  { %v157_v41 = vpop.f32.mrf.mxu0 }
 0x208   :  { %v158_v43 = vadd.f32 %v734_v39, %v157_v41 }
 0x209   :  { %v779_v44 = vpop.f32.mrf.mxu0 }
 0x20a   :  { %v1020_v45 = vpack.c.bf16 %v158_v43, %v155_v42 }
 0x20c   :  { %296 = vrot.lane.b32.xlu1 %v1020_v45, %s879_s2  ;;  %165 = vrot.lane.b32.xlu0 %v1020_v45, %s880_s3 }
 0x210   :  { %294 = vrot.lane.b32.xlu1 %v1020_v45, %s881_s24 }
 0x27e   :  { %v166_v46 = vpop.permute.xlu0 %165  ;;  %v297_v48 = vpop.permute.xlu1 %296 }
 0x27f   :  { %v172_v47 = vsel %vm167_vm3, %v166_v46, 0  ;;  %v302_v49 = vsel %vm167_vm3, %v297_v48, 0 }
 0x280   :  { %781 = vmatpush3.bf16.xpose.msra.mxu1 %v172_v47 }
 0x281   :  { %792 = vmatprep.subr.bf16.mxu1 %v877_v14 }
 0x282   :  { %v295_v50 = vpop.permute.xlu1 %294 }
 0x287   :  { %783 = vmatmul.mubr.msk.bf16.vlgmr.msra.gmra.mxu1 %vm167_vm3, %v1020_v45 }
 0x288   :  { %793 = vmatpush3.bf16.xpose.msra.mxu1 %v302_v49  ;;  %794 = vmatprep.mubr.msk.bf16.mxu1 %vm878_vm2, %v877_v14 }
 0x289   :  { %804 = vmatprep.subr.bf16.mxu1 %v877_v14 }
 0x28f   :  { %795 = vmatmul.mubr.msk.bf16.vlgmr.msra.gmra.mxu1 %vm167_vm3, %v295_v50  ;;  %v433_v50 = vld [vmem:[%s1175_s6 + $0x10] sm:$0xff] }
 0x290   :  { %808 = vmatprep.mubr.msk.bf16.mxu1 %vm878_vm2, %v877_v14 }
 0x347   :  { %v208_v51 = vpop.f32.mrf.mxu1 }
 0x348   :  { %v215_v53 = vmul.f32 0.25, %v208_v51  ;;  %v434_v51 = vld [vmem:[%s1175_s6 + $0x18] sm:$0xff] }
 0x349   :  { %v784_v54 = vpop.f32.mrf.mxu1 }
 0x34a   :  { %v217_v55 = vadd.f32 %v215_v53, %v161_v52 }
 0x34b   :  { %v211_v56 = vpop.f32.mrf.mxu1 }
 0x34c   :  { %v216_v58 = vmul.f32 0.25, %v211_v56  ;;  %v220_v59 = vsel %vm219_vm4, %v217_v55, -inf  ;;  %v432_v56 = vld [vmem:[%s1175_s6 + $0x8] sm:$0xff] }
 0x34d   :  { %221 = vmax.xlane.f32.xlu1 %v220_v59  ;;  %v785_v60 = vpop.f32.mrf.mxu1 }
 0x34e   :  { %v218_v61 = vadd.f32 %v216_v58, %v162_v57 }
 0x34f   :  { %v338_v62 = vpop.f32.mrf.mxu1 }
 0x350   :  { %v345_v63 = vmul.f32 0.25, %v338_v62  ;;  %v224_v2 = vsel %vm223_vm5, %v218_v61, -inf }
 0x351   :  { %225 = vmax.xlane.f32.xlu0 %v224_v2  ;;  %v796_v3 = vpop.f32.mrf.mxu1 }
 0x352   :  { %v347_v4 = vadd.f32 %v345_v63, %v161_v52  ;;  %v437_v52 = vpack.c.bf16 %v434_v51, %v433_v50 }
 0x353   :  { %v341_v5 = vpop.f32.mrf.mxu1 }
 0x354   :  { %v346_v6 = vmul.f32 0.25, %v341_v5  ;;  %v349_v7 = vsel %vm219_vm4, %v347_v4, -inf  ;;  %805 = vmatpush3.bf16.msra.mxu1 %v437_v52  ;;  %v619_v52 = vld [vmem:[%s1180_s12 + $0x30] sm:$0xff] }
 0x355   :  { %350 = vmax.xlane.f32.xlu0 %v349_v7  ;;  %v797_v8 = vpop.f32.mrf.mxu1  ;;  %806 = vmatprep.subr.bf16.mxu1 %v877_v14 }
 0x356   :  { %v348_v9 = vadd.f32 %v346_v6, %v162_v57 }
 0x358   :  { %v352_v10 = vsel %vm223_vm5, %v348_v9, -inf }
 0x359   :  { %353 = vmax.xlane.f32.xlu0 %v352_v10  ;;  %v741_v10 = vld [vmem:[%s1176_s7] ss:$0 sm:$0xff] }
 0x3d6   :  { %v222_v11 = vpop.xlane.xlu1 %221 }
 0x3d7   :  { %v227_v12 = vsub.f32 %v217_v55, %v222_v11  ;;  %v431_v55 = vld [vmem:[%s1175_s6] sm:$0xff] }
 0x3d8   :  { %v436_v57 = vpack.c.bf16 %v432_v56, %v431_v55  ;;  %v617_v55 = vld [vmem:[%s1180_s12 + $0x20] sm:$0xff]  ;;  %v618_v56 = vld [vmem:[%s1180_s12 + $0x28] sm:$0xff] }
 0x3d9   :  { %v229_v13 = vmul.f32 1.442695, %v227_v12 }
 0x3da   :  { %v226_v15 = vpop.xlane.xlu0 %225  ;;  %807 = vmatpush3.bf16.msra.mxu1 %v436_v57  ;;  %v624_v57 = vpack.c.bf16 %v618_v56, %v617_v55  ;;  %v749_v56 = vld [vmem:[%s1184_s15] ss:$0 sm:$0xff] }
 0x3db   :  { %849 = vpow2.f32 %v229_v13  ;;  %v228_v16 = vsub.f32 %v218_v61, %v226_v15  ;;  %820 = vmatprep.subr.bf16.mxu1 %v877_v14 }
 0x3dd   :  { %v231_v17 = vmul.f32 1.442695, %v228_v16 }
 0x3de   :  { %v351_v18 = vpop.xlane.xlu0 %350 }
 0x3df   :  { %851 = vpow2.f32 %v231_v17  ;;  %v355_v19 = vsub.f32 %v347_v4, %v351_v18 }
 0x3e1   :  { %v357_v20 = vmul.f32 1.442695, %v355_v19 }
 0x3e2   :  { %v354_v21 = vpop.xlane.xlu0 %353 }
 0x3e3   :  { %853 = vpow2.f32 %v357_v20  ;;  %v356_v22 = vsub.f32 %v348_v9, %v354_v21 }
 0x3e5   :  { %v359_v23 = vmul.f32 1.442695, %v356_v22 }
 0x3e7   :  { %855 = vpow2.f32 %v359_v23 }
 0x3e8   :  { %v850_v24 = vpop.eup %849 }
 0x3e9   :  { %v233_v25 = vsel %vm219_vm4, %v850_v24, 0.0 }
 0x3ea   :  { %234 = vadd.xlane.f32.xlu1 %v233_v25 }
 0x3ec   :  { %v852_v26 = vpop.eup %851 }
 0x3ed   :  { %v236_v27 = vsel %vm223_vm5, %v852_v26, 0.0 }
 0x3ee   :  { %237 = vadd.xlane.f32.xlu0 %v236_v27 }
 0x3f0   :  { %v854_v28 = vpop.eup %853 }
 0x3f1   :  { %v361_v29 = vsel %vm219_vm4, %v854_v28, 0.0 }
 0x3f2   :  { %362 = vadd.xlane.f32.xlu1 %v361_v29  ;;  %v539_v29 = vld [vmem:[%s1177_s10 + $0x10] sm:$0xff] }
 0x3f4   :  { %v856_v30 = vpop.eup %855 }
 0x3f5   :  { %v364_v31 = vsel %vm223_vm5, %v856_v30, 0.0 }
 0x3f6   :  { %365 = vadd.xlane.f32.xlu0 %v364_v31 }
 0x403   :  { %244 = vrot.lane.b32.xlu1 %v1020_v45, %s882_s1 }
 0x40c   :  { %372 = vrot.lane.b32.xlu0 %v1020_v45, %s883_s28 }
 0x473   :  { %v235_v32 = vpop.xlane.xlu1 %234 }
 0x474   :  { %857 = vrcp.f32 %v235_v32  ;;  %v537_v32 = vld [vmem:[%s1177_s10] sm:$0xff] }
 0x477   :  { %v238_v33 = vpop.xlane.xlu0 %237 }
 0x478   :  { %859 = vrcp.f32 %v238_v33  ;;  %v538_v33 = vld [vmem:[%s1177_s10 + $0x8] sm:$0xff] }
 0x47b   :  { %v363_v34 = vpop.xlane.xlu1 %362 }
 0x47c   :  { %861 = vrcp.f32 %v363_v34  ;;  %v542_v34 = vpack.c.bf16 %v538_v33, %v537_v32 }
 0x47f   :  { %v245_v35 = vpop.permute.xlu1 %244  ;;  %v366_v36 = vpop.xlane.xlu0 %365 }
 0x480   :  { %v251_v37 = vsel %vm249_vm6, %v245_v35, 0  ;;  %863 = vrcp.f32 %v366_v36 }
 0x481   :  { %787 = vmatpush3.bf16.msra.mxu0 %v251_v37  ;;  %v858_v38 = vpop.eup %857 }
 0x482   :  { %798 = vmatprep.subr.bf16.mxu0 %v877_v14  ;;  %v241_v40 = vmul.f32 %v858_v38, %v850_v24 }
 0x483   :  { %v373_v42 = vpop.permute.xlu0 %372 }
 0x484   :  { %v378_v44 = vsel %vm249_vm6, %v373_v42, 0 }
 0x485   :  { %v860_v39 = vpop.eup %859 }
 0x486   :  { %v242_v41 = vmul.f32 %v860_v39, %v852_v26 }
 0x488   :  { %v243_v43 = vpack.c.bf16 %v242_v41, %v241_v40 }
 0x489   :  { %v862_v45 = vpop.eup %861 }
 0x48a   :  { %789 = vmatmul.mubr.msk.bf16.vlgmr.msra.gmra.mxu0 %vm219_vm4, %v243_v43  ;;  %v369_v47 = vmul.f32 %v862_v45, %v854_v28  ;;  %v742_v43 = vld [vmem:[%s1178_s8] ss:$0 sm:$0xff] }
 0x48b   :  { %799 = vmatpush3.bf16.msra.mxu0 %v378_v44  ;;  %800 = vmatprep.mubr.msk.bf16.mxu0 %vm878_vm2, %v877_v14 }
 0x48c   :  { %812 = vmatprep.subr.bf16.mxu0 %v877_v14 }
 0x48d   :  { %v864_v46 = vpop.eup %863 }
 0x48e   :  { %v370_v48 = vmul.f32 %v864_v46, %v856_v30  ;;  %v540_v30 = vld [vmem:[%s1177_s10 + $0x18] sm:$0xff] }
 0x48f   :  { %v543_v31 = vpack.c.bf16 %v540_v30, %v539_v29  ;;  %v747_v29 = vld [vmem:[%s1182_s13] ss:$0 sm:$0xff] }
 0x490   :  { %v371_v49 = vpack.c.bf16 %v370_v48, %v369_v47  ;;  %v743_v47 = vld [vmem:[%s1179_s9] ss:$0 sm:$0xff] }
 0x492   :  { %801 = vmatmul.mubr.msk.bf16.vlgmr.msra.gmra.mxu0 %vm219_vm4, %v371_v49 }
 0x493   :  { %816 = vmatprep.mubr.msk.bf16.mxu0 %vm878_vm2, %v877_v14  ;;  %813 = vmatpush3.bf16.msra.mxu0 %v543_v31 }
 0x494   :  { %814 = vmatprep.subr.bf16.mxu0 %v877_v14 }
 0x497   :  { %815 = vmatpush3.bf16.msra.mxu0 %v542_v34 }
 0x54a   :  { %v287_v53 = vpop.f32.mrf.mxu0 }
 0x54c   :  { %v790_v54 = vpop.f32.mrf.mxu0 }
 0x54e   :  { %v290_v58 = vpop.f32.mrf.mxu0 }
 0x550   :  { %v791_v59 = vpop.f32.mrf.mxu0 }
 0x551   :  { %v616_v59 = vld [vmem:[%s1180_s12 + $0x18] sm:$0xff] }
 0x552   :  { %v414_v60 = vpop.f32.mrf.mxu0 }
 0x554   :  { %v802_v61 = vpop.f32.mrf.mxu0 }
 0x555   :  { %v613_v61 = vld [vmem:[%s1180_s12] sm:$0xff] }
 0x556   :  { %v417_v62 = vpop.f32.mrf.mxu0 }
 0x557   :  { %v840_v63 = vpack.i.bf16 %v417_v62, %v414_v60  ;;  %v614_v62 = vld [vmem:[%s1180_s12 + $0x8] sm:$0xff] }
 0x558   :  { %v803_v2 = vpop.f32.mrf.mxu0 }
 0x559   :  { %841 = vrot.lane.b32.xlu1 %v840_v63, %s884_s21  ;;  %v622_v63 = vpack.c.bf16 %v614_v62, %v613_v61  ;;  %v744_v2 = vld [vmem:[%s1181_s11] ss:$0 sm:$0xff] }
 0x5cb   :  { %v842_v3 = vpop.permute.xlu1 %841 }
 0x5cc   :  { %v844_v4 = vunpack.i.h.bf16 %v842_v3  ;;  %v843_v5 = vunpack.i.l.bf16 %v842_v3 }
 0x5ce   :  { %v430_v6 = vsel %vm167_vm3, %v290_v58, %v844_v4  ;;  %v429_v7 = vsel %vm167_vm3, %v287_v53, %v843_v5  ;;  %v620_v53 = vld [vmem:[%s1180_s12 + $0x38] sm:$0xff]  ;;  %v615_v58 = vld [vmem:[%s1180_s12 + $0x10] sm:$0xff] }
 0x5cf   :  { %v435_v8 = vpack.c.bf16 %v430_v6, %v429_v7  ;;  %v625_v54 = vpack.c.bf16 %v620_v53, %v619_v52  ;;  %v623_v60 = vpack.c.bf16 %v616_v59, %v615_v58 }
 0x5d1   :  { %809 = vmatmul.mubr.msk.bf16.vlgmr.msra.gmra.mxu1 %vm58_vm0, %v435_v8 }
 0x5d2   :  { %828 = vmatprep.mubr.msk.bf16.mxu1 %vm878_vm2, %v877_v14  ;;  %821 = vmatpush3.bf16.msra.mxu1 %v625_v54  ;;  %v748_v54 = vld [vmem:[%s1183_s14] ss:$0 sm:$0xff] }
 0x5d3   :  { %822 = vmatprep.subr.bf16.mxu1 %v877_v14 }
 0x5d6   :  { %823 = vmatpush3.bf16.msra.mxu1 %v624_v57 }
 0x5d7   :  { %824 = vmatprep.subr.bf16.mxu1 %v877_v14 }
 0x5da   :  { %825 = vmatpush3.bf16.msra.mxu1 %v623_v60 }
 0x5db   :  { %826 = vmatprep.subr.bf16.mxu1 %v877_v14 }
 0x5de   :  { %827 = vmatpush3.bf16.msra.mxu1 %v622_v63 }
 0x691   :  { %v475_v9 = vpop.f32.mrf.mxu1 }
 0x692   :  { %v482_v11 = vadd.f32 %v475_v9, %v973_v0 }
 0x693   :  { %v810_v12 = vpop.f32.mrf.mxu1 }
 0x694   :  { %v1083_v13 = vadd.f32 %v741_v10, %v482_v11 }
 0x695   :  { %v478_v15 = vpop.f32.mrf.mxu1 }
 0x696   :  { %v483_v16 = vadd.f32 %v478_v15, %v978_v1  ;;  %v495_v17 = vsel %vm58_vm0, %v1083_v13, 0.0 }
 0x697   :  { %496 = vadd.xlane.f32.xlu1 %v495_v17  ;;  %v811_v18 = vpop.f32.mrf.mxu1 }
 0x698   :  { %v1088_v19 = vadd.f32 %v741_v10, %v483_v16 }
 0x69a   :  { %v498_v20 = vsel %vm62_vm1, %v1088_v19, 0.0 }
 0x69b   :  { %499 = vadd.xlane.f32.xlu0 %v498_v20 }
 0x720   :  { %v497_v21 = vpop.xlane.xlu1 %496 }
 0x721   :  { %v501_v22 = vmul.f32 0.03125, %v497_v21 }
 0x723   :  { %v503_v0 = vsub.f32 %v1083_v13, %v501_v22 }
 0x724   :  { %v500_v23 = vpop.xlane.xlu0 %499 }
 0x725   :  { %v502_v24 = vmul.f32 0.03125, %v500_v23  ;;  %v505_v25 = vmul.f32 %v503_v0, %v503_v0 }
 0x727   :  { %v504_v1 = vsub.f32 %v1088_v19, %v502_v24  ;;  %v507_v26 = vsel %vm58_vm0, %v505_v25, 0.0 }
 0x728   :  { %508 = vadd.xlane.f32.xlu0 %v507_v26 }
 0x729   :  { %v506_v27 = vmul.f32 %v504_v1, %v504_v1 }
 0x72b   :  { %v510_v28 = vsel %vm62_vm1, %v506_v27, 0.0 }
 0x72c   :  { %511 = vadd.xlane.f32.xlu1 %v510_v28 }
 0x7b1   :  { %v509_v35 = vpop.xlane.xlu0 %508 }
 0x7b2   :  { %v513_v36 = vmul.f32 0.03125, %v509_v35 }
 0x7b4   :  { %v515_v37 = vadd.f32 1e-06, %v513_v36 }
 0x7b5   :  { %v512_v38 = vpop.xlane.xlu1 %511 }
 0x7b6   :  { %865 = vrsqrt.f32 %v515_v37  ;;  %v514_v39 = vmul.f32 0.03125, %v512_v38 }
 0x7b8   :  { %v516_v40 = vadd.f32 1e-06, %v514_v39 }
 0x7ba   :  { %867 = vrsqrt.f32 %v516_v40 }
 0x7c3   :  { %v866_v41 = vpop.eup %865 }
 0x7c4   :  { %v519_v42 = vmul.f32 %v866_v41, %v503_v0 }
 0x7c6   :  { %v527_v46 = vmul.f32 %v742_v43, %v519_v42 }
 0x7c7   :  { %v868_v44 = vpop.eup %867 }
 0x7c8   :  { %v520_v45 = vmul.f32 %v868_v44, %v504_v1  ;;  %v535_v49 = vadd.f32 %v743_v47, %v527_v46 }
 0x7ca   :  { %v528_v48 = vmul.f32 %v742_v43, %v520_v45 }
 0x7cc   :  { %v536_v50 = vadd.f32 %v743_v47, %v528_v48 }
 0x7ce   :  { %v541_v51 = vpack.c.bf16 %v536_v50, %v535_v49 }
 0x7d0   :  { %817 = vmatmul.mubr.msk.bf16.vlgmr.msra.gmra.mxu0 %vm58_vm0, %v541_v51 }
 0x890   :  { %v588_v3 = vpop.f32.mrf.mxu0 }
 0x891   :  { %v589_v4 = vadd.f32 %v744_v2, %v588_v3 }
 0x892   :  { %v818_v5 = vpop.f32.mrf.mxu0 }
 0x893   :  { %v595_v6 = vmul.f32 %v589_v4, %v589_v4 }
 0x894   :  { %v591_v7 = vpop.f32.mrf.mxu0 }
 0x895   :  { %v597_v14 = vmul.f32 %v595_v6, %v589_v4  ;;  %v592_v8 = vadd.f32 %v744_v2, %v591_v7 }
 0x896   :  { %v819_v9 = vpop.f32.mrf.mxu0 }
 0x897   :  { %v599_v10 = vmul.f32 0.044715, %v597_v14  ;;  %v596_v11 = vmul.f32 %v592_v8, %v592_v8 }
 0x899   :  { %v601_v12 = vadd.f32 %v599_v10, %v589_v4  ;;  %v598_v15 = vmul.f32 %v596_v11, %v592_v8 }
 0x89b   :  { %v603_v16 = vmul.f32 0.7978846, %v601_v12  ;;  %v600_v17 = vmul.f32 0.044715, %v598_v15 }
 0x89d   :  { %869 = vtanh.f32 %v603_v16  ;;  %v602_v18 = vadd.f32 %v600_v17, %v592_v8 }
 0x89f   :  { %v604_v20 = vmul.f32 0.7978846, %v602_v18 }
 0x8a1   :  { %871 = vtanh.f32 %v604_v20 }
 0x8aa   :  { %v870_v21 = vpop.eup %869 }
 0x8ab   :  { %v607_v22 = vadd.f32 1.0, %v870_v21 }
 0x8ad   :  { %v609_v23 = vmul.f32 0.5, %v607_v22 }
 0x8ae   :  { %v872_v0 = vpop.eup %871 }
 0x8af   :  { %v608_v24 = vadd.f32 1.0, %v872_v0  ;;  %v611_v1 = vmul.f32 %v609_v23, %v589_v4 }
 0x8b1   :  { %v610_v25 = vmul.f32 0.5, %v608_v24 }
 0x8b3   :  { %v612_v26 = vmul.f32 %v610_v25, %v592_v8 }
 0x8b5   :  { %v621_v27 = vpack.c.bf16 %v612_v26, %v611_v1 }
 0x8b7   :  { %829 = vmatmul.mubr.msk.bf16.vlgmr.msra.gmra.mxu1 %vm626_vm7, %v621_v27 }
 0x977   :  { %v664_v28 = vpop.f32.mrf.mxu1 }
 0x978   :  { %v671_v30 = vadd.f32 %v664_v28, %v1083_v13 }
 0x979   :  { %v830_v31 = vpop.f32.mrf.mxu1 }
 0x97a   :  { %v680_v32 = vadd.f32 %v747_v29, %v671_v30 }
 0x97b   :  { %v667_v33 = vpop.f32.mrf.mxu1 }
 0x97c   :  { %v672_v34 = vadd.f32 %v667_v33, %v1088_v19  ;;  %v684_v35 = vsel %vm58_vm0, %v680_v32, 0.0 }
 0x97d   :  { %685 = vadd.xlane.f32.xlu0 %v684_v35  ;;  %v831_v36 = vpop.f32.mrf.mxu1 }
 0x97e   :  { %v681_v37 = vadd.f32 %v747_v29, %v672_v34 }
 0x980   :  { %v687_v38 = vsel %vm62_vm1, %v681_v37, 0.0 }
 0x981   :  { %688 = vadd.xlane.f32.xlu1 %v687_v38 }
 0xa06   :  { %v686_v39 = vpop.xlane.xlu0 %685 }
 0xa07   :  { %v690_v40 = vmul.f32 0.03125, %v686_v39 }
 0xa09   :  { %v692_v41 = vsub.f32 %v680_v32, %v690_v40 }
 0xa0a   :  { %v689_v42 = vpop.xlane.xlu1 %688 }
 0xa0b   :  { %v691_v43 = vmul.f32 0.03125, %v689_v42  ;;  %v694_v44 = vmul.f32 %v692_v41, %v692_v41 }
 0xa0d   :  { %v693_v13 = vsub.f32 %v681_v37, %v691_v43  ;;  %v696_v45 = vsel %vm58_vm0, %v694_v44, 0.0 }
 0xa0e   :  { %697 = vadd.xlane.f32.xlu0 %v696_v45 }
 0xa0f   :  { %v695_v46 = vmul.f32 %v693_v13, %v693_v13 }
 0xa11   :  { %v699_v19 = vsel %vm62_vm1, %v695_v46, 0.0 }
 0xa12   :  { %700 = vadd.xlane.f32.xlu1 %v699_v19 }
 0xa97   :  { %v698_v47 = vpop.xlane.xlu0 %697 }
 0xa98   :  { %v702_v48 = vmul.f32 0.03125, %v698_v47 }
 0xa9a   :  { %v704_v49 = vadd.f32 1e-06, %v702_v48 }
 0xa9b   :  { %v701_v50 = vpop.xlane.xlu1 %700 }
 0xa9c   :  { %873 = vrsqrt.f32 %v704_v49  ;;  %v703_v51 = vmul.f32 0.03125, %v701_v50 }
 0xa9e   :  { %v705_v52 = vadd.f32 1e-06, %v703_v51 }
 0xaa0   :  { %875 = vrsqrt.f32 %v705_v52 }
 0xaa9   :  { %v874_v53 = vpop.eup %873 }
 0xaaa   :  { %v708_v55 = vmul.f32 %v874_v53, %v692_v41 }
 0xaac   :  { %v716_v57 = vmul.f32 %v748_v54, %v708_v55 }
 0xaad   :  { %v876_v58 = vpop.eup %875 }
 0xaae   :  { %v724_v59 = vadd.f32 %v749_v56, %v716_v57  ;;  %v709_v60 = vmul.f32 %v876_v58, %v693_v13 }
 0xab0   :  { %726 = vst.msk [vmem:[%s1185_s16] sm:$0xff] %vm58_vm0, %v724_v59  ;;  %v717_v61 = vmul.f32 %v748_v54, %v709_v60 }
 0xab2   :  { %v725_v62 = vadd.f32 %v749_v56, %v717_v61 }
 0xab4   :  { %727 = vst.msk [vmem:[%s1185_s16 + $0x8] sm:$0x3] %vm62_vm1, %v725_v62 }

// kernel: blip_forward.22
= control target key start
LH: loop header
LB: loop body
LE: loop exit
PB: predicated region body
PF: predicated region fallthrough
CT: control target
= control target key end

     0   :  { %v135_v0 = vmov 0.0   ;;  %vm136_vm0 = vmmov 0   ;;  %vm26_vm1 = vcmask 261120   ;;  %vm101_vm2 = vcmask 123904   ;;  %s178_s1 = inlined_call_operand.vmem [shape: f32[32,16], index: 1, kind: input, shape index: {}]   ;;  %s179_s0 = inlined_call_operand.vmem [shape: f32[2,32], index: 0, kind: input, shape index: {}]   ;;  %s180_s2 = inlined_call_operand.vmem [shape: f32[1,16], index: 2, kind: input, shape index: {}]   ;;  %s181_s3 = inlined_call_operand.vmem [shape: f32[2,16], index: 3, kind: output, shape index: {}]  }
   0x1   :  { %120 = vmatprep.subr.mxu0 %v135_v0  ;;  %v18_v1 = vld [vmem:[%s178_s1 + $0x18] sm:$0xff]  ;;  %v17_v2 = vld [vmem:[%s178_s1 + $0x10] sm:$0xff]  ;;  %128 = vmatprep.mubr.msk.f32.mxu0 %vm136_vm0, %v135_v0  ;;  %v16_v3 = vld [vmem:[%s178_s1 + $0x8] sm:$0xff] }
   0x2   :  { %121 = vmatpush3.msra.mxu0 %v18_v1  ;;  %v15_v4 = vld [vmem:[%s178_s1] sm:$0xff] }
   0x3   :  { %122 = vmatprep.subr.mxu0 %v135_v0  ;;  %v14_v5 = vld [vmem:[%s179_s0] sm:$0x3] }
   0x4   :  { %123 = vmatpush3.msra.mxu0 %v17_v2  ;;  %v113_v6 = vld [vmem:[%s180_s2] ss:$0 sm:$0xff] }
   0x5   :  { %124 = vmatprep.subr.mxu0 %v135_v0 }
   0x6   :  { %125 = vmatpush3.msra.mxu0 %v16_v3 }
   0x7   :  { %126 = vmatprep.subr.mxu0 %v135_v0 }
   0x8   :  { %127 = vmatpush3.msra.mxu0 %v15_v4 }
   0x9   :  { %129 = vmatmul.mubr.msk.f32.vlgmr.msra.gmra.mxu0 %vm26_vm1, %v14_v5 }
  0xc9   :  { %v96_v7 = vpop.f32.mrf.mxu0 }
  0xca   :  { %v97_v8 = vadd.f32 %v113_v6, %v96_v7 }
  0xcb   :  { %v130_v9 = vpop.f32.mrf.mxu0 }
  0xcc   :  { %v100_v10 = vmul.f32 %v97_v8, %v97_v8 }
  0xce   :  { %v102_v11 = vsel %vm101_vm2, %v100_v10, 0.0 }
  0xcf   :  { %103 = vadd.xlane.f32.xlu0 %v102_v11 }
 0x158   :  { %v104_v12 = vpop.xlane.xlu0 %103 }
 0x159   :  { %v105_v13 = vmax.f32 %v104_v12, 1e-24 }
 0x15b   :  { %133 = vrsqrt.f32 %v105_v13 }
 0x168   :  { %v134_v14 = vpop.eup %133 }
 0x169   :  { %v107_v15 = vmul.f32 %v134_v14, %v97_v8 }
 0x16b   :  { %108 = vst.msk [vmem:[%s181_s3] sm:$0x3] %vm101_vm2, %v107_v15 }

// kernel: blip_forward.20
= control target key start
LH: loop header
LB: loop body
LE: loop exit
PB: predicated region body
PF: predicated region fallthrough
CT: control target
= control target key end

     0   :  { %vm58_vm0 = vcmask 261120   ;;  %v869_v14 = vmov 0.0   ;;  %vm870_vm1 = vmmov 0   ;;  %s873_s24 = smov 112   ;;  %vm166_vm2 = vcmask 130048   ;;  %s875_s28 = smov 48   ;;  %s1149_s0 = inlined_call_operand.vmem [shape: f32[16,32], index: 0, kind: input, shape index: {}]   ;;  %s1150_s4 = inlined_call_operand.vmem [shape: f32[32,96], index: 4, kind: input, shape index: {}]   ;;  %s1151_s2 = inlined_call_operand.vmem [shape: f32[1,32], index: 2, kind: input, shape index: {}]   ;;  %s1152_s3 = inlined_call_operand.vmem [shape: f32[1,32], index: 3, kind: input, shape index: {}]   ;;  %s1153_s5 = inlined_call_operand.vmem [shape: f32[1,96], index: 5, kind: input, shape index: {}]   ;;  %s1154_s1 = inlined_call_operand.vmem [shape: f32[16,16], index: 1, kind: input, shape index: {}]   ;;  %s1155_s6 = inlined_call_operand.vmem [shape: f32[32,32], index: 6, kind: input, shape index: {}]   ;;  %s1156_s7 = inlined_call_operand.vmem [shape: f32[1,32], index: 7, kind: input, shape index: {}]   ;;  %s1157_s10 = inlined_call_operand.vmem [shape: f32[32,64], index: 10, kind: input, shape index: {}]   ;;  %s1158_s8 = inlined_call_operand.vmem [shape: f32[1,32], index: 8, kind: input, shape index: {}]   ;;  %s1159_s9 = inlined_call_operand.vmem [shape: f32[1,32], index: 9, kind: input, shape index: {}]   ;;  %s1160_s12 = inlined_call_operand.vmem [shape: f32[64,32], index: 12, kind: input, shape index: {}]   ;;  %s1161_s11 = inlined_call_operand.vmem [shape: f32[1,64], index: 11, kind: input, shape index: {}]   ;;  %s1162_s13 = inlined_call_operand.vmem [shape: f32[1,32], index: 13, kind: input, shape index: {}]   ;;  %s1163_s14 = inlined_call_operand.vmem [shape: f32[1,32], index: 14, kind: input, shape index: {}]   ;;  %s1164_s15 = inlined_call_operand.vmem [shape: f32[1,32], index: 15, kind: input, shape index: {}]   ;;  %s1165_s16 = inlined_call_operand.vmem [shape: f32[16,32], index: 16, kind: output, shape index: {}]  }
   0x1   :  { %1167 = sst [smem:[#allocation2_spill]] %s1149_s0  ;;  %764 = vmatprep.subr.bf16.mxu0 %v869_v14  ;;  %v104_v15 = vld [vmem:[%s1150_s4 + $0x10] sm:$0xff]  ;;  %v105_v16 = vld [vmem:[%s1150_s4 + $0x18] sm:$0xff]  ;;  %v102_v17 = vld [vmem:[%s1150_s4] sm:$0xff]  ;;  %768 = vmatprep.mubr.msk.bf16.mxu0 %vm870_vm1, %v869_v14  ;;  %s876_s21 = smov 16   ;;  %vm618_vm3 = vcmask 523264  }
   0x2   :  { %s1168_s23 = sld [smem:[#allocation2_spill]]  ;;  %v108_v18 = vpack.c.bf16 %v105_v16, %v104_v15  ;;  %v103_v19 = vld [vmem:[%s1150_s4 + $0x8] sm:$0xff]  ;;  %772 = vmatprep.subr.bf16.mxu1 %v869_v14  ;;  %774 = vmatprep.mubr.msk.bf16.mxu1 %vm870_vm1, %v869_v14  ;;  %v724_v29 = vld [vmem:[%s1151_s2] ss:$0 sm:$0xff] }
   0x3   :  { %v107_v20 = vpack.c.bf16 %v103_v19, %v102_v17  ;;  %v725_v33 = vld [vmem:[%s1152_s3] ss:$0 sm:$0xff]  ;;  %s871_s3 = smov 80   ;;  %v161_v57 = vld [vmem:[%s1154_s1 + $0x8] sm:$0xff] }
   0x4   :  { %765 = vmatpush3.bf16.msra.mxu0 %v108_v18  ;;  %v726_v39 = vld [vmem:[%s1153_s5] ss:$0 sm:$0xff] }
   0x5   :  { %766 = vmatprep.subr.bf16.mxu0 %v869_v14  ;;  %v160_v52 = vld [vmem:[%s1154_s1] sm:$0xff]  ;;  %s874_s1 = smov 64  }
   0x8   :  { %v54_v0 = vld [vmem:[%s1168_s23] sm:$0xff]  ;;  %v55_v1 = vld [vmem:[%s1168_s23 + $0x8] sm:$0xff]  ;;  %767 = vmatpush3.bf16.msra.mxu0 %v107_v20  ;;  %s872_s23 = smov 96  }
   0x9   :  { %v59_v2 = vsel %vm58_vm0, %v54_v0, 0.0  ;;  %v62_v3 = vsel %vm58_vm0, %v55_v1, 0.0  ;;  %778 = vmatprep.subr.bf16.mxu0 %v869_v14 }
   0xa   :  { %60 = vadd.xlane.f32.xlu0 %v59_v2 }
   0xe   :  { %63 = vadd.xlane.f32.xlu0 %v62_v3 }
  0x93   :  { %v61_v4 = vpop.xlane.xlu0 %60 }
  0x94   :  { %v66_v5 = vmul.f32 0.03125, %v61_v4 }
  0x96   :  { %v68_v6 = vsub.f32 %v54_v0, %v66_v5 }
  0x97   :  { %v64_v7 = vpop.xlane.xlu0 %63 }
  0x98   :  { %v67_v8 = vmul.f32 0.03125, %v64_v7  ;;  %v70_v9 = vmul.f32 %v68_v6, %v68_v6 }
  0x9a   :  { %v69_v10 = vsub.f32 %v55_v1, %v67_v8  ;;  %v72_v11 = vsel %vm58_vm0, %v70_v9, 0.0 }
  0x9b   :  { %73 = vadd.xlane.f32.xlu1 %v72_v11 }
  0x9c   :  { %v71_v12 = vmul.f32 %v69_v10, %v69_v10 }
  0x9e   :  { %v75_v13 = vsel %vm58_vm0, %v71_v12, 0.0 }
  0x9f   :  { %76 = vadd.xlane.f32.xlu1 %v75_v13 }
 0x124   :  { %v74_v21 = vpop.xlane.xlu1 %73 }
 0x125   :  { %v78_v22 = vmul.f32 0.03125, %v74_v21 }
 0x127   :  { %v80_v23 = vadd.f32 1e-12, %v78_v22 }
 0x128   :  { %v77_v24 = vpop.xlane.xlu1 %76 }
 0x129   :  { %837 = vrsqrt.f32 %v80_v23  ;;  %v79_v25 = vmul.f32 0.03125, %v77_v24 }
 0x12b   :  { %v81_v26 = vadd.f32 1e-12, %v79_v25 }
 0x12d   :  { %839 = vrsqrt.f32 %v81_v26 }
 0x136   :  { %v838_v27 = vpop.eup %837 }
 0x137   :  { %v84_v28 = vmul.f32 %v838_v27, %v68_v6 }
 0x139   :  { %v92_v32 = vmul.f32 %v724_v29, %v84_v28 }
 0x13a   :  { %v840_v30 = vpop.eup %839 }
 0x13b   :  { %v85_v31 = vmul.f32 %v840_v30, %v69_v10  ;;  %v998_v35 = vadd.f32 %v725_v33, %v92_v32 }
 0x13d   :  { %v93_v34 = vmul.f32 %v724_v29, %v85_v31 }
 0x13f   :  { %v1000_v36 = vadd.f32 %v725_v33, %v93_v34 }
 0x141   :  { %v106_v37 = vpack.c.bf16 %v1000_v36, %v998_v35 }
 0x143   :  { %769 = vmatmul.mubr.msk.bf16.vlgmr.msra.gmra.mxu0 %vm58_vm0, %v106_v37 }
 0x144   :  { %780 = vmatprep.mubr.msk.bf16.mxu0 %vm870_vm1, %v869_v14 }
 0x203   :  { %v153_v38 = vpop.f32.mrf.mxu0 }
 0x204   :  { %v154_v42 = vadd.f32 %v726_v39, %v153_v38 }
 0x205   :  { %v770_v40 = vpop.f32.mrf.mxu0 }
 0x207   :  { %v156_v41 = vpop.f32.mrf.mxu0 }
 0x208   :  { %v157_v43 = vadd.f32 %v726_v39, %v156_v41 }
 0x209   :  { %v771_v44 = vpop.f32.mrf.mxu0 }
 0x20a   :  { %v1010_v45 = vpack.c.bf16 %v157_v43, %v154_v42 }
 0x20c   :  { %290 = vrot.lane.b32.xlu1 %v1010_v45, %s871_s3  ;;  %164 = vrot.lane.b32.xlu0 %v1010_v45, %s872_s23 }
 0x210   :  { %288 = vrot.lane.b32.xlu1 %v1010_v45, %s873_s24 }
 0x27e   :  { %v165_v46 = vpop.permute.xlu0 %164  ;;  %v291_v48 = vpop.permute.xlu1 %290 }
 0x27f   :  { %v171_v47 = vsel %vm166_vm2, %v165_v46, 0  ;;  %v296_v49 = vsel %vm166_vm2, %v291_v48, 0  ;;  %v425_v48 = vld [vmem:[%s1155_s6 + $0x10] sm:$0xff] }
 0x280   :  { %773 = vmatpush3.bf16.xpose.msra.mxu1 %v171_v47 }
 0x281   :  { %784 = vmatprep.subr.bf16.mxu1 %v869_v14 }
 0x282   :  { %v289_v50 = vpop.permute.xlu1 %288 }
 0x287   :  { %775 = vmatmul.mubr.msk.bf16.vlgmr.msra.gmra.mxu1 %vm166_vm2, %v1010_v45 }
 0x288   :  { %785 = vmatpush3.bf16.xpose.msra.mxu1 %v296_v49  ;;  %786 = vmatprep.mubr.msk.bf16.mxu1 %vm870_vm1, %v869_v14  ;;  %v426_v49 = vld [vmem:[%s1155_s6 + $0x18] sm:$0xff] }
 0x289   :  { %796 = vmatprep.subr.bf16.mxu1 %v869_v14 }
 0x28f   :  { %787 = vmatmul.mubr.msk.bf16.vlgmr.msra.gmra.mxu1 %vm166_vm2, %v289_v50  ;;  %v429_v50 = vpack.c.bf16 %v426_v49, %v425_v48 }
 0x290   :  { %800 = vmatprep.mubr.msk.bf16.mxu1 %vm870_vm1, %v869_v14 }
 0x291   :  { %797 = vmatpush3.bf16.msra.mxu1 %v429_v50  ;;  %v611_v50 = vld [vmem:[%s1160_s12 + $0x30] sm:$0xff] }
 0x292   :  { %798 = vmatprep.subr.bf16.mxu1 %v869_v14 }
 0x347   :  { %v207_v51 = vpop.f32.mrf.mxu1 }
 0x348   :  { %v214_v53 = vmul.f32 0.25, %v207_v51 }
 0x349   :  { %v776_v54 = vpop.f32.mrf.mxu1 }
 0x34a   :  { %v216_v55 = vadd.f32 %v214_v53, %v160_v52  ;;  %v423_v53 = vld [vmem:[%s1155_s6] sm:$0xff]  ;;  %v424_v54 = vld [vmem:[%s1155_s6 + $0x8] sm:$0xff] }
 0x34b   :  { %v210_v56 = vpop.f32.mrf.mxu1 }
 0x34c   :  { %v215_v58 = vmul.f32 0.25, %v210_v56  ;;  %v218_v59 = vsel %vm166_vm2, %v216_v55, -inf }
 0x34d   :  { %219 = vmax.xlane.f32.xlu1 %v218_v59  ;;  %v777_v60 = vpop.f32.mrf.mxu1 }
 0x34e   :  { %v217_v61 = vadd.f32 %v215_v58, %v161_v57 }
 0x34f   :  { %v332_v62 = vpop.f32.mrf.mxu1 }
 0x350   :  { %v339_v63 = vmul.f32 0.25, %v332_v62  ;;  %v221_v0 = vsel %vm166_vm2, %v217_v61, -inf }
 0x351   :  { %222 = vmax.xlane.f32.xlu0 %v221_v0  ;;  %v788_v1 = vpop.f32.mrf.mxu1 }
 0x352   :  { %v341_v2 = vadd.f32 %v339_v63, %v160_v52 }
 0x353   :  { %v335_v3 = vpop.f32.mrf.mxu1 }
 0x354   :  { %v340_v4 = vmul.f32 0.25, %v335_v3  ;;  %v343_v5 = vsel %vm166_vm2, %v341_v2, -inf }
 0x355   :  { %344 = vmax.xlane.f32.xlu0 %v343_v5  ;;  %v789_v6 = vpop.f32.mrf.mxu1 }
 0x356   :  { %v342_v7 = vadd.f32 %v340_v4, %v161_v57  ;;  %v733_v6 = vld [vmem:[%s1156_s7] ss:$0 sm:$0xff] }
 0x358   :  { %v346_v8 = vsel %vm166_vm2, %v342_v7, -inf }
 0x359   :  { %347 = vmax.xlane.f32.xlu0 %v346_v8 }
 0x3d6   :  { %v220_v9 = vpop.xlane.xlu1 %219 }
 0x3d7   :  { %v224_v10 = vsub.f32 %v216_v55, %v220_v9  ;;  %v428_v55 = vpack.c.bf16 %v424_v54, %v423_v53  ;;  %v609_v53 = vld [vmem:[%s1160_s12 + $0x20] sm:$0xff]  ;;  %v610_v54 = vld [vmem:[%s1160_s12 + $0x28] sm:$0xff] }
 0x3d9   :  { %v226_v11 = vmul.f32 1.442695, %v224_v10  ;;  %799 = vmatpush3.bf16.msra.mxu1 %v428_v55  ;;  %v616_v55 = vpack.c.bf16 %v610_v54, %v609_v53  ;;  %v741_v54 = vld [vmem:[%s1164_s15] ss:$0 sm:$0xff] }
 0x3da   :  { %v223_v12 = vpop.xlane.xlu0 %222  ;;  %812 = vmatprep.subr.bf16.mxu1 %v869_v14 }
 0x3db   :  { %841 = vpow2.f32 %v226_v11  ;;  %v225_v13 = vsub.f32 %v217_v61, %v223_v12 }
 0x3dd   :  { %v228_v15 = vmul.f32 1.442695, %v225_v13 }
 0x3de   :  { %v345_v16 = vpop.xlane.xlu0 %344 }
 0x3df   :  { %843 = vpow2.f32 %v228_v15  ;;  %v349_v17 = vsub.f32 %v341_v2, %v345_v16 }
 0x3e1   :  { %v351_v18 = vmul.f32 1.442695, %v349_v17 }
 0x3e2   :  { %v348_v19 = vpop.xlane.xlu0 %347 }
 0x3e3   :  { %845 = vpow2.f32 %v351_v18  ;;  %v350_v20 = vsub.f32 %v342_v7, %v348_v19 }
 0x3e5   :  { %v353_v21 = vmul.f32 1.442695, %v350_v20 }
 0x3e7   :  { %847 = vpow2.f32 %v353_v21 }
 0x3e8   :  { %v842_v22 = vpop.eup %841 }
 0x3e9   :  { %v230_v23 = vsel %vm166_vm2, %v842_v22, 0.0 }
 0x3ea   :  { %231 = vadd.xlane.f32.xlu1 %v230_v23 }
 0x3ec   :  { %v844_v24 = vpop.eup %843 }
 0x3ed   :  { %v233_v25 = vsel %vm166_vm2, %v844_v24, 0.0 }
 0x3ee   :  { %234 = vadd.xlane.f32.xlu0 %v233_v25  ;;  %v531_v25 = vld [vmem:[%s1157_s10 + $0x10] sm:$0xff] }
 0x3f0   :  { %v846_v26 = vpop.eup %845 }
 0x3f1   :  { %v355_v27 = vsel %vm166_vm2, %v846_v26, 0.0 }
 0x3f2   :  { %356 = vadd.xlane.f32.xlu1 %v355_v27 }
 0x3f4   :  { %v848_v28 = vpop.eup %847 }
 0x3f5   :  { %v358_v29 = vsel %vm166_vm2, %v848_v28, 0.0 }
 0x3f6   :  { %359 = vadd.xlane.f32.xlu0 %v358_v29  ;;  %v530_v29 = vld [vmem:[%s1157_s10 + $0x8] sm:$0xff] }
 0x403   :  { %241 = vrot.lane.b32.xlu1 %v1010_v45, %s874_s1 }
 0x40c   :  { %366 = vrot.lane.b32.xlu0 %v1010_v45, %s875_s28 }
 0x473   :  { %v232_v30 = vpop.xlane.xlu1 %231 }
 0x474   :  { %849 = vrcp.f32 %v232_v30 }
 0x477   :  { %v235_v31 = vpop.xlane.xlu0 %234 }
 0x478   :  { %851 = vrcp.f32 %v235_v31 }
 0x47b   :  { %v357_v32 = vpop.xlane.xlu1 %356 }
 0x47c   :  { %853 = vrcp.f32 %v357_v32 }
 0x47f   :  { %v242_v33 = vpop.permute.xlu1 %241  ;;  %v360_v34 = vpop.xlane.xlu0 %359 }
 0x480   :  { %855 = vrcp.f32 %v360_v34  ;;  %779 = vmatpush3.bf16.msra.mxu0 %v242_v33 }
 0x481   :  { %790 = vmatprep.subr.bf16.mxu0 %v869_v14  ;;  %v850_v37 = vpop.eup %849 }
 0x482   :  { %v238_v39 = vmul.f32 %v850_v37, %v842_v22 }
 0x483   :  { %v367_v42 = vpop.permute.xlu0 %366 }
 0x485   :  { %v852_v38 = vpop.eup %851 }
 0x486   :  { %v239_v40 = vmul.f32 %v852_v38, %v844_v24 }
 0x488   :  { %v240_v41 = vpack.c.bf16 %v239_v40, %v238_v39 }
 0x489   :  { %v854_v43 = vpop.eup %853 }
 0x48a   :  { %781 = vmatmul.mubr.msk.bf16.vlgmr.msra.gmra.mxu0 %vm166_vm2, %v240_v41  ;;  %v363_v45 = vmul.f32 %v854_v43, %v846_v26  ;;  %v532_v26 = vld [vmem:[%s1157_s10 + $0x18] sm:$0xff]  ;;  %v734_v41 = vld [vmem:[%s1158_s8] ss:$0 sm:$0xff] }
 0x48b   :  { %791 = vmatpush3.bf16.msra.mxu0 %v367_v42  ;;  %792 = vmatprep.mubr.msk.bf16.mxu0 %vm870_vm1, %v869_v14  ;;  %v535_v27 = vpack.c.bf16 %v532_v26, %v531_v25 }
 0x48c   :  { %804 = vmatprep.subr.bf16.mxu0 %v869_v14 }
 0x48d   :  { %v856_v44 = vpop.eup %855 }
 0x48e   :  { %v364_v46 = vmul.f32 %v856_v44, %v848_v28  ;;  %v529_v28 = vld [vmem:[%s1157_s10] sm:$0xff] }
 0x48f   :  { %v534_v30 = vpack.c.bf16 %v530_v29, %v529_v28 }
 0x490   :  { %v365_v47 = vpack.c.bf16 %v364_v46, %v363_v45  ;;  %v735_v45 = vld [vmem:[%s1159_s9] ss:$0 sm:$0xff] }
 0x492   :  { %793 = vmatmul.mubr.msk.bf16.vlgmr.msra.gmra.mxu0 %vm166_vm2, %v365_v47 }
 0x493   :  { %808 = vmatprep.mubr.msk.bf16.mxu0 %vm870_vm1, %v869_v14  ;;  %805 = vmatpush3.bf16.msra.mxu0 %v535_v27 }
 0x494   :  { %806 = vmatprep.subr.bf16.mxu0 %v869_v14 }
 0x497   :  { %807 = vmatpush3.bf16.msra.mxu0 %v534_v30 }
 0x54a   :  { %v281_v51 = vpop.f32.mrf.mxu0 }
 0x54c   :  { %v782_v52 = vpop.f32.mrf.mxu0 }
 0x54e   :  { %v284_v56 = vpop.f32.mrf.mxu0 }
 0x550   :  { %v783_v57 = vpop.f32.mrf.mxu0 }
 0x551   :  { %v608_v57 = vld [vmem:[%s1160_s12 + $0x18] sm:$0xff] }
 0x552   :  { %v406_v58 = vpop.f32.mrf.mxu0 }
 0x554   :  { %v794_v59 = vpop.f32.mrf.mxu0 }
 0x555   :  { %v605_v59 = vld [vmem:[%s1160_s12] sm:$0xff] }
 0x556   :  { %v409_v60 = vpop.f32.mrf.mxu0 }
 0x557   :  { %v832_v61 = vpack.i.bf16 %v409_v60, %v406_v58  ;;  %v606_v60 = vld [vmem:[%s1160_s12 + $0x8] sm:$0xff] }
 0x558   :  { %v795_v62 = vpop.f32.mrf.mxu0 }
 0x559   :  { %833 = vrot.lane.b32.xlu1 %v832_v61, %s876_s21  ;;  %v614_v61 = vpack.c.bf16 %v606_v60, %v605_v59  ;;  %v736_v62 = vld [vmem:[%s1161_s11] ss:$0 sm:$0xff] }
 0x5cb   :  { %v834_v63 = vpop.permute.xlu1 %833 }
 0x5cc   :  { %v836_v0 = vunpack.i.h.bf16 %v834_v63  ;;  %v835_v1 = vunpack.i.l.bf16 %v834_v63 }
 0x5ce   :  { %v422_v2 = vsel %vm166_vm2, %v284_v56, %v836_v0  ;;  %v421_v3 = vsel %vm166_vm2, %v281_v51, %v835_v1  ;;  %v612_v51 = vld [vmem:[%s1160_s12 + $0x38] sm:$0xff]  ;;  %v607_v56 = vld [vmem:[%s1160_s12 + $0x10] sm:$0xff] }
 0x5cf   :  { %v427_v4 = vpack.c.bf16 %v422_v2, %v421_v3  ;;  %v617_v52 = vpack.c.bf16 %v612_v51, %v611_v50  ;;  %v615_v58 = vpack.c.bf16 %v608_v57, %v607_v56 }
 0x5d1   :  { %801 = vmatmul.mubr.msk.bf16.vlgmr.msra.gmra.mxu1 %vm58_vm0, %v427_v4 }
 0x5d2   :  { %820 = vmatprep.mubr.msk.bf16.mxu1 %vm870_vm1, %v869_v14  ;;  %813 = vmatpush3.bf16.msra.mxu1 %v617_v52  ;;  %v740_v52 = vld [vmem:[%s1163_s14] ss:$0 sm:$0xff] }
 0x5d3   :  { %814 = vmatprep.subr.bf16.mxu1 %v869_v14 }
 0x5d6   :  { %815 = vmatpush3.bf16.msra.mxu1 %v616_v55 }
 0x5d7   :  { %816 = vmatprep.subr.bf16.mxu1 %v869_v14 }
 0x5da   :  { %817 = vmatpush3.bf16.msra.mxu1 %v615_v58 }
 0x5db   :  { %818 = vmatprep.subr.bf16.mxu1 %v869_v14 }
 0x5de   :  { %819 = vmatpush3.bf16.msra.mxu1 %v614_v61 }
 0x691   :  { %v467_v5 = vpop.f32.mrf.mxu1 }
 0x692   :  { %v474_v7 = vadd.f32 %v467_v5, %v998_v35 }
 0x693   :  { %v802_v8 = vpop.f32.mrf.mxu1 }
 0x694   :  { %v483_v9 = vadd.f32 %v733_v6, %v474_v7 }
 0x695   :  { %v470_v10 = vpop.f32.mrf.mxu1 }
 0x696   :  { %v475_v11 = vadd.f32 %v470_v10, %v1000_v36  ;;  %v487_v12 = vsel %vm58_vm0, %v483_v9, 0.0 }
 0x697   :  { %488 = vadd.xlane.f32.xlu1 %v487_v12  ;;  %v803_v13 = vpop.f32.mrf.mxu1 }
 0x698   :  { %v484_v15 = vadd.f32 %v733_v6, %v475_v11 }
 0x69a   :  { %v490_v16 = vsel %vm58_vm0, %v484_v15, 0.0 }
 0x69b   :  { %491 = vadd.xlane.f32.xlu0 %v490_v16 }
 0x720   :  { %v489_v17 = vpop.xlane.xlu1 %488 }
 0x721   :  { %v493_v18 = vmul.f32 0.03125, %v489_v17 }
 0x723   :  { %v495_v19 = vsub.f32 %v483_v9, %v493_v18 }
 0x724   :  { %v492_v20 = vpop.xlane.xlu0 %491 }
 0x725   :  { %v494_v21 = vmul.f32 0.03125, %v492_v20  ;;  %v497_v22 = vmul.f32 %v495_v19, %v495_v19 }
 0x727   :  { %v496_v35 = vsub.f32 %v484_v15, %v494_v21  ;;  %v499_v23 = vsel %vm58_vm0, %v497_v22, 0.0 }
 0x728   :  { %500 = vadd.xlane.f32.xlu0 %v499_v23 }
 0x729   :  { %v498_v24 = vmul.f32 %v496_v35, %v496_v35 }
 0x72b   :  { %v502_v36 = vsel %vm58_vm0, %v498_v24, 0.0  ;;  %v739_v24 = vld [vmem:[%s1162_s13] ss:$0 sm:$0xff] }
 0x72c   :  { %503 = vadd.xlane.f32.xlu1 %v502_v36 }
 0x7b1   :  { %v501_v31 = vpop.xlane.xlu0 %500 }
 0x7b2   :  { %v505_v32 = vmul.f32 0.03125, %v501_v31 }
 0x7b4   :  { %v507_v33 = vadd.f32 1e-12, %v505_v32 }
 0x7b5   :  { %v504_v34 = vpop.xlane.xlu1 %503 }
 0x7b6   :  { %857 = vrsqrt.f32 %v507_v33  ;;  %v506_v37 = vmul.f32 0.03125, %v504_v34 }
 0x7b8   :  { %v508_v38 = vadd.f32 1e-12, %v506_v37 }
 0x7ba   :  { %859 = vrsqrt.f32 %v508_v38 }
 0x7c3   :  { %v858_v39 = vpop.eup %857 }
 0x7c4   :  { %v511_v40 = vmul.f32 %v858_v39, %v495_v19 }
 0x7c6   :  { %v519_v44 = vmul.f32 %v734_v41, %v511_v40 }
 0x7c7   :  { %v860_v42 = vpop.eup %859 }
 0x7c8   :  { %v512_v43 = vmul.f32 %v860_v42, %v496_v35  ;;  %v527_v47 = vadd.f32 %v735_v45, %v519_v44 }
 0x7ca   :  { %v520_v46 = vmul.f32 %v734_v41, %v512_v43 }
 0x7cc   :  { %v528_v48 = vadd.f32 %v735_v45, %v520_v46 }
 0x7ce   :  { %v533_v49 = vpack.c.bf16 %v528_v48, %v527_v47 }
 0x7d0   :  { %809 = vmatmul.mubr.msk.bf16.vlgmr.msra.gmra.mxu0 %vm58_vm0, %v533_v49 }
 0x890   :  { %v580_v63 = vpop.f32.mrf.mxu0 }
 0x891   :  { %v581_v0 = vadd.f32 %v736_v62, %v580_v63 }
 0x892   :  { %v810_v1 = vpop.f32.mrf.mxu0 }
 0x893   :  { %v587_v2 = vmul.f32 %v581_v0, %v581_v0 }
 0x894   :  { %v583_v3 = vpop.f32.mrf.mxu0 }
 0x895   :  { %v589_v14 = vmul.f32 %v587_v2, %v581_v0  ;;  %v584_v4 = vadd.f32 %v736_v62, %v583_v3 }
 0x896   :  { %v811_v5 = vpop.f32.mrf.mxu0 }
 0x897   :  { %v591_v6 = vmul.f32 0.044715, %v589_v14  ;;  %v588_v7 = vmul.f32 %v584_v4, %v584_v4 }
 0x899   :  { %v593_v8 = vadd.f32 %v591_v6, %v581_v0  ;;  %v590_v9 = vmul.f32 %v588_v7, %v584_v4 }
 0x89b   :  { %v595_v10 = vmul.f32 0.7978846, %v593_v8  ;;  %v592_v11 = vmul.f32 0.044715, %v590_v9 }
 0x89d   :  { %861 = vtanh.f32 %v595_v10  ;;  %v594_v12 = vadd.f32 %v592_v11, %v584_v4 }
 0x89f   :  { %v596_v13 = vmul.f32 0.7978846, %v594_v12 }
 0x8a1   :  { %863 = vtanh.f32 %v596_v13 }
 0x8aa   :  { %v862_v15 = vpop.eup %861 }
 0x8ab   :  { %v599_v16 = vadd.f32 1.0, %v862_v15 }
 0x8ad   :  { %v601_v18 = vmul.f32 0.5, %v599_v16 }
 0x8ae   :  { %v864_v17 = vpop.eup %863 }
 0x8af   :  { %v600_v19 = vadd.f32 1.0, %v864_v17  ;;  %v603_v21 = vmul.f32 %v601_v18, %v581_v0 }
 0x8b1   :  { %v602_v20 = vmul.f32 0.5, %v600_v19 }
 0x8b3   :  { %v604_v22 = vmul.f32 %v602_v20, %v584_v4 }
 0x8b5   :  { %v613_v35 = vpack.c.bf16 %v604_v22, %v603_v21 }
 0x8b7   :  { %821 = vmatmul.mubr.msk.bf16.vlgmr.msra.gmra.mxu1 %vm618_vm3, %v613_v35 }
 0x977   :  { %v656_v23 = vpop.f32.mrf.mxu1 }
 0x978   :  { %v663_v36 = vadd.f32 %v656_v23, %v527_v47 }
 0x979   :  { %v822_v25 = vpop.f32.mrf.mxu1 }
 0x97a   :  { %v672_v26 = vadd.f32 %v739_v24, %v663_v36 }
 0x97b   :  { %v659_v27 = vpop.f32.mrf.mxu1 }
 0x97c   :  { %v664_v28 = vadd.f32 %v659_v27, %v528_v48  ;;  %v676_v29 = vsel %vm58_vm0, %v672_v26, 0.0 }
 0x97d   :  { %677 = vadd.xlane.f32.xlu0 %v676_v29  ;;  %v823_v30 = vpop.f32.mrf.mxu1 }
 0x97e   :  { %v673_v31 = vadd.f32 %v739_v24, %v664_v28 }
 0x980   :  { %v679_v32 = vsel %vm58_vm0, %v673_v31, 0.0 }
 0x981   :  { %680 = vadd.xlane.f32.xlu1 %v679_v32 }
 0xa06   :  { %v678_v33 = vpop.xlane.xlu0 %677 }
 0xa07   :  { %v682_v34 = vmul.f32 0.03125, %v678_v33 }
 0xa09   :  { %v684_v37 = vsub.f32 %v672_v26, %v682_v34 }
 0xa0a   :  { %v681_v38 = vpop.xlane.xlu1 %680 }
 0xa0b   :  { %v683_v39 = vmul.f32 0.03125, %v681_v38  ;;  %v686_v40 = vmul.f32 %v684_v37, %v684_v37 }
 0xa0d   :  { %v685_v41 = vsub.f32 %v673_v31, %v683_v39  ;;  %v688_v42 = vsel %vm58_vm0, %v686_v40, 0.0 }
 0xa0e   :  { %689 = vadd.xlane.f32.xlu0 %v688_v42 }
 0xa0f   :  { %v687_v43 = vmul.f32 %v685_v41, %v685_v41 }
 0xa11   :  { %v691_v44 = vsel %vm58_vm0, %v687_v43, 0.0 }
 0xa12   :  { %692 = vadd.xlane.f32.xlu1 %v691_v44 }
 0xa97   :  { %v690_v45 = vpop.xlane.xlu0 %689 }
 0xa98   :  { %v694_v46 = vmul.f32 0.03125, %v690_v45 }
 0xa9a   :  { %v696_v47 = vadd.f32 1e-12, %v694_v46 }
 0xa9b   :  { %v693_v48 = vpop.xlane.xlu1 %692 }
 0xa9c   :  { %865 = vrsqrt.f32 %v696_v47  ;;  %v695_v49 = vmul.f32 0.03125, %v693_v48 }
 0xa9e   :  { %v697_v50 = vadd.f32 1e-12, %v695_v49 }
 0xaa0   :  { %867 = vrsqrt.f32 %v697_v50 }
 0xaa9   :  { %v866_v51 = vpop.eup %865 }
 0xaaa   :  { %v700_v53 = vmul.f32 %v866_v51, %v684_v37 }
 0xaac   :  { %v708_v55 = vmul.f32 %v740_v52, %v700_v53 }
 0xaad   :  { %v868_v56 = vpop.eup %867 }
 0xaae   :  { %v716_v57 = vadd.f32 %v741_v54, %v708_v55  ;;  %v701_v58 = vmul.f32 %v868_v56, %v685_v41 }
 0xab0   :  { %718 = vst.msk [vmem:[%s1165_s16] sm:$0xff] %vm58_vm0, %v716_v57  ;;  %v709_v59 = vmul.f32 %v740_v52, %v701_v58 }
 0xab2   :  { %v717_v60 = vadd.f32 %v741_v54, %v709_v59 }
 0xab4   :  { %719 = vst.msk [vmem:[%s1165_s16 + $0x8] sm:$0xff] %vm58_vm0, %v717_v60 }

// kernel: blip_forward.21
= control target key start
LH: loop header
LB: loop body
LE: loop exit
PB: predicated region body
PF: predicated region fallthrough
CT: control target
= control target key end

     0   :  { %vm88_vm0 = vcmask 261120   ;;  %vm92_vm1 = vcmask 254976   ;;  %v1496_v14 = vmov 0.0   ;;  %vm1497_vm2 = vmmov 0   ;;  %s1499_s30 = smov 96   ;;  %s1503_s27 = smov 16   ;;  %s1959_s0 = inlined_call_operand.vmem [shape: f32[10,32], index: 0, kind: input, shape index: {}]   ;;  %s1960_s6 = inlined_call_operand.vmem [shape: f32[32,96], index: 6, kind: input, shape index: {}]   ;;  %s1961_s4 = inlined_call_operand.vmem [shape: f32[1,32], index: 4, kind: input, shape index: {}]   ;;  %s1962_s5 = inlined_call_operand.vmem [shape: f32[1,32], index: 5, kind: input, shape index: {}]   ;;  %s1963_s7 = inlined_call_operand.vmem [shape: f32[1,96], index: 7, kind: input, shape index: {}]   ;;  %s1964_s1 = inlined_call_operand.vmem [shape: f32[10,10], index: 1, kind: input, shape index: {}]   ;;  %s1965_s8 = inlined_call_operand.vmem [shape: f32[32,32], index: 8, kind: input, shape index: {}]   ;;  %s1966_s9 = inlined_call_operand.vmem [shape: f32[1,32], index: 9, kind: input, shape index: {}]   ;;  %s1967_s14 = inlined_call_operand.vmem [shape: f32[32,64], index: 14, kind: input, shape index: {}]   ;;  %s1968_s2 = inlined_call_operand.vmem [shape: f32[16,32], index: 2, kind: input, shape index: {}]   ;;  %s1969_s12 = inlined_call_operand.vmem [shape: f32[32,32], index: 12, kind: input, shape index: {}]   ;;  %s1970_s10 = inlined_call_operand.vmem [shape: f32[1,32], index: 10, kind: input, shape index: {}]   ;;  %s1971_s11 = inlined_call_operand.vmem [shape: f32[1,32], index: 11, kind: input, shape index: {}]   ;;  %s1972_s15 = inlined_call_operand.vmem [shape: f32[1,64], index: 15, kind: input, shape index: {}]   ;;  %s1973_s13 = inlined_call_operand.vmem [shape: f32[1,32], index: 13, kind: input, shape index: {}]   ;;  %s1974_s3 = inlined_call_operand.vmem [shape: f32[10,16], index: 3, kind: input, shape index: {}]   ;;  %s1975_s16 = inlined_call_operand.vmem [shape: f32[32,32], index: 16, kind: input, shape index: {}]   ;;  %s1976_s17 = inlined_call_operand.vmem [shape: f32[1,32], index: 17, kind: input, shape index: {}]   ;;  %s1977_s20 = inlined_call_operand.vmem [shape: f32[32,64], index: 20, kind: input, shape index: {}]   ;;  %s1978_s18 = inlined_call_operand.vmem [shape: f32[1,32], index: 18, kind: input, shape index: {}]   ;;  %s1979_s19 = inlined_call_operand.vmem [shape: f32[1,32], index: 19, kind: input, shape index: {}]   ;;  %s1980_s22 = inlined_call_operand.vmem [shape: f32[64,32], index: 22, kind: input, shape index: {}]   ;;  %s1981_s21 = inlined_call_operand.vmem [shape: f32[1,64], index: 21, kind: input, shape index: {}]   ;;  %s1982_s23 = inlined_call_operand.vmem [shape: f32[1,32], index: 23, kind: input, shape index: {}]   ;;  %s1983_s24 = inlined_call_operand.vmem [shape: f32[1,32], index: 24, kind: input, shape index: {}]   ;;  %s1984_s25 = inlined_call_operand.vmem [shape: f32[1,32], index: 25, kind: input, shape index: {}]   ;;  %s1985_s26 = inlined_call_operand.vmem [shape: f32[10,32], index: 26, kind: output, shape index: {}]  }
   0x1   :  { %1993 = sst [smem:[#allocation2_spill]] %s1959_s0  ;;  %1318 = vmatprep.subr.bf16.mxu1 %v1496_v14  ;;  %1322 = vmatprep.mubr.msk.bf16.mxu1 %vm1497_vm2, %v1496_v14  ;;  %vm197_vm3 = vcmask 130048   ;;  %vm249_vm4 = vcmask 80896   ;;  %vm253_vm5 = vcmask 74752   ;;  %vm279_vm6 = vcmask 1044480  }
   0x2   :  { %1994 = sst [smem:[#allocation3_spill]] %s1960_s6  ;;  %1332 = vmatprep.subr.bf16.mxu0 %v1496_v14  ;;  %1334 = vmatprep.mubr.msk.bf16.mxu0 %vm1497_vm2, %v1496_v14  ;;  %vm743_vm7 = vcmask 123904   ;;  %vm1143_vm8 = vcmask 523264  }
   0x3   :  { %1995 = sst [smem:[#allocation4_spill]] %s1961_s4 }
   0x4   :  { %1996 = sst [smem:[#allocation5_spill]] %s1962_s5 }
   0x5   :  { %1997 = sst [smem:[#allocation6_spill]] %s1963_s7 }
   0x6   :  { %1998 = sst [smem:[#allocation7_spill]] %s1964_s1  ;;  %s1500_s1 = smov 112  }
   0x7   :  { %1999 = sst [smem:[#allocation8_spill]] %s1965_s8 }
   0x8   :  { %2000 = sst [smem:[#allocation9_spill]] %s1966_s9 }
   0x9   :  { %2001 = sst [smem:[#allocation10_spill]] %s1967_s14 }
   0xa   :  { %2002 = sst [smem:[#allocation11_spill]] %s1968_s2  ;;  %s1498_s2 = smov 80  }
   0xb   :  { %2003 = sst [smem:[#allocation12_spill]] %s1969_s12 }
   0xc   :  { %s2004_s9 = sld [smem:[#allocation2_spill]] }
   0xd   :  { %s2005_s0 = sld [smem:[#allocation3_spill]] }
   0xe   :  { %s2006_s6 = sld [smem:[#allocation4_spill]] }
   0xf   :  { %s2007_s14 = sld [smem:[#allocation5_spill]] }
  0x10   :  { %s2009_s8 = sld [smem:[#allocation7_spill]] }
  0x11   :  { %s2010_s7 = sld [smem:[#allocation8_spill]] }
  0x12   :  { %v84_v0 = vld [vmem:[%s2004_s9] sm:$0xff]  ;;  %v85_v1 = vld [vmem:[%s2004_s9 + $0x8] sm:$0x3]  ;;  %s1502_s9 = smov 48   ;;  %s2011_s28 = sld [smem:[#allocation9_spill]] }
  0x13   :  { %v89_v2 = vsel %vm88_vm0, %v84_v0, 0.0  ;;  %v93_v3 = vsel %vm92_vm1, %v85_v1, 0.0  ;;  %v135_v15 = vld [vmem:[%s2005_s0 + $0x10] sm:$0xff]  ;;  %v136_v16 = vld [vmem:[%s2005_s0 + $0x18] sm:$0xff]  ;;  %v133_v17 = vld [vmem:[%s2005_s0] sm:$0xff]  ;;  %s2012_s29 = sld [smem:[#allocation10_spill]] }
  0x14   :  { %90 = vadd.xlane.f32.xlu0 %v89_v2  ;;  %v139_v18 = vpack.c.bf16 %v136_v16, %v135_v15  ;;  %v134_v19 = vld [vmem:[%s2005_s0 + $0x8] sm:$0xff]  ;;  %v1249_v29 = vld [vmem:[%s2006_s6] ss:$0 sm:$0xff]  ;;  %s2008_s0 = sld [smem:[#allocation6_spill]]  ;;  %s1501_s6 = smov 64  }
  0x15   :  { %v138_v20 = vpack.c.bf16 %v134_v19, %v133_v17  ;;  %v1250_v33 = vld [vmem:[%s2007_s14] ss:$0 sm:$0xff]  ;;  %s2013_s14 = sld [smem:[#allocation11_spill]] }
  0x16   :  { %1319 = vmatpush3.bf16.msra.mxu1 %v139_v18  ;;  %v191_v52 = vld [vmem:[%s2009_s8] sm:$0xff]  ;;  %v192_v57 = vld [vmem:[%s2009_s8 + $0x8] sm:$0x3]  ;;  %s2014_s12 = sld [smem:[#allocation12_spill]] }
  0x17   :  { %1320 = vmatprep.subr.bf16.mxu1 %v1496_v14 }
  0x18   :  { %94 = vadd.xlane.f32.xlu0 %v93_v3 }
  0x1a   :  { %1321 = vmatpush3.bf16.msra.mxu1 %v138_v20  ;;  %v1251_v39 = vld [vmem:[%s2008_s0] ss:$0 sm:$0xff] }
  0x1b   :  { %1326 = vmatprep.subr.bf16.mxu1 %v1496_v14 }
  0x9d   :  { %v91_v4 = vpop.xlane.xlu0 %90 }
  0x9e   :  { %v97_v5 = vmul.f32 0.03125, %v91_v4 }
  0xa0   :  { %v99_v6 = vsub.f32 %v84_v0, %v97_v5 }
  0xa1   :  { %v95_v7 = vpop.xlane.xlu0 %94 }
  0xa2   :  { %v98_v8 = vmul.f32 0.03125, %v95_v7  ;;  %v101_v9 = vmul.f32 %v99_v6, %v99_v6 }
  0xa4   :  { %v100_v10 = vsub.f32 %v85_v1, %v98_v8  ;;  %v103_v11 = vsel %vm88_vm0, %v101_v9, 0.0 }
  0xa5   :  { %104 = vadd.xlane.f32.xlu1 %v103_v11 }
  0xa6   :  { %v102_v12 = vmul.f32 %v100_v10, %v100_v10 }
  0xa8   :  { %v106_v13 = vsel %vm92_vm1, %v102_v12, 0.0 }
  0xa9   :  { %107 = vadd.xlane.f32.xlu1 %v106_v13 }
 0x12e   :  { %v105_v21 = vpop.xlane.xlu1 %104 }
 0x12f   :  { %v109_v22 = vmul.f32 0.03125, %v105_v21 }
 0x131   :  { %v111_v23 = vadd.f32 1e-12, %v109_v22 }
 0x132   :  { %v108_v24 = vpop.xlane.xlu1 %107 }
 0x133   :  { %1444 = vrsqrt.f32 %v111_v23  ;;  %v110_v25 = vmul.f32 0.03125, %v108_v24 }
 0x135   :  { %v112_v26 = vadd.f32 1e-12, %v110_v25 }
 0x137   :  { %1446 = vrsqrt.f32 %v112_v26 }
 0x140   :  { %v1445_v27 = vpop.eup %1444 }
 0x141   :  { %v115_v28 = vmul.f32 %v1445_v27, %v99_v6 }
 0x143   :  { %v123_v32 = vmul.f32 %v1249_v29, %v115_v28 }
 0x144   :  { %v1447_v30 = vpop.eup %1446 }
 0x145   :  { %v116_v31 = vmul.f32 %v1447_v30, %v100_v10  ;;  %v1675_v35 = vadd.f32 %v1250_v33, %v123_v32 }
 0x147   :  { %v124_v34 = vmul.f32 %v1249_v29, %v116_v31 }
 0x149   :  { %v1677_v36 = vadd.f32 %v1250_v33, %v124_v34 }
 0x14b   :  { %v137_v37 = vpack.c.bf16 %v1677_v36, %v1675_v35 }
 0x14d   :  { %1323 = vmatmul.mubr.msk.bf16.vlgmr.msra.gmra.mxu1 %vm88_vm0, %v137_v37 }
 0x14e   :  { %1328 = vmatprep.mubr.msk.bf16.mxu1 %vm1497_vm2, %v1496_v14 }
 0x20d   :  { %v184_v38 = vpop.f32.mrf.mxu1 }
 0x20e   :  { %v185_v42 = vadd.f32 %v1251_v39, %v184_v38 }
 0x20f   :  { %v1324_v40 = vpop.f32.mrf.mxu1 }
 0x211   :  { %v187_v41 = vpop.f32.mrf.mxu1 }
 0x212   :  { %v188_v43 = vadd.f32 %v1251_v39, %v187_v41 }
 0x213   :  { %v1325_v44 = vpop.f32.mrf.mxu1 }
 0x214   :  { %v1687_v45 = vpack.c.bf16 %v188_v43, %v185_v42 }
 0x216   :  { %326 = vrot.lane.b32.xlu1 %v1687_v45, %s1498_s2  ;;  %195 = vrot.lane.b32.xlu0 %v1687_v45, %s1499_s30 }
 0x21a   :  { %324 = vrot.lane.b32.xlu1 %v1687_v45, %s1500_s1 }
 0x288   :  { %v196_v46 = vpop.permute.xlu0 %195  ;;  %v327_v48 = vpop.permute.xlu1 %326 }
 0x289   :  { %v202_v47 = vsel %vm197_vm3, %v196_v46, 0  ;;  %v332_v49 = vsel %vm197_vm3, %v327_v48, 0 }
 0x28a   :  { %1327 = vmatpush3.bf16.xpose.msra.mxu1 %v202_v47 }
 0x28b   :  { %1338 = vmatprep.subr.bf16.mxu1 %v1496_v14 }
 0x28c   :  { %v325_v50 = vpop.permute.xlu1 %324 }
 0x291   :  { %1329 = vmatmul.mubr.msk.bf16.vlgmr.msra.gmra.mxu1 %vm197_vm3, %v1687_v45 }
 0x292   :  { %1339 = vmatpush3.bf16.xpose.msra.mxu1 %v332_v49  ;;  %1340 = vmatprep.mubr.msk.bf16.mxu1 %vm1497_vm2, %v1496_v14 }
 0x293   :  { %1350 = vmatprep.subr.bf16.mxu1 %v1496_v14 }
 0x299   :  { %1341 = vmatmul.mubr.msk.bf16.vlgmr.msra.gmra.mxu1 %vm197_vm3, %v325_v50  ;;  %v463_v50 = vld [vmem:[%s2010_s7 + $0x10] sm:$0xff] }
 0x29a   :  { %1354 = vmatprep.mubr.msk.bf16.mxu1 %vm1497_vm2, %v1496_v14 }
 0x351   :  { %v238_v51 = vpop.f32.mrf.mxu1 }
 0x352   :  { %v245_v53 = vmul.f32 0.25, %v238_v51  ;;  %v464_v51 = vld [vmem:[%s2010_s7 + $0x18] sm:$0xff] }
 0x353   :  { %v1330_v54 = vpop.f32.mrf.mxu1 }
 0x354   :  { %v247_v55 = vadd.f32 %v245_v53, %v191_v52 }
 0x355   :  { %v241_v56 = vpop.f32.mrf.mxu1 }
 0x356   :  { %v246_v58 = vmul.f32 0.25, %v241_v56  ;;  %v250_v59 = vsel %vm249_vm4, %v247_v55, -inf  ;;  %v462_v56 = vld [vmem:[%s2010_s7 + $0x8] sm:$0xff] }
 0x357   :  { %251 = vmax.xlane.f32.xlu1 %v250_v59  ;;  %v1331_v60 = vpop.f32.mrf.mxu1 }
 0x358   :  { %v248_v61 = vadd.f32 %v246_v58, %v192_v57 }
 0x359   :  { %v368_v62 = vpop.f32.mrf.mxu1 }
 0x35a   :  { %v375_v63 = vmul.f32 0.25, %v368_v62  ;;  %v254_v0 = vsel %vm253_vm5, %v248_v61, -inf }
 0x35b   :  { %255 = vmax.xlane.f32.xlu0 %v254_v0  ;;  %v1342_v1 = vpop.f32.mrf.mxu1 }
 0x35c   :  { %v377_v2 = vadd.f32 %v375_v63, %v191_v52  ;;  %v467_v52 = vpack.c.bf16 %v464_v51, %v463_v50 }
 0x35d   :  { %v371_v3 = vpop.f32.mrf.mxu1 }
 0x35e   :  { %v376_v4 = vmul.f32 0.25, %v371_v3  ;;  %v379_v5 = vsel %vm249_vm4, %v377_v2, -inf  ;;  %1351 = vmatpush3.bf16.msra.mxu1 %v467_v52  ;;  %v1259_v52 = vld [vmem:[%s1970_s10] ss:$0 sm:$0xff] }
 0x35f   :  { %380 = vmax.xlane.f32.xlu0 %v379_v5  ;;  %v1343_v6 = vpop.f32.mrf.mxu1  ;;  %1352 = vmatprep.subr.bf16.mxu1 %v1496_v14 }
 0x360   :  { %v378_v7 = vadd.f32 %v376_v4, %v192_v57 }
 0x362   :  { %v382_v8 = vsel %vm253_vm5, %v378_v7, -inf }
 0x363   :  { %383 = vmax.xlane.f32.xlu0 %v382_v8  ;;  %v1258_v8 = vld [vmem:[%s2011_s28] ss:$0 sm:$0xff] }
 0x3e0   :  { %v252_v9 = vpop.xlane.xlu1 %251 }
 0x3e1   :  { %v257_v10 = vsub.f32 %v247_v55, %v252_v9  ;;  %v461_v55 = vld [vmem:[%s2010_s7] sm:$0xff] }
 0x3e2   :  { %v466_v57 = vpack.c.bf16 %v462_v56, %v461_v55  ;;  %v1260_v56 = vld [vmem:[%s1971_s11] ss:$0 sm:$0xff] }
 0x3e3   :  { %v259_v11 = vmul.f32 1.442695, %v257_v10 }
 0x3e4   :  { %v256_v12 = vpop.xlane.xlu0 %255  ;;  %1353 = vmatpush3.bf16.msra.mxu1 %v466_v57 }
 0x3e5   :  { %1448 = vpow2.f32 %v259_v11  ;;  %v258_v13 = vsub.f32 %v248_v61, %v256_v12  ;;  %1366 = vmatprep.subr.bf16.mxu1 %v1496_v14 }
 0x3e7   :  { %v261_v15 = vmul.f32 1.442695, %v258_v13 }
 0x3e8   :  { %v381_v16 = vpop.xlane.xlu0 %380 }
 0x3e9   :  { %1450 = vpow2.f32 %v261_v15  ;;  %v385_v17 = vsub.f32 %v377_v2, %v381_v16 }
 0x3eb   :  { %v387_v18 = vmul.f32 1.442695, %v385_v17 }
 0x3ec   :  { %v384_v19 = vpop.xlane.xlu0 %383 }
 0x3ed   :  { %1452 = vpow2.f32 %v387_v18  ;;  %v386_v20 = vsub.f32 %v378_v7, %v384_v19 }
 0x3ef   :  { %v389_v21 = vmul.f32 1.442695, %v386_v20 }
 0x3f1   :  { %1454 = vpow2.f32 %v389_v21 }
 0x3f2   :  { %v1449_v22 = vpop.eup %1448 }
 0x3f3   :  { %v263_v23 = vsel %vm249_vm4, %v1449_v22, 0.0 }
 0x3f4   :  { %264 = vadd.xlane.f32.xlu1 %v263_v23 }
 0x3f6   :  { %v1451_v24 = vpop.eup %1450 }
 0x3f7   :  { %v266_v25 = vsel %vm253_vm5, %v1451_v24, 0.0 }
 0x3f8   :  { %267 = vadd.xlane.f32.xlu0 %v266_v25 }
 0x3fa   :  { %v1453_v26 = vpop.eup %1452 }
 0x3fb   :  { %v391_v27 = vsel %vm249_vm4, %v1453_v26, 0.0 }
 0x3fc   :  { %392 = vadd.xlane.f32.xlu1 %v391_v27  ;;  %v629_v27 = vld [vmem:[%s2012_s29 + $0x10] sm:$0xff] }
 0x3fe   :  { %v1455_v28 = vpop.eup %1454 }
 0x3ff   :  { %v394_v29 = vsel %vm253_vm5, %v1455_v28, 0.0 }
 0x400   :  { %395 = vadd.xlane.f32.xlu0 %v394_v29 }
 0x40d   :  { %274 = vrot.lane.b32.xlu1 %v1687_v45, %s1501_s6 }
 0x416   :  { %402 = vrot.lane.b32.xlu0 %v1687_v45, %s1502_s9 }
 0x47d   :  { %v265_v30 = vpop.xlane.xlu1 %264 }
 0x47e   :  { %1456 = vrcp.f32 %v265_v30  ;;  %v627_v30 = vld [vmem:[%s2012_s29] sm:$0xff] }
 0x481   :  { %v268_v31 = vpop.xlane.xlu0 %267 }
 0x482   :  { %1458 = vrcp.f32 %v268_v31  ;;  %v628_v31 = vld [vmem:[%s2012_s29 + $0x8] sm:$0xff] }
 0x485   :  { %v393_v32 = vpop.xlane.xlu1 %392 }
 0x486   :  { %1460 = vrcp.f32 %v393_v32  ;;  %v632_v32 = vpack.c.bf16 %v628_v31, %v627_v30 }
 0x489   :  { %v275_v33 = vpop.permute.xlu1 %274  ;;  %v396_v34 = vpop.xlane.xlu0 %395 }
 0x48a   :  { %1462 = vrcp.f32 %v396_v34  ;;  %v281_v37 = vsel %vm279_vm6, %v275_v33, 0  ;;  %v567_v33 = vld [vmem:[%s2013_s14] sm:$0xff]  ;;  %v568_v34 = vld [vmem:[%s2013_s14 + $0x8] sm:$0xff] }
 0x48b   :  { %1333 = vmatpush3.bf16.msra.mxu0 %v281_v37  ;;  %v1457_v38 = vpop.eup %1456  ;;  %v631_v37 = vpack.c.bf16 %v568_v34, %v567_v33 }
 0x48c   :  { %1344 = vmatprep.subr.bf16.mxu0 %v1496_v14  ;;  %v271_v40 = vmul.f32 %v1457_v38, %v1449_v22  ;;  %v571_v38 = vld [vmem:[%s2014_s12 + $0x10] sm:$0xff] }
 0x48d   :  { %v403_v42 = vpop.permute.xlu0 %402 }
 0x48e   :  { %v408_v44 = vsel %vm279_vm6, %v403_v42, 0  ;;  %v570_v42 = vld [vmem:[%s2014_s12 + $0x8] sm:$0xff] }
 0x48f   :  { %v1459_v39 = vpop.eup %1458 }
 0x490   :  { %v272_v41 = vmul.f32 %v1459_v39, %v1451_v24  ;;  %v572_v39 = vld [vmem:[%s2014_s12 + $0x18] sm:$0xff] }
 0x492   :  { %v273_v43 = vpack.c.bf16 %v272_v41, %v271_v40  ;;  %v575_v40 = vpack.c.bf16 %v572_v39, %v571_v38  ;;  %v569_v41 = vld [vmem:[%s2014_s12] sm:$0xff] }
 0x493   :  { %v1461_v45 = vpop.eup %1460 }
 0x494   :  { %1335 = vmatmul.mubr.msk.bf16.vlgmr.msra.gmra.mxu0 %vm249_vm4, %v273_v43  ;;  %v399_v47 = vmul.f32 %v1461_v45, %v1453_v26  ;;  %v574_v43 = vpack.c.bf16 %v570_v42, %v569_v41 }
 0x495   :  { %1345 = vmatpush3.bf16.msra.mxu0 %v408_v44  ;;  %1346 = vmatprep.mubr.msk.bf16.mxu0 %vm1497_vm2, %v1496_v14 }
 0x496   :  { %1358 = vmatprep.subr.bf16.mxu0 %v1496_v14 }
 0x497   :  { %v1463_v46 = vpop.eup %1462 }
 0x498   :  { %v400_v48 = vmul.f32 %v1463_v46, %v1455_v28  ;;  %v630_v28 = vld [vmem:[%s2012_s29 + $0x18] sm:$0xff] }
 0x499   :  { %v633_v29 = vpack.c.bf16 %v630_v28, %v629_v27 }
 0x49a   :  { %v401_v49 = vpack.c.bf16 %v400_v48, %v399_v47 }
 0x49c   :  { %1347 = vmatmul.mubr.msk.bf16.vlgmr.msra.gmra.mxu0 %vm249_vm4, %v401_v49 }
 0x49d   :  { %1362 = vmatprep.mubr.msk.bf16.mxu0 %vm1497_vm2, %v1496_v14  ;;  %1359 = vmatpush3.bf16.msra.mxu0 %v575_v40 }
 0x49e   :  { %1360 = vmatprep.subr.bf16.mxu0 %v1496_v14 }
 0x4a1   :  { %1361 = vmatpush3.bf16.msra.mxu0 %v574_v43 }
 0x4a2   :  { %1374 = vmatprep.subr.bf16.mxu0 %v1496_v14 }
 0x554   :  { %v317_v53 = vpop.f32.mrf.mxu0 }
 0x556   :  { %v1336_v54 = vpop.f32.mrf.mxu0 }
 0x558   :  { %v320_v58 = vpop.f32.mrf.mxu0 }
 0x55a   :  { %v1337_v59 = vpop.f32.mrf.mxu0 }
 0x55c   :  { %v444_v60 = vpop.f32.mrf.mxu0 }
 0x55e   :  { %v1348_v61 = vpop.f32.mrf.mxu0 }
 0x55f   :  { %v1263_v61 = vld [vmem:[%s1972_s15] ss:$0 sm:$0xff] }
 0x560   :  { %v447_v62 = vpop.f32.mrf.mxu0 }
 0x561   :  { %v1434_v63 = vpack.i.bf16 %v447_v62, %v444_v60 }
 0x562   :  { %v1349_v0 = vpop.f32.mrf.mxu0 }
 0x563   :  { %1435 = vrot.lane.b32.xlu1 %v1434_v63, %s1503_s27 }
 0x5d5   :  { %v1436_v1 = vpop.permute.xlu1 %1435 }
 0x5d6   :  { %v1438_v2 = vunpack.i.h.bf16 %v1436_v1  ;;  %v1437_v3 = vunpack.i.l.bf16 %v1436_v1 }
 0x5d8   :  { %v460_v4 = vsel %vm197_vm3, %v320_v58, %v1438_v2  ;;  %v459_v5 = vsel %vm197_vm3, %v317_v53, %v1437_v3 }
 0x5d9   :  { %v465_v6 = vpack.c.bf16 %v460_v4, %v459_v5 }
 0x5db   :  { %1355 = vmatmul.mubr.msk.bf16.vlgmr.msra.gmra.mxu1 %vm88_vm0, %v465_v6 }
 0x5dc   :  { %1370 = vmatprep.mubr.msk.bf16.mxu1 %vm1497_vm2, %v1496_v14  ;;  %1367 = vmatpush3.bf16.msra.mxu1 %v633_v29 }
 0x5dd   :  { %1368 = vmatprep.subr.bf16.mxu1 %v1496_v14 }
 0x5e0   :  { %1369 = vmatpush3.bf16.msra.mxu1 %v632_v32 }
 0x5e1   :  { %1380 = vmatprep.subr.bf16.mxu1 %v1496_v14 }
 0x5e3   :  { %1371 = vmatmul.mubr.msk.bf16.vlgmr.msra.gmra.mxu1 %vm88_vm0, %v631_v37 }
 0x5e4   :  { %1382 = vmatprep.mubr.msk.bf16.mxu1 %vm1497_vm2, %v1496_v14 }
 0x69b   :  { %v505_v7 = vpop.f32.mrf.mxu1 }
 0x69c   :  { %v512_v9 = vadd.f32 %v505_v7, %v1675_v35  ;;  %v1261_v7 = vld [vmem:[%s1973_s13] ss:$0 sm:$0xff] }
 0x69d   :  { %v1356_v10 = vpop.f32.mrf.mxu1 }
 0x69e   :  { %v521_v11 = vadd.f32 %v1258_v8, %v512_v9 }
 0x69f   :  { %v508_v12 = vpop.f32.mrf.mxu1 }
 0x6a0   :  { %v513_v13 = vadd.f32 %v508_v12, %v1677_v36  ;;  %v525_v15 = vsel %vm88_vm0, %v521_v11, 0.0 }
 0x6a1   :  { %526 = vadd.xlane.f32.xlu1 %v525_v15  ;;  %v1357_v16 = vpop.f32.mrf.mxu1 }
 0x6a2   :  { %v522_v17 = vadd.f32 %v1258_v8, %v513_v13 }
 0x6a3   :  { %v678_v62 = vpop.f32.mrf.mxu1 }
 0x6a4   :  { %v528_v18 = vsel %vm92_vm1, %v522_v17, 0.0  ;;  %v679_v0 = vadd.f32 %v1263_v61, %v678_v62 }
 0x6a5   :  { %529 = vadd.xlane.f32.xlu0 %v528_v18  ;;  %v1372_v63 = vpop.f32.mrf.mxu1 }
 0x6a7   :  { %v681_v1 = vpop.f32.mrf.mxu1 }
 0x6a8   :  { %v682_v2 = vadd.f32 %v1263_v61, %v681_v1 }
 0x6a9   :  { %v1373_v3 = vpop.f32.mrf.mxu1 }
 0x6aa   :  { %v1814_v4 = vpack.c.bf16 %v682_v2, %v679_v0 }
 0x6ac   :  { %v693_v5 = vsel %vm197_vm3, %v1814_v4, 0 }
 0x72a   :  { %v527_v19 = vpop.xlane.xlu1 %526 }
 0x72b   :  { %v531_v20 = vmul.f32 0.03125, %v527_v19  ;;  %v685_v19 = vld [vmem:[%s1974_s3] sm:$0xff] }
 0x72d   :  { %v533_v21 = vsub.f32 %v521_v11, %v531_v20 }
 0x72e   :  { %v530_v22 = vpop.xlane.xlu0 %529 }
 0x72f   :  { %v532_v23 = vmul.f32 0.03125, %v530_v22  ;;  %v535_v24 = vmul.f32 %v533_v21, %v533_v21 }
 0x731   :  { %v534_v35 = vsub.f32 %v522_v17, %v532_v23  ;;  %v537_v25 = vsel %vm88_vm0, %v535_v24, 0.0  ;;  %v686_v24 = vld [vmem:[%s1974_s3 + $0x8] sm:$0x3] }
 0x732   :  { %538 = vadd.xlane.f32.xlu0 %v537_v25 }
 0x733   :  { %v536_v26 = vmul.f32 %v534_v35, %v534_v35 }
 0x735   :  { %v540_v36 = vsel %vm92_vm1, %v536_v26, 0.0 }
 0x736   :  { %541 = vadd.xlane.f32.xlu1 %v540_v36 }
 0x748   :  { %815 = vrot.lane.b32.xlu0 %v1814_v4, %s1500_s1 }
 0x7bb   :  { %v539_v44 = vpop.xlane.xlu0 %538 }
 0x7bc   :  { %v543_v45 = vmul.f32 0.03125, %v539_v44 }
 0x7be   :  { %v545_v46 = vadd.f32 1e-12, %v543_v45 }
 0x7bf   :  { %v542_v47 = vpop.xlane.xlu1 %541  ;;  %v816_v10 = vpop.permute.xlu0 %815 }
 0x7c0   :  { %1464 = vrsqrt.f32 %v545_v46  ;;  %v544_v48 = vmul.f32 0.03125, %v542_v47  ;;  %v821_v16 = vsel %vm197_vm3, %v816_v10, 0 }
 0x7c2   :  { %v546_v49 = vadd.f32 1e-12, %v544_v48 }
 0x7c4   :  { %1466 = vrsqrt.f32 %v546_v49 }
 0x7cd   :  { %v1465_v50 = vpop.eup %1464 }
 0x7ce   :  { %v549_v51 = vmul.f32 %v1465_v50, %v533_v21 }
 0x7d0   :  { %v557_v55 = vmul.f32 %v1259_v52, %v549_v51 }
 0x7d1   :  { %v1467_v53 = vpop.eup %1466 }
 0x7d2   :  { %v550_v54 = vmul.f32 %v1467_v53, %v534_v35  ;;  %v1802_v58 = vadd.f32 %v1260_v56, %v557_v55 }
 0x7d4   :  { %v558_v57 = vmul.f32 %v1259_v52, %v550_v54 }
 0x7d6   :  { %v1804_v59 = vadd.f32 %v1260_v56, %v558_v57 }
 0x7d8   :  { %v573_v60 = vpack.c.bf16 %v1804_v59, %v1802_v58 }
 0x7da   :  { %1363 = vmatmul.mubr.msk.bf16.vlgmr.msra.gmra.mxu0 %vm88_vm0, %v573_v60 }
 0x7db   :  { %1376 = vmatprep.mubr.msk.bf16.mxu0 %vm1497_vm2, %v1496_v14  ;;  %1375 = vmatpush3.bf16.xpose.msra.mxu0 %v693_v5 }
 0x7dc   :  { %1386 = vmatprep.subr.bf16.mxu0 %v1496_v14 }
 0x89a   :  { %v620_v6 = vpop.f32.mrf.mxu0 }
 0x89b   :  { %v621_v11 = vadd.f32 %v1261_v7, %v620_v6 }
 0x89c   :  { %v1364_v8 = vpop.f32.mrf.mxu0 }
 0x89e   :  { %v623_v9 = vpop.f32.mrf.mxu0 }
 0x89f   :  { %v624_v12 = vadd.f32 %v1261_v7, %v623_v9 }
 0x8a0   :  { %v1365_v13 = vpop.f32.mrf.mxu0 }
 0x8a1   :  { %v687_v15 = vpack.c.bf16 %v624_v12, %v621_v11 }
 0x8a3   :  { %813 = vrot.lane.b32.xlu1 %v687_v15, %s1500_s1  ;;  %1377 = vmatmul.mubr.msk.bf16.vlgmr.msra.gmra.mxu0 %vm197_vm3, %v687_v15  ;;  %v950_v15 = vld [vmem:[%s1975_s16 + $0x10] sm:$0xff] }
 0x8a4   :  { %1387 = vmatpush3.bf16.xpose.msra.mxu0 %v821_v16  ;;  %1388 = vmatprep.mubr.msk.bf16.mxu0 %vm1497_vm2, %v1496_v14  ;;  %v951_v16 = vld [vmem:[%s1975_s16 + $0x18] sm:$0xff] }
 0x8a5   :  { %1398 = vmatprep.subr.bf16.mxu0 %v1496_v14 }
 0x915   :  { %v814_v17 = vpop.permute.xlu1 %813 }
 0x916   :  { %1389 = vmatmul.mubr.msk.bf16.vlgmr.msra.gmra.mxu0 %vm197_vm3, %v814_v17  ;;  %v954_v17 = vpack.c.bf16 %v951_v16, %v950_v15 }
 0x917   :  { %1402 = vmatprep.mubr.msk.bf16.mxu0 %vm1497_vm2, %v1496_v14 }
 0x918   :  { %1399 = vmatpush3.bf16.msra.mxu0 %v954_v17  ;;  %v1136_v17 = vld [vmem:[%s1980_s22 + $0x30] sm:$0xff] }
 0x919   :  { %1400 = vmatprep.subr.bf16.mxu0 %v1496_v14 }
 0x963   :  { %v729_v18 = vpop.f32.mrf.mxu0 }
 0x964   :  { %v736_v20 = vmul.f32 0.25, %v729_v18 }
 0x965   :  { %v1378_v21 = vpop.f32.mrf.mxu0 }
 0x966   :  { %v738_v22 = vadd.f32 %v736_v20, %v685_v19 }
 0x967   :  { %v732_v23 = vpop.f32.mrf.mxu0 }
 0x968   :  { %v737_v35 = vmul.f32 0.25, %v732_v23  ;;  %v740_v25 = vsel %vm197_vm3, %v738_v22, -inf  ;;  %v949_v23 = vld [vmem:[%s1975_s16 + $0x8] sm:$0xff] }
 0x969   :  { %741 = vmax.xlane.f32.xlu1 %v740_v25  ;;  %v1379_v26 = vpop.f32.mrf.mxu0 }
 0x96a   :  { %v739_v36 = vadd.f32 %v737_v35, %v686_v24 }
 0x96c   :  { %v744_v27 = vsel %vm743_vm7, %v739_v36, -inf }
 0x96d   :  { %745 = vmax.xlane.f32.xlu0 %v744_v27 }
 0x9d6   :  { %v857_v28 = vpop.f32.mrf.mxu0 }
 0x9d7   :  { %v864_v29 = vmul.f32 0.25, %v857_v28 }
 0x9d8   :  { %v1390_v30 = vpop.f32.mrf.mxu0 }
 0x9d9   :  { %v866_v31 = vadd.f32 %v864_v29, %v685_v19 }
 0x9da   :  { %v860_v32 = vpop.f32.mrf.mxu0 }
 0x9db   :  { %v865_v33 = vmul.f32 0.25, %v860_v32  ;;  %v868_v34 = vsel %vm197_vm3, %v866_v31, -inf }
 0x9dc   :  { %869 = vmax.xlane.f32.xlu0 %v868_v34  ;;  %v1391_v37 = vpop.f32.mrf.mxu0 }
 0x9dd   :  { %v867_v38 = vadd.f32 %v865_v33, %v686_v24  ;;  %v1270_v37 = vld [vmem:[%s1976_s17] ss:$0 sm:$0xff] }
 0x9df   :  { %v871_v39 = vsel %vm743_vm7, %v867_v38, -inf }
 0x9e0   :  { %872 = vmax.xlane.f32.xlu1 %v871_v39 }
 0x9f2   :  { %v742_v40 = vpop.xlane.xlu1 %741 }
 0x9f3   :  { %v747_v41 = vsub.f32 %v738_v22, %v742_v40  ;;  %v948_v22 = vld [vmem:[%s1975_s16] sm:$0xff] }
 0x9f4   :  { %v953_v24 = vpack.c.bf16 %v949_v23, %v948_v22  ;;  %v1132_v23 = vld [vmem:[%s1980_s22 + $0x10] sm:$0xff] }
 0x9f5   :  { %v749_v42 = vmul.f32 1.442695, %v747_v41 }
 0x9f6   :  { %v746_v43 = vpop.xlane.xlu0 %745  ;;  %1401 = vmatpush3.bf16.msra.mxu0 %v953_v24  ;;  %v1133_v24 = vld [vmem:[%s1980_s22 + $0x18] sm:$0xff] }
 0x9f7   :  { %1468 = vpow2.f32 %v749_v42  ;;  %v748_v44 = vsub.f32 %v739_v36, %v746_v43  ;;  %1414 = vmatprep.subr.bf16.mxu0 %v1496_v14 }
 0x9f9   :  { %v751_v45 = vmul.f32 1.442695, %v748_v44 }
 0x9fb   :  { %1470 = vpow2.f32 %v751_v45 }
 0xa04   :  { %v1469_v46 = vpop.eup %1468 }
 0xa05   :  { %v753_v47 = vsel %vm197_vm3, %v1469_v46, 0.0 }
 0xa06   :  { %754 = vadd.xlane.f32.xlu0 %v753_v47 }
 0xa08   :  { %v1471_v48 = vpop.eup %1470 }
 0xa09   :  { %v756_v49 = vsel %vm743_vm7, %v1471_v48, 0.0 }
 0xa0a   :  { %757 = vadd.xlane.f32.xlu1 %v756_v49 }
 0xa65   :  { %v870_v50 = vpop.xlane.xlu0 %869 }
 0xa66   :  { %v874_v51 = vsub.f32 %v866_v31, %v870_v50 }
 0xa68   :  { %v876_v52 = vmul.f32 1.442695, %v874_v51 }
 0xa69   :  { %v873_v53 = vpop.xlane.xlu1 %872 }
 0xa6a   :  { %1472 = vpow2.f32 %v876_v52  ;;  %v875_v54 = vsub.f32 %v867_v38, %v873_v53 }
 0xa6c   :  { %v878_v55 = vmul.f32 1.442695, %v875_v54 }
 0xa6e   :  { %1474 = vpow2.f32 %v878_v55  ;;  %v1056_v55 = vld [vmem:[%s1977_s20 + $0x10] sm:$0xff] }
 0xa77   :  { %v1473_v56 = vpop.eup %1472 }
 0xa78   :  { %v880_v57 = vsel %vm197_vm3, %v1473_v56, 0.0 }
 0xa79   :  { %881 = vadd.xlane.f32.xlu0 %v880_v57 }
 0xa7b   :  { %v1475_v60 = vpop.eup %1474 }
 0xa7c   :  { %v883_v61 = vsel %vm743_vm7, %v1475_v60, 0.0 }
 0xa7d   :  { %884 = vadd.xlane.f32.xlu1 %v883_v61  ;;  %v1055_v61 = vld [vmem:[%s1977_s20 + $0x8] sm:$0xff] }
 0xa8e   :  { %891 = vrot.lane.b32.xlu1 %v1814_v4, %s1498_s2 }
 0xa8f   :  { %765 = vrot.lane.b32.xlu0 %v1814_v4, %s1499_s30  ;;  %v755_v63 = vpop.xlane.xlu0 %754 }
 0xa93   :  { %v758_v62 = vpop.xlane.xlu1 %757 }
 0xa94   :  { %1476 = vrcp.f32 %v758_v62 }
 0xa95   :  { %1478 = vrcp.f32 %v755_v63 }
 0xaa1   :  { %v1477_v0 = vpop.eup %1476 }
 0xaa2   :  { %v1479_v2 = vpop.eup %1478  ;;  %v762_v3 = vmul.f32 %v1477_v0, %v1471_v48 }
 0xaa3   :  { %v761_v7 = vmul.f32 %v1479_v2, %v1469_v46 }
 0xaa5   :  { %v763_v8 = vpack.c.bf16 %v762_v3, %v761_v7 }
 0xb02   :  { %v882_v1 = vpop.xlane.xlu0 %881 }
 0xb03   :  { %1480 = vrcp.f32 %v882_v1 }
 0xb06   :  { %v766_v5 = vpop.permute.xlu0 %765  ;;  %v885_v6 = vpop.xlane.xlu1 %884 }
 0xb07   :  { %1482 = vrcp.f32 %v885_v6  ;;  %1381 = vmatpush3.bf16.msra.mxu1 %v766_v5 }
 0xb08   :  { %1392 = vmatprep.subr.bf16.mxu1 %v1496_v14 }
 0xb0a   :  { %1383 = vmatmul.mubr.msk.bf16.vlgmr.msra.gmra.mxu1 %vm197_vm3, %v763_v8  ;;  %v892_v4 = vpop.permute.xlu1 %891  ;;  %v1271_v8 = vld [vmem:[%s1978_s18] ss:$0 sm:$0xff] }
 0xb0b   :  { %1393 = vmatpush3.bf16.msra.mxu1 %v892_v4  ;;  %1394 = vmatprep.mubr.msk.bf16.mxu1 %vm1497_vm2, %v1496_v14 }
 0xb0c   :  { %1406 = vmatprep.subr.bf16.mxu1 %v1496_v14 }
 0xb10   :  { %v1481_v9 = vpop.eup %1480 }
 0xb11   :  { %v888_v11 = vmul.f32 %v1481_v9, %v1473_v56  ;;  %v1057_v56 = vld [vmem:[%s1977_s20 + $0x18] sm:$0xff] }
 0xb12   :  { %v1060_v57 = vpack.c.bf16 %v1057_v56, %v1056_v55 }
 0xb14   :  { %v1483_v10 = vpop.eup %1482 }
 0xb15   :  { %v889_v12 = vmul.f32 %v1483_v10, %v1475_v60  ;;  %v1054_v60 = vld [vmem:[%s1977_s20] sm:$0xff] }
 0xb16   :  { %v1059_v62 = vpack.c.bf16 %v1055_v61, %v1054_v60 }
 0xb17   :  { %v890_v13 = vpack.c.bf16 %v889_v12, %v888_v11  ;;  %v1272_v11 = vld [vmem:[%s1979_s19] ss:$0 sm:$0xff] }
 0xb19   :  { %1395 = vmatmul.mubr.msk.bf16.vlgmr.msra.gmra.mxu1 %vm197_vm3, %v890_v13 }
 0xb1a   :  { %1410 = vmatprep.mubr.msk.bf16.mxu1 %vm1497_vm2, %v1496_v14  ;;  %1407 = vmatpush3.bf16.msra.mxu1 %v1060_v57 }
 0xb1b   :  { %1408 = vmatprep.subr.bf16.mxu1 %v1496_v14 }
 0xb1e   :  { %1409 = vmatpush3.bf16.msra.mxu1 %v1059_v62 }
 0xbca   :  { %v805_v18 = vpop.f32.mrf.mxu1 }
 0xbcc   :  { %v1384_v19 = vpop.f32.mrf.mxu1 }
 0xbce   :  { %v808_v20 = vpop.f32.mrf.mxu1 }
 0xbd0   :  { %v1385_v21 = vpop.f32.mrf.mxu1 }
 0xbd1   :  { %v1135_v21 = vld [vmem:[%s1980_s22 + $0x28] sm:$0xff] }
 0xbd9   :  { %v931_v35 = vpop.f32.mrf.mxu1 }
 0xbdb   :  { %v1396_v25 = vpop.f32.mrf.mxu1 }
 0xbdc   :  { %v1130_v25 = vld [vmem:[%s1980_s22] sm:$0xff] }
 0xbdd   :  { %v934_v26 = vpop.f32.mrf.mxu1 }
 0xbde   :  { %v1439_v36 = vpack.i.bf16 %v934_v26, %v931_v35  ;;  %v1140_v35 = vpack.c.bf16 %v1133_v24, %v1132_v23  ;;  %v1131_v26 = vld [vmem:[%s1980_s22 + $0x8] sm:$0xff] }
 0xbdf   :  { %v1397_v27 = vpop.f32.mrf.mxu1 }
 0xbe0   :  { %1440 = vrot.lane.b32.xlu1 %v1439_v36, %s1503_s27  ;;  %v1139_v36 = vpack.c.bf16 %v1131_v26, %v1130_v25  ;;  %v1273_v27 = vld [vmem:[%s1981_s21] ss:$0 sm:$0xff] }
 0xc52   :  { %v1441_v28 = vpop.permute.xlu1 %1440 }
 0xc53   :  { %v1443_v29 = vunpack.i.h.bf16 %v1441_v28  ;;  %v1442_v30 = vunpack.i.l.bf16 %v1441_v28 }
 0xc55   :  { %v947_v31 = vsel %vm197_vm3, %v808_v20, %v1443_v29  ;;  %v946_v32 = vsel %vm197_vm3, %v805_v18, %v1442_v30  ;;  %v1137_v18 = vld [vmem:[%s1980_s22 + $0x38] sm:$0xff]  ;;  %v1134_v20 = vld [vmem:[%s1980_s22 + $0x20] sm:$0xff] }
 0xc56   :  { %v952_v33 = vpack.c.bf16 %v947_v31, %v946_v32  ;;  %v1142_v19 = vpack.c.bf16 %v1137_v18, %v1136_v17  ;;  %v1141_v22 = vpack.c.bf16 %v1135_v21, %v1134_v20  ;;  %v1278_v21 = vld [vmem:[%s1984_s25] ss:$0 sm:$0xff] }
 0xc58   :  { %1403 = vmatmul.mubr.msk.bf16.vlgmr.msra.gmra.mxu0 %vm88_vm0, %v952_v33 }
 0xc59   :  { %1422 = vmatprep.mubr.msk.bf16.mxu0 %vm1497_vm2, %v1496_v14  ;;  %1415 = vmatpush3.bf16.msra.mxu0 %v1142_v19  ;;  %v1277_v19 = vld [vmem:[%s1983_s24] ss:$0 sm:$0xff] }
 0xc5a   :  { %1416 = vmatprep.subr.bf16.mxu0 %v1496_v14 }
 0xc5d   :  { %1417 = vmatpush3.bf16.msra.mxu0 %v1141_v22 }
 0xc5e   :  { %1418 = vmatprep.subr.bf16.mxu0 %v1496_v14 }
 0xc61   :  { %1419 = vmatpush3.bf16.msra.mxu0 %v1140_v35 }
 0xc62   :  { %1420 = vmatprep.subr.bf16.mxu0 %v1496_v14 }
 0xc65   :  { %1421 = vmatpush3.bf16.msra.mxu0 %v1139_v36 }
 0xd18   :  { %v992_v34 = vpop.f32.mrf.mxu0 }
 0xd19   :  { %v999_v38 = vadd.f32 %v992_v34, %v1802_v58 }
 0xd1a   :  { %v1404_v39 = vpop.f32.mrf.mxu0 }
 0xd1b   :  { %v1008_v40 = vadd.f32 %v1270_v37, %v999_v38 }
 0xd1c   :  { %v995_v41 = vpop.f32.mrf.mxu0 }
 0xd1d   :  { %v1000_v42 = vadd.f32 %v995_v41, %v1804_v59  ;;  %v1012_v43 = vsel %vm88_vm0, %v1008_v40, 0.0 }
 0xd1e   :  { %1013 = vadd.xlane.f32.xlu1 %v1012_v43  ;;  %v1405_v44 = vpop.f32.mrf.mxu0 }
 0xd1f   :  { %v1009_v45 = vadd.f32 %v1270_v37, %v1000_v42 }
 0xd21   :  { %v1015_v46 = vsel %vm92_vm1, %v1009_v45, 0.0 }
 0xd22   :  { %1016 = vadd.xlane.f32.xlu0 %v1015_v46 }
 0xda7   :  { %v1014_v47 = vpop.xlane.xlu1 %1013 }
 0xda8   :  { %v1018_v48 = vmul.f32 0.03125, %v1014_v47 }
 0xdaa   :  { %v1020_v49 = vsub.f32 %v1008_v40, %v1018_v48 }
 0xdab   :  { %v1017_v50 = vpop.xlane.xlu0 %1016 }
 0xdac   :  { %v1019_v51 = vmul.f32 0.03125, %v1017_v50  ;;  %v1022_v52 = vmul.f32 %v1020_v49, %v1020_v49 }
 0xdae   :  { %v1021_v58 = vsub.f32 %v1009_v45, %v1019_v51  ;;  %v1024_v53 = vsel %vm88_vm0, %v1022_v52, 0.0 }
 0xdaf   :  { %1025 = vadd.xlane.f32.xlu0 %v1024_v53 }
 0xdb0   :  { %v1023_v54 = vmul.f32 %v1021_v58, %v1021_v58 }
 0xdb2   :  { %v1027_v59 = vsel %vm92_vm1, %v1023_v54, 0.0  ;;  %v1276_v54 = vld [vmem:[%s1982_s23] ss:$0 sm:$0xff] }
 0xdb3   :  { %1028 = vadd.xlane.f32.xlu0 %v1027_v59 }
 0xe38   :  { %v1026_v63 = vpop.xlane.xlu0 %1025 }
 0xe39   :  { %v1030_v0 = vmul.f32 0.03125, %v1026_v63 }
 0xe3b   :  { %v1032_v1 = vadd.f32 1e-12, %v1030_v0 }
 0xe3c   :  { %v1029_v2 = vpop.xlane.xlu0 %1028 }
 0xe3d   :  { %1484 = vrsqrt.f32 %v1032_v1  ;;  %v1031_v3 = vmul.f32 0.03125, %v1029_v2 }
 0xe3f   :  { %v1033_v5 = vadd.f32 1e-12, %v1031_v3 }
 0xe41   :  { %1486 = vrsqrt.f32 %v1033_v5 }
 0xe4a   :  { %v1485_v6 = vpop.eup %1484 }
 0xe4b   :  { %v1036_v7 = vmul.f32 %v1485_v6, %v1020_v49 }
 0xe4d   :  { %v1044_v10 = vmul.f32 %v1271_v8, %v1036_v7 }
 0xe4e   :  { %v1487_v4 = vpop.eup %1486 }
 0xe4f   :  { %v1037_v9 = vmul.f32 %v1487_v4, %v1021_v58  ;;  %v1052_v13 = vadd.f32 %v1272_v11, %v1044_v10 }
 0xe51   :  { %v1045_v12 = vmul.f32 %v1271_v8, %v1037_v9 }
 0xe53   :  { %v1053_v15 = vadd.f32 %v1272_v11, %v1045_v12 }
 0xe55   :  { %v1058_v16 = vpack.c.bf16 %v1053_v15, %v1052_v13 }
 0xe57   :  { %1411 = vmatmul.mubr.msk.bf16.vlgmr.msra.gmra.mxu1 %vm88_vm0, %v1058_v16 }
 0xf17   :  { %v1105_v28 = vpop.f32.mrf.mxu1 }
 0xf18   :  { %v1106_v29 = vadd.f32 %v1273_v27, %v1105_v28 }
 0xf19   :  { %v1412_v30 = vpop.f32.mrf.mxu1 }
 0xf1a   :  { %v1112_v31 = vmul.f32 %v1106_v29, %v1106_v29 }
 0xf1b   :  { %v1108_v32 = vpop.f32.mrf.mxu1 }
 0xf1c   :  { %v1114_v14 = vmul.f32 %v1112_v31, %v1106_v29  ;;  %v1109_v33 = vadd.f32 %v1273_v27, %v1108_v32 }
 0xf1d   :  { %v1413_v34 = vpop.f32.mrf.mxu1 }
 0xf1e   :  { %v1116_v37 = vmul.f32 0.044715, %v1114_v14  ;;  %v1113_v38 = vmul.f32 %v1109_v33, %v1109_v33 }
 0xf20   :  { %v1118_v39 = vadd.f32 %v1116_v37, %v1106_v29  ;;  %v1115_v40 = vmul.f32 %v1113_v38, %v1109_v33 }
 0xf22   :  { %v1120_v41 = vmul.f32 0.7978846, %v1118_v39  ;;  %v1117_v42 = vmul.f32 0.044715, %v1115_v40 }
 0xf24   :  { %1488 = vtanh.f32 %v1120_v41  ;;  %v1119_v43 = vadd.f32 %v1117_v42, %v1109_v33 }
 0xf26   :  { %v1121_v44 = vmul.f32 0.7978846, %v1119_v43 }
 0xf28   :  { %1490 = vtanh.f32 %v1121_v44 }
 0xf31   :  { %v1489_v45 = vpop.eup %1488 }
 0xf32   :  { %v1124_v46 = vadd.f32 1.0, %v1489_v45 }
 0xf34   :  { %v1126_v48 = vmul.f32 0.5, %v1124_v46 }
 0xf35   :  { %v1491_v47 = vpop.eup %1490 }
 0xf36   :  { %v1125_v49 = vadd.f32 1.0, %v1491_v47  ;;  %v1128_v51 = vmul.f32 %v1126_v48, %v1106_v29 }
 0xf38   :  { %v1127_v50 = vmul.f32 0.5, %v1125_v49 }
 0xf3a   :  { %v1129_v52 = vmul.f32 %v1127_v50, %v1109_v33 }
 0xf3c   :  { %v1138_v58 = vpack.c.bf16 %v1129_v52, %v1128_v51 }
 0xf3e   :  { %1423 = vmatmul.mubr.msk.bf16.vlgmr.msra.gmra.mxu0 %vm1143_vm8, %v1138_v58 }
 0xffe   :  { %v1181_v53 = vpop.f32.mrf.mxu0 }
 0xfff   :  { %v1188_v59 = vadd.f32 %v1181_v53, %v1052_v13 }
0x1000   :  { %v1424_v55 = vpop.f32.mrf.mxu0 }
0x1001   :  { %v1197_v56 = vadd.f32 %v1276_v54, %v1188_v59 }
0x1002   :  { %v1184_v57 = vpop.f32.mrf.mxu0 }
0x1003   :  { %v1189_v60 = vadd.f32 %v1184_v57, %v1053_v15  ;;  %v1201_v61 = vsel %vm88_vm0, %v1197_v56, 0.0 }
0x1004   :  { %1202 = vadd.xlane.f32.xlu1 %v1201_v61  ;;  %v1425_v62 = vpop.f32.mrf.mxu0 }
0x1005   :  { %v1198_v63 = vadd.f32 %v1276_v54, %v1189_v60 }
0x1007   :  { %v1204_v0 = vsel %vm92_vm1, %v1198_v63, 0.0 }
0x1008   :  { %1205 = vadd.xlane.f32.xlu0 %v1204_v0 }
0x108d   :  { %v1203_v1 = vpop.xlane.xlu1 %1202 }
0x108e   :  { %v1207_v2 = vmul.f32 0.03125, %v1203_v1 }
0x1090   :  { %v1209_v3 = vsub.f32 %v1197_v56, %v1207_v2 }
0x1091   :  { %v1206_v5 = vpop.xlane.xlu0 %1205 }
0x1092   :  { %v1208_v6 = vmul.f32 0.03125, %v1206_v5  ;;  %v1211_v7 = vmul.f32 %v1209_v3, %v1209_v3 }
0x1094   :  { %v1210_v8 = vsub.f32 %v1198_v63, %v1208_v6  ;;  %v1213_v4 = vsel %vm88_vm0, %v1211_v7, 0.0 }
0x1095   :  { %1214 = vadd.xlane.f32.xlu1 %v1213_v4 }
0x1096   :  { %v1212_v9 = vmul.f32 %v1210_v8, %v1210_v8 }
0x1098   :  { %v1216_v10 = vsel %vm92_vm1, %v1212_v9, 0.0 }
0x1099   :  { %1217 = vadd.xlane.f32.xlu0 %v1216_v10 }
0x111e   :  { %v1215_v11 = vpop.xlane.xlu1 %1214 }
0x111f   :  { %v1219_v12 = vmul.f32 0.03125, %v1215_v11 }
0x1121   :  { %v1221_v13 = vadd.f32 1e-12, %v1219_v12 }
0x1122   :  { %v1218_v15 = vpop.xlane.xlu0 %1217 }
0x1123   :  { %1492 = vrsqrt.f32 %v1221_v13  ;;  %v1220_v16 = vmul.f32 0.03125, %v1218_v15 }
0x1125   :  { %v1222_v17 = vadd.f32 1e-12, %v1220_v16 }
0x1127   :  { %1494 = vrsqrt.f32 %v1222_v17 }
0x1130   :  { %v1493_v18 = vpop.eup %1492 }
0x1131   :  { %v1225_v20 = vmul.f32 %v1493_v18, %v1209_v3 }
0x1133   :  { %v1233_v22 = vmul.f32 %v1277_v19, %v1225_v20 }
0x1134   :  { %v1495_v23 = vpop.eup %1494 }
0x1135   :  { %v1241_v24 = vadd.f32 %v1278_v21, %v1233_v22  ;;  %v1226_v35 = vmul.f32 %v1495_v23, %v1210_v8 }
0x1137   :  { %1243 = vst.msk [vmem:[%s1985_s26] sm:$0xff] %vm88_vm0, %v1241_v24  ;;  %v1234_v25 = vmul.f32 %v1277_v19, %v1226_v35 }
0x1139   :  { %v1242_v26 = vadd.f32 %v1278_v21, %v1234_v25 }
0x113b   :  { %1244 = vst.msk [vmem:[%s1985_s26 + $0x8] sm:$0x3] %vm92_vm1, %v1242_v26 }

// kernel: blip_forward.30
= control target key start
LH: loop header
LB: loop body
LE: loop exit
PB: predicated region body
PF: predicated region fallthrough
CT: control target
= control target key end

     0   :  { %s1134_s0 = inlined_call_operand.vmem [shape: f32[2,16], index: 0, kind: input, shape index: {}]   ;;  %s1135_s1 = inlined_call_operand.vmem [shape: f32[2,16], index: 1, kind: input, shape index: {}]   ;;  %s1136_s2 = inlined_call_operand.vmem [shape: f32[2,16], index: 2, kind: input, shape index: {}]   ;;  %s1137_s3 = inlined_call_operand.vmem [shape: f32[2,16], index: 3, kind: input, shape index: {}]   ;;  %s1138_s4 = inlined_call_operand.vmem [shape: f32[16,8], index: 4, kind: input, shape index: {}]   ;;  %s1139_s5 = inlined_call_operand.vmem [shape: f32[16,8], index: 5, kind: input, shape index: {}]   ;;  %s1140_s6 = inlined_call_operand.<no memory space> [shape: f32[1,1], index: 6, kind: input, shape index: {}]   ;;  %s1141_s8 = inlined_call_operand.hbm [shape: f32[1,1], index: 8, kind: output, shape index: {0}]   ;;  %s1142_s9 = inlined_call_operand.vmem [shape: f32[2,2], index: 9, kind: output, shape index: {1}]   ;;  %s1143_s10 = inlined_call_operand.vmem [shape: f32[2,2], index: 10, kind: output, shape index: {2}]   ;;  %s1144_s7 = inlined_call_operand.<no memory space> [shape: f32[1,1], index: 7, kind: input, shape index: {}]  }
   0x1   :  { %v16_v0 = vstv %s1140_s6  ;;  %v18_v1 = vstv %s1144_s7 }
   0x2   :  { %17 = vst [vmem:[#allocation2] sm:$0x1] %v16_v0  ;;  %19 = vst [vmem:[#allocation3] sm:$0x1] %v18_v1 }
   0x3   :  { %v44_v2 = vld [vmem:[%s1139_s5 + $0x8] sm:$0xff]  ;;  %v952_v3 = vmov 0.0   ;;  %v43_v4 = vld [vmem:[%s1139_s5] sm:$0xff]  ;;  %vm953_vm0 = vmmov 0   ;;  %vm49_vm1 = vcmask 130048  }
   0x4   :  { %854 = vmatprep.subr.mxu1 %v952_v3  ;;  %858 = vmatprep.mubr.msk.f32.mxu1 %vm953_vm0, %v952_v3  ;;  %v39_v5 = vld [vmem:[%s1136_s2] sm:$0x3]  ;;  %v42_v8 = vld [vmem:[%s1138_s4 + $0x8] sm:$0xff] }
   0x5   :  { %855 = vmatpush3.msra.mxu1 %v44_v2  ;;  %v40_v6 = vld [vmem:[%s1137_s3] sm:$0x3]  ;;  %849 = vmatprep.subr.mxu0 %v952_v3 }
   0x6   :  { %856 = vmatprep.subr.mxu1 %v952_v3  ;;  %850 = vmatpush3.xpose.msk.msra.mxu0 %vm49_vm1, %v40_v6 }
   0x9   :  { %v45_v7 = vld [vmem:[#allocation2] sm:$0x1] }
   0xa   :  { %904 = vrcp.f32 %v45_v7 }
   0xb   :  { %20 = vsyncpa [#allocation5], 0  ;;  %857 = vmatpush3.msra.mxu1 %v43_v4  ;;  %851 = vmatprep.mubr.msk.f32.mxu0 %vm953_vm0, %v952_v3  ;;  %v41_v9 = vld [vmem:[%s1138_s4] sm:$0xff]  ;;  %v203_v10 = vlaneseq  ;;  %v954_v17 = vmov 0   ;;  %vm200_vm2 = vcmask 15360   ;;  %vm662_vm3 = vcmask 74752  }
   0xc   :  { %859 = vmatmul.mubr.msk.f32.vlgmr.msra.gmra.mxu1 %vm49_vm1, %v39_v5  ;;  %866 = vmatprep.subr.mxu1 %v952_v3  ;;  %v37_v12 = vld [vmem:[%s1134_s0] sm:$0x3]  ;;  %vm766_vm4 = vcmask 9216   ;;  %vm725_vm6 = vcmask 1041408   ;;  %s956_s26 = smov [#allocation4]   ;;  %vm763_vm8 = vcmask 0  }
   0xd   :  { %867 = vmatpush3.msra.mxu1 %v42_v8  ;;  %870 = vmatprep.mubr.msk.f32.mxu1 %vm953_vm0, %v952_v3  ;;  %v1054_v11 = vshrl.u32 %v203_v10, 7  ;;  %v38_v14 = vld [vmem:[%s1135_s1] sm:$0x3]  ;;  %s955_s1 = smov 2   ;;  %s801_s27 = sshll.u32 %s956_s26, 4  ;;  %s802_s27 = int_to_ptr.vmem [resolvable:$true] %s801_s27 }
   0xe   :  { %868 = vmatprep.subr.mxu1 %v952_v3  ;;  %852 = vmatmul.mubr.msk.f32.vlgmr.msra.gmra.mxu0 %vm49_vm1, %v39_v5  ;;  %s930_s30 = scalar_lea.vmem %s802_s27, 16  ;;  %s934_s11 = scalar_lea.vmem %s802_s27, 32 }
   0xf   :  { %869 = vmatpush3.msra.mxu1 %v41_v9  ;;  %861 = vmatprep.subr.mxu0 %v952_v3  ;;  %v1068_v13 = vsub.s32 0, %v1054_v11  ;;  %p931_p0 = scmp.ne.s32.totalorder %s802_s27, %s930_s30  ;;  %p935_p1 = scmp.lt.s32.totalorder %s802_s27, %s802_s27 }
  0x10   :  { %871 = vmatmul.mubr.msk.f32.vlgmr.msra.gmra.mxu1 %vm49_vm1, %v40_v6  ;;  %878 = vmatprep.subr.mxu1 %v952_v3  ;;  %p936_p2 = scmp.lt.s32.totalorder %s934_s11, %s930_s30 }
  0x11   :  { %879 = vmatpush3.msra.mxu1 %v44_v2  ;;  %882 = vmatprep.mubr.msk.f32.mxu1 %vm953_vm0, %v952_v3 }
  0x12   :  { %880 = vmatprep.subr.mxu1 %v952_v3  ;;  %862 = vmatpush3.xpose.msk.msra.mxu0 %vm49_vm1, %v39_v5  ;;  %p937_p3 = por %p936_p2, %p935_p1 }
  0x13   :  { %881 = vmatpush3.msra.mxu1 %v43_v4  ;;  %863 = vmatprep.mubr.msk.f32.mxu0 %vm953_vm0, %v952_v3 }
  0x14   :  { %883 = vmatmul.mubr.msk.f32.vlgmr.msra.gmra.mxu1 %vm49_vm1, %v37_v12  ;;  %890 = vmatprep.subr.mxu1 %v952_v3  ;;  %p938_p4 = pnand %p937_p3, %p931_p0 }
  0x15   :  { %891 = vmatpush3.msra.mxu1 %v42_v8  ;;  %894 = vmatprep.mubr.msk.f32.mxu1 %vm953_vm0, %v952_v3 }
  0x16   :  { %892 = vmatprep.subr.mxu1 %v952_v3  ;;  %864 = vmatmul.mubr.msk.f32.vlgmr.msra.gmra.mxu0 %vm49_vm1, %v40_v6 }
  0x17   :  { %v905_v15 = vpop.eup %904  ;;  %893 = vmatpush3.msra.mxu1 %v41_v9  ;;  %873 = vmatprep.subr.mxu0 %v952_v3 }
  0x18   :  { %895 = vmatmul.mubr.msk.f32.vlgmr.msra.gmra.mxu1 %vm49_vm1, %v38_v14  ;;  %874 = vmatpush3.xpose.msk.msra.mxu0 %vm49_vm1, %v40_v6  ;;  %v206_v16 = vrot.slane %v905_v15, %v1068_v13 }
  0x19   :  { %875 = vmatprep.mubr.msk.f32.mxu0 %vm953_vm0, %v952_v3  ;;  %885 = vmatprep.subr.mxu0 %v952_v3 }
  0x1a   :  { %902 = vset.pattern.permute.xlu0 %v954_v17  ;;  %903 = vset.pattern.permute.xlu1 %v954_v17 }
  0x1b   :  { %876 = vmatmul.mubr.msk.f32.vlgmr.msra.gmra.mxu0 %vm49_vm1, %v37_v12  ;;  %208 = vperm.xlu0 %902, %v206_v16   ;;  %v48_v12 = vld [vmem:[#allocation3] sm:$0x1] }
  0x1c   :  { %886 = vmatpush3.xpose.msk.msra.mxu0 %vm49_vm1, %v39_v5  ;;  %887 = vmatprep.mubr.msk.f32.mxu0 %vm953_vm0, %v952_v3  ;;  %v678_v15 = vrot.slane %v48_v12, %v1068_v13 }
  0x1f   :  { %888 = vmatmul.mubr.msk.f32.vlgmr.msra.gmra.mxu0 %vm49_vm1, %v38_v14  ;;  %v684_v14 = vsub.f32 1.0, %v48_v12 }
  0x21   :  { %v689_v16 = vrot.slane %v684_v14, %v1068_v13 }
  0x96   :  { %v209_v34 = vpop.permute.xlu0 %208 }
  0xcc   :  { %v192_v18 = vpop.f32.mrf.mxu1 }
  0xcd   :  { %197 = vrot.lane.b32.xlu0 %v192_v18, %s955_s1 }
  0xce   :  { %v860_v19 = vpop.f32.mrf.mxu1  ;;  %v122_v20 = vpop.f32.mrf.mxu0 }
  0xd0   :  { %v348_v21 = vpop.f32.mrf.mxu1  ;;  %v853_v22 = vpop.f32.mrf.mxu0 }
  0xd1   :  { %353 = vrot.lane.b32.xlu1 %v348_v21, %s955_s1 }
  0xd2   :  { %v872_v23 = vpop.f32.mrf.mxu1 }
  0xd3   :  { %v1106_v23 = vand.u32 127, %v203_v10 }
  0xd4   :  { %v497_v24 = vpop.f32.mrf.mxu1 }
  0xd5   :  { %502 = vrot.lane.b32.xlu1 %v497_v24, %s955_s1  ;;  %vm660_vm5 = vcmp.eq.s32.totalorder %v1054_v11, %v1106_v23  ;;  %vm765_vm7 = vcmp.ne.s32.totalorder %v1054_v11, %v1106_v23 }
  0xd6   :  { %v884_v25 = vpop.f32.mrf.mxu1  ;;  %v278_v26 = vpop.f32.mrf.mxu0 }
  0xd8   :  { %v646_v27 = vpop.f32.mrf.mxu1  ;;  %v865_v28 = vpop.f32.mrf.mxu0 }
  0xd9   :  { %651 = vrot.lane.b32.xlu0 %v646_v27, %s955_s1 }
  0xda   :  { %v896_v29 = vpop.f32.mrf.mxu1 }
  0xdb   :  { %v427_v30 = vpop.f32.mrf.mxu0 }
  0xdd   :  { %v877_v31 = vpop.f32.mrf.mxu0 }
  0xdf   :  { %v576_v32 = vpop.f32.mrf.mxu0 }
  0xe1   :  { %v889_v33 = vpop.f32.mrf.mxu0 }
 0x13f   :  { %v198_v35 = vpop.permute.xlu0 %197 }
 0x140   :  { %v201_v36 = vsel %vm200_vm2, %v122_v20, %v198_v35 }
 0x141   :  { %v211_v37 = vmul.f32 %v209_v34, %v201_v36 }
 0x143   :  { %v354_v38 = vpop.permute.xlu1 %353  ;;  %v663_v39 = vsel %vm662_vm3, %v211_v37, -inf }
 0x144   :  { %v356_v40 = vsel %vm200_vm2, %v278_v26, %v354_v38  ;;  %664 = vmax.xlane.f32.xlu1 %v663_v39 }
 0x145   :  { %v357_v41 = vmul.f32 %v356_v40, %v209_v34 }
 0x147   :  { %v503_v42 = vpop.permute.xlu1 %502  ;;  %v696_v43 = vsel %vm662_vm3, %v357_v41, -inf }
 0x148   :  { %v505_v44 = vsel %vm200_vm2, %v427_v30, %v503_v42  ;;  %697 = vmax.xlane.f32.xlu0 %v696_v43  ;;  %v661_v30 = vsel %vm660_vm5, 1.0, %v952_v3 }
 0x149   :  { %v506_v45 = vmul.f32 %v505_v44, %v209_v34 }
 0x14b   :  { %v652_v46 = vpop.permute.xlu0 %651  ;;  %v709_v47 = vsel %vm662_vm3, %v506_v45, -inf  ;;  %v781_v52 = vsel %vm766_vm4, %v506_v45, -inf }
 0x14c   :  { %v654_v48 = vsel %vm200_vm2, %v576_v32, %v652_v46  ;;  %710 = vmax.xlane.f32.xlu0 %v709_v47 }
 0x14d   :  { %v655_v49 = vmul.f32 %v654_v48, %v209_v34 }
 0x14f   :  { %v767_v50 = vsel %vm766_vm4, %v655_v49, -inf  ;;  %v736_v51 = vsel %vm662_vm3, %v655_v49, -inf }
 0x150   :  { %768 = vmax.xlane.f32.xlu0 %v767_v50  ;;  %737 = vmax.xlane.f32.xlu1 %v736_v51 }
 0x154   :  { %782 = vmax.xlane.f32.xlu1 %v781_v52 }
 0x1cd   :  { %v665_v53 = vpop.xlane.xlu1 %664 }
 0x1ce   :  { %v666_v54 = vsub.f32 %v211_v37, %v665_v53 }
 0x1d0   :  { %v667_v55 = vmul.f32 1.442695, %v666_v54 }
 0x1d1   :  { %v698_v56 = vpop.xlane.xlu0 %697 }
 0x1d2   :  { %906 = vpow2.f32 %v667_v55  ;;  %v699_v57 = vsub.f32 %v357_v41, %v698_v56 }
 0x1d4   :  { %v700_v58 = vmul.f32 1.442695, %v699_v57 }
 0x1d5   :  { %v711_v59 = vpop.xlane.xlu0 %710 }
 0x1d6   :  { %908 = vpow2.f32 %v700_v58  ;;  %v712_v60 = vsub.f32 %v506_v45, %v711_v59 }
 0x1d8   :  { %v713_v61 = vmul.f32 1.442695, %v712_v60 }
 0x1d9   :  { %v738_v62 = vpop.xlane.xlu1 %737  ;;  %v769_v17 = vpop.xlane.xlu0 %768 }
 0x1da   :  { %910 = vpow2.f32 %v713_v61  ;;  %v739_v63 = vsub.f32 %v655_v49, %v738_v62  ;;  %v770_v27 = vsub.f32 %v655_v49, %v769_v17 }
 0x1dc   :  { %v740_v0 = vmul.f32 1.442695, %v739_v63  ;;  %v771_v28 = vmul.f32 1.442695, %v770_v27 }
 0x1dd   :  { %v783_v18 = vpop.xlane.xlu1 %782 }
 0x1de   :  { %912 = vpow2.f32 %v740_v0  ;;  %v784_v22 = vsub.f32 %v506_v45, %v783_v18 }
 0x1df   :  { %v907_v1 = vpop.eup %906 }
 0x1e0   :  { %v669_v2 = vsel %vm662_vm3, %v907_v1, 0.0  ;;  %v785_v24 = vmul.f32 1.442695, %v784_v22 }
 0x1e1   :  { %670 = vadd.xlane.f32.xlu0 %v669_v2 }
 0x1e3   :  { %v909_v4 = vpop.eup %908 }
 0x1e4   :  { %v702_v5 = vsel %vm662_vm3, %v909_v4, 0.0 }
 0x1e5   :  { %703 = vadd.xlane.f32.xlu1 %v702_v5 }
 0x1e7   :  { %v911_v6 = vpop.eup %910 }
 0x1e8   :  { %v715_v7 = vsel %vm662_vm3, %v911_v6, 0.0 }
 0x1e9   :  { %716 = vadd.xlane.f32.xlu0 %v715_v7 }
 0x1eb   :  { %v913_v8 = vpop.eup %912 }
 0x1ec   :  { %v742_v9 = vsel %vm662_vm3, %v913_v8, 0.0 }
 0x1ed   :  { %743 = vadd.xlane.f32.xlu1 %v742_v9 }
 0x1fe   :  { %691 = vperm.xlu1 %903, %v689_v16  }
 0x1ff   :  { %680 = vperm.xlu0 %902, %v678_v15  }
 0x26a   :  { %v671_v19 = vpop.xlane.xlu0 %670 }
 0x26b   :  { %914 = vrcp.f32 %v671_v19 }
 0x26e   :  { %v704_v20 = vpop.xlane.xlu1 %703 }
 0x26f   :  { %916 = vrcp.f32 %v704_v20 }
 0x272   :  { %v717_v21 = vpop.xlane.xlu0 %716 }
 0x273   :  { %918 = vlog2.f32 %v717_v21 }
 0x276   :  { %v744_v25 = vpop.xlane.xlu1 %743 }
 0x277   :  { %920 = vlog2.f32 %v744_v25 }
 0x278   :  { %v915_v26 = vpop.eup %914  ;;  %922 = vpow2.f32 %v785_v24 }
 0x279   :  { %v673_v13 = vmul.f32 %v915_v26, %v907_v1  ;;  %924 = vpow2.f32 %v771_v28 }
 0x27a   :  { %v681_v29 = vpop.permute.xlu0 %680  ;;  %v692_v31 = vpop.permute.xlu1 %691 }
 0x27b   :  { %v683_v33 = vmul.f32 %v681_v29, %v673_v13  ;;  %v694_v34 = vmul.f32 %v692_v31, %v661_v30 }
 0x27c   :  { %v917_v32 = vpop.eup %916 }
 0x27d   :  { %v706_v35 = vmul.f32 %v917_v32, %v909_v4  ;;  %v695_v37 = vadd.f32 %v694_v34, %v683_v33 }
 0x27f   :  { %v707_v39 = vmul.f32 %v706_v35, %v681_v29 }
 0x280   :  { %v919_v10 = vpop.eup %918 }
 0x281   :  { %v719_v36 = vmul.f32 0.6931472, %v919_v10  ;;  %v708_v45 = vadd.f32 %v707_v39, %v694_v34 }
 0x283   :  { %v720_v38 = vsub.f32 %v712_v60, %v719_v36 }
 0x284   :  { %v921_v40 = vpop.eup %920 }
 0x285   :  { %v721_v41 = vmul.f32 %v720_v38, %v695_v37  ;;  %v746_v42 = vmul.f32 0.6931472, %v921_v40  ;;  %v923_v44 = vpop.eup %922 }
 0x286   :  { %v787_v47 = vsel %vm766_vm4, %v923_v44, 0.0  ;;  %v925_v49 = vpop.eup %924 }
 0x287   :  { %v722_v43 = vsel %vm662_vm3, %v721_v41, 0.0  ;;  %v747_v3 = vsub.f32 %v739_v63, %v746_v42  ;;  %v773_v50 = vsel %vm766_vm4, %v925_v49, 0.0 }
 0x288   :  { %723 = vadd.xlane.f32.xlu1 %v722_v43 }
 0x289   :  { %v748_v46 = vmul.f32 %v747_v3, %v708_v45 }
 0x28b   :  { %v749_v48 = vsel %vm662_vm3, %v748_v46, 0.0 }
 0x28c   :  { %788 = vadd.xlane.f32.xlu1 %v787_v47  ;;  %750 = vadd.xlane.f32.xlu0 %v749_v48 }
 0x290   :  { %774 = vadd.xlane.f32.xlu0 %v773_v50 }
 0x311   :  { %v724_v51 = vpop.xlane.xlu1 %723 }
 0x312   :  { %v726_v52 = vsel %vm725_vm6, %v724_v51, 0.0 }
 0x313   :  { %v727_v53 = vrot.slane %v726_v52, 4 }
 0x315   :  { %v728_v54 = vadd.f32 %v727_v53, %v726_v52  ;;  %v789_v55 = vpop.xlane.xlu1 %788  ;;  %v751_v56 = vpop.xlane.xlu0 %750 }
 0x316   :  { %926 = vrcp.f32 %v789_v55  ;;  %v752_v58 = vsel %vm725_vm6, %v751_v56, 0.0 }
 0x317   :  { %v729_v57 = vrot.slane %v728_v54, 2  ;;  %v753_v59 = vrot.slane %v752_v58, 4 }
 0x319   :  { %v730_v60 = vadd.f32 %v729_v57, %v728_v54  ;;  %v754_v61 = vadd.f32 %v753_v59, %v752_v58  ;;  %v775_v62 = vpop.xlane.xlu0 %774 }
 0x31a   :  { %928 = vrcp.f32 %v775_v62 }
 0x31b   :  { %v731_v63 = vrot.slane %v730_v60, 1  ;;  %v755_v0 = vrot.slane %v754_v61, 2 }
 0x31d   :  { %v732_v1 = vadd.f32 %v731_v63, %v730_v60  ;;  %v756_v2 = vadd.f32 %v755_v0, %v754_v61 }
 0x31f   :  { %v757_v4 = vrot.slane %v756_v2, 1  ;;  %v733_v5 = vsub.f32 0.0, %v732_v1 }
 0x321   :  { %v758_v6 = vadd.f32 %v757_v4, %v756_v2  ;;  %v735_v14 = vmul.f32 0.5, %v733_v5 }
 0x323   :  { %v927_v7 = vpop.eup %926  ;;  %v759_v8 = vsub.f32 0.0, %v758_v6 }
 0x324   :  { %v791_v9 = vmul.f32 %v927_v7, %v923_v44 }
 0x325   :  { %v760_v15 = vmul.f32 0.5, %v759_v8 }
 0x326   :  { %v792_v12 = vadd.f32 0.0001, %v791_v9 }
 0x327   :  { %v929_v16 = vpop.eup %928  ;;  %v761_v18 = vadd.f32 %v760_v15, %v735_v14 }
 0x328   :  { %v793_v17 = vsel %vm765_vm7, %v792_v12, 0.0  ;;  %v777_v19 = vmul.f32 %v929_v16, %v925_v49 }
 0x329   :  { %794 = vst.msk [vmem:[%s1143_s10] sm:$0x3] %vm766_vm4, %v793_v17  ;;  %v762_v20 = vmul.f32 0.5, %v761_v18 }
 0x32a   :  { %v778_v21 = vadd.f32 0.0001, %v777_v19 }
 0x32b   :  { %764 = vst.msk [vmem:[#allocation4] sm:$0x1] %vm763_vm8, %v762_v20 }
 0x32c   :  { %v779_v22 = vsel %vm765_vm7, %v778_v21, 0.0 }
 0x32d   :  { %941 = shalt.err (!%p938_p4)
}
 0x32e   :  { %804 = dma.vmem_to_hbm [thread:$0]  %s802_s27, 16, %s1141_s8, [#allocation5]   ;;  %780 = vst.msk [vmem:[%s1142_s9] sm:$0x3] %vm766_vm4, %v779_v22 }
 0x32f   :  { %950 = dma.done.wait [#allocation5], 16  }
 0x330   :  { %951 = vsyncadd [#allocation5], 4294967280 }
 0x331   :  { %816 = vsyncpa [#allocation5], 1 }

// kernel: blip_forward.33
= control target key start
LH: loop header
LB: loop body
LE: loop exit
PB: predicated region body
PF: predicated region fallthrough
CT: control target
= control target key end

     0   :  { %v202_v1 = vmov 0.0   ;;  %vm203_vm0 = vmmov 0   ;;  %s248_s0 = inlined_call_operand.vmem [shape: f32[6,32], index: 0, kind: input, shape index: {}]   ;;  %s249_s1 = inlined_call_operand.vmem [shape: f32[32,2], index: 1, kind: input, shape index: {}]   ;;  %s250_s2 = inlined_call_operand.vmem [shape: f32[1,2], index: 2, kind: input, shape index: {}]   ;;  %s251_s3 = inlined_call_operand.hbm [shape: f32[1,1], index: 3, kind: output, shape index: {}]  }
   0x1   :  { %v19_v0 = vld [vmem:[%s249_s1 + $0x18] sm:$0xff]  ;;  %160 = vmatprep.subr.mxu0 %v202_v1  ;;  %v18_v2 = vld [vmem:[%s249_s1 + $0x10] sm:$0xff]  ;;  %168 = vmatprep.mubr.msk.f32.mxu0 %vm203_vm0, %v202_v1 }
   0x2   :  { %161 = vmatpush3.msra.mxu0 %v19_v0 }
   0x3   :  { %8 = vsyncpa [#allocation3], 0  ;;  %162 = vmatprep.subr.mxu0 %v202_v1  ;;  %v17_v3 = vld [vmem:[%s249_s1 + $0x8] sm:$0xff]  ;;  %v16_v4 = vld [vmem:[%s249_s1] sm:$0xff]  ;;  %vm27_vm1 = vcmask 261120   ;;  %vm101_vm2 = vcmask 13312   ;;  %v114_v20 = vlaneseq }
   0x4   :  { %163 = vmatpush3.msra.mxu0 %v18_v2  ;;  %v15_v5 = vld [vmem:[%s248_s0] sm:$0x3f]  ;;  %s204_s0 = smov 1   ;;  %vm122_vm4 = vcmask 13320   ;;  %s205_s1 = smov 127   ;;  %vm137_vm5 = vcmask 0  }
   0x5   :  { %164 = vmatprep.subr.mxu0 %v202_v1  ;;  %v153_v6 = vld [vmem:[%s250_s2] ss:$0 sm:$0xff]  ;;  %v115_v21 = vshrl.u32 %v114_v20, 7  ;;  %s206_s2 = smov [#allocation2]  }
   0x6   :  { %165 = vmatpush3.msra.mxu0 %v17_v3  ;;  %s145_s24 = sshll.u32 %s206_s2, 4  ;;  %s146_s24 = int_to_ptr.vmem [resolvable:$true] %s145_s24 }
   0x7   :  { %166 = vmatprep.subr.mxu0 %v202_v1  ;;  %vm116_vm3 = vcmp.lt.s32.totalorder %v115_v21, 2  ;;  %s180_s25 = scalar_lea.vmem %s146_s24, 16  ;;  %s184_s26 = scalar_lea.vmem %s146_s24, 32 }
   0x8   :  { %167 = vmatpush3.msra.mxu0 %v16_v4  ;;  %p181_p0 = scmp.ne.s32.totalorder %s146_s24, %s180_s25  ;;  %p185_p1 = scmp.lt.s32.totalorder %s146_s24, %s146_s24 }
   0x9   :  { %169 = vmatmul.mubr.msk.f32.vlgmr.msra.gmra.mxu0 %vm27_vm1, %v15_v5  ;;  %p186_p2 = scmp.lt.s32.totalorder %s184_s26, %s180_s25 }
   0xb   :  { %p187_p3 = por %p186_p2, %p185_p1 }
   0xd   :  { %p188_p4 = pnand %p187_p3, %p181_p0 }
  0xc9   :  { %v97_v7 = vpop.f32.mrf.mxu0 }
  0xca   :  { %v98_v8 = vadd.f32 %v153_v6, %v97_v7 }
  0xcb   :  { %v170_v9 = vpop.f32.mrf.mxu0 }
  0xcc   :  { %v102_v10 = vsel %vm101_vm2, %v98_v8, -inf }
  0xcd   :  { %103 = vmax.xlane.f32.xlu0 %v102_v10 }
 0x156   :  { %v104_v11 = vpop.xlane.xlu0 %103 }
 0x157   :  { %v105_v12 = vsub.f32 %v98_v8, %v104_v11 }
 0x159   :  { %v106_v13 = vmul.f32 1.442695, %v105_v12 }
 0x15b   :  { %176 = vpow2.f32 %v106_v13 }
 0x168   :  { %v177_v14 = vpop.eup %176 }
 0x169   :  { %v108_v15 = vsel %vm101_vm2, %v177_v14, 0.0 }
 0x16a   :  { %109 = vadd.xlane.f32.xlu0 %v108_v15 }
 0x1f3   :  { %v110_v16 = vpop.xlane.xlu0 %109 }
 0x1f4   :  { %178 = vlog2.f32 %v110_v16 }
 0x201   :  { %v179_v17 = vpop.eup %178 }
 0x202   :  { %v112_v18 = vmul.f32 0.6931472, %v179_v17 }
 0x204   :  { %v113_v19 = vsub.f32 %v105_v12, %v112_v18 }
 0x206   :  { %118 = vrot.lane.b32.xlu1 %v113_v19, %s204_s0 }
 0x278   :  { %v119_v22 = vpop.permute.xlu1 %118 }
 0x279   :  { %v121_v23 = vsel %vm116_vm3, %v113_v19, %v119_v22 }
 0x27a   :  { %v123_v24 = vsel %vm122_vm4, %v121_v23, 0.0 }
 0x27b   :  { %v124_v25 = vrot.slane %v123_v24, 4 }
 0x27d   :  { %v125_v26 = vadd.f32 %v124_v25, %v123_v24 }
 0x27f   :  { %v126_v27 = vrot.slane %v125_v26, 2 }
 0x281   :  { %v127_v28 = vadd.f32 %v126_v27, %v125_v26 }
 0x283   :  { %v128_v29 = vrot.slane %v127_v28, 1 }
 0x285   :  { %v129_v30 = vadd.f32 %v128_v29, %v127_v28 }
 0x287   :  { %v130_v31 = vsub.f32 0.0, %v129_v30 }
 0x289   :  { %v132_v32 = vmul.f32 0.16666667, %v130_v31 }
 0x28b   :  { %134 = vrot.lane.b32.xlu1 %v132_v32, %s205_s1 }
 0x2fd   :  { %v135_v33 = vpop.permute.xlu1 %134 }
 0x2fe   :  { %138 = vst.msk [vmem:[#allocation2] sm:$0x1] %vm137_vm5, %v135_v33 }
 0x2ff   :  { %191 = shalt.err (!%p188_p4)
}
 0x300   :  { %148 = dma.vmem_to_hbm [thread:$0]  %s146_s24, 16, %s251_s3, [#allocation3]  }
 0x301   :  { %200 = dma.done.wait [#allocation3], 16  }
 0x302   :  { %201 = vsyncadd [#allocation3], 4294967280 }
 0x303   :  { %152 = vsyncpa [#allocation3], 1 }

// kernel: blip_forward.35
= control target key start
LH: loop header
LB: loop body
LE: loop exit
PB: predicated region body
PF: predicated region fallthrough
CT: control target
= control target key end

     0   :  { %vm33_vm0 = vcmask 261120   ;;  %s341_s0 = inlined_call_operand.vmem [shape: f32[14,32], index: 0, kind: input, shape index: {}]   ;;  %s342_s1 = inlined_call_operand.vmem [shape: s32[14,1], index: 1, kind: input, shape index: {}]   ;;  %s343_s2 = inlined_call_operand.vmem [shape: f32[32,64], index: 2, kind: input, shape index: {}]   ;;  %s344_s3 = inlined_call_operand.vmem [shape: f32[1,64], index: 3, kind: input, shape index: {}]   ;;  %s345_s4 = inlined_call_operand.hbm [shape: f32[1,1], index: 4, kind: output, shape index: {}]  }
   0x1   :  { %v25_v0 = vld [vmem:[%s343_s2 + $0x18] sm:$0xff]  ;;  %v24_v1 = vld [vmem:[%s343_s2 + $0x10] sm:$0xff]  ;;  %v18_v2 = vld [vmem:[%s341_s0] sm:$0xff] }
   0x2   :  { %225 = vmatprep.subr.mxu0 %v25_v0  ;;  %v23_v3 = vld [vmem:[%s343_s2 + $0x8] sm:$0xff]  ;;  %233 = vmatprep.mubr.msk.f32.mxu0 %vm33_vm0, %v18_v2 }
   0x3   :  { %226 = vmatpush3.msra.mxu0 %v25_v0 }
   0x4   :  { %9 = vsyncpa [#allocation3], 0  ;;  %227 = vmatprep.subr.mxu0 %v24_v1  ;;  %v22_v4 = vld [vmem:[%s343_s2] sm:$0xff]  ;;  %v19_v5 = vld [vmem:[%s341_s0 + $0x8] sm:$0x3f]  ;;  %vm115_vm1 = vcmask 523264   ;;  %v141_v28 = vlaneseq }
   0x5   :  { %228 = vmatpush3.msra.mxu0 %v24_v1  ;;  %v212_v7 = vld [vmem:[%s344_s3] ss:$0 sm:$0xff]  ;;  %vm119_vm2 = vcmask 521216   ;;  %v273_v13 = vmov 0   ;;  %v21_v25 = vld [vmem:[%s342_s1 + $0x8] sm:$0x3f] }
   0x6   :  { %229 = vmatprep.subr.mxu0 %v23_v3  ;;  %240 = vset.pattern.permute.xlu1 %v273_v13  ;;  %v20_v14 = vld [vmem:[%s342_s1] sm:$0xff]  ;;  %v142_v29 = vand.u32 127, %v141_v28  ;;  %v274_v34 = vmov 0.0   ;;  %vm166_vm5 = vcmp.ne.s32.totalorder %v21_v25, 4294967196  ;;  %vm175_vm7 = vcmask 5120   ;;  %s275_s1 = smov [#allocation2]  }
   0x7   :  { %230 = vmatpush3.msra.mxu0 %v23_v3  ;;  %239 = vset.pattern.permute.xlu0 %v273_v13  ;;  %vm165_vm6 = vcmp.ne.s32.totalorder %v20_v14, 4294967196  ;;  %v218_v45 = vsel %vm166_vm5, 1.0, %v274_v34  ;;  %vm173_vm8 = vcmask 7168   ;;  %s204_s30 = sshll.u32 %s275_s1, 4  ;;  %vm196_vm9 = vcmask 0   ;;  %s205_s30 = int_to_ptr.vmem [resolvable:$true] %s204_s30 }
   0x8   :  { %231 = vmatprep.subr.mxu0 %v22_v4  ;;  %v217_v46 = vsel %vm165_vm6, 1.0, %v274_v34  ;;  %v185_v47 = vsel %vm175_vm7, %v218_v45, 0.0  ;;  %s251_s5 = scalar_lea.vmem %s205_s30, 16  ;;  %s255_s6 = scalar_lea.vmem %s205_s30, 32 }
   0x9   :  { %232 = vmatpush3.msra.mxu0 %v22_v4  ;;  %v184_v48 = vsel %vm173_vm8, %v217_v46, 0.0  ;;  %p252_p0 = scmp.ne.s32.totalorder %s205_s30, %s251_s5  ;;  %p256_p1 = scmp.lt.s32.totalorder %s205_s30, %s205_s30 }
   0xa   :  { %234 = vmatmul.mubr.msk.f32.vlgmr.msra.gmra.mxu0 %vm33_vm0, %v19_v5  ;;  %v186_v49 = vadd.f32 %v185_v47, %v184_v48  ;;  %p257_p2 = scmp.lt.s32.totalorder %s255_s6, %s251_s5 }
   0xc   :  { %v187_v50 = vrot.slane %v186_v49, 4  ;;  %p258_p3 = por %p257_p2, %p256_p1 }
   0xe   :  { %v188_v51 = vadd.f32 %v187_v50, %v186_v49  ;;  %p259_p4 = pnand %p258_p3, %p252_p0 }
  0x10   :  { %v189_v52 = vrot.slane %v188_v51, 2 }
  0x12   :  { %v190_v53 = vadd.f32 %v189_v52, %v188_v51 }
  0x14   :  { %v191_v54 = vrot.slane %v190_v53, 1 }
  0x16   :  { %v192_v56 = vadd.f32 %v191_v54, %v190_v53 }
  0x18   :  { %v193_v58 = vmax.f32 %v192_v56, 1.0 }
  0xca   :  { %v235_v6 = vpop.f32.mrf.mxu0 }
  0xcb   :  { %v112_v10 = vadd.f32 %v235_v6, %v212_v7 }
  0xcc   :  { %v106_v8 = vpop.f32.mrf.mxu0 }
  0xcd   :  { %v107_v9 = vadd.f32 %v212_v7, %v106_v8  ;;  %v120_v12 = vsel %vm119_vm2, %v112_v10, -inf }
  0xcf   :  { %v116_v11 = vsel %vm115_vm1, %v107_v9, -inf }
  0xd0   :  { %117 = vmax.xlane.f32.xlu0 %v116_v11 }
  0xd4   :  { %121 = vmax.xlane.f32.xlu0 %v120_v12 }
  0xea   :  { %144 = vperm.xlu0 %239, %v20_v14  }
 0x159   :  { %v118_v15 = vpop.xlane.xlu0 %117 }
 0x15a   :  { %v123_v16 = vsub.f32 %v107_v9, %v118_v15 }
 0x15c   :  { %v125_v19 = vmul.f32 1.442695, %v123_v16 }
 0x15d   :  { %v122_v17 = vpop.xlane.xlu0 %121 }
 0x15e   :  { %v124_v18 = vsub.f32 %v112_v10, %v122_v17 }
 0x160   :  { %v127_v20 = vmul.f32 1.442695, %v124_v18 }
 0x162   :  { %241 = vpow2.f32 %v127_v20 }
 0x163   :  { %243 = vpow2.f32 %v125_v19 }
 0x165   :  { %v145_v32 = vpop.permute.xlu0 %144 }
 0x166   :  { %vm149_vm4 = vcmp.eq.s32.totalorder %v142_v29, %v145_v32 }
 0x167   :  { %v215_v40 = vsel %vm149_vm4, 1.0, %v274_v34 }
 0x16f   :  { %v242_v21 = vpop.eup %241 }
 0x170   :  { %v132_v22 = vsel %vm119_vm2, %v242_v21, 0.0  ;;  %v244_v23 = vpop.eup %243 }
 0x171   :  { %133 = vadd.xlane.f32.xlu1 %v132_v22  ;;  %v129_v24 = vsel %vm115_vm1, %v244_v23, 0.0 }
 0x175   :  { %130 = vadd.xlane.f32.xlu1 %v129_v24 }
 0x186   :  { %147 = vperm.xlu1 %240, %v21_v25  }
 0x1fa   :  { %v134_v26 = vpop.xlane.xlu1 %133 }
 0x1fb   :  { %245 = vlog2.f32 %v134_v26 }
 0x1fe   :  { %v131_v27 = vpop.xlane.xlu1 %130 }
 0x1ff   :  { %247 = vlog2.f32 %v131_v27 }
 0x200   :  { %249 = vrcp.f32 %v193_v58 }
 0x202   :  { %v148_v30 = vpop.permute.xlu1 %147 }
 0x203   :  { %vm150_vm3 = vcmp.eq.s32.totalorder %v142_v29, %v148_v30 }
 0x204   :  { %v216_v35 = vsel %vm150_vm3, 1.0, %v274_v34 }
 0x208   :  { %v246_v31 = vpop.eup %245 }
 0x209   :  { %v138_v33 = vmul.f32 0.6931472, %v246_v31 }
 0x20b   :  { %v140_v36 = vsub.f32 %v124_v18, %v138_v33 }
 0x20c   :  { %v248_v37 = vpop.eup %247 }
 0x20d   :  { %v136_v38 = vmul.f32 0.6931472, %v248_v37  ;;  %v156_v39 = vmul.f32 %v216_v35, %v140_v36  ;;  %v250_v7 = vpop.eup %249 }
 0x20f   :  { %v160_v41 = vsel %vm119_vm2, %v156_v39, 0.0  ;;  %v139_v42 = vsub.f32 %v123_v16, %v136_v38 }
 0x210   :  { %161 = vadd.xlane.f32.xlu0 %v160_v41 }
 0x211   :  { %v155_v43 = vmul.f32 %v215_v40, %v139_v42 }
 0x213   :  { %v157_v44 = vsel %vm115_vm1, %v155_v43, 0.0 }
 0x214   :  { %158 = vadd.xlane.f32.xlu1 %v157_v44 }
 0x299   :  { %v162_v55 = vpop.xlane.xlu0 %161 }
 0x29a   :  { %v164_v57 = vsub.f32 0.0, %v162_v55 }
 0x29c   :  { %v172_v60 = vmul.f32 %v218_v45, %v164_v57 }
 0x29d   :  { %v159_v59 = vpop.xlane.xlu1 %158 }
 0x29e   :  { %v163_v61 = vsub.f32 0.0, %v159_v59  ;;  %v176_v63 = vsel %vm175_vm7, %v172_v60, 0.0 }
 0x2a0   :  { %v171_v62 = vmul.f32 %v217_v46, %v163_v61 }
 0x2a2   :  { %v174_v0 = vsel %vm173_vm8, %v171_v62, 0.0 }
 0x2a3   :  { %v177_v1 = vadd.f32 %v176_v63, %v174_v0 }
 0x2a5   :  { %v178_v2 = vrot.slane %v177_v1, 4 }
 0x2a7   :  { %v179_v3 = vadd.f32 %v178_v2, %v177_v1 }
 0x2a9   :  { %v180_v4 = vrot.slane %v179_v3, 2 }
 0x2ab   :  { %v181_v5 = vadd.f32 %v180_v4, %v179_v3 }
 0x2ad   :  { %v182_v6 = vrot.slane %v181_v5, 1 }
 0x2af   :  { %v183_v8 = vadd.f32 %v182_v6, %v181_v5 }
 0x2b1   :  { %v195_v9 = vmul.f32 %v250_v7, %v183_v8 }
 0x2b3   :  { %197 = vst.msk [vmem:[#allocation2] sm:$0x1] %vm196_vm9, %v195_v9 }
 0x2b4   :  { %262 = shalt.err (!%p259_p4)
}
 0x2b5   :  { %207 = dma.vmem_to_hbm [thread:$0]  %s205_s30, 16, %s345_s4, [#allocation3]  }
 0x2b6   :  { %271 = dma.done.wait [#allocation3], 16  }
 0x2b7   :  { %272 = vsyncadd [#allocation3], 4294967280 }
 0x2b8   :  { %211 = vsyncpa [#allocation3], 1 }

// kernel: blip_forward.32
= control target key start
LH: loop header
LB: loop body
LE: loop exit
PB: predicated region body
PF: predicated region fallthrough
CT: control target
= control target key end

     0   :  { %vm90_vm0 = vcmask 261120   ;;  %vm246_vm1 = vcmask 130048   ;;  %s2118_s30 = smov 112   ;;  %s2786_s29 = smov 16   ;;  %vm998_vm2 = vcmask 162816   ;;  %vm1058_vm3 = vcmask 1041408   ;;  %s2752_s0 = inlined_call_operand.vmem [shape: f32[32,32], index: 0, kind: input, shape index: {}]   ;;  %s2753_s6 = inlined_call_operand.vmem [shape: f32[32,96], index: 6, kind: input, shape index: {}]   ;;  %s2754_s4 = inlined_call_operand.vmem [shape: f32[1,32], index: 4, kind: input, shape index: {}]   ;;  %s2755_s5 = inlined_call_operand.vmem [shape: f32[1,32], index: 5, kind: input, shape index: {}]   ;;  %s2756_s7 = inlined_call_operand.vmem [shape: f32[1,96], index: 7, kind: input, shape index: {}]   ;;  %s2757_s1 = inlined_call_operand.vmem [shape: f32[32,32], index: 1, kind: input, shape index: {}]   ;;  %s2758_s8 = inlined_call_operand.vmem [shape: f32[32,32], index: 8, kind: input, shape index: {}]   ;;  %s2759_s9 = inlined_call_operand.vmem [shape: f32[1,32], index: 9, kind: input, shape index: {}]   ;;  %s2760_s14 = inlined_call_operand.vmem [shape: f32[32,64], index: 14, kind: input, shape index: {}]   ;;  %s2761_s2 = inlined_call_operand.vmem [shape: f32[20,32], index: 2, kind: input, shape index: {}]   ;;  %s2762_s12 = inlined_call_operand.vmem [shape: f32[32,32], index: 12, kind: input, shape index: {}]   ;;  %s2763_s10 = inlined_call_operand.vmem [shape: f32[1,32], index: 10, kind: input, shape index: {}]   ;;  %s2764_s11 = inlined_call_operand.vmem [shape: f32[1,32], index: 11, kind: input, shape index: {}]   ;;  %s2765_s15 = inlined_call_operand.vmem [shape: f32[1,64], index: 15, kind: input, shape index: {}]   ;;  %s2766_s13 = inlined_call_operand.vmem [shape: f32[1,32], index: 13, kind: input, shape index: {}]   ;;  %s2767_s3 = inlined_call_operand.vmem [shape: f32[32,20], index: 3, kind: input, shape index: {}]   ;;  %s2768_s16 = inlined_call_operand.vmem [shape: f32[32,32], index: 16, kind: input, shape index: {}]   ;;  %s2769_s17 = inlined_call_operand.vmem [shape: f32[1,32], index: 17, kind: input, shape index: {}]   ;;  %s2770_s20 = inlined_call_operand.vmem [shape: f32[32,64], index: 20, kind: input, shape index: {}]   ;;  %s2771_s18 = inlined_call_operand.vmem [shape: f32[1,32], index: 18, kind: input, shape index: {}]   ;;  %s2772_s19 = inlined_call_operand.vmem [shape: f32[1,32], index: 19, kind: input, shape index: {}]   ;;  %s2773_s22 = inlined_call_operand.vmem [shape: f32[64,32], index: 22, kind: input, shape index: {}]   ;;  %s2774_s21 = inlined_call_operand.vmem [shape: f32[1,64], index: 21, kind: input, shape index: {}]   ;;  %s2775_s23 = inlined_call_operand.vmem [shape: f32[1,32], index: 23, kind: input, shape index: {}]   ;;  %s2776_s24 = inlined_call_operand.vmem [shape: f32[1,32], index: 24, kind: input, shape index: {}]   ;;  %s2777_s25 = inlined_call_operand.vmem [shape: f32[1,32], index: 25, kind: input, shape index: {}]   ;;  %s2778_s26 = inlined_call_operand.vmem [shape: f32[32,32], index: 26, kind: output, shape index: {}]  }
   0x1   :  { %2788 = sst [smem:[#allocation2_spill]] %s2752_s0  ;;  %s2116_s0 = smov 64   ;;  %vm1591_vm4 = vcmask 523264  }
   0x2   :  { %2789 = sst [smem:[#allocation3_spill]] %s2753_s6 }
   0x3   :  { %2790 = sst [smem:[#allocation4_spill]] %s2754_s4 }
   0x4   :  { %2791 = sst [smem:[#allocation5_spill]] %s2755_s5 }
   0x5   :  { %2792 = sst [smem:[#allocation6_spill]] %s2756_s7 }
   0x6   :  { %2793 = sst [smem:[#allocation7_spill]] %s2757_s1  ;;  %s2119_s1 = smov 48  }
   0x7   :  { %2794 = sst [smem:[#allocation8_spill]] %s2758_s8 }
   0x8   :  { %2795 = sst [smem:[#allocation9_spill]] %s2759_s9 }
   0x9   :  { %2796 = sst [smem:[#allocation10_spill]] %s2760_s14 }
   0xa   :  { %2797 = sst [smem:[#allocation11_spill]] %s2761_s2 }
   0xb   :  { %2798 = sst [smem:[#allocation12_spill]] %s2762_s12  ;;  %s2115_s12 = smov 96  }
   0xc   :  { %s2799_s9 = sld [smem:[#allocation2_spill]] }
   0xd   :  { %s2800_s4 = sld [smem:[#allocation3_spill]] }
   0xe   :  { %s2801_s7 = sld [smem:[#allocation4_spill]] }
   0xf   :  { %s2802_s2 = sld [smem:[#allocation5_spill]] }
  0x10   :  { %s2804_s27 = sld [smem:[#allocation7_spill]] }
  0x11   :  { %s2805_s5 = sld [smem:[#allocation8_spill]] }
  0x12   :  { %v84_v0 = vld [vmem:[%s2799_s9] sm:$0xff]  ;;  %v86_v1 = vld [vmem:[%s2799_s9 + $0x10] sm:$0xff]  ;;  %v85_v2 = vld [vmem:[%s2799_s9 + $0x8] sm:$0xff]  ;;  %s2808_s8 = sld [smem:[#allocation11_spill]] }
  0x13   :  { %v91_v3 = vsel %vm90_vm0, %v84_v0, 0.0  ;;  %v97_v4 = vsel %vm90_vm0, %v86_v1, 0.0  ;;  %v87_v5 = vld [vmem:[%s2799_s9 + $0x18] sm:$0xff]  ;;  %v94_v6 = vsel %vm90_vm0, %v85_v2, 0.0  ;;  %v166_v28 = vld [vmem:[%s2800_s4 + $0x10] sm:$0xff]  ;;  %v164_v30 = vld [vmem:[%s2800_s4] sm:$0xff] }
  0x14   :  { %92 = vadd.xlane.f32.xlu0 %v91_v3  ;;  %98 = vadd.xlane.f32.xlu1 %v97_v4  ;;  %v100_v7 = vsel %vm90_vm0, %v87_v5, 0.0  ;;  %v167_v29 = vld [vmem:[%s2800_s4 + $0x18] sm:$0xff]  ;;  %v165_v32 = vld [vmem:[%s2800_s4 + $0x8] sm:$0xff]  ;;  %v1744_v48 = vld [vmem:[%s2801_s7] ss:$0 sm:$0xff]  ;;  %s2803_s4 = sld [smem:[#allocation6_spill]] }
  0x15   :  { %v171_v31 = vpack.c.bf16 %v167_v29, %v166_v28  ;;  %v170_v33 = vpack.c.bf16 %v165_v32, %v164_v30  ;;  %v1745_v53 = vld [vmem:[%s2802_s2] ss:$0 sm:$0xff]  ;;  %s2117_s2 = smov 80   ;;  %s2809_s14 = sld [smem:[#allocation12_spill]] }
  0x17   :  { %1851 = vmatprep.subr.bf16.mxu1 %v171_v31 }
  0x18   :  { %95 = vadd.xlane.f32.xlu0 %v94_v6  ;;  %101 = vadd.xlane.f32.xlu1 %v100_v7 }
  0x19   :  { %1852 = vmatpush3.bf16.msra.mxu1 %v171_v31  ;;  %v2348_v31 = vld [vmem:[%s2804_s27 + $0x10] sm:$0xff] }
  0x1a   :  { %1853 = vmatprep.subr.bf16.mxu1 %v170_v33  ;;  %v1746_v3 = vld [vmem:[%s2803_s4] ss:$0 sm:$0xff]  ;;  %s2806_s4 = sld [smem:[#allocation9_spill]] }
  0x1d   :  { %1854 = vmatpush3.bf16.msra.mxu1 %v170_v33 }
  0x9d   :  { %v93_v8 = vpop.xlane.xlu0 %92  ;;  %v99_v9 = vpop.xlane.xlu1 %98 }
  0x9e   :  { %v104_v10 = vmul.f32 0.03125, %v93_v8  ;;  %v106_v11 = vmul.f32 0.03125, %v99_v9 }
  0xa0   :  { %v108_v12 = vsub.f32 %v84_v0, %v104_v10  ;;  %v110_v13 = vsub.f32 %v86_v1, %v106_v11 }
  0xa1   :  { %v96_v14 = vpop.xlane.xlu0 %95  ;;  %v102_v15 = vpop.xlane.xlu1 %101 }
  0xa2   :  { %v105_v16 = vmul.f32 0.03125, %v96_v14  ;;  %v107_v17 = vmul.f32 0.03125, %v102_v15  ;;  %v112_v18 = vmul.f32 %v108_v12, %v108_v12  ;;  %v114_v19 = vmul.f32 %v110_v13, %v110_v13 }
  0xa4   :  { %v109_v20 = vsub.f32 %v85_v2, %v105_v16  ;;  %v111_v21 = vsub.f32 %v87_v5, %v107_v17  ;;  %v116_v22 = vsel %vm90_vm0, %v112_v18, 0.0  ;;  %v122_v23 = vsel %vm90_vm0, %v114_v19, 0.0  ;;  %v2330_v19 = vld [vmem:[%s2804_s27] sm:$0xff] }
  0xa5   :  { %117 = vadd.xlane.f32.xlu0 %v116_v22  ;;  %v2335_v22 = vld [vmem:[%s2804_s27 + $0x18] sm:$0xff] }
  0xa6   :  { %v113_v24 = vmul.f32 %v109_v20, %v109_v20  ;;  %v115_v25 = vmul.f32 %v111_v21, %v111_v21 }
  0xa8   :  { %v119_v26 = vsel %vm90_vm0, %v113_v24, 0.0  ;;  %v125_v27 = vsel %vm90_vm0, %v115_v25, 0.0 }
  0xa9   :  { %123 = vadd.xlane.f32.xlu0 %v122_v23  ;;  %120 = vadd.xlane.f32.xlu1 %v119_v26  ;;  %v2341_v26 = vld [vmem:[%s2804_s27 + $0x8] sm:$0xff]  ;;  %s2807_s27 = sld [smem:[#allocation10_spill]] }
  0xad   :  { %126 = vadd.xlane.f32.xlu1 %v125_v27 }
 0x12e   :  { %v118_v34 = vpop.xlane.xlu0 %117 }
 0x12f   :  { %v128_v35 = vmul.f32 0.03125, %v118_v34 }
 0x131   :  { %v132_v36 = vadd.f32 1e-12, %v128_v35 }
 0x132   :  { %v121_v37 = vpop.xlane.xlu1 %120  ;;  %v124_v38 = vpop.xlane.xlu0 %123 }
 0x133   :  { %2011 = vrsqrt.f32 %v132_v36  ;;  %v129_v39 = vmul.f32 0.03125, %v121_v37  ;;  %v130_v40 = vmul.f32 0.03125, %v124_v38 }
 0x135   :  { %v133_v41 = vadd.f32 1e-12, %v129_v39  ;;  %v134_v42 = vadd.f32 1e-12, %v130_v40 }
 0x136   :  { %v127_v43 = vpop.xlane.xlu1 %126 }
 0x137   :  { %2013 = vrsqrt.f32 %v133_v41  ;;  %v131_v44 = vmul.f32 0.03125, %v127_v43 }
 0x138   :  { %2015 = vrsqrt.f32 %v134_v42 }
 0x139   :  { %v135_v45 = vadd.f32 1e-12, %v131_v44 }
 0x13b   :  { %2017 = vrsqrt.f32 %v135_v45 }
 0x140   :  { %v2012_v46 = vpop.eup %2011 }
 0x141   :  { %v140_v47 = vmul.f32 %v2012_v46, %v108_v12 }
 0x143   :  { %v150_v52 = vmul.f32 %v1744_v48, %v140_v47 }
 0x144   :  { %v2014_v49 = vpop.eup %2013 }
 0x145   :  { %v2016_v50 = vpop.eup %2015  ;;  %v141_v51 = vmul.f32 %v2014_v49, %v109_v20  ;;  %v2294_v57 = vadd.f32 %v1745_v53, %v150_v52 }
 0x146   :  { %v142_v54 = vmul.f32 %v2016_v50, %v110_v13 }
 0x147   :  { %v151_v55 = vmul.f32 %v1744_v48, %v141_v51 }
 0x148   :  { %v2018_v56 = vpop.eup %2017  ;;  %v152_v60 = vmul.f32 %v1744_v48, %v142_v54 }
 0x149   :  { %v2296_v58 = vadd.f32 %v1745_v53, %v151_v55  ;;  %v143_v59 = vmul.f32 %v2018_v56, %v111_v21 }
 0x14a   :  { %v2301_v63 = vadd.f32 %v1745_v53, %v152_v60 }
 0x14b   :  { %v168_v61 = vpack.c.bf16 %v2296_v58, %v2294_v57  ;;  %v153_v62 = vmul.f32 %v1744_v48, %v143_v59 }
 0x14d   :  { %1855 = vmatprep.mubr.msk.bf16.mxu1 %vm90_vm0, %v168_v61  ;;  %v2303_v0 = vadd.f32 %v1745_v53, %v153_v62 }
 0x14f   :  { %v169_v1 = vpack.c.bf16 %v2303_v0, %v2301_v63 }
 0x151   :  { %1856 = vmatmul.mubr.msk.bf16.vlgmr.msra.gmra.mxu1 %vm90_vm0, %v169_v1 }
 0x211   :  { %v1857_v2 = vpop.f32.mrf.mxu1 }
 0x212   :  { %v228_v6 = vadd.f32 %v1857_v2, %v1746_v3 }
 0x213   :  { %v219_v4 = vpop.f32.mrf.mxu1 }
 0x214   :  { %v220_v9 = vadd.f32 %v1746_v3, %v219_v4 }
 0x215   :  { %v1858_v5 = vpop.f32.mrf.mxu1 }
 0x216   :  { %v231_v7 = vadd.f32 %v1858_v5, %v1746_v3 }
 0x217   :  { %v222_v8 = vpop.f32.mrf.mxu1 }
 0x218   :  { %v2311_v10 = vpack.c.bf16 %v231_v7, %v228_v6  ;;  %v223_v11 = vadd.f32 %v1746_v3, %v222_v8 }
 0x21a   :  { %v2313_v12 = vpack.c.bf16 %v223_v11, %v220_v9  ;;  %244 = vrot.lane.b32.xlu0 %v2311_v10, %s2115_s12 }
 0x21c   :  { %242 = vrot.lane.b32.xlu1 %v2313_v12, %s2115_s12  ;;  %1863 = vmatprep.mubr.msk.bf16.mxu1 %vm246_vm1, %v2313_v12 }
 0x28c   :  { %v245_v13 = vpop.permute.xlu0 %244 }
 0x28d   :  { %v257_v14 = vsel %vm246_vm1, %v245_v13, 0  ;;  %1975 = vmatprep.subr.msk.bf16.mxu1 %vm246_vm1, %v245_v13 }
 0x28e   :  { %1860 = vmatpush3.bf16.xpose.msra.mxu1 %v257_v14  ;;  %v243_v15 = vpop.permute.xlu1 %242 }
 0x28f   :  { %1976 = vmatprep.subr.msk.bf16.mxu1 %vm246_vm1, %v243_v15  ;;  %v254_v16 = vsel %vm246_vm1, %v243_v15, 0 }
 0x296   :  { %1862 = vmatpush3.bf16.xpose.msra.mxu1 %v254_v16 }
 0x29d   :  { %1864 = vmatmul.mubr.msk.bf16.vlgmr.msra.gmra.mxu1 %vm246_vm1, %v2311_v10 }
 0x35d   :  { %v1865_v17 = vpop.f32.mrf.mxu1 }
 0x35e   :  { %v310_v27 = vmul.f32 0.25, %v1865_v17 }
 0x35f   :  { %v293_v18 = vpop.f32.mrf.mxu1 }
 0x360   :  { %v308_v20 = vmul.f32 0.25, %v293_v18  ;;  %v314_v35 = vadd.f32 %v310_v27, %v2348_v31 }
 0x361   :  { %v1866_v21 = vpop.f32.mrf.mxu1 }
 0x362   :  { %v311_v23 = vmul.f32 0.25, %v1866_v21  ;;  %v312_v24 = vadd.f32 %v308_v20, %v2330_v19  ;;  %v322_v36 = vsel %vm90_vm0, %v314_v35, -inf }
 0x363   :  { %v296_v25 = vpop.f32.mrf.mxu1 }
 0x364   :  { %v309_v28 = vmul.f32 0.25, %v296_v25  ;;  %v316_v29 = vsel %vm90_vm0, %v312_v24, -inf  ;;  %v315_v30 = vadd.f32 %v311_v23, %v2335_v22 }
 0x365   :  { %317 = vmax.xlane.f32.xlu1 %v316_v29 }
 0x366   :  { %v313_v32 = vadd.f32 %v309_v28, %v2341_v26  ;;  %v325_v33 = vsel %vm90_vm0, %v315_v30, -inf }
 0x368   :  { %v319_v34 = vsel %vm90_vm0, %v313_v32, -inf }
 0x369   :  { %326 = vmax.xlane.f32.xlu1 %v325_v33  ;;  %320 = vmax.xlane.f32.xlu0 %v319_v34 }
 0x36d   :  { %323 = vmax.xlane.f32.xlu0 %v322_v36 }
 0x37a   :  { %362 = vrot.lane.b32.xlu1 %v2313_v12, %s2116_s0 }
 0x3ee   :  { %v318_v37 = vpop.xlane.xlu1 %317 }
 0x3ef   :  { %v328_v42 = vsub.f32 %v312_v24, %v318_v37 }
 0x3f1   :  { %v332_v47 = vmul.f32 1.442695, %v328_v42 }
 0x3f2   :  { %v327_v38 = vpop.xlane.xlu1 %326  ;;  %v321_v39 = vpop.xlane.xlu0 %320 }
 0x3f3   :  { %v331_v40 = vsub.f32 %v315_v30, %v327_v38  ;;  %v329_v41 = vsub.f32 %v313_v32, %v321_v39 }
 0x3f5   :  { %v338_v43 = vmul.f32 1.442695, %v331_v40  ;;  %v334_v44 = vmul.f32 1.442695, %v329_v41 }
 0x3f6   :  { %v324_v45 = vpop.xlane.xlu0 %323  ;;  %v363_v59 = vpop.permute.xlu1 %362 }
 0x3f7   :  { %2019 = vpow2.f32 %v338_v43  ;;  %v330_v46 = vsub.f32 %v314_v35, %v324_v45 }
 0x3f8   :  { %2021 = vpow2.f32 %v334_v44 }
 0x3f9   :  { %v336_v48 = vmul.f32 1.442695, %v330_v46 }
 0x3fb   :  { %2023 = vpow2.f32 %v336_v48 }
 0x3fc   :  { %2025 = vpow2.f32 %v332_v47 }
 0x404   :  { %v2020_v49 = vpop.eup %2019 }
 0x405   :  { %v349_v50 = vsel %vm90_vm0, %v2020_v49, 0.0  ;;  %v2022_v51 = vpop.eup %2021 }
 0x406   :  { %350 = vadd.xlane.f32.xlu1 %v349_v50  ;;  %v343_v53 = vsel %vm90_vm0, %v2022_v51, 0.0 }
 0x408   :  { %v2024_v52 = vpop.eup %2023 }
 0x409   :  { %v346_v54 = vsel %vm90_vm0, %v2024_v52, 0.0  ;;  %v2026_v55 = vpop.eup %2025 }
 0x40a   :  { %344 = vadd.xlane.f32.xlu1 %v343_v53  ;;  %347 = vadd.xlane.f32.xlu0 %v346_v54  ;;  %v340_v56 = vsel %vm90_vm0, %v2026_v55, 0.0 }
 0x40e   :  { %341 = vadd.xlane.f32.xlu0 %v340_v56 }
 0x41b   :  { %429 = vrot.lane.b32.xlu1 %v2311_v10, %s2117_s2 }
 0x41f   :  { %427 = vrot.lane.b32.xlu1 %v2313_v12, %s2117_s2 }
 0x423   :  { %425 = vrot.lane.b32.xlu1 %v2311_v10, %s2118_s30 }
 0x424   :  { %364 = vrot.lane.b32.xlu0 %v2311_v10, %s2116_s0 }
 0x428   :  { %423 = vrot.lane.b32.xlu0 %v2313_v12, %s2118_s30 }
 0x48f   :  { %v351_v60 = vpop.xlane.xlu1 %350 }
 0x493   :  { %v345_v61 = vpop.xlane.xlu1 %344  ;;  %v348_v62 = vpop.xlane.xlu0 %347 }
 0x494   :  { %2027 = vrcp.f32 %v348_v62 }
 0x495   :  { %2029 = vrcp.f32 %v345_v61 }
 0x496   :  { %2031 = vrcp.f32 %v351_v60 }
 0x497   :  { %v342_v1 = vpop.xlane.xlu0 %341  ;;  %v430_v3 = vpop.permute.xlu1 %429 }
 0x498   :  { %2033 = vrcp.f32 %v342_v1  ;;  %v441_v16 = vsel %vm246_vm1, %v430_v3, 0 }
 0x49b   :  { %v365_v2 = vpop.permute.xlu0 %364  ;;  %v428_v18 = vpop.permute.xlu1 %427 }
 0x49c   :  { %1867 = vmatprep.subr.bf16.mxu0 %v365_v2  ;;  %v438_v20 = vsel %vm246_vm1, %v428_v18, 0 }
 0x49d   :  { %1868 = vmatpush3.bf16.msra.mxu0 %v365_v2 }
 0x49e   :  { %1869 = vmatprep.subr.bf16.mxu0 %v363_v59 }
 0x49f   :  { %v424_v17 = vpop.permute.xlu0 %423  ;;  %v426_v21 = vpop.permute.xlu1 %425 }
 0x4a1   :  { %1870 = vmatpush3.bf16.msra.mxu0 %v363_v59  ;;  %v2028_v4 = vpop.eup %2027 }
 0x4a2   :  { %1977 = vmatprep.subr.msk.bf16.mxu0 %vm246_vm1, %v430_v3  ;;  %v2030_v5 = vpop.eup %2029  ;;  %v358_v8 = vmul.f32 %v2028_v4, %v2024_v52 }
 0x4a3   :  { %v2032_v6 = vpop.eup %2031  ;;  %v357_v11 = vmul.f32 %v2030_v5, %v2022_v51 }
 0x4a4   :  { %v359_v13 = vmul.f32 %v2032_v6, %v2020_v49 }
 0x4a5   :  { %v2034_v7 = vpop.eup %2033 }
 0x4a6   :  { %v356_v9 = vmul.f32 %v2034_v7, %v2026_v55  ;;  %v361_v15 = vpack.c.bf16 %v359_v13, %v358_v8 }
 0x4a8   :  { %v360_v14 = vpack.c.bf16 %v357_v11, %v356_v9 }
 0x4aa   :  { %1871 = vmatprep.mubr.msk.bf16.mxu0 %vm90_vm0, %v360_v14 }
 0x4ab   :  { %1872 = vmatmul.mubr.msk.bf16.vlgmr.msra.gmra.mxu0 %vm90_vm0, %v361_v15 }
 0x4ac   :  { %1876 = vmatpush3.bf16.xpose.msra.mxu0 %v441_v16  ;;  %1879 = vmatprep.mubr.msk.bf16.mxu0 %vm246_vm1, %v424_v17  ;;  %v629_v17 = vld [vmem:[%s2805_s5 + $0x10] sm:$0xff] }
 0x4ad   :  { %1978 = vmatprep.subr.msk.bf16.mxu0 %vm246_vm1, %v428_v18  ;;  %v630_v18 = vld [vmem:[%s2805_s5 + $0x18] sm:$0xff] }
 0x4b4   :  { %1878 = vmatpush3.bf16.xpose.msra.mxu0 %v438_v20  ;;  %v634_v20 = vpack.c.bf16 %v630_v18, %v629_v17  ;;  %v852_v17 = vld [vmem:[%s2807_s27] sm:$0xff]  ;;  %v853_v18 = vld [vmem:[%s2807_s27 + $0x8] sm:$0xff] }
 0x4bb   :  { %1880 = vmatmul.mubr.msk.bf16.vlgmr.msra.gmra.mxu0 %vm246_vm1, %v426_v21  ;;  %v627_v21 = vld [vmem:[%s2805_s5] sm:$0xff] }
 0x56b   :  { %v2379_v23 = vpop.f32.mrf.mxu0 }
 0x56d   :  { %v2381_v24 = vpop.f32.mrf.mxu0 }
 0x56f   :  { %v2383_v25 = vpop.f32.mrf.mxu0 }
 0x571   :  { %v2385_v27 = vpop.f32.mrf.mxu0 }
 0x57b   :  { %v1881_v28 = vpop.f32.mrf.mxu0 }
 0x57c   :  { %v494_v30 = vmul.f32 0.25, %v1881_v28  ;;  %v628_v28 = vld [vmem:[%s2805_s5 + $0x8] sm:$0xff] }
 0x57d   :  { %v477_v29 = vpop.f32.mrf.mxu0 }
 0x57e   :  { %v492_v32 = vmul.f32 0.25, %v477_v29  ;;  %v498_v39 = vadd.f32 %v494_v30, %v2348_v31  ;;  %v633_v30 = vpack.c.bf16 %v628_v28, %v627_v21  ;;  %v779_v21 = vld [vmem:[%s2808_s8] sm:$0xff]  ;;  %v780_v28 = vld [vmem:[%s2808_s8 + $0x8] sm:$0xff] }
 0x57f   :  { %v1882_v33 = vpop.f32.mrf.mxu0 }
 0x580   :  { %v496_v34 = vadd.f32 %v492_v32, %v2330_v19  ;;  %v495_v36 = vmul.f32 0.25, %v1882_v33  ;;  %v506_v41 = vsel %vm90_vm0, %v498_v39, -inf }
 0x581   :  { %v480_v35 = vpop.f32.mrf.mxu0 }
 0x582   :  { %v493_v37 = vmul.f32 0.25, %v480_v35  ;;  %v500_v38 = vsel %vm90_vm0, %v496_v34, -inf  ;;  %v499_v43 = vadd.f32 %v495_v36, %v2335_v22 }
 0x583   :  { %501 = vmax.xlane.f32.xlu0 %v500_v38 }
 0x584   :  { %v497_v40 = vadd.f32 %v493_v37, %v2341_v26  ;;  %v509_v19 = vsel %vm90_vm0, %v499_v43, -inf }
 0x586   :  { %v503_v42 = vsel %vm90_vm0, %v497_v40, -inf }
 0x587   :  { %507 = vmax.xlane.f32.xlu0 %v506_v41  ;;  %504 = vmax.xlane.f32.xlu1 %v503_v42 }
 0x58b   :  { %510 = vmax.xlane.f32.xlu0 %v509_v19 }
 0x60c   :  { %v502_v44 = vpop.xlane.xlu0 %501 }
 0x60d   :  { %v512_v45 = vsub.f32 %v496_v34, %v502_v44 }
 0x60f   :  { %v516_v31 = vmul.f32 1.442695, %v512_v45 }
 0x610   :  { %v508_v46 = vpop.xlane.xlu0 %507  ;;  %v505_v47 = vpop.xlane.xlu1 %504 }
 0x611   :  { %v514_v48 = vsub.f32 %v498_v39, %v508_v46  ;;  %v513_v50 = vsub.f32 %v497_v40, %v505_v47 }
 0x613   :  { %v520_v49 = vmul.f32 1.442695, %v514_v48  ;;  %v518_v52 = vmul.f32 1.442695, %v513_v50  ;;  %v1759_v50 = vld [vmem:[%s2806_s4] ss:$0 sm:$0xff] }
 0x614   :  { %v511_v26 = vpop.xlane.xlu0 %510 }
 0x615   :  { %2035 = vpow2.f32 %v520_v49  ;;  %v515_v51 = vsub.f32 %v499_v43, %v511_v26 }
 0x616   :  { %2037 = vpow2.f32 %v516_v31 }
 0x617   :  { %v522_v53 = vmul.f32 1.442695, %v515_v51 }
 0x619   :  { %2039 = vpow2.f32 %v522_v53 }
 0x61a   :  { %2041 = vpow2.f32 %v518_v52 }
 0x622   :  { %v2036_v22 = vpop.eup %2035 }
 0x623   :  { %v530_v54 = vsel %vm90_vm0, %v2036_v22, 0.0  ;;  %v2038_v55 = vpop.eup %2037 }
 0x624   :  { %531 = vadd.xlane.f32.xlu0 %v530_v54  ;;  %v524_v59 = vsel %vm90_vm0, %v2038_v55, 0.0 }
 0x626   :  { %v2040_v56 = vpop.eup %2039 }
 0x627   :  { %v533_v60 = vsel %vm90_vm0, %v2040_v56, 0.0  ;;  %v2042_v61 = vpop.eup %2041 }
 0x628   :  { %525 = vadd.xlane.f32.xlu0 %v524_v59  ;;  %534 = vadd.xlane.f32.xlu1 %v533_v60  ;;  %v527_v62 = vsel %vm90_vm0, %v2042_v61, 0.0 }
 0x62c   :  { %528 = vadd.xlane.f32.xlu1 %v527_v62 }
 0x63d   :  { %546 = vrot.lane.b32.xlu1 %v2313_v12, %s2119_s1 }
 0x63e   :  { %548 = vrot.lane.b32.xlu0 %v2311_v10, %s2119_s1 }
 0x6ad   :  { %v532_v1 = vpop.xlane.xlu0 %531 }
 0x6b1   :  { %v526_v2 = vpop.xlane.xlu0 %525  ;;  %v535_v3 = vpop.xlane.xlu1 %534 }
 0x6b2   :  { %2043 = vrcp.f32 %v535_v3 }
 0x6b3   :  { %2045 = vrcp.f32 %v526_v2 }
 0x6b4   :  { %2047 = vrcp.f32 %v532_v1 }
 0x6b5   :  { %v549_v4 = vpop.permute.xlu0 %548  ;;  %v529_v5 = vpop.xlane.xlu1 %528 }
 0x6b6   :  { %2049 = vrcp.f32 %v529_v5  ;;  %1883 = vmatprep.subr.bf16.mxu1 %v549_v4 }
 0x6b7   :  { %1884 = vmatpush3.bf16.msra.mxu1 %v549_v4 }
 0x6b9   :  { %v547_v6 = vpop.permute.xlu1 %546 }
 0x6ba   :  { %1885 = vmatprep.subr.bf16.mxu1 %v547_v6 }
 0x6bb   :  { %1886 = vmatpush3.bf16.msra.mxu1 %v547_v6 }
 0x6bc   :  { %1891 = vmatprep.subr.bf16.mxu1 %v634_v20 }
 0x6bf   :  { %v2044_v7 = vpop.eup %2043 }
 0x6c0   :  { %v2046_v8 = vpop.eup %2045  ;;  %v543_v11 = vmul.f32 %v2044_v7, %v2040_v56 }
 0x6c1   :  { %v2048_v9 = vpop.eup %2047  ;;  %v540_v10 = vmul.f32 %v2046_v8, %v2038_v55 }
 0x6c2   :  { %v542_v14 = vmul.f32 %v2048_v9, %v2036_v22 }
 0x6c3   :  { %v2050_v12 = vpop.eup %2049 }
 0x6c4   :  { %v541_v13 = vmul.f32 %v2050_v12, %v2042_v61  ;;  %v545_v16 = vpack.c.bf16 %v543_v11, %v542_v14  ;;  %v854_v14 = vld [vmem:[%s2807_s27 + $0x10] sm:$0xff] }
 0x6c6   :  { %v544_v15 = vpack.c.bf16 %v541_v13, %v540_v10 }
 0x6c8   :  { %1887 = vmatprep.mubr.msk.bf16.mxu1 %vm90_vm0, %v544_v15  ;;  %v855_v15 = vld [vmem:[%s2807_s27 + $0x18] sm:$0xff] }
 0x6c9   :  { %1888 = vmatmul.mubr.msk.bf16.vlgmr.msra.gmra.mxu1 %vm90_vm0, %v545_v16  ;;  %v859_v16 = vpack.c.bf16 %v855_v15, %v854_v14  ;;  %v1762_v14 = vld [vmem:[%s2766_s13] ss:$0 sm:$0xff] }
 0x6ca   :  { %1892 = vmatpush3.bf16.msra.mxu1 %v634_v20  ;;  %v858_v20 = vpack.c.bf16 %v853_v18, %v852_v17 }
 0x6cb   :  { %1893 = vmatprep.subr.bf16.mxu1 %v633_v30 }
 0x6ce   :  { %1894 = vmatpush3.bf16.msra.mxu1 %v633_v30  ;;  %v781_v30 = vld [vmem:[%s2808_s8 + $0x10] sm:$0xf] }
 0x6cf   :  { %1907 = vmatprep.subr.bf16.mxu1 %v859_v16 }
 0x789   :  { %v1889_v29 = vpop.f32.mrf.mxu1 }
 0x78b   :  { %v592_v32 = vpop.f32.mrf.mxu1 }
 0x78d   :  { %v1890_v33 = vpop.f32.mrf.mxu1 }
 0x78e   :  { %v1996_v36 = vpack.i.bf16 %v1890_v33, %v1889_v29  ;;  %v856_v29 = vpack.c.bf16 %v780_v28, %v779_v21  ;;  %v784_v33 = vld [vmem:[%s2809_s14 + $0x10] sm:$0xff] }
 0x78f   :  { %v595_v34 = vpop.f32.mrf.mxu1 }
 0x790   :  { %v1991_v35 = vpack.i.bf16 %v595_v34, %v592_v32  ;;  %v857_v32 = vpack.c.bf16 %v781_v30, %v781_v30  ;;  %v785_v34 = vld [vmem:[%s2809_s14 + $0x18] sm:$0xff] }
 0x792   :  { %1992 = vrot.lane.b32.xlu1 %v1991_v35, %s2786_s29  ;;  %v789_v35 = vpack.c.bf16 %v785_v34, %v784_v33 }
 0x794   :  { %1899 = vmatprep.subr.bf16.mxu0 %v789_v35 }
 0x795   :  { %1900 = vmatpush3.bf16.msra.mxu0 %v789_v35 }
 0x796   :  { %1997 = vrot.lane.b32.xlu1 %v1996_v36, %s2786_s29  ;;  %v782_v36 = vld [vmem:[%s2809_s14] sm:$0xff] }
 0x804   :  { %v1993_v37 = vpop.permute.xlu1 %1992 }
 0x805   :  { %v1995_v38 = vunpack.i.h.bf16 %v1993_v37  ;;  %v1994_v39 = vunpack.i.l.bf16 %v1993_v37  ;;  %v783_v37 = vld [vmem:[%s2809_s14 + $0x8] sm:$0xff] }
 0x807   :  { %v624_v40 = vsel %vm246_vm1, %v2385_v27, %v1995_v38  ;;  %v623_v41 = vsel %vm246_vm1, %v2381_v24, %v1994_v39  ;;  %v788_v38 = vpack.c.bf16 %v783_v37, %v782_v36  ;;  %v2545_v36 = vld [vmem:[%s2767_s3 + $0x10] sm:$0xff] }
 0x808   :  { %v631_v42 = vpack.c.bf16 %v624_v40, %v623_v41  ;;  %v1998_v43 = vpop.permute.xlu1 %1997 }
 0x809   :  { %v2000_v19 = vunpack.i.h.bf16 %v1998_v43  ;;  %v1999_v44 = vunpack.i.l.bf16 %v1998_v43  ;;  %1901 = vmatprep.subr.bf16.mxu0 %v788_v38 }
 0x80a   :  { %1895 = vmatprep.mubr.msk.bf16.mxu1 %vm90_vm0, %v631_v42  ;;  %1902 = vmatpush3.bf16.msra.mxu0 %v788_v38 }
 0x80b   :  { %v626_v45 = vsel %vm246_vm1, %v2383_v25, %v2000_v19  ;;  %v625_v46 = vsel %vm246_vm1, %v2379_v23, %v1999_v44 }
 0x80c   :  { %v632_v47 = vpack.c.bf16 %v626_v45, %v625_v46 }
 0x80e   :  { %1896 = vmatmul.mubr.msk.bf16.vlgmr.msra.gmra.mxu1 %vm90_vm0, %v632_v47 }
 0x80f   :  { %1908 = vmatpush3.bf16.msra.mxu1 %v859_v16  ;;  %1911 = vmatprep.mubr.msk.bf16.mxu1 %vm90_vm0, %v856_v29 }
 0x810   :  { %1909 = vmatprep.subr.bf16.mxu1 %v858_v20 }
 0x813   :  { %1910 = vmatpush3.bf16.msra.mxu1 %v858_v20 }
 0x816   :  { %1912 = vmatmul.mubr.msk.bf16.vlgmr.msra.gmra.mxu1 %vm90_vm0, %v857_v32  ;;  %v2540_v32 = vld [vmem:[%s2767_s3] sm:$0xff] }
 0x8ce   :  { %v1897_v48 = vpop.f32.mrf.mxu1 }
 0x8cf   :  { %v692_v31 = vadd.f32 %v1897_v48, %v2301_v63 }
 0x8d0   :  { %v675_v27 = vpop.f32.mrf.mxu1 }
 0x8d1   :  { %v690_v24 = vadd.f32 %v675_v27, %v2294_v57  ;;  %v703_v53 = vadd.f32 %v1759_v50, %v692_v31 }
 0x8d2   :  { %v1898_v49 = vpop.f32.mrf.mxu1 }
 0x8d3   :  { %v701_v26 = vadd.f32 %v1759_v50, %v690_v24  ;;  %v693_v25 = vadd.f32 %v1898_v49, %v2303_v0  ;;  %v713_v63 = vsel %vm90_vm0, %v703_v53, 0.0  ;;  %v1760_v49 = vld [vmem:[%s2763_s10] ss:$0 sm:$0xff]  ;;  %s2810_s10 = smov 16  }
 0x8d4   :  { %v678_v51 = vpop.f32.mrf.mxu1 }
 0x8d5   :  { %v691_v23 = vadd.f32 %v678_v51, %v2296_v58  ;;  %v707_v52 = vsel %vm90_vm0, %v701_v26, 0.0  ;;  %v704_v54 = vadd.f32 %v1759_v50, %v693_v25 }
 0x8d6   :  { %708 = vadd.xlane.f32.xlu0 %v707_v52  ;;  %v1761_v52 = vld [vmem:[%s2764_s11] ss:$0 sm:$0xff] }
 0x8d7   :  { %v702_v22 = vadd.f32 %v1759_v50, %v691_v23  ;;  %v716_v55 = vsel %vm90_vm0, %v704_v54, 0.0 }
 0x8d9   :  { %v710_v57 = vsel %vm90_vm0, %v702_v22, 0.0 }
 0x8da   :  { %714 = vadd.xlane.f32.xlu0 %v713_v63  ;;  %711 = vadd.xlane.f32.xlu1 %v710_v57 }
 0x8de   :  { %717 = vadd.xlane.f32.xlu0 %v716_v55 }
 0x95f   :  { %v709_v56 = vpop.xlane.xlu0 %708 }
 0x960   :  { %v719_v59 = vmul.f32 0.03125, %v709_v56 }
 0x962   :  { %v2438_v0 = vsub.f32 %v701_v26, %v719_v59 }
 0x963   :  { %v715_v58 = vpop.xlane.xlu0 %714  ;;  %v712_v60 = vpop.xlane.xlu1 %711 }
 0x964   :  { %v721_v61 = vmul.f32 0.03125, %v715_v58  ;;  %v720_v62 = vmul.f32 0.03125, %v712_v60  ;;  %v727_v1 = vmul.f32 %v2438_v0, %v2438_v0 }
 0x966   :  { %v2442_v2 = vsub.f32 %v703_v53, %v721_v61  ;;  %v2444_v3 = vsub.f32 %v702_v22, %v720_v62  ;;  %v731_v4 = vsel %vm90_vm0, %v727_v1, 0.0  ;;  %v1765_v61 = vld [vmem:[%s2765_s15] ss:$0 sm:$0xff]  ;;  %v1913_v62 = vpop.f32.mrf.mxu1 }
 0x967   :  { %732 = vadd.xlane.f32.xlu0 %v731_v4  ;;  %v718_v5 = vpop.xlane.xlu0 %717  ;;  %v916_v1 = vadd.f32 %v1913_v62, %v1765_v61 }
 0x968   :  { %v722_v6 = vmul.f32 0.03125, %v718_v5  ;;  %v729_v7 = vmul.f32 %v2442_v2, %v2442_v2  ;;  %v728_v8 = vmul.f32 %v2444_v3, %v2444_v3 }
 0x96a   :  { %v2451_v9 = vsub.f32 %v704_v54, %v722_v6  ;;  %v737_v12 = vsel %vm90_vm0, %v729_v7, 0.0  ;;  %v734_v11 = vsel %vm90_vm0, %v728_v8, 0.0 }
 0x96b   :  { %738 = vadd.xlane.f32.xlu0 %v737_v12  ;;  %735 = vadd.xlane.f32.xlu1 %v734_v11 }
 0x96c   :  { %v730_v10 = vmul.f32 %v2451_v9, %v2451_v9 }
 0x96e   :  { %v740_v13 = vsel %vm90_vm0, %v730_v10, 0.0 }
 0x96f   :  { %741 = vadd.xlane.f32.xlu1 %v740_v13 }
 0x9f0   :  { %v733_v39 = vpop.xlane.xlu0 %732 }
 0x9f1   :  { %v743_v40 = vmul.f32 0.03125, %v733_v39  ;;  %v2551_v39 = vld [vmem:[%s2767_s3 + $0x8] sm:$0xff] }
 0x9f3   :  { %v747_v41 = vadd.f32 1e-12, %v743_v40 }
 0x9f4   :  { %v739_v42 = vpop.xlane.xlu0 %738  ;;  %v736_v43 = vpop.xlane.xlu1 %735 }
 0x9f5   :  { %2051 = vrsqrt.f32 %v747_v41  ;;  %v745_v19 = vmul.f32 0.03125, %v739_v42  ;;  %v744_v44 = vmul.f32 0.03125, %v736_v43 }
 0x9f7   :  { %v749_v45 = vadd.f32 1e-12, %v745_v19  ;;  %v748_v46 = vadd.f32 1e-12, %v744_v44  ;;  %v2558_v19 = vld [vmem:[%s2767_s3 + $0x18] sm:$0xff] }
 0x9f8   :  { %v742_v47 = vpop.xlane.xlu1 %741 }
 0x9f9   :  { %2053 = vrsqrt.f32 %v749_v45  ;;  %v746_v48 = vmul.f32 0.03125, %v742_v47 }
 0x9fa   :  { %2055 = vrsqrt.f32 %v748_v46 }
 0x9fb   :  { %v750_v27 = vadd.f32 1e-12, %v746_v48 }
 0x9fd   :  { %2057 = vrsqrt.f32 %v750_v27 }
 0xa02   :  { %v2052_v31 = vpop.eup %2051 }
 0xa03   :  { %v755_v24 = vmul.f32 %v2052_v31, %v2438_v0 }
 0xa05   :  { %v765_v23 = vmul.f32 %v1760_v49, %v755_v24 }
 0xa06   :  { %v2054_v50 = vpop.eup %2053 }
 0xa07   :  { %v2056_v26 = vpop.eup %2055  ;;  %v757_v51 = vmul.f32 %v2054_v50, %v2442_v2  ;;  %v2503_v54 = vadd.f32 %v1761_v52, %v765_v23  ;;  %v907_v2 = vpop.f32.mrf.mxu1 }
 0xa08   :  { %v756_v25 = vmul.f32 %v2056_v26, %v2444_v3  ;;  %v2520_v3 = vpack.c.bf16 %v916_v1, %v916_v1  ;;  %v908_v5 = vadd.f32 %v1765_v61, %v907_v2 }
 0xa09   :  { %v767_v57 = vmul.f32 %v1760_v49, %v757_v51  ;;  %v1914_v4 = vpop.f32.mrf.mxu1 }
 0xa0a   :  { %v2058_v53 = vpop.eup %2057  ;;  %v766_v22 = vmul.f32 %v1760_v49, %v756_v25  ;;  %1979 = vmatprep.subr.msk.bf16.mxu0 %vm246_vm1, %v2520_v3  ;;  %v939_v6 = vsel %vm246_vm1, %v2520_v3, 0 }
 0xa0b   :  { %v758_v63 = vmul.f32 %v2058_v53, %v2451_v9  ;;  %v2509_v0 = vadd.f32 %v1761_v52, %v767_v57  ;;  %v910_v7 = vpop.f32.mrf.mxu1 }
 0xa0c   :  { %v2505_v55 = vadd.f32 %v1761_v52, %v766_v22  ;;  %v911_v8 = vadd.f32 %v1765_v61, %v910_v7 }
 0xa0d   :  { %v768_v56 = vmul.f32 %v1760_v49, %v758_v63 }
 0xa0e   :  { %v786_v59 = vpack.c.bf16 %v2505_v55, %v2503_v54  ;;  %v2526_v9 = vpack.c.bf16 %v911_v8, %v908_v5 }
 0xa0f   :  { %v2511_v58 = vadd.f32 %v1761_v52, %v768_v56 }
 0xa10   :  { %1903 = vmatprep.mubr.msk.bf16.mxu0 %vm90_vm0, %v786_v59  ;;  %v936_v12 = vsel %vm246_vm1, %v2526_v9, 0 }
 0xa11   :  { %v787_v60 = vpack.c.bf16 %v2511_v58, %v2509_v0 }
 0xa13   :  { %1904 = vmatmul.mubr.msk.bf16.vlgmr.msra.gmra.mxu0 %vm90_vm0, %v787_v60 }
 0xa14   :  { %1916 = vmatpush3.bf16.xpose.msra.mxu0 %v939_v6 }
 0xa15   :  { %1980 = vmatprep.subr.msk.bf16.mxu0 %vm246_vm1, %v2526_v9 }
 0xa1c   :  { %1918 = vmatpush3.bf16.xpose.msra.mxu0 %v936_v12 }
 0xad3   :  { %v1905_v11 = vpop.f32.mrf.mxu0 }
 0xad4   :  { %v846_v20 = vadd.f32 %v1905_v11, %v1762_v14 }
 0xad5   :  { %v837_v10 = vpop.f32.mrf.mxu0 }
 0xad6   :  { %v838_v17 = vadd.f32 %v1762_v14, %v837_v10 }
 0xad7   :  { %v1906_v13 = vpop.f32.mrf.mxu0 }
 0xad8   :  { %v849_v15 = vadd.f32 %v1906_v13, %v1762_v14 }
 0xad9   :  { %v840_v16 = vpop.f32.mrf.mxu0 }
 0xada   :  { %v841_v18 = vadd.f32 %v1762_v14, %v840_v16  ;;  %v926_v28 = vpack.c.bf16 %v849_v15, %v846_v20 }
 0xadc   :  { %v925_v21 = vpack.c.bf16 %v841_v18, %v838_v17 }
 0xade   :  { %1919 = vmatprep.mubr.msk.bf16.mxu0 %vm246_vm1, %v925_v21 }
 0xadf   :  { %1920 = vmatmul.mubr.msk.bf16.vlgmr.msra.gmra.mxu0 %vm246_vm1, %v926_v28 }
 0xb9f   :  { %v1921_v29 = vpop.f32.mrf.mxu0 }
 0xba0   :  { %v992_v33 = vmul.f32 0.25, %v1921_v29 }
 0xba1   :  { %v975_v30 = vpop.f32.mrf.mxu0 }
 0xba2   :  { %v990_v34 = vmul.f32 0.25, %v975_v30  ;;  %v996_v43 = vadd.f32 %v992_v33, %v2545_v36 }
 0xba3   :  { %v1922_v35 = vpop.f32.mrf.mxu0 }
 0xba4   :  { %v994_v37 = vadd.f32 %v990_v34, %v2540_v32  ;;  %v993_v40 = vmul.f32 0.25, %v1922_v35  ;;  %v1005_v45 = vsel %vm998_vm2, %v996_v43, -inf }
 0xba5   :  { %v978_v38 = vpop.f32.mrf.mxu0 }
 0xba6   :  { %v991_v41 = vmul.f32 0.25, %v978_v38  ;;  %v999_v42 = vsel %vm998_vm2, %v994_v37, -inf  ;;  %v997_v47 = vadd.f32 %v993_v40, %v2558_v19 }
 0xba7   :  { %1000 = vmax.xlane.f32.xlu0 %v999_v42 }
 0xba8   :  { %v995_v44 = vadd.f32 %v991_v41, %v2551_v39  ;;  %v1008_v48 = vsel %vm998_vm2, %v997_v47, -inf }
 0xbaa   :  { %v1002_v46 = vsel %vm998_vm2, %v995_v44, -inf }
 0xbab   :  { %1006 = vmax.xlane.f32.xlu0 %v1005_v45  ;;  %1003 = vmax.xlane.f32.xlu1 %v1002_v46 }
 0xbaf   :  { %1009 = vmax.xlane.f32.xlu1 %v1008_v48 }
 0xbc0   :  { %1047 = vrot.lane.b32.xlu1 %v2526_v9, %s2115_s12 }
 0xc30   :  { %v1001_v27 = vpop.xlane.xlu0 %1000 }
 0xc31   :  { %v1011_v31 = vsub.f32 %v994_v37, %v1001_v27 }
 0xc33   :  { %v1015_v26 = vmul.f32 1.442695, %v1011_v31 }
 0xc34   :  { %v1007_v24 = vpop.xlane.xlu0 %1006  ;;  %v1004_v49 = vpop.xlane.xlu1 %1003 }
 0xc35   :  { %v1013_v50 = vsub.f32 %v996_v43, %v1007_v24  ;;  %v1012_v25 = vsub.f32 %v995_v44, %v1004_v49 }
 0xc37   :  { %v1019_v51 = vmul.f32 1.442695, %v1013_v50  ;;  %v1017_v53 = vmul.f32 1.442695, %v1012_v25 }
 0xc38   :  { %v1010_v23 = vpop.xlane.xlu1 %1009 }
 0xc39   :  { %2059 = vpow2.f32 %v1019_v51  ;;  %v1014_v52 = vsub.f32 %v997_v47, %v1010_v23 }
 0xc3a   :  { %2061 = vpow2.f32 %v1015_v26 }
 0xc3b   :  { %v1021_v22 = vmul.f32 1.442695, %v1014_v52 }
 0xc3c   :  { %v1048_v2 = vpop.permute.xlu1 %1047 }
 0xc3d   :  { %2063 = vpow2.f32 %v1021_v22 }
 0xc3e   :  { %2065 = vpow2.f32 %v1017_v53 }
 0xc46   :  { %v2060_v63 = vpop.eup %2059 }
 0xc47   :  { %v1029_v57 = vsel %vm998_vm2, %v2060_v63, 0.0  ;;  %v2062_v56 = vpop.eup %2061 }
 0xc48   :  { %1030 = vadd.xlane.f32.xlu0 %v1029_v57  ;;  %v1023_v60 = vsel %vm998_vm2, %v2062_v56, 0.0 }
 0xc4a   :  { %v2064_v59 = vpop.eup %2063 }
 0xc4b   :  { %v1032_v61 = vsel %vm998_vm2, %v2064_v59, 0.0  ;;  %v2066_v62 = vpop.eup %2065 }
 0xc4c   :  { %1024 = vadd.xlane.f32.xlu0 %v1023_v60  ;;  %1033 = vadd.xlane.f32.xlu1 %v1032_v61  ;;  %v1026_v1 = vsel %vm998_vm2, %v2066_v62, 0.0 }
 0xc50   :  { %1027 = vadd.xlane.f32.xlu1 %v1026_v1 }
 0xc61   :  { %1119 = vrot.lane.b32.xlu1 %v2520_v3, %s2118_s30 }
 0xc62   :  { %1049 = vrot.lane.b32.xlu0 %v2520_v3, %s2115_s12 }
 0xc65   :  { %1117 = vrot.lane.b32.xlu1 %v2526_v9, %s2118_s30 }
 0xc66   :  { %1113 = vrot.lane.b32.xlu0 %v925_v21, %s2118_s30 }
 0xc69   :  { %1115 = vrot.lane.b32.xlu1 %v926_v28, %s2118_s30 }
 0xcd1   :  { %v1031_v4 = vpop.xlane.xlu0 %1030 }
 0xcd5   :  { %v1025_v5 = vpop.xlane.xlu0 %1024  ;;  %v1034_v6 = vpop.xlane.xlu1 %1033 }
 0xcd6   :  { %2067 = vrcp.f32 %v1034_v6 }
 0xcd7   :  { %2069 = vrcp.f32 %v1025_v5 }
 0xcd8   :  { %2071 = vrcp.f32 %v1031_v4 }
 0xcd9   :  { %v1050_v7 = vpop.permute.xlu0 %1049  ;;  %v1028_v8 = vpop.xlane.xlu1 %1027 }
 0xcda   :  { %v1060_v12 = vsel %vm1058_vm3, %v1050_v7, 0  ;;  %2073 = vrcp.f32 %v1028_v8  ;;  %1981 = vmatprep.subr.msk.bf16.mxu1 %vm1058_vm3, %v1050_v7 }
 0xcdb   :  { %1924 = vmatpush3.bf16.msra.mxu1 %v1060_v12 }
 0xcdc   :  { %1925 = vmatprep.subr.bf16.mxu1 %v1048_v2 }
 0xcdd   :  { %v1120_v11 = vpop.permute.xlu1 %1119  ;;  %v1114_v29 = vpop.permute.xlu0 %1113 }
 0xcde   :  { %v1131_v30 = vsel %vm246_vm1, %v1120_v11, 0 }
 0xcdf   :  { %1926 = vmatpush3.bf16.msra.mxu1 %v1048_v2 }
 0xce0   :  { %1982 = vmatprep.subr.msk.bf16.mxu1 %vm246_vm1, %v1120_v11 }
 0xce1   :  { %v1118_v33 = vpop.permute.xlu1 %1117 }
 0xce2   :  { %v1128_v34 = vsel %vm246_vm1, %v1118_v33, 0 }
 0xce3   :  { %v2068_v10 = vpop.eup %2067 }
 0xce4   :  { %v2070_v13 = vpop.eup %2069  ;;  %v1042_v16 = vmul.f32 %v2068_v10, %v2064_v59 }
 0xce5   :  { %v2072_v14 = vpop.eup %2071  ;;  %v1039_v17 = vmul.f32 %v2070_v13, %v2062_v56  ;;  %v1116_v35 = vpop.permute.xlu1 %1115 }
 0xce6   :  { %v1041_v20 = vmul.f32 %v2072_v14, %v2060_v63 }
 0xce7   :  { %v2074_v15 = vpop.eup %2073 }
 0xce8   :  { %v1040_v18 = vmul.f32 %v2074_v15, %v2066_v62  ;;  %v1044_v28 = vpack.c.bf16 %v1042_v16, %v1041_v20 }
 0xcea   :  { %v1043_v21 = vpack.c.bf16 %v1040_v18, %v1039_v17 }
 0xcec   :  { %1927 = vmatprep.mubr.msk.bf16.mxu1 %vm998_vm2, %v1043_v21 }
 0xced   :  { %1928 = vmatmul.mubr.msk.bf16.vlgmr.msra.gmra.mxu1 %vm998_vm2, %v1044_v28 }
 0xcee   :  { %1932 = vmatpush3.bf16.xpose.msra.mxu1 %v1131_v30  ;;  %1935 = vmatprep.mubr.msk.bf16.mxu1 %vm246_vm1, %v1114_v29 }
 0xcef   :  { %1983 = vmatprep.subr.msk.bf16.mxu1 %vm246_vm1, %v1118_v33  ;;  %v1321_v33 = vld [vmem:[%s2768_s16 + $0x10] sm:$0xff] }
 0xcf6   :  { %1934 = vmatpush3.bf16.xpose.msra.mxu1 %v1128_v34  ;;  %v1322_v34 = vld [vmem:[%s2768_s16 + $0x18] sm:$0xff] }
 0xcfd   :  { %1936 = vmatmul.mubr.msk.bf16.vlgmr.msra.gmra.mxu1 %vm246_vm1, %v1116_v35  ;;  %v1326_v35 = vpack.c.bf16 %v1322_v34, %v1321_v33  ;;  %v1471_v33 = vld [vmem:[%s2770_s20] sm:$0xff]  ;;  %v1472_v34 = vld [vmem:[%s2770_s20 + $0x8] sm:$0xff] }
 0xdad   :  { %v2589_v37 = vpop.f32.mrf.mxu1 }
 0xdaf   :  { %v2591_v38 = vpop.f32.mrf.mxu1 }
 0xdb1   :  { %v2593_v40 = vpop.f32.mrf.mxu1 }
 0xdb3   :  { %v2595_v41 = vpop.f32.mrf.mxu1 }
 0xdbd   :  { %v1937_v42 = vpop.f32.mrf.mxu1 }
 0xdbe   :  { %v1184_v44 = vmul.f32 0.25, %v1937_v42  ;;  %v1319_v42 = vld [vmem:[%s2768_s16] sm:$0xff] }
 0xdbf   :  { %v1167_v43 = vpop.f32.mrf.mxu1 }
 0xdc0   :  { %v1182_v45 = vmul.f32 0.25, %v1167_v43  ;;  %v1188_v49 = vadd.f32 %v1184_v44, %v2545_v36  ;;  %v1320_v43 = vld [vmem:[%s2768_s16 + $0x8] sm:$0xff] }
 0xdc1   :  { %v1938_v46 = vpop.f32.mrf.mxu1 }
 0xdc2   :  { %v1186_v47 = vadd.f32 %v1182_v45, %v2540_v32  ;;  %v1185_v27 = vmul.f32 0.25, %v1938_v46  ;;  %v1196_v26 = vsel %vm998_vm2, %v1188_v49, -inf  ;;  %v1325_v45 = vpack.c.bf16 %v1320_v43, %v1319_v42 }
 0xdc3   :  { %v1170_v48 = vpop.f32.mrf.mxu1 }
 0xdc4   :  { %v1183_v31 = vmul.f32 0.25, %v1170_v48  ;;  %v1190_v24 = vsel %vm998_vm2, %v1186_v47, -inf  ;;  %v1189_v25 = vadd.f32 %v1185_v27, %v2558_v19 }
 0xdc5   :  { %1191 = vmax.xlane.f32.xlu0 %v1190_v24 }
 0xdc6   :  { %v1187_v50 = vadd.f32 %v1183_v31, %v2551_v39  ;;  %v1199_v32 = vsel %vm998_vm2, %v1189_v25, -inf }
 0xdc8   :  { %v1193_v51 = vsel %vm998_vm2, %v1187_v50, -inf }
 0xdc9   :  { %1197 = vmax.xlane.f32.xlu0 %v1196_v26  ;;  %1194 = vmax.xlane.f32.xlu1 %v1193_v51 }
 0xdcd   :  { %1200 = vmax.xlane.f32.xlu0 %v1199_v32 }
 0xe4e   :  { %v1192_v23 = vpop.xlane.xlu0 %1191 }
 0xe4f   :  { %v1202_v52 = vsub.f32 %v1186_v47, %v1192_v23 }
 0xe51   :  { %v1206_v36 = vmul.f32 1.442695, %v1202_v52 }
 0xe52   :  { %v1198_v53 = vpop.xlane.xlu0 %1197  ;;  %v1195_v22 = vpop.xlane.xlu1 %1194 }
 0xe53   :  { %v1204_v63 = vsub.f32 %v1188_v49, %v1198_v53  ;;  %v1203_v56 = vsub.f32 %v1187_v50, %v1195_v22 }
 0xe55   :  { %v1210_v57 = vmul.f32 1.442695, %v1204_v63  ;;  %v1208_v60 = vmul.f32 1.442695, %v1203_v56 }
 0xe56   :  { %v1201_v39 = vpop.xlane.xlu0 %1200 }
 0xe57   :  { %2075 = vpow2.f32 %v1210_v57  ;;  %v1205_v59 = vsub.f32 %v1189_v25, %v1201_v39  ;;  %v1778_v39 = vld [vmem:[%s2769_s17] ss:$0 sm:$0xff] }
 0xe58   :  { %2077 = vpow2.f32 %v1206_v36 }
 0xe59   :  { %v1212_v61 = vmul.f32 1.442695, %v1205_v59 }
 0xe5b   :  { %2079 = vpow2.f32 %v1212_v61 }
 0xe5c   :  { %2081 = vpow2.f32 %v1208_v60 }
 0xe64   :  { %v2076_v19 = vpop.eup %2075 }
 0xe65   :  { %v1220_v62 = vsel %vm998_vm2, %v2076_v19, 0.0  ;;  %v2078_v1 = vpop.eup %2077 }
 0xe66   :  { %1221 = vadd.xlane.f32.xlu0 %v1220_v62  ;;  %v1214_v4 = vsel %vm998_vm2, %v2078_v1, 0.0 }
 0xe68   :  { %v2080_v2 = vpop.eup %2079 }
 0xe69   :  { %v1223_v5 = vsel %vm998_vm2, %v2080_v2, 0.0  ;;  %v2082_v6 = vpop.eup %2081 }
 0xe6a   :  { %1215 = vadd.xlane.f32.xlu0 %v1214_v4  ;;  %1224 = vadd.xlane.f32.xlu1 %v1223_v5  ;;  %v1217_v7 = vsel %vm998_vm2, %v2082_v6, 0.0 }
 0xe6e   :  { %1218 = vadd.xlane.f32.xlu1 %v1217_v7 }
 0xe7f   :  { %1236 = vrot.lane.b32.xlu1 %v2526_v9, %s2117_s2 }
 0xe80   :  { %1238 = vrot.lane.b32.xlu0 %v2520_v3, %s2117_s2 }
 0xeef   :  { %v1222_v8 = vpop.xlane.xlu0 %1221 }
 0xef3   :  { %v1216_v12 = vpop.xlane.xlu0 %1215  ;;  %v1225_v11 = vpop.xlane.xlu1 %1224 }
 0xef4   :  { %2083 = vrcp.f32 %v1225_v11 }
 0xef5   :  { %2085 = vrcp.f32 %v1216_v12 }
 0xef6   :  { %2087 = vrcp.f32 %v1222_v8 }
 0xef7   :  { %v1239_v10 = vpop.permute.xlu0 %1238  ;;  %v1219_v13 = vpop.xlane.xlu1 %1218 }
 0xef8   :  { %v1248_v14 = vsel %vm1058_vm3, %v1239_v10, 0  ;;  %2089 = vrcp.f32 %v1219_v13  ;;  %1984 = vmatprep.subr.msk.bf16.mxu0 %vm1058_vm3, %v1239_v10 }
 0xef9   :  { %1940 = vmatpush3.bf16.msra.mxu0 %v1248_v14 }
 0xefb   :  { %v1237_v15 = vpop.permute.xlu1 %1236 }
 0xefc   :  { %1941 = vmatprep.subr.bf16.mxu0 %v1237_v15 }
 0xefd   :  { %1942 = vmatpush3.bf16.msra.mxu0 %v1237_v15 }
 0xefe   :  { %1947 = vmatprep.subr.bf16.mxu0 %v1326_v35 }
 0xf01   :  { %v2084_v9 = vpop.eup %2083 }
 0xf02   :  { %v2086_v16 = vpop.eup %2085  ;;  %v1233_v18 = vmul.f32 %v2084_v9, %v2080_v2 }
 0xf03   :  { %v2088_v3 = vpop.eup %2087  ;;  %v1230_v20 = vmul.f32 %v2086_v16, %v2078_v1 }
 0xf04   :  { %v1232_v28 = vmul.f32 %v2088_v3, %v2076_v19 }
 0xf05   :  { %v2090_v17 = vpop.eup %2089 }
 0xf06   :  { %v1231_v21 = vmul.f32 %v2090_v17, %v2082_v6  ;;  %v1235_v30 = vpack.c.bf16 %v1233_v18, %v1232_v28  ;;  %v1473_v28 = vld [vmem:[%s2770_s20 + $0x10] sm:$0xff] }
 0xf08   :  { %v1234_v29 = vpack.c.bf16 %v1231_v21, %v1230_v20 }
 0xf0a   :  { %1943 = vmatprep.mubr.msk.bf16.mxu0 %vm998_vm2, %v1234_v29  ;;  %v1474_v29 = vld [vmem:[%s2770_s20 + $0x18] sm:$0xff] }
 0xf0b   :  { %1944 = vmatmul.mubr.msk.bf16.vlgmr.msra.gmra.mxu0 %vm998_vm2, %v1235_v30  ;;  %v1478_v30 = vpack.c.bf16 %v1474_v29, %v1473_v28 }
 0xf0c   :  { %1948 = vmatpush3.bf16.msra.mxu0 %v1326_v35  ;;  %v1477_v35 = vpack.c.bf16 %v1472_v34, %v1471_v33 }
 0xf0d   :  { %1949 = vmatprep.subr.bf16.mxu0 %v1325_v45  ;;  %1955 = vmatprep.subr.bf16.mxu1 %v1478_v30 }
 0xf0e   :  { %1956 = vmatpush3.bf16.msra.mxu1 %v1478_v30 }
 0xf0f   :  { %1957 = vmatprep.subr.bf16.mxu1 %v1477_v35 }
 0xf10   :  { %1950 = vmatpush3.bf16.msra.mxu0 %v1325_v45 }
 0xf12   :  { %1958 = vmatpush3.bf16.msra.mxu1 %v1477_v35 }
 0xfcb   :  { %v1945_v44 = vpop.f32.mrf.mxu0 }
 0xfcd   :  { %v1284_v46 = vpop.f32.mrf.mxu0 }
 0xfcf   :  { %v1946_v47 = vpop.f32.mrf.mxu0 }
 0xfd0   :  { %v2006_v31 = vpack.i.bf16 %v1946_v47, %v1945_v44 }
 0xfd1   :  { %v1287_v48 = vpop.f32.mrf.mxu0 }
 0xfd2   :  { %v2001_v27 = vpack.i.bf16 %v1287_v48, %v1284_v46 }
 0xfd4   :  { %2002 = vrot.lane.b32.xlu1 %v2001_v27, %s2810_s10 }
 0xfd8   :  { %2007 = vrot.lane.b32.xlu1 %v2006_v31, %s2810_s10 }
0x1046   :  { %v2003_v24 = vpop.permute.xlu1 %2002 }
0x1047   :  { %v2005_v49 = vunpack.i.h.bf16 %v2003_v24  ;;  %v2004_v50 = vunpack.i.l.bf16 %v2003_v24 }
0x1049   :  { %v1316_v26 = vsel %vm246_vm1, %v2595_v41, %v2005_v49  ;;  %v1315_v51 = vsel %vm246_vm1, %v2591_v38, %v2004_v50 }
0x104a   :  { %v1323_v25 = vpack.c.bf16 %v1316_v26, %v1315_v51  ;;  %v2008_v32 = vpop.permute.xlu1 %2007 }
0x104b   :  { %v2010_v23 = vunpack.i.h.bf16 %v2008_v32  ;;  %v2009_v52 = vunpack.i.l.bf16 %v2008_v32 }
0x104c   :  { %1951 = vmatprep.mubr.msk.bf16.mxu0 %vm90_vm0, %v1323_v25  ;;  %v1779_v25 = vld [vmem:[%s2771_s18] ss:$0 sm:$0xff] }
0x104d   :  { %v1318_v53 = vsel %vm246_vm1, %v2593_v40, %v2010_v23  ;;  %v1317_v22 = vsel %vm246_vm1, %v2589_v37, %v2009_v52 }
0x104e   :  { %v1324_v63 = vpack.c.bf16 %v1318_v53, %v1317_v22 }
0x1050   :  { %1952 = vmatmul.mubr.msk.bf16.vlgmr.msra.gmra.mxu0 %vm90_vm0, %v1324_v63  ;;  %v1780_v63 = vld [vmem:[%s2772_s19] ss:$0 sm:$0xff] }
0x1110   :  { %v1953_v36 = vpop.f32.mrf.mxu0 }
0x1111   :  { %v1384_v57 = vadd.f32 %v1953_v36, %v2509_v0 }
0x1112   :  { %v1367_v41 = vpop.f32.mrf.mxu0 }
0x1113   :  { %v1382_v38 = vadd.f32 %v1367_v41, %v2503_v54  ;;  %v1395_v19 = vadd.f32 %v1778_v39, %v1384_v57 }
0x1114   :  { %v1954_v56 = vpop.f32.mrf.mxu0 }
0x1115   :  { %v1393_v59 = vadd.f32 %v1778_v39, %v1382_v38  ;;  %v1385_v40 = vadd.f32 %v1954_v56, %v2511_v58  ;;  %v1405_v0 = vsel %vm90_vm0, %v1395_v19, 0.0 }
0x1116   :  { %v1370_v60 = vpop.f32.mrf.mxu0 }
0x1117   :  { %v1383_v37 = vadd.f32 %v1370_v60, %v2505_v55  ;;  %v1399_v61 = vsel %vm90_vm0, %v1393_v59, 0.0  ;;  %v1396_v1 = vadd.f32 %v1778_v39, %v1385_v40 }
0x1118   :  { %1400 = vadd.xlane.f32.xlu0 %v1399_v61 }
0x1119   :  { %v1394_v62 = vadd.f32 %v1778_v39, %v1383_v37  ;;  %v1408_v2 = vsel %vm90_vm0, %v1396_v1, 0.0 }
0x111b   :  { %v1402_v54 = vsel %vm90_vm0, %v1394_v62, 0.0 }
0x111c   :  { %1406 = vadd.xlane.f32.xlu0 %v1405_v0  ;;  %1403 = vadd.xlane.f32.xlu1 %v1402_v54  ;;  %v1581_v54 = vld [vmem:[%s2773_s22 + $0x20] sm:$0xff] }
0x1120   :  { %1409 = vadd.xlane.f32.xlu0 %v1408_v2 }
0x11a1   :  { %v1401_v4 = vpop.xlane.xlu0 %1400 }
0x11a2   :  { %v1411_v5 = vmul.f32 0.03125, %v1401_v4  ;;  %v1579_v4 = vld [vmem:[%s2773_s22 + $0x10] sm:$0xff] }
0x11a4   :  { %v1415_v58 = vsub.f32 %v1393_v59, %v1411_v5  ;;  %v1580_v5 = vld [vmem:[%s2773_s22 + $0x18] sm:$0xff] }
0x11a5   :  { %v1407_v6 = vpop.xlane.xlu0 %1406  ;;  %v1404_v55 = vpop.xlane.xlu1 %1403 }
0x11a6   :  { %v1413_v7 = vmul.f32 0.03125, %v1407_v6  ;;  %v1412_v8 = vmul.f32 0.03125, %v1404_v55  ;;  %v1419_v12 = vmul.f32 %v1415_v58, %v1415_v58  ;;  %v1577_v6 = vld [vmem:[%s2773_s22] sm:$0xff]  ;;  %v1578_v55 = vld [vmem:[%s2773_s22 + $0x8] sm:$0xff] }
0x11a8   :  { %v1417_v11 = vsub.f32 %v1395_v19, %v1413_v7  ;;  %v1416_v10 = vsub.f32 %v1394_v62, %v1412_v8  ;;  %v1423_v13 = vsel %vm90_vm0, %v1419_v12, 0.0  ;;  %v1583_v19 = vld [vmem:[%s2773_s22 + $0x30] sm:$0xff]  ;;  %v1584_v62 = vld [vmem:[%s2773_s22 + $0x38] sm:$0xff]  ;;  %v1587_v7 = vpack.c.bf16 %v1578_v55, %v1577_v6  ;;  %v1781_v8 = vld [vmem:[%s2774_s21] ss:$0 sm:$0xff] }
0x11a9   :  { %1424 = vadd.xlane.f32.xlu0 %v1423_v13  ;;  %v1410_v14 = vpop.xlane.xlu0 %1409  ;;  %v1590_v0 = vpack.c.bf16 %v1584_v62, %v1583_v19 }
0x11aa   :  { %v1414_v15 = vmul.f32 0.03125, %v1410_v14  ;;  %v1421_v9 = vmul.f32 %v1417_v11, %v1417_v11  ;;  %v1420_v16 = vmul.f32 %v1416_v10, %v1416_v10 }
0x11ab   :  { %1963 = vmatprep.subr.bf16.mxu0 %v1590_v0 }
0x11ac   :  { %v1418_v3 = vsub.f32 %v1396_v1, %v1414_v15  ;;  %v1429_v17 = vsel %vm90_vm0, %v1421_v9, 0.0  ;;  %v1426_v18 = vsel %vm90_vm0, %v1420_v16, 0.0  ;;  %1964 = vmatpush3.bf16.msra.mxu0 %v1590_v0  ;;  %v1582_v1 = vld [vmem:[%s2773_s22 + $0x28] sm:$0xff] }
0x11ad   :  { %1430 = vadd.xlane.f32.xlu0 %v1429_v17  ;;  %1427 = vadd.xlane.f32.xlu1 %v1426_v18  ;;  %v1589_v2 = vpack.c.bf16 %v1582_v1, %v1581_v54  ;;  %v1786_v1 = vld [vmem:[%s2775_s23] ss:$0 sm:$0xff] }
0x11ae   :  { %v1422_v20 = vmul.f32 %v1418_v3, %v1418_v3 }
0x11af   :  { %1965 = vmatprep.subr.bf16.mxu0 %v1589_v2 }
0x11b0   :  { %v1432_v21 = vsel %vm90_vm0, %v1422_v20, 0.0  ;;  %1966 = vmatpush3.bf16.msra.mxu0 %v1589_v2 }
0x11b1   :  { %1433 = vadd.xlane.f32.xlu1 %v1432_v21 }
0x1232   :  { %v1425_v42 = vpop.xlane.xlu0 %1424 }
0x1233   :  { %v1435_v43 = vmul.f32 0.03125, %v1425_v42 }
0x1235   :  { %v1439_v44 = vadd.f32 1e-12, %v1435_v43 }
0x1236   :  { %v1431_v45 = vpop.xlane.xlu0 %1430  ;;  %v1428_v46 = vpop.xlane.xlu1 %1427 }
0x1237   :  { %2091 = vrsqrt.f32 %v1439_v44  ;;  %v1437_v47 = vmul.f32 0.03125, %v1431_v45  ;;  %v1436_v48 = vmul.f32 0.03125, %v1428_v46 }
0x1239   :  { %v1441_v27 = vadd.f32 1e-12, %v1437_v47  ;;  %v1440_v31 = vadd.f32 1e-12, %v1436_v48 }
0x123a   :  { %v1434_v24 = vpop.xlane.xlu1 %1433 }
0x123b   :  { %2093 = vrsqrt.f32 %v1441_v27  ;;  %v1438_v49 = vmul.f32 0.03125, %v1434_v24 }
0x123c   :  { %2095 = vrsqrt.f32 %v1440_v31 }
0x123d   :  { %v1442_v50 = vadd.f32 1e-12, %v1438_v49 }
0x123f   :  { %2097 = vrsqrt.f32 %v1442_v50 }
0x1244   :  { %v2092_v26 = vpop.eup %2091 }
0x1245   :  { %v1447_v51 = vmul.f32 %v2092_v26, %v1415_v58  ;;  %v1588_v58 = vpack.c.bf16 %v1580_v5, %v1579_v4 }
0x1247   :  { %v1457_v22 = vmul.f32 %v1779_v25, %v1447_v51  ;;  %1967 = vmatprep.subr.bf16.mxu0 %v1588_v58 }
0x1248   :  { %v2094_v32 = vpop.eup %2093  ;;  %1968 = vmatpush3.bf16.msra.mxu0 %v1588_v58 }
0x1249   :  { %v2096_v23 = vpop.eup %2095  ;;  %v1449_v52 = vmul.f32 %v2094_v32, %v1417_v11  ;;  %v2674_v56 = vadd.f32 %v1780_v63, %v1457_v22  ;;  %1969 = vmatprep.subr.bf16.mxu0 %v1587_v7 }
0x124a   :  { %v1448_v53 = vmul.f32 %v2096_v23, %v1416_v10 }
0x124b   :  { %v1459_v38 = vmul.f32 %v1779_v25, %v1449_v52 }
0x124c   :  { %v2098_v36 = vpop.eup %2097  ;;  %v1458_v41 = vmul.f32 %v1779_v25, %v1448_v53  ;;  %1970 = vmatpush3.bf16.msra.mxu0 %v1587_v7 }
0x124d   :  { %v1450_v57 = vmul.f32 %v2098_v36, %v1418_v3  ;;  %v2680_v40 = vadd.f32 %v1780_v63, %v1459_v38 }
0x124e   :  { %v2676_v39 = vadd.f32 %v1780_v63, %v1458_v41 }
0x124f   :  { %v1460_v59 = vmul.f32 %v1779_v25, %v1450_v57 }
0x1250   :  { %v1475_v60 = vpack.c.bf16 %v2676_v39, %v2674_v56 }
0x1251   :  { %v2682_v37 = vadd.f32 %v1780_v63, %v1460_v59 }
0x1252   :  { %1959 = vmatprep.mubr.msk.bf16.mxu1 %vm90_vm0, %v1475_v60 }
0x1253   :  { %v1476_v61 = vpack.c.bf16 %v2682_v37, %v2680_v40 }
0x1255   :  { %1960 = vmatmul.mubr.msk.bf16.vlgmr.msra.gmra.mxu1 %vm90_vm0, %v1476_v61 }
0x1315   :  { %v1961_v12 = vpop.f32.mrf.mxu1 }
0x1316   :  { %v1535_v11 = vadd.f32 %v1961_v12, %v1781_v8 }
0x1317   :  { %v1526_v10 = vpop.f32.mrf.mxu1 }
0x1318   :  { %v1543_v13 = vmul.f32 %v1535_v11, %v1535_v11  ;;  %v1527_v14 = vadd.f32 %v1781_v8, %v1526_v10 }
0x1319   :  { %v1962_v15 = vpop.f32.mrf.mxu1 }
0x131a   :  { %v1547_v9 = vmul.f32 %v1543_v13, %v1535_v11  ;;  %v1541_v16 = vmul.f32 %v1527_v14, %v1527_v14  ;;  %v1538_v3 = vadd.f32 %v1962_v15, %v1781_v8 }
0x131b   :  { %v1529_v17 = vpop.f32.mrf.mxu1 }
0x131c   :  { %v1551_v18 = vmul.f32 0.044715, %v1547_v9  ;;  %v1545_v20 = vmul.f32 %v1541_v16, %v1527_v14  ;;  %v1544_v21 = vmul.f32 %v1538_v3, %v1538_v3  ;;  %v1530_v28 = vadd.f32 %v1781_v8, %v1529_v17 }
0x131e   :  { %v1555_v29 = vadd.f32 %v1551_v18, %v1535_v11  ;;  %v1549_v30 = vmul.f32 0.044715, %v1545_v20  ;;  %v1548_v33 = vmul.f32 %v1544_v21, %v1538_v3  ;;  %v1542_v34 = vmul.f32 %v1530_v28, %v1530_v28 }
0x1320   :  { %v1559_v35 = vmul.f32 0.7978846, %v1555_v29  ;;  %v1553_v42 = vadd.f32 %v1549_v30, %v1527_v14  ;;  %v1552_v43 = vmul.f32 0.044715, %v1548_v33  ;;  %v1546_v44 = vmul.f32 %v1542_v34, %v1530_v28 }
0x1322   :  { %v1557_v45 = vmul.f32 0.7978846, %v1553_v42  ;;  %v1556_v46 = vadd.f32 %v1552_v43, %v1538_v3  ;;  %v1550_v47 = vmul.f32 0.044715, %v1546_v44  ;;  %2099 = vtanh.f32 %v1559_v35 }
0x1324   :  { %2101 = vtanh.f32 %v1557_v45  ;;  %v1560_v48 = vmul.f32 0.7978846, %v1556_v46  ;;  %v1554_v27 = vadd.f32 %v1550_v47, %v1530_v28 }
0x1326   :  { %2103 = vtanh.f32 %v1560_v48  ;;  %v1558_v31 = vmul.f32 0.7978846, %v1554_v27 }
0x1328   :  { %2105 = vtanh.f32 %v1558_v31 }
0x132f   :  { %v2100_v24 = vpop.eup %2099 }
0x1330   :  { %v1567_v51 = vadd.f32 1.0, %v2100_v24 }
0x1331   :  { %v2102_v49 = vpop.eup %2101 }
0x1332   :  { %v1565_v50 = vadd.f32 1.0, %v2102_v49  ;;  %v1571_v22 = vmul.f32 0.5, %v1567_v51  ;;  %v1787_v51 = vld [vmem:[%s2776_s24] ss:$0 sm:$0xff] }
0x1333   :  { %v2104_v26 = vpop.eup %2103 }
0x1334   :  { %v1568_v25 = vadd.f32 1.0, %v2104_v26  ;;  %v1569_v23 = vmul.f32 0.5, %v1565_v50  ;;  %v1575_v38 = vmul.f32 %v1571_v22, %v1535_v11 }
0x1335   :  { %v2106_v32 = vpop.eup %2105 }
0x1336   :  { %v1572_v52 = vmul.f32 0.5, %v1568_v25  ;;  %v1566_v53 = vadd.f32 1.0, %v2106_v32  ;;  %v1573_v41 = vmul.f32 %v1569_v23, %v1527_v14  ;;  %v1788_v32 = vld [vmem:[%s2777_s25] ss:$0 sm:$0xff] }
0x1338   :  { %v1570_v63 = vmul.f32 0.5, %v1566_v53  ;;  %v1576_v36 = vmul.f32 %v1572_v52, %v1538_v3 }
0x133a   :  { %v1574_v57 = vmul.f32 %v1570_v63, %v1530_v28  ;;  %v1586_v60 = vpack.c.bf16 %v1576_v36, %v1575_v38 }
0x133c   :  { %v1585_v59 = vpack.c.bf16 %v1574_v57, %v1573_v41 }
0x133e   :  { %1971 = vmatprep.mubr.msk.bf16.mxu0 %vm1591_vm4, %v1585_v59 }
0x133f   :  { %1972 = vmatmul.mubr.msk.bf16.vlgmr.msra.gmra.mxu0 %vm1591_vm4, %v1586_v60 }
0x13ff   :  { %v1973_v61 = vpop.f32.mrf.mxu0 }
0x1400   :  { %v1649_v62 = vadd.f32 %v1973_v61, %v2680_v40 }
0x1401   :  { %v1632_v19 = vpop.f32.mrf.mxu0 }
0x1402   :  { %v1647_v0 = vadd.f32 %v1632_v19, %v2674_v56  ;;  %v1660_v55 = vadd.f32 %v1786_v1, %v1649_v62 }
0x1403   :  { %v1974_v54 = vpop.f32.mrf.mxu0 }
0x1404   :  { %v1658_v2 = vadd.f32 %v1786_v1, %v1647_v0  ;;  %v1650_v5 = vadd.f32 %v1974_v54, %v2682_v37  ;;  %v1670_v40 = vsel %vm90_vm0, %v1660_v55, 0.0 }
0x1405   :  { %v1635_v4 = vpop.f32.mrf.mxu0 }
0x1406   :  { %v1648_v58 = vadd.f32 %v1635_v4, %v2676_v39  ;;  %v1664_v6 = vsel %vm90_vm0, %v1658_v2, 0.0  ;;  %v1661_v8 = vadd.f32 %v1786_v1, %v1650_v5 }
0x1407   :  { %1665 = vadd.xlane.f32.xlu0 %v1664_v6 }
0x1408   :  { %v1659_v7 = vadd.f32 %v1786_v1, %v1648_v58  ;;  %v1673_v12 = vsel %vm90_vm0, %v1661_v8, 0.0 }
0x140a   :  { %v1667_v56 = vsel %vm90_vm0, %v1659_v7, 0.0 }
0x140b   :  { %1671 = vadd.xlane.f32.xlu0 %v1670_v40  ;;  %1668 = vadd.xlane.f32.xlu1 %v1667_v56 }
0x140f   :  { %1674 = vadd.xlane.f32.xlu1 %v1673_v12 }
0x1490   :  { %v1666_v11 = vpop.xlane.xlu0 %1665 }
0x1491   :  { %v1676_v10 = vmul.f32 0.03125, %v1666_v11 }
0x1493   :  { %v1680_v37 = vsub.f32 %v1658_v2, %v1676_v10 }
0x1494   :  { %v1672_v13 = vpop.xlane.xlu0 %1671  ;;  %v1669_v39 = vpop.xlane.xlu1 %1668 }
0x1495   :  { %v1678_v14 = vmul.f32 0.03125, %v1672_v13  ;;  %v1677_v15 = vmul.f32 0.03125, %v1669_v39  ;;  %v1684_v9 = vmul.f32 %v1680_v37, %v1680_v37 }
0x1497   :  { %v1682_v16 = vsub.f32 %v1660_v55, %v1678_v14  ;;  %v1681_v3 = vsub.f32 %v1659_v7, %v1677_v15  ;;  %v1688_v17 = vsel %vm90_vm0, %v1684_v9, 0.0 }
0x1498   :  { %1689 = vadd.xlane.f32.xlu0 %v1688_v17  ;;  %v1675_v18 = vpop.xlane.xlu1 %1674 }
0x1499   :  { %v1679_v20 = vmul.f32 0.03125, %v1675_v18  ;;  %v1686_v21 = vmul.f32 %v1682_v16, %v1682_v16  ;;  %v1685_v28 = vmul.f32 %v1681_v3, %v1681_v3 }
0x149b   :  { %v1683_v29 = vsub.f32 %v1661_v8, %v1679_v20  ;;  %v1694_v30 = vsel %vm90_vm0, %v1686_v21, 0.0  ;;  %v1691_v33 = vsel %vm90_vm0, %v1685_v28, 0.0 }
0x149c   :  { %1695 = vadd.xlane.f32.xlu0 %v1694_v30  ;;  %1692 = vadd.xlane.f32.xlu1 %v1691_v33 }
0x149d   :  { %v1687_v34 = vmul.f32 %v1683_v29, %v1683_v29 }
0x149f   :  { %v1697_v35 = vsel %vm90_vm0, %v1687_v34, 0.0 }
0x14a0   :  { %1698 = vadd.xlane.f32.xlu1 %v1697_v35 }
0x1521   :  { %v1690_v42 = vpop.xlane.xlu0 %1689 }
0x1522   :  { %v1700_v43 = vmul.f32 0.03125, %v1690_v42 }
0x1524   :  { %v1704_v44 = vadd.f32 1e-12, %v1700_v43 }
0x1525   :  { %v1696_v45 = vpop.xlane.xlu0 %1695  ;;  %v1693_v46 = vpop.xlane.xlu1 %1692 }
0x1526   :  { %2107 = vrsqrt.f32 %v1704_v44  ;;  %v1702_v47 = vmul.f32 0.03125, %v1696_v45  ;;  %v1701_v48 = vmul.f32 0.03125, %v1693_v46 }
0x1528   :  { %v1706_v27 = vadd.f32 1e-12, %v1702_v47  ;;  %v1705_v31 = vadd.f32 1e-12, %v1701_v48 }
0x1529   :  { %v1699_v24 = vpop.xlane.xlu1 %1698 }
0x152a   :  { %2109 = vrsqrt.f32 %v1706_v27  ;;  %v1703_v49 = vmul.f32 0.03125, %v1699_v24 }
0x152b   :  { %2111 = vrsqrt.f32 %v1705_v31 }
0x152c   :  { %v1707_v50 = vadd.f32 1e-12, %v1703_v49 }
0x152e   :  { %2113 = vrsqrt.f32 %v1707_v50 }
0x1533   :  { %v2108_v26 = vpop.eup %2107 }
0x1534   :  { %v1712_v25 = vmul.f32 %v2108_v26, %v1680_v37 }
0x1536   :  { %v1722_v23 = vmul.f32 %v1787_v51, %v1712_v25 }
0x1537   :  { %v2110_v52 = vpop.eup %2109 }
0x1538   :  { %v2112_v53 = vpop.eup %2111  ;;  %v1732_v22 = vadd.f32 %v1788_v32, %v1722_v23  ;;  %v1714_v63 = vmul.f32 %v2110_v52, %v1682_v16 }
0x1539   :  { %v1713_v36 = vmul.f32 %v2112_v53, %v1681_v3 }
0x153a   :  { %1736 = vst.msk [vmem:[%s2778_s26] sm:$0xff] %vm90_vm0, %v1732_v22  ;;  %v1724_v41 = vmul.f32 %v1787_v51, %v1714_v63 }
0x153b   :  { %v2114_v57 = vpop.eup %2113  ;;  %v1723_v38 = vmul.f32 %v1787_v51, %v1713_v36 }
0x153c   :  { %v1734_v59 = vadd.f32 %v1788_v32, %v1724_v41  ;;  %v1715_v60 = vmul.f32 %v2114_v57, %v1683_v29 }
0x153d   :  { %v1733_v61 = vadd.f32 %v1788_v32, %v1723_v38 }
0x153e   :  { %1738 = vst.msk [vmem:[%s2778_s26 + $0x10] sm:$0xff] %vm90_vm0, %v1734_v59  ;;  %v1725_v19 = vmul.f32 %v1787_v51, %v1715_v60 }
0x153f   :  { %1737 = vst.msk [vmem:[%s2778_s26 + $0x8] sm:$0xff] %vm90_vm0, %v1733_v61 }
0x1540   :  { %v1735_v62 = vadd.f32 %v1788_v32, %v1725_v19 }
0x1542   :  { %1739 = vst.msk [vmem:[%s2778_s26 + $0x18] sm:$0xff] %vm90_vm0, %v1735_v62 }

// kernel: blip_forward.31
= control target key start
LH: loop header
LB: loop body
LE: loop exit
PB: predicated region body
PF: predicated region fallthrough
CT: control target
= control target key end

     0   :  { %vm88_vm0 = vcmask 261120   ;;  %v1493_v14 = vmov 0.0   ;;  %vm1494_vm1 = vmmov 0   ;;  %s1496_s30 = smov 96   ;;  %vm196_vm2 = vcmask 130048   ;;  %s1500_s27 = smov 16   ;;  %s1956_s0 = inlined_call_operand.vmem [shape: f32[16,32], index: 0, kind: input, shape index: {}]   ;;  %s1957_s6 = inlined_call_operand.vmem [shape: f32[32,96], index: 6, kind: input, shape index: {}]   ;;  %s1958_s4 = inlined_call_operand.vmem [shape: f32[1,32], index: 4, kind: input, shape index: {}]   ;;  %s1959_s5 = inlined_call_operand.vmem [shape: f32[1,32], index: 5, kind: input, shape index: {}]   ;;  %s1960_s7 = inlined_call_operand.vmem [shape: f32[1,96], index: 7, kind: input, shape index: {}]   ;;  %s1961_s1 = inlined_call_operand.vmem [shape: f32[16,16], index: 1, kind: input, shape index: {}]   ;;  %s1962_s8 = inlined_call_operand.vmem [shape: f32[32,32], index: 8, kind: input, shape index: {}]   ;;  %s1963_s9 = inlined_call_operand.vmem [shape: f32[1,32], index: 9, kind: input, shape index: {}]   ;;  %s1964_s14 = inlined_call_operand.vmem [shape: f32[32,64], index: 14, kind: input, shape index: {}]   ;;  %s1965_s2 = inlined_call_operand.vmem [shape: f32[10,32], index: 2, kind: input, shape index: {}]   ;;  %s1966_s12 = inlined_call_operand.vmem [shape: f32[32,32], index: 12, kind: input, shape index: {}]   ;;  %s1967_s10 = inlined_call_operand.vmem [shape: f32[1,32], index: 10, kind: input, shape index: {}]   ;;  %s1968_s11 = inlined_call_operand.vmem [shape: f32[1,32], index: 11, kind: input, shape index: {}]   ;;  %s1969_s15 = inlined_call_operand.vmem [shape: f32[1,64], index: 15, kind: input, shape index: {}]   ;;  %s1970_s13 = inlined_call_operand.vmem [shape: f32[1,32], index: 13, kind: input, shape index: {}]   ;;  %s1971_s3 = inlined_call_operand.vmem [shape: f32[16,10], index: 3, kind: input, shape index: {}]   ;;  %s1972_s16 = inlined_call_operand.vmem [shape: f32[32,32], index: 16, kind: input, shape index: {}]   ;;  %s1973_s17 = inlined_call_operand.vmem [shape: f32[1,32], index: 17, kind: input, shape index: {}]   ;;  %s1974_s20 = inlined_call_operand.vmem [shape: f32[32,64], index: 20, kind: input, shape index: {}]   ;;  %s1975_s18 = inlined_call_operand.vmem [shape: f32[1,32], index: 18, kind: input, shape index: {}]   ;;  %s1976_s19 = inlined_call_operand.vmem [shape: f32[1,32], index: 19, kind: input, shape index: {}]   ;;  %s1977_s22 = inlined_call_operand.vmem [shape: f32[64,32], index: 22, kind: input, shape index: {}]   ;;  %s1978_s21 = inlined_call_operand.vmem [shape: f32[1,64], index: 21, kind: input, shape index: {}]   ;;  %s1979_s23 = inlined_call_operand.vmem [shape: f32[1,32], index: 23, kind: input, shape index: {}]   ;;  %s1980_s24 = inlined_call_operand.vmem [shape: f32[1,32], index: 24, kind: input, shape index: {}]   ;;  %s1981_s25 = inlined_call_operand.vmem [shape: f32[1,32], index: 25, kind: input, shape index: {}]   ;;  %s1982_s26 = inlined_call_operand.vmem [shape: f32[16,32], index: 26, kind: output, shape index: {}]  }
   0x1   :  { %1990 = sst [smem:[#allocation2_spill]] %s1956_s0  ;;  %1315 = vmatprep.subr.bf16.mxu1 %v1493_v14  ;;  %1319 = vmatprep.mubr.msk.bf16.mxu1 %vm1494_vm1, %v1493_v14  ;;  %vm732_vm3 = vcmask 80896   ;;  %vm762_vm4 = vcmask 1044480   ;;  %vm1140_vm5 = vcmask 523264  }
   0x2   :  { %1991 = sst [smem:[#allocation3_spill]] %s1957_s6  ;;  %1329 = vmatprep.subr.bf16.mxu0 %v1493_v14  ;;  %1331 = vmatprep.mubr.msk.bf16.mxu0 %vm1494_vm1, %v1493_v14 }
   0x3   :  { %1992 = sst [smem:[#allocation4_spill]] %s1958_s4 }
   0x4   :  { %1993 = sst [smem:[#allocation5_spill]] %s1959_s5 }
   0x5   :  { %1994 = sst [smem:[#allocation6_spill]] %s1960_s7 }
   0x6   :  { %1995 = sst [smem:[#allocation7_spill]] %s1961_s1  ;;  %s1497_s1 = smov 112  }
   0x7   :  { %1996 = sst [smem:[#allocation8_spill]] %s1962_s8 }
   0x8   :  { %1997 = sst [smem:[#allocation9_spill]] %s1963_s9 }
   0x9   :  { %1998 = sst [smem:[#allocation10_spill]] %s1964_s14 }
   0xa   :  { %1999 = sst [smem:[#allocation11_spill]] %s1965_s2  ;;  %s1495_s2 = smov 80  }
   0xb   :  { %2000 = sst [smem:[#allocation12_spill]] %s1966_s12 }
   0xc   :  { %s2001_s9 = sld [smem:[#allocation2_spill]] }
   0xd   :  { %s2002_s0 = sld [smem:[#allocation3_spill]] }
   0xe   :  { %s2003_s6 = sld [smem:[#allocation4_spill]] }
   0xf   :  { %s2004_s14 = sld [smem:[#allocation5_spill]] }
  0x10   :  { %s2006_s8 = sld [smem:[#allocation7_spill]] }
  0x11   :  { %s2007_s7 = sld [smem:[#allocation8_spill]] }
  0x12   :  { %v84_v0 = vld [vmem:[%s2001_s9] sm:$0xff]  ;;  %v85_v1 = vld [vmem:[%s2001_s9 + $0x8] sm:$0xff]  ;;  %s1499_s9 = smov 48   ;;  %s2008_s28 = sld [smem:[#allocation9_spill]] }
  0x13   :  { %v89_v2 = vsel %vm88_vm0, %v84_v0, 0.0  ;;  %v92_v3 = vsel %vm88_vm0, %v85_v1, 0.0  ;;  %v134_v15 = vld [vmem:[%s2002_s0 + $0x10] sm:$0xff]  ;;  %v135_v16 = vld [vmem:[%s2002_s0 + $0x18] sm:$0xff]  ;;  %v132_v17 = vld [vmem:[%s2002_s0] sm:$0xff]  ;;  %s2009_s29 = sld [smem:[#allocation10_spill]] }
  0x14   :  { %90 = vadd.xlane.f32.xlu0 %v89_v2  ;;  %v138_v18 = vpack.c.bf16 %v135_v16, %v134_v15  ;;  %v133_v19 = vld [vmem:[%s2002_s0 + $0x8] sm:$0xff]  ;;  %v1246_v29 = vld [vmem:[%s2003_s6] ss:$0 sm:$0xff]  ;;  %s2005_s0 = sld [smem:[#allocation6_spill]]  ;;  %s1498_s6 = smov 64  }
  0x15   :  { %v137_v20 = vpack.c.bf16 %v133_v19, %v132_v17  ;;  %v1247_v33 = vld [vmem:[%s2004_s14] ss:$0 sm:$0xff]  ;;  %s2010_s14 = sld [smem:[#allocation11_spill]] }
  0x16   :  { %1316 = vmatpush3.bf16.msra.mxu1 %v138_v18  ;;  %v190_v52 = vld [vmem:[%s2006_s8] sm:$0xff]  ;;  %v191_v57 = vld [vmem:[%s2006_s8 + $0x8] sm:$0xff]  ;;  %s2011_s12 = sld [smem:[#allocation12_spill]] }
  0x17   :  { %1317 = vmatprep.subr.bf16.mxu1 %v1493_v14 }
  0x18   :  { %93 = vadd.xlane.f32.xlu0 %v92_v3 }
  0x1a   :  { %1318 = vmatpush3.bf16.msra.mxu1 %v137_v20  ;;  %v1248_v39 = vld [vmem:[%s2005_s0] ss:$0 sm:$0xff] }
  0x1b   :  { %1323 = vmatprep.subr.bf16.mxu1 %v1493_v14 }
  0x9d   :  { %v91_v4 = vpop.xlane.xlu0 %90 }
  0x9e   :  { %v96_v5 = vmul.f32 0.03125, %v91_v4 }
  0xa0   :  { %v98_v6 = vsub.f32 %v84_v0, %v96_v5 }
  0xa1   :  { %v94_v7 = vpop.xlane.xlu0 %93 }
  0xa2   :  { %v97_v8 = vmul.f32 0.03125, %v94_v7  ;;  %v100_v9 = vmul.f32 %v98_v6, %v98_v6 }
  0xa4   :  { %v99_v10 = vsub.f32 %v85_v1, %v97_v8  ;;  %v102_v11 = vsel %vm88_vm0, %v100_v9, 0.0 }
  0xa5   :  { %103 = vadd.xlane.f32.xlu1 %v102_v11 }
  0xa6   :  { %v101_v12 = vmul.f32 %v99_v10, %v99_v10 }
  0xa8   :  { %v105_v13 = vsel %vm88_vm0, %v101_v12, 0.0 }
  0xa9   :  { %106 = vadd.xlane.f32.xlu1 %v105_v13 }
 0x12e   :  { %v104_v21 = vpop.xlane.xlu1 %103 }
 0x12f   :  { %v108_v22 = vmul.f32 0.03125, %v104_v21 }
 0x131   :  { %v110_v23 = vadd.f32 1e-12, %v108_v22 }
 0x132   :  { %v107_v24 = vpop.xlane.xlu1 %106 }
 0x133   :  { %1441 = vrsqrt.f32 %v110_v23  ;;  %v109_v25 = vmul.f32 0.03125, %v107_v24 }
 0x135   :  { %v111_v26 = vadd.f32 1e-12, %v109_v25 }
 0x137   :  { %1443 = vrsqrt.f32 %v111_v26 }
 0x140   :  { %v1442_v27 = vpop.eup %1441 }
 0x141   :  { %v114_v28 = vmul.f32 %v1442_v27, %v98_v6 }
 0x143   :  { %v122_v32 = vmul.f32 %v1246_v29, %v114_v28 }
 0x144   :  { %v1444_v30 = vpop.eup %1443 }
 0x145   :  { %v115_v31 = vmul.f32 %v1444_v30, %v99_v10  ;;  %v1672_v35 = vadd.f32 %v1247_v33, %v122_v32 }
 0x147   :  { %v123_v34 = vmul.f32 %v1246_v29, %v115_v31 }
 0x149   :  { %v1674_v36 = vadd.f32 %v1247_v33, %v123_v34 }
 0x14b   :  { %v136_v37 = vpack.c.bf16 %v1674_v36, %v1672_v35 }
 0x14d   :  { %1320 = vmatmul.mubr.msk.bf16.vlgmr.msra.gmra.mxu1 %vm88_vm0, %v136_v37 }
 0x14e   :  { %1325 = vmatprep.mubr.msk.bf16.mxu1 %vm1494_vm1, %v1493_v14 }
 0x20d   :  { %v183_v38 = vpop.f32.mrf.mxu1 }
 0x20e   :  { %v184_v42 = vadd.f32 %v1248_v39, %v183_v38 }
 0x20f   :  { %v1321_v40 = vpop.f32.mrf.mxu1 }
 0x211   :  { %v186_v41 = vpop.f32.mrf.mxu1 }
 0x212   :  { %v187_v43 = vadd.f32 %v1248_v39, %v186_v41 }
 0x213   :  { %v1322_v44 = vpop.f32.mrf.mxu1 }
 0x214   :  { %v1684_v45 = vpack.c.bf16 %v187_v43, %v184_v42 }
 0x216   :  { %320 = vrot.lane.b32.xlu1 %v1684_v45, %s1495_s2  ;;  %194 = vrot.lane.b32.xlu0 %v1684_v45, %s1496_s30 }
 0x21a   :  { %318 = vrot.lane.b32.xlu1 %v1684_v45, %s1497_s1 }
 0x288   :  { %v195_v46 = vpop.permute.xlu0 %194  ;;  %v321_v48 = vpop.permute.xlu1 %320 }
 0x289   :  { %v201_v47 = vsel %vm196_vm2, %v195_v46, 0  ;;  %v326_v49 = vsel %vm196_vm2, %v321_v48, 0  ;;  %v455_v48 = vld [vmem:[%s2007_s7 + $0x10] sm:$0xff] }
 0x28a   :  { %1324 = vmatpush3.bf16.xpose.msra.mxu1 %v201_v47 }
 0x28b   :  { %1335 = vmatprep.subr.bf16.mxu1 %v1493_v14 }
 0x28c   :  { %v319_v50 = vpop.permute.xlu1 %318 }
 0x291   :  { %1326 = vmatmul.mubr.msk.bf16.vlgmr.msra.gmra.mxu1 %vm196_vm2, %v1684_v45 }
 0x292   :  { %1336 = vmatpush3.bf16.xpose.msra.mxu1 %v326_v49  ;;  %1337 = vmatprep.mubr.msk.bf16.mxu1 %vm1494_vm1, %v1493_v14  ;;  %v456_v49 = vld [vmem:[%s2007_s7 + $0x18] sm:$0xff] }
 0x293   :  { %1347 = vmatprep.subr.bf16.mxu1 %v1493_v14 }
 0x299   :  { %1338 = vmatmul.mubr.msk.bf16.vlgmr.msra.gmra.mxu1 %vm196_vm2, %v319_v50  ;;  %v459_v50 = vpack.c.bf16 %v456_v49, %v455_v48 }
 0x29a   :  { %1351 = vmatprep.mubr.msk.bf16.mxu1 %vm1494_vm1, %v1493_v14 }
 0x29b   :  { %1348 = vmatpush3.bf16.msra.mxu1 %v459_v50  ;;  %v1256_v50 = vld [vmem:[%s1967_s10] ss:$0 sm:$0xff] }
 0x29c   :  { %1349 = vmatprep.subr.bf16.mxu1 %v1493_v14 }
 0x351   :  { %v237_v51 = vpop.f32.mrf.mxu1 }
 0x352   :  { %v244_v53 = vmul.f32 0.25, %v237_v51 }
 0x353   :  { %v1327_v54 = vpop.f32.mrf.mxu1 }
 0x354   :  { %v246_v55 = vadd.f32 %v244_v53, %v190_v52  ;;  %v453_v53 = vld [vmem:[%s2007_s7] sm:$0xff]  ;;  %v454_v54 = vld [vmem:[%s2007_s7 + $0x8] sm:$0xff] }
 0x355   :  { %v240_v56 = vpop.f32.mrf.mxu1 }
 0x356   :  { %v245_v58 = vmul.f32 0.25, %v240_v56  ;;  %v248_v59 = vsel %vm196_vm2, %v246_v55, -inf }
 0x357   :  { %249 = vmax.xlane.f32.xlu1 %v248_v59  ;;  %v1328_v60 = vpop.f32.mrf.mxu1 }
 0x358   :  { %v247_v61 = vadd.f32 %v245_v58, %v191_v57 }
 0x359   :  { %v362_v62 = vpop.f32.mrf.mxu1 }
 0x35a   :  { %v369_v63 = vmul.f32 0.25, %v362_v62  ;;  %v251_v0 = vsel %vm196_vm2, %v247_v61, -inf }
 0x35b   :  { %252 = vmax.xlane.f32.xlu0 %v251_v0  ;;  %v1339_v1 = vpop.f32.mrf.mxu1 }
 0x35c   :  { %v371_v2 = vadd.f32 %v369_v63, %v190_v52 }
 0x35d   :  { %v365_v3 = vpop.f32.mrf.mxu1 }
 0x35e   :  { %v370_v4 = vmul.f32 0.25, %v365_v3  ;;  %v373_v5 = vsel %vm196_vm2, %v371_v2, -inf }
 0x35f   :  { %374 = vmax.xlane.f32.xlu0 %v373_v5  ;;  %v1340_v6 = vpop.f32.mrf.mxu1 }
 0x360   :  { %v372_v7 = vadd.f32 %v370_v4, %v191_v57  ;;  %v1255_v6 = vld [vmem:[%s2008_s28] ss:$0 sm:$0xff] }
 0x362   :  { %v376_v8 = vsel %vm196_vm2, %v372_v7, -inf }
 0x363   :  { %377 = vmax.xlane.f32.xlu0 %v376_v8 }
 0x3e0   :  { %v250_v9 = vpop.xlane.xlu1 %249 }
 0x3e1   :  { %v254_v10 = vsub.f32 %v246_v55, %v250_v9  ;;  %v458_v55 = vpack.c.bf16 %v454_v54, %v453_v53  ;;  %v1257_v54 = vld [vmem:[%s1968_s11] ss:$0 sm:$0xff] }
 0x3e3   :  { %v256_v11 = vmul.f32 1.442695, %v254_v10  ;;  %1350 = vmatpush3.bf16.msra.mxu1 %v458_v55 }
 0x3e4   :  { %v253_v12 = vpop.xlane.xlu0 %252  ;;  %1363 = vmatprep.subr.bf16.mxu1 %v1493_v14 }
 0x3e5   :  { %1445 = vpow2.f32 %v256_v11  ;;  %v255_v13 = vsub.f32 %v247_v61, %v253_v12 }
 0x3e7   :  { %v258_v15 = vmul.f32 1.442695, %v255_v13 }
 0x3e8   :  { %v375_v16 = vpop.xlane.xlu0 %374 }
 0x3e9   :  { %1447 = vpow2.f32 %v258_v15  ;;  %v379_v17 = vsub.f32 %v371_v2, %v375_v16 }
 0x3eb   :  { %v381_v18 = vmul.f32 1.442695, %v379_v17 }
 0x3ec   :  { %v378_v19 = vpop.xlane.xlu0 %377 }
 0x3ed   :  { %1449 = vpow2.f32 %v381_v18  ;;  %v380_v20 = vsub.f32 %v372_v7, %v378_v19 }
 0x3ef   :  { %v383_v21 = vmul.f32 1.442695, %v380_v20 }
 0x3f1   :  { %1451 = vpow2.f32 %v383_v21 }
 0x3f2   :  { %v1446_v22 = vpop.eup %1445 }
 0x3f3   :  { %v260_v23 = vsel %vm196_vm2, %v1446_v22, 0.0 }
 0x3f4   :  { %261 = vadd.xlane.f32.xlu1 %v260_v23 }
 0x3f6   :  { %v1448_v24 = vpop.eup %1447 }
 0x3f7   :  { %v263_v25 = vsel %vm196_vm2, %v1448_v24, 0.0 }
 0x3f8   :  { %264 = vadd.xlane.f32.xlu0 %v263_v25  ;;  %v621_v25 = vld [vmem:[%s2009_s29 + $0x10] sm:$0xff] }
 0x3fa   :  { %v1450_v26 = vpop.eup %1449 }
 0x3fb   :  { %v385_v27 = vsel %vm196_vm2, %v1450_v26, 0.0 }
 0x3fc   :  { %386 = vadd.xlane.f32.xlu1 %v385_v27 }
 0x3fe   :  { %v1452_v28 = vpop.eup %1451 }
 0x3ff   :  { %v388_v29 = vsel %vm196_vm2, %v1452_v28, 0.0 }
 0x400   :  { %389 = vadd.xlane.f32.xlu0 %v388_v29  ;;  %v620_v29 = vld [vmem:[%s2009_s29 + $0x8] sm:$0xff] }
 0x40d   :  { %271 = vrot.lane.b32.xlu1 %v1684_v45, %s1498_s6 }
 0x416   :  { %396 = vrot.lane.b32.xlu0 %v1684_v45, %s1499_s9 }
 0x47d   :  { %v262_v30 = vpop.xlane.xlu1 %261 }
 0x47e   :  { %1453 = vrcp.f32 %v262_v30 }
 0x481   :  { %v265_v31 = vpop.xlane.xlu0 %264 }
 0x482   :  { %1455 = vrcp.f32 %v265_v31  ;;  %v559_v31 = vld [vmem:[%s2010_s14] sm:$0xff] }
 0x485   :  { %v387_v32 = vpop.xlane.xlu1 %386 }
 0x486   :  { %1457 = vrcp.f32 %v387_v32  ;;  %v560_v32 = vld [vmem:[%s2010_s14 + $0x8] sm:$0x3] }
 0x489   :  { %v272_v33 = vpop.permute.xlu1 %271  ;;  %v390_v34 = vpop.xlane.xlu0 %389 }
 0x48a   :  { %1459 = vrcp.f32 %v390_v34  ;;  %1330 = vmatpush3.bf16.msra.mxu0 %v272_v33  ;;  %v623_v33 = vpack.c.bf16 %v560_v32, %v559_v31  ;;  %v563_v34 = vld [vmem:[%s2011_s12 + $0x10] sm:$0xff] }
 0x48b   :  { %1341 = vmatprep.subr.bf16.mxu0 %v1493_v14  ;;  %v1454_v37 = vpop.eup %1453 }
 0x48c   :  { %v268_v39 = vmul.f32 %v1454_v37, %v1446_v22  ;;  %v564_v37 = vld [vmem:[%s2011_s12 + $0x18] sm:$0xff] }
 0x48d   :  { %v397_v42 = vpop.permute.xlu0 %396 }
 0x48f   :  { %v1456_v38 = vpop.eup %1455 }
 0x490   :  { %v269_v40 = vmul.f32 %v1456_v38, %v1448_v24  ;;  %v567_v38 = vpack.c.bf16 %v564_v37, %v563_v34 }
 0x492   :  { %v270_v41 = vpack.c.bf16 %v269_v40, %v268_v39  ;;  %v561_v39 = vld [vmem:[%s2011_s12] sm:$0xff]  ;;  %v562_v40 = vld [vmem:[%s2011_s12 + $0x8] sm:$0xff] }
 0x493   :  { %v1458_v43 = vpop.eup %1457 }
 0x494   :  { %1332 = vmatmul.mubr.msk.bf16.vlgmr.msra.gmra.mxu0 %vm196_vm2, %v270_v41  ;;  %v393_v45 = vmul.f32 %v1458_v43, %v1450_v26  ;;  %v622_v26 = vld [vmem:[%s2009_s29 + $0x18] sm:$0xff]  ;;  %v566_v41 = vpack.c.bf16 %v562_v40, %v561_v39 }
 0x495   :  { %1342 = vmatpush3.bf16.msra.mxu0 %v397_v42  ;;  %1343 = vmatprep.mubr.msk.bf16.mxu0 %vm1494_vm1, %v1493_v14  ;;  %v625_v27 = vpack.c.bf16 %v622_v26, %v621_v25 }
 0x496   :  { %1355 = vmatprep.subr.bf16.mxu0 %v1493_v14 }
 0x497   :  { %v1460_v44 = vpop.eup %1459 }
 0x498   :  { %v394_v46 = vmul.f32 %v1460_v44, %v1452_v28  ;;  %v619_v28 = vld [vmem:[%s2009_s29] sm:$0xff] }
 0x499   :  { %v624_v30 = vpack.c.bf16 %v620_v29, %v619_v28 }
 0x49a   :  { %v395_v47 = vpack.c.bf16 %v394_v46, %v393_v45 }
 0x49c   :  { %1344 = vmatmul.mubr.msk.bf16.vlgmr.msra.gmra.mxu0 %vm196_vm2, %v395_v47 }
 0x49d   :  { %1359 = vmatprep.mubr.msk.bf16.mxu0 %vm1494_vm1, %v1493_v14  ;;  %1356 = vmatpush3.bf16.msra.mxu0 %v567_v38 }
 0x49e   :  { %1357 = vmatprep.subr.bf16.mxu0 %v1493_v14 }
 0x4a1   :  { %1358 = vmatpush3.bf16.msra.mxu0 %v566_v41 }
 0x4a2   :  { %1371 = vmatprep.subr.bf16.mxu0 %v1493_v14 }
 0x554   :  { %v311_v51 = vpop.f32.mrf.mxu0 }
 0x556   :  { %v1333_v52 = vpop.f32.mrf.mxu0 }
 0x558   :  { %v314_v56 = vpop.f32.mrf.mxu0 }
 0x55a   :  { %v1334_v57 = vpop.f32.mrf.mxu0 }
 0x55c   :  { %v436_v58 = vpop.f32.mrf.mxu0 }
 0x55e   :  { %v1345_v59 = vpop.f32.mrf.mxu0 }
 0x55f   :  { %v1260_v59 = vld [vmem:[%s1969_s15] ss:$0 sm:$0xff] }
 0x560   :  { %v439_v60 = vpop.f32.mrf.mxu0 }
 0x561   :  { %v1431_v61 = vpack.i.bf16 %v439_v60, %v436_v58 }
 0x562   :  { %v1346_v62 = vpop.f32.mrf.mxu0 }
 0x563   :  { %1432 = vrot.lane.b32.xlu1 %v1431_v61, %s1500_s27 }
 0x5d5   :  { %v1433_v63 = vpop.permute.xlu1 %1432 }
 0x5d6   :  { %v1435_v0 = vunpack.i.h.bf16 %v1433_v63  ;;  %v1434_v1 = vunpack.i.l.bf16 %v1433_v63 }
 0x5d8   :  { %v452_v2 = vsel %vm196_vm2, %v314_v56, %v1435_v0  ;;  %v451_v3 = vsel %vm196_vm2, %v311_v51, %v1434_v1 }
 0x5d9   :  { %v457_v4 = vpack.c.bf16 %v452_v2, %v451_v3 }
 0x5db   :  { %1352 = vmatmul.mubr.msk.bf16.vlgmr.msra.gmra.mxu1 %vm88_vm0, %v457_v4 }
 0x5dc   :  { %1367 = vmatprep.mubr.msk.bf16.mxu1 %vm1494_vm1, %v1493_v14  ;;  %1364 = vmatpush3.bf16.msra.mxu1 %v625_v27 }
 0x5dd   :  { %1365 = vmatprep.subr.bf16.mxu1 %v1493_v14 }
 0x5e0   :  { %1366 = vmatpush3.bf16.msra.mxu1 %v624_v30 }
 0x5e1   :  { %1377 = vmatprep.subr.bf16.mxu1 %v1493_v14 }
 0x5e3   :  { %1368 = vmatmul.mubr.msk.bf16.vlgmr.msra.gmra.mxu1 %vm88_vm0, %v623_v33 }
 0x5e4   :  { %1379 = vmatprep.mubr.msk.bf16.mxu1 %vm1494_vm1, %v1493_v14 }
 0x69b   :  { %v497_v5 = vpop.f32.mrf.mxu1 }
 0x69c   :  { %v504_v7 = vadd.f32 %v497_v5, %v1672_v35  ;;  %v1258_v5 = vld [vmem:[%s1970_s13] ss:$0 sm:$0xff] }
 0x69d   :  { %v1353_v8 = vpop.f32.mrf.mxu1 }
 0x69e   :  { %v513_v9 = vadd.f32 %v1255_v6, %v504_v7 }
 0x69f   :  { %v500_v10 = vpop.f32.mrf.mxu1 }
 0x6a0   :  { %v505_v11 = vadd.f32 %v500_v10, %v1674_v36  ;;  %v517_v12 = vsel %vm88_vm0, %v513_v9, 0.0 }
 0x6a1   :  { %518 = vadd.xlane.f32.xlu1 %v517_v12  ;;  %v1354_v13 = vpop.f32.mrf.mxu1 }
 0x6a2   :  { %v514_v15 = vadd.f32 %v1255_v6, %v505_v11 }
 0x6a3   :  { %v670_v60 = vpop.f32.mrf.mxu1 }
 0x6a4   :  { %v520_v16 = vsel %vm88_vm0, %v514_v15, 0.0  ;;  %v671_v62 = vadd.f32 %v1260_v59, %v670_v60 }
 0x6a5   :  { %521 = vadd.xlane.f32.xlu0 %v520_v16  ;;  %v1369_v61 = vpop.f32.mrf.mxu1 }
 0x6a7   :  { %v673_v63 = vpop.f32.mrf.mxu1 }
 0x6a8   :  { %v674_v0 = vadd.f32 %v1260_v59, %v673_v63 }
 0x6a9   :  { %v1370_v1 = vpop.f32.mrf.mxu1 }
 0x6aa   :  { %v1811_v2 = vpack.c.bf16 %v674_v0, %v671_v62 }
 0x6ac   :  { %v685_v3 = vsel %vm196_vm2, %v1811_v2, 0 }
 0x72a   :  { %v519_v17 = vpop.xlane.xlu1 %518 }
 0x72b   :  { %v523_v18 = vmul.f32 0.03125, %v519_v17  ;;  %v677_v17 = vld [vmem:[%s1971_s3] sm:$0xff] }
 0x72d   :  { %v525_v19 = vsub.f32 %v513_v9, %v523_v18 }
 0x72e   :  { %v522_v20 = vpop.xlane.xlu0 %521 }
 0x72f   :  { %v524_v21 = vmul.f32 0.03125, %v522_v20  ;;  %v527_v22 = vmul.f32 %v525_v19, %v525_v19 }
 0x731   :  { %v526_v35 = vsub.f32 %v514_v15, %v524_v21  ;;  %v529_v23 = vsel %vm88_vm0, %v527_v22, 0.0  ;;  %v678_v22 = vld [vmem:[%s1971_s3 + $0x8] sm:$0xff] }
 0x732   :  { %530 = vadd.xlane.f32.xlu0 %v529_v23 }
 0x733   :  { %v528_v24 = vmul.f32 %v526_v35, %v526_v35 }
 0x735   :  { %v532_v36 = vsel %vm88_vm0, %v528_v24, 0.0 }
 0x736   :  { %533 = vadd.xlane.f32.xlu1 %v532_v36 }
 0x748   :  { %810 = vrot.lane.b32.xlu0 %v1811_v2, %s1497_s1 }
 0x7bb   :  { %v531_v42 = vpop.xlane.xlu0 %530 }
 0x7bc   :  { %v535_v43 = vmul.f32 0.03125, %v531_v42 }
 0x7be   :  { %v537_v44 = vadd.f32 1e-12, %v535_v43 }
 0x7bf   :  { %v534_v45 = vpop.xlane.xlu1 %533  ;;  %v811_v8 = vpop.permute.xlu0 %810 }
 0x7c0   :  { %1461 = vrsqrt.f32 %v537_v44  ;;  %v536_v46 = vmul.f32 0.03125, %v534_v45  ;;  %v816_v13 = vsel %vm196_vm2, %v811_v8, 0 }
 0x7c2   :  { %v538_v47 = vadd.f32 1e-12, %v536_v46 }
 0x7c4   :  { %1463 = vrsqrt.f32 %v538_v47 }
 0x7cd   :  { %v1462_v48 = vpop.eup %1461 }
 0x7ce   :  { %v541_v49 = vmul.f32 %v1462_v48, %v525_v19 }
 0x7d0   :  { %v549_v53 = vmul.f32 %v1256_v50, %v541_v49 }
 0x7d1   :  { %v1464_v51 = vpop.eup %1463 }
 0x7d2   :  { %v542_v52 = vmul.f32 %v1464_v51, %v526_v35  ;;  %v1799_v56 = vadd.f32 %v1257_v54, %v549_v53 }
 0x7d4   :  { %v550_v55 = vmul.f32 %v1256_v50, %v542_v52 }
 0x7d6   :  { %v1801_v57 = vadd.f32 %v1257_v54, %v550_v55 }
 0x7d8   :  { %v565_v58 = vpack.c.bf16 %v1801_v57, %v1799_v56 }
 0x7da   :  { %1360 = vmatmul.mubr.msk.bf16.vlgmr.msra.gmra.mxu0 %vm88_vm0, %v565_v58 }
 0x7db   :  { %1373 = vmatprep.mubr.msk.bf16.mxu0 %vm1494_vm1, %v1493_v14  ;;  %1372 = vmatpush3.bf16.xpose.msra.mxu0 %v685_v3 }
 0x7dc   :  { %1383 = vmatprep.subr.bf16.mxu0 %v1493_v14 }
 0x89a   :  { %v612_v4 = vpop.f32.mrf.mxu0 }
 0x89b   :  { %v613_v9 = vadd.f32 %v1258_v5, %v612_v4 }
 0x89c   :  { %v1361_v6 = vpop.f32.mrf.mxu0 }
 0x89e   :  { %v615_v7 = vpop.f32.mrf.mxu0 }
 0x89f   :  { %v616_v10 = vadd.f32 %v1258_v5, %v615_v7 }
 0x8a0   :  { %v1362_v11 = vpop.f32.mrf.mxu0 }
 0x8a1   :  { %v679_v12 = vpack.c.bf16 %v616_v10, %v613_v9 }
 0x8a3   :  { %808 = vrot.lane.b32.xlu1 %v679_v12, %s1497_s1  ;;  %1374 = vmatmul.mubr.msk.bf16.vlgmr.msra.gmra.mxu0 %vm196_vm2, %v679_v12 }
 0x8a4   :  { %1384 = vmatpush3.bf16.xpose.msra.mxu0 %v816_v13  ;;  %1385 = vmatprep.mubr.msk.bf16.mxu0 %vm1494_vm1, %v1493_v14 }
 0x8a5   :  { %1395 = vmatprep.subr.bf16.mxu0 %v1493_v14 }
 0x915   :  { %v809_v15 = vpop.permute.xlu1 %808 }
 0x916   :  { %1386 = vmatmul.mubr.msk.bf16.vlgmr.msra.gmra.mxu0 %vm196_vm2, %v809_v15  ;;  %v947_v15 = vld [vmem:[%s1972_s16 + $0x10] sm:$0xff] }
 0x917   :  { %1399 = vmatprep.mubr.msk.bf16.mxu0 %vm1494_vm1, %v1493_v14 }
 0x963   :  { %v721_v16 = vpop.f32.mrf.mxu0 }
 0x964   :  { %v728_v18 = vmul.f32 0.25, %v721_v16  ;;  %v948_v16 = vld [vmem:[%s1972_s16 + $0x18] sm:$0xff] }
 0x965   :  { %v1375_v19 = vpop.f32.mrf.mxu0 }
 0x966   :  { %v730_v20 = vadd.f32 %v728_v18, %v677_v17 }
 0x967   :  { %v724_v21 = vpop.f32.mrf.mxu0 }
 0x968   :  { %v729_v35 = vmul.f32 0.25, %v724_v21  ;;  %v733_v23 = vsel %vm732_vm3, %v730_v20, -inf }
 0x969   :  { %734 = vmax.xlane.f32.xlu1 %v733_v23  ;;  %v1376_v24 = vpop.f32.mrf.mxu0 }
 0x96a   :  { %v731_v36 = vadd.f32 %v729_v35, %v678_v22  ;;  %v946_v35 = vld [vmem:[%s1972_s16 + $0x8] sm:$0xff] }
 0x96c   :  { %v736_v25 = vsel %vm732_vm3, %v731_v36, -inf }
 0x96d   :  { %737 = vmax.xlane.f32.xlu0 %v736_v25 }
 0x9d6   :  { %v852_v26 = vpop.f32.mrf.mxu0 }
 0x9d7   :  { %v859_v27 = vmul.f32 0.25, %v852_v26 }
 0x9d8   :  { %v1387_v28 = vpop.f32.mrf.mxu0 }
 0x9d9   :  { %v861_v29 = vadd.f32 %v859_v27, %v677_v17  ;;  %v951_v17 = vpack.c.bf16 %v948_v16, %v947_v15 }
 0x9da   :  { %v855_v30 = vpop.f32.mrf.mxu0 }
 0x9db   :  { %v860_v31 = vmul.f32 0.25, %v855_v30  ;;  %v863_v32 = vsel %vm732_vm3, %v861_v29, -inf  ;;  %1396 = vmatpush3.bf16.msra.mxu0 %v951_v17  ;;  %v1133_v17 = vld [vmem:[%s1977_s22 + $0x30] sm:$0xff] }
 0x9dc   :  { %864 = vmax.xlane.f32.xlu0 %v863_v32  ;;  %v1388_v33 = vpop.f32.mrf.mxu0  ;;  %1397 = vmatprep.subr.bf16.mxu0 %v1493_v14 }
 0x9dd   :  { %v862_v34 = vadd.f32 %v860_v31, %v678_v22  ;;  %v945_v22 = vld [vmem:[%s1972_s16] sm:$0xff] }
 0x9de   :  { %v950_v23 = vpack.c.bf16 %v946_v35, %v945_v22  ;;  %v1129_v35 = vld [vmem:[%s1977_s22 + $0x10] sm:$0xff] }
 0x9df   :  { %v866_v37 = vsel %vm732_vm3, %v862_v34, -inf }
 0x9e0   :  { %867 = vmax.xlane.f32.xlu1 %v866_v37  ;;  %1398 = vmatpush3.bf16.msra.mxu0 %v950_v23  ;;  %v1267_v37 = vld [vmem:[%s1973_s17] ss:$0 sm:$0xff]  ;;  %v1130_v23 = vld [vmem:[%s1977_s22 + $0x18] sm:$0xff] }
 0x9e1   :  { %1411 = vmatprep.subr.bf16.mxu0 %v1493_v14 }
 0x9f2   :  { %v735_v38 = vpop.xlane.xlu1 %734 }
 0x9f3   :  { %v739_v39 = vsub.f32 %v730_v20, %v735_v38 }
 0x9f5   :  { %v741_v40 = vmul.f32 1.442695, %v739_v39 }
 0x9f6   :  { %v738_v41 = vpop.xlane.xlu0 %737 }
 0x9f7   :  { %1465 = vpow2.f32 %v741_v40  ;;  %v740_v42 = vsub.f32 %v731_v36, %v738_v41 }
 0x9f9   :  { %v743_v43 = vmul.f32 1.442695, %v740_v42 }
 0x9fb   :  { %1467 = vpow2.f32 %v743_v43 }
 0xa04   :  { %v1466_v44 = vpop.eup %1465 }
 0xa05   :  { %v745_v45 = vsel %vm732_vm3, %v1466_v44, 0.0 }
 0xa06   :  { %746 = vadd.xlane.f32.xlu0 %v745_v45 }
 0xa08   :  { %v1468_v46 = vpop.eup %1467 }
 0xa09   :  { %v748_v47 = vsel %vm732_vm3, %v1468_v46, 0.0 }
 0xa0a   :  { %749 = vadd.xlane.f32.xlu1 %v748_v47 }
 0xa65   :  { %v865_v48 = vpop.xlane.xlu0 %864 }
 0xa66   :  { %v869_v49 = vsub.f32 %v861_v29, %v865_v48 }
 0xa68   :  { %v871_v50 = vmul.f32 1.442695, %v869_v49 }
 0xa69   :  { %v868_v51 = vpop.xlane.xlu1 %867 }
 0xa6a   :  { %1469 = vpow2.f32 %v871_v50  ;;  %v870_v52 = vsub.f32 %v862_v34, %v868_v51 }
 0xa6c   :  { %v873_v53 = vmul.f32 1.442695, %v870_v52 }
 0xa6e   :  { %1471 = vpow2.f32 %v873_v53 }
 0xa77   :  { %v1470_v54 = vpop.eup %1469 }
 0xa78   :  { %v875_v55 = vsel %vm732_vm3, %v1470_v54, 0.0 }
 0xa79   :  { %876 = vadd.xlane.f32.xlu0 %v875_v55  ;;  %v1053_v55 = vld [vmem:[%s1974_s20 + $0x10] sm:$0xff] }
 0xa7b   :  { %v1472_v58 = vpop.eup %1471 }
 0xa7c   :  { %v878_v59 = vsel %vm732_vm3, %v1472_v58, 0.0 }
 0xa7d   :  { %879 = vadd.xlane.f32.xlu1 %v878_v59 }
 0xa8e   :  { %886 = vrot.lane.b32.xlu1 %v1811_v2, %s1495_s2 }
 0xa8f   :  { %757 = vrot.lane.b32.xlu0 %v1811_v2, %s1496_s30  ;;  %v747_v61 = vpop.xlane.xlu0 %746 }
 0xa93   :  { %v750_v60 = vpop.xlane.xlu1 %749 }
 0xa94   :  { %1473 = vrcp.f32 %v750_v60  ;;  %v1051_v60 = vld [vmem:[%s1974_s20] sm:$0xff] }
 0xa95   :  { %1475 = vrcp.f32 %v747_v61  ;;  %v1052_v61 = vld [vmem:[%s1974_s20 + $0x8] sm:$0xff] }
 0xaa1   :  { %v1474_v62 = vpop.eup %1473 }
 0xaa2   :  { %v1476_v0 = vpop.eup %1475  ;;  %v754_v1 = vmul.f32 %v1474_v62, %v1468_v46  ;;  %v1056_v62 = vpack.c.bf16 %v1052_v61, %v1051_v60 }
 0xaa3   :  { %v753_v6 = vmul.f32 %v1476_v0, %v1466_v44 }
 0xaa5   :  { %v755_v7 = vpack.c.bf16 %v754_v1, %v753_v6 }
 0xb02   :  { %v877_v63 = vpop.xlane.xlu0 %876 }
 0xb03   :  { %1477 = vrcp.f32 %v877_v63 }
 0xb06   :  { %v758_v3 = vpop.permute.xlu0 %757  ;;  %v880_v4 = vpop.xlane.xlu1 %879 }
 0xb07   :  { %v764_v5 = vsel %vm762_vm4, %v758_v3, 0  ;;  %1479 = vrcp.f32 %v880_v4 }
 0xb08   :  { %1378 = vmatpush3.bf16.msra.mxu1 %v764_v5 }
 0xb09   :  { %1389 = vmatprep.subr.bf16.mxu1 %v1493_v14 }
 0xb0a   :  { %v887_v2 = vpop.permute.xlu1 %886 }
 0xb0b   :  { %v892_v8 = vsel %vm762_vm4, %v887_v2, 0  ;;  %1380 = vmatmul.mubr.msk.bf16.vlgmr.msra.gmra.mxu1 %vm732_vm3, %v755_v7  ;;  %v1268_v2 = vld [vmem:[%s1975_s18] ss:$0 sm:$0xff] }
 0xb0c   :  { %1390 = vmatpush3.bf16.msra.mxu1 %v892_v8  ;;  %1391 = vmatprep.mubr.msk.bf16.mxu1 %vm1494_vm1, %v1493_v14 }
 0xb0d   :  { %1403 = vmatprep.subr.bf16.mxu1 %v1493_v14 }
 0xb10   :  { %v1478_v9 = vpop.eup %1477 }
 0xb11   :  { %v883_v11 = vmul.f32 %v1478_v9, %v1470_v54 }
 0xb14   :  { %v1480_v10 = vpop.eup %1479 }
 0xb15   :  { %v884_v12 = vmul.f32 %v1480_v10, %v1472_v58  ;;  %v1054_v58 = vld [vmem:[%s1974_s20 + $0x18] sm:$0xff] }
 0xb16   :  { %v1057_v59 = vpack.c.bf16 %v1054_v58, %v1053_v55 }
 0xb17   :  { %v885_v13 = vpack.c.bf16 %v884_v12, %v883_v11  ;;  %v1269_v11 = vld [vmem:[%s1976_s19] ss:$0 sm:$0xff] }
 0xb19   :  { %1392 = vmatmul.mubr.msk.bf16.vlgmr.msra.gmra.mxu1 %vm732_vm3, %v885_v13 }
 0xb1a   :  { %1407 = vmatprep.mubr.msk.bf16.mxu1 %vm1494_vm1, %v1493_v14  ;;  %1404 = vmatpush3.bf16.msra.mxu1 %v1057_v59 }
 0xb1b   :  { %1405 = vmatprep.subr.bf16.mxu1 %v1493_v14 }
 0xb1e   :  { %1406 = vmatpush3.bf16.msra.mxu1 %v1056_v62 }
 0xbcb   :  { %v800_v18 = vpop.f32.mrf.mxu1 }
 0xbcd   :  { %v1381_v19 = vpop.f32.mrf.mxu1 }
 0xbcf   :  { %v803_v20 = vpop.f32.mrf.mxu1 }
 0xbd1   :  { %v1382_v21 = vpop.f32.mrf.mxu1 }
 0xbd2   :  { %v1132_v21 = vld [vmem:[%s1977_s22 + $0x28] sm:$0xff] }
 0xbd9   :  { %v928_v24 = vpop.f32.mrf.mxu1 }
 0xbdb   :  { %v1393_v36 = vpop.f32.mrf.mxu1 }
 0xbdc   :  { %v1127_v36 = vld [vmem:[%s1977_s22] sm:$0xff] }
 0xbdd   :  { %v931_v25 = vpop.f32.mrf.mxu1 }
 0xbde   :  { %v1436_v26 = vpack.i.bf16 %v931_v25, %v928_v24  ;;  %v1137_v24 = vpack.c.bf16 %v1130_v23, %v1129_v35  ;;  %v1128_v25 = vld [vmem:[%s1977_s22 + $0x8] sm:$0xff] }
 0xbdf   :  { %v1394_v27 = vpop.f32.mrf.mxu1 }
 0xbe0   :  { %1437 = vrot.lane.b32.xlu1 %v1436_v26, %s1500_s27  ;;  %v1136_v26 = vpack.c.bf16 %v1128_v25, %v1127_v36  ;;  %v1270_v27 = vld [vmem:[%s1978_s21] ss:$0 sm:$0xff] }
 0xc52   :  { %v1438_v28 = vpop.permute.xlu1 %1437 }
 0xc53   :  { %v1440_v29 = vunpack.i.h.bf16 %v1438_v28  ;;  %v1439_v30 = vunpack.i.l.bf16 %v1438_v28 }
 0xc55   :  { %v944_v31 = vsel %vm196_vm2, %v803_v20, %v1440_v29  ;;  %v943_v32 = vsel %vm196_vm2, %v800_v18, %v1439_v30  ;;  %v1134_v18 = vld [vmem:[%s1977_s22 + $0x38] sm:$0xff]  ;;  %v1131_v20 = vld [vmem:[%s1977_s22 + $0x20] sm:$0xff] }
 0xc56   :  { %v949_v33 = vpack.c.bf16 %v944_v31, %v943_v32  ;;  %v1139_v19 = vpack.c.bf16 %v1134_v18, %v1133_v17  ;;  %v1138_v22 = vpack.c.bf16 %v1132_v21, %v1131_v20  ;;  %v1275_v21 = vld [vmem:[%s1981_s25] ss:$0 sm:$0xff] }
 0xc58   :  { %1400 = vmatmul.mubr.msk.bf16.vlgmr.msra.gmra.mxu0 %vm88_vm0, %v949_v33 }
 0xc59   :  { %1419 = vmatprep.mubr.msk.bf16.mxu0 %vm1494_vm1, %v1493_v14  ;;  %1412 = vmatpush3.bf16.msra.mxu0 %v1139_v19  ;;  %v1274_v19 = vld [vmem:[%s1980_s24] ss:$0 sm:$0xff] }
 0xc5a   :  { %1413 = vmatprep.subr.bf16.mxu0 %v1493_v14 }
 0xc5d   :  { %1414 = vmatpush3.bf16.msra.mxu0 %v1138_v22 }
 0xc5e   :  { %1415 = vmatprep.subr.bf16.mxu0 %v1493_v14 }
 0xc61   :  { %1416 = vmatpush3.bf16.msra.mxu0 %v1137_v24 }
 0xc62   :  { %1417 = vmatprep.subr.bf16.mxu0 %v1493_v14 }
 0xc65   :  { %1418 = vmatpush3.bf16.msra.mxu0 %v1136_v26 }
 0xd18   :  { %v989_v34 = vpop.f32.mrf.mxu0 }
 0xd19   :  { %v996_v38 = vadd.f32 %v989_v34, %v1799_v56 }
 0xd1a   :  { %v1401_v39 = vpop.f32.mrf.mxu0 }
 0xd1b   :  { %v1005_v40 = vadd.f32 %v1267_v37, %v996_v38 }
 0xd1c   :  { %v992_v41 = vpop.f32.mrf.mxu0 }
 0xd1d   :  { %v997_v42 = vadd.f32 %v992_v41, %v1801_v57  ;;  %v1009_v43 = vsel %vm88_vm0, %v1005_v40, 0.0 }
 0xd1e   :  { %1010 = vadd.xlane.f32.xlu1 %v1009_v43  ;;  %v1402_v44 = vpop.f32.mrf.mxu0 }
 0xd1f   :  { %v1006_v45 = vadd.f32 %v1267_v37, %v997_v42 }
 0xd21   :  { %v1012_v46 = vsel %vm88_vm0, %v1006_v45, 0.0 }
 0xd22   :  { %1013 = vadd.xlane.f32.xlu0 %v1012_v46 }
 0xda7   :  { %v1011_v47 = vpop.xlane.xlu1 %1010 }
 0xda8   :  { %v1015_v48 = vmul.f32 0.03125, %v1011_v47 }
 0xdaa   :  { %v1017_v49 = vsub.f32 %v1005_v40, %v1015_v48 }
 0xdab   :  { %v1014_v50 = vpop.xlane.xlu0 %1013 }
 0xdac   :  { %v1016_v51 = vmul.f32 0.03125, %v1014_v50  ;;  %v1019_v52 = vmul.f32 %v1017_v49, %v1017_v49 }
 0xdae   :  { %v1018_v56 = vsub.f32 %v1006_v45, %v1016_v51  ;;  %v1021_v53 = vsel %vm88_vm0, %v1019_v52, 0.0 }
 0xdaf   :  { %1022 = vadd.xlane.f32.xlu0 %v1021_v53 }
 0xdb0   :  { %v1020_v54 = vmul.f32 %v1018_v56, %v1018_v56 }
 0xdb2   :  { %v1024_v57 = vsel %vm88_vm0, %v1020_v54, 0.0  ;;  %v1273_v54 = vld [vmem:[%s1979_s23] ss:$0 sm:$0xff] }
 0xdb3   :  { %1025 = vadd.xlane.f32.xlu0 %v1024_v57 }
 0xe38   :  { %v1023_v63 = vpop.xlane.xlu0 %1022 }
 0xe39   :  { %v1027_v0 = vmul.f32 0.03125, %v1023_v63 }
 0xe3b   :  { %v1029_v1 = vadd.f32 1e-12, %v1027_v0 }
 0xe3c   :  { %v1026_v3 = vpop.xlane.xlu0 %1025 }
 0xe3d   :  { %1481 = vrsqrt.f32 %v1029_v1  ;;  %v1028_v4 = vmul.f32 0.03125, %v1026_v3 }
 0xe3f   :  { %v1030_v5 = vadd.f32 1e-12, %v1028_v4 }
 0xe41   :  { %1483 = vrsqrt.f32 %v1030_v5 }
 0xe4a   :  { %v1482_v6 = vpop.eup %1481 }
 0xe4b   :  { %v1033_v7 = vmul.f32 %v1482_v6, %v1017_v49 }
 0xe4d   :  { %v1041_v10 = vmul.f32 %v1268_v2, %v1033_v7 }
 0xe4e   :  { %v1484_v8 = vpop.eup %1483 }
 0xe4f   :  { %v1034_v9 = vmul.f32 %v1484_v8, %v1018_v56  ;;  %v1049_v13 = vadd.f32 %v1269_v11, %v1041_v10 }
 0xe51   :  { %v1042_v12 = vmul.f32 %v1268_v2, %v1034_v9 }
 0xe53   :  { %v1050_v15 = vadd.f32 %v1269_v11, %v1042_v12 }
 0xe55   :  { %v1055_v16 = vpack.c.bf16 %v1050_v15, %v1049_v13 }
 0xe57   :  { %1408 = vmatmul.mubr.msk.bf16.vlgmr.msra.gmra.mxu1 %vm88_vm0, %v1055_v16 }
 0xf17   :  { %v1102_v28 = vpop.f32.mrf.mxu1 }
 0xf18   :  { %v1103_v29 = vadd.f32 %v1270_v27, %v1102_v28 }
 0xf19   :  { %v1409_v30 = vpop.f32.mrf.mxu1 }
 0xf1a   :  { %v1109_v31 = vmul.f32 %v1103_v29, %v1103_v29 }
 0xf1b   :  { %v1105_v32 = vpop.f32.mrf.mxu1 }
 0xf1c   :  { %v1111_v14 = vmul.f32 %v1109_v31, %v1103_v29  ;;  %v1106_v33 = vadd.f32 %v1270_v27, %v1105_v32 }
 0xf1d   :  { %v1410_v34 = vpop.f32.mrf.mxu1 }
 0xf1e   :  { %v1113_v37 = vmul.f32 0.044715, %v1111_v14  ;;  %v1110_v38 = vmul.f32 %v1106_v33, %v1106_v33 }
 0xf20   :  { %v1115_v39 = vadd.f32 %v1113_v37, %v1103_v29  ;;  %v1112_v40 = vmul.f32 %v1110_v38, %v1106_v33 }
 0xf22   :  { %v1117_v41 = vmul.f32 0.7978846, %v1115_v39  ;;  %v1114_v42 = vmul.f32 0.044715, %v1112_v40 }
 0xf24   :  { %1485 = vtanh.f32 %v1117_v41  ;;  %v1116_v43 = vadd.f32 %v1114_v42, %v1106_v33 }
 0xf26   :  { %v1118_v44 = vmul.f32 0.7978846, %v1116_v43 }
 0xf28   :  { %1487 = vtanh.f32 %v1118_v44 }
 0xf31   :  { %v1486_v45 = vpop.eup %1485 }
 0xf32   :  { %v1121_v46 = vadd.f32 1.0, %v1486_v45 }
 0xf34   :  { %v1123_v48 = vmul.f32 0.5, %v1121_v46 }
 0xf35   :  { %v1488_v47 = vpop.eup %1487 }
 0xf36   :  { %v1122_v49 = vadd.f32 1.0, %v1488_v47  ;;  %v1125_v51 = vmul.f32 %v1123_v48, %v1103_v29 }
 0xf38   :  { %v1124_v50 = vmul.f32 0.5, %v1122_v49 }
 0xf3a   :  { %v1126_v52 = vmul.f32 %v1124_v50, %v1106_v33 }
 0xf3c   :  { %v1135_v56 = vpack.c.bf16 %v1126_v52, %v1125_v51 }
 0xf3e   :  { %1420 = vmatmul.mubr.msk.bf16.vlgmr.msra.gmra.mxu0 %vm1140_vm5, %v1135_v56 }
 0xffe   :  { %v1178_v53 = vpop.f32.mrf.mxu0 }
 0xfff   :  { %v1185_v57 = vadd.f32 %v1178_v53, %v1049_v13 }
0x1000   :  { %v1421_v55 = vpop.f32.mrf.mxu0 }
0x1001   :  { %v1194_v58 = vadd.f32 %v1273_v54, %v1185_v57 }
0x1002   :  { %v1181_v59 = vpop.f32.mrf.mxu0 }
0x1003   :  { %v1186_v60 = vadd.f32 %v1181_v59, %v1050_v15  ;;  %v1198_v61 = vsel %vm88_vm0, %v1194_v58, 0.0 }
0x1004   :  { %1199 = vadd.xlane.f32.xlu1 %v1198_v61  ;;  %v1422_v62 = vpop.f32.mrf.mxu0 }
0x1005   :  { %v1195_v63 = vadd.f32 %v1273_v54, %v1186_v60 }
0x1007   :  { %v1201_v0 = vsel %vm88_vm0, %v1195_v63, 0.0 }
0x1008   :  { %1202 = vadd.xlane.f32.xlu0 %v1201_v0 }
0x108d   :  { %v1200_v1 = vpop.xlane.xlu1 %1199 }
0x108e   :  { %v1204_v3 = vmul.f32 0.03125, %v1200_v1 }
0x1090   :  { %v1206_v4 = vsub.f32 %v1194_v58, %v1204_v3 }
0x1091   :  { %v1203_v5 = vpop.xlane.xlu0 %1202 }
0x1092   :  { %v1205_v6 = vmul.f32 0.03125, %v1203_v5  ;;  %v1208_v7 = vmul.f32 %v1206_v4, %v1206_v4 }
0x1094   :  { %v1207_v2 = vsub.f32 %v1195_v63, %v1205_v6  ;;  %v1210_v8 = vsel %vm88_vm0, %v1208_v7, 0.0 }
0x1095   :  { %1211 = vadd.xlane.f32.xlu1 %v1210_v8 }
0x1096   :  { %v1209_v9 = vmul.f32 %v1207_v2, %v1207_v2 }
0x1098   :  { %v1213_v10 = vsel %vm88_vm0, %v1209_v9, 0.0 }
0x1099   :  { %1214 = vadd.xlane.f32.xlu0 %v1213_v10 }
0x111e   :  { %v1212_v11 = vpop.xlane.xlu1 %1211 }
0x111f   :  { %v1216_v12 = vmul.f32 0.03125, %v1212_v11 }
0x1121   :  { %v1218_v13 = vadd.f32 1e-12, %v1216_v12 }
0x1122   :  { %v1215_v15 = vpop.xlane.xlu0 %1214 }
0x1123   :  { %1489 = vrsqrt.f32 %v1218_v13  ;;  %v1217_v16 = vmul.f32 0.03125, %v1215_v15 }
0x1125   :  { %v1219_v17 = vadd.f32 1e-12, %v1217_v16 }
0x1127   :  { %1491 = vrsqrt.f32 %v1219_v17 }
0x1130   :  { %v1490_v18 = vpop.eup %1489 }
0x1131   :  { %v1222_v20 = vmul.f32 %v1490_v18, %v1206_v4 }
0x1133   :  { %v1230_v22 = vmul.f32 %v1274_v19, %v1222_v20 }
0x1134   :  { %v1492_v35 = vpop.eup %1491 }
0x1135   :  { %v1238_v23 = vadd.f32 %v1275_v21, %v1230_v22  ;;  %v1223_v24 = vmul.f32 %v1492_v35, %v1207_v2 }
0x1137   :  { %1240 = vst.msk [vmem:[%s1982_s26] sm:$0xff] %vm88_vm0, %v1238_v23  ;;  %v1231_v36 = vmul.f32 %v1274_v19, %v1223_v24 }
0x1139   :  { %v1239_v25 = vadd.f32 %v1275_v21, %v1231_v36 }
0x113b   :  { %1241 = vst.msk [vmem:[%s1982_s26 + $0x8] sm:$0xff] %vm88_vm0, %v1239_v25 }

</bundles_post_ra>
